<compile_context>
chip_gen: v5e
topology: v5e:2x2
jax: 0.10.0
libtpu: 0.0.40
codegen_flags: <defaults>
</compile_context>

<pallas_src>
import functools

import jax
import jax.numpy as jnp
from jax.experimental import pallas as pl
from jax.experimental.pallas import tpu as pltpu


_NEG_SLOPE = 0.2
_GN_EPS = 1e-5


# ----------------------------------------------------------------------------
# In-kernel helpers (all activations are (C, S) with S = H*W on lanes)
# ----------------------------------------------------------------------------
def _lrelu(x):
    return jnp.where(x > 0, x, _NEG_SLOPE * x)


def _shifted_taps(x, masks, W):
    """9 copies of x (C, S), each spatially shifted by (dy, dx) in {-1,0,1}^2
    with zero padding at the image border.  masks: (9, S) precomputed border
    masks (1.0 = valid source pixel).  Tap order t = (dy+1)*3 + (dx+1) matches
    a row-major (ky, kx) flattening of the conv weights."""
    C, S = x.shape
    taps = []
    t = 0
    for dy in (-1, 0, 1):
        for dx in (-1, 0, 1):
            if dy == 0 and dx == 0:
                taps.append(x)
            else:
                off = dy * W + dx
                xs = pltpu.roll(x, (-off) % S, axis=1)          # XLU lane rotate
                taps.append(xs * masks[t:t + 1, :])
            t += 1
    return taps


def _conv_im2col(taps, w, b):
    """taps: 9 x (Cin, S) (Cin sublane-aligned); w: (Cout, 9*Cin); b: (Cout,1)."""
    patches = jnp.concatenate(taps, axis=0)                     # (9*Cin, S), VMEM
    out = jnp.dot(w, patches, preferred_element_type=jnp.float32)
    return out if b is None else out + b


def _conv_per_tap(taps, w, b):
    """taps: 9 x (Cin, S); w: (Cout, 9*Cin); used when Cin is tiny (3)."""
    cin = taps[0].shape[0]
    out = jnp.dot(w[:, :cin], taps[0], preferred_element_type=jnp.float32)
    for t in range(1, 9):
        out = out + jnp.dot(w[:, t * cin:(t + 1) * cin], taps[t],
                            preferred_element_type=jnp.float32)
    return out if b is None else out + b


def _dwconv(taps, w, b):
    """Depthwise 3x3: taps 9 x (C, S); w: (C, 9); b: (C, 1)."""
    out = taps[0] * w[:, 0:1]
    for t in range(1, 9):
        out = out + taps[t] * w[:, t:t + 1]
    return out + b


def _group_norm(x, gamma, beta, member_over_n, eps=_GN_EPS):
    """Single-pass GroupNorm on (C, S).
    member_over_n: (C, C) block-diagonal group membership pre-scaled by
    1/(channels_per_group * S), so one small matmul yields E[x] and E[x^2]."""
    sums = jnp.concatenate(
        [jnp.sum(x, axis=1, keepdims=True),
         jnp.sum(x * x, axis=1, keepdims=True)], axis=1)        # (C, 2)
    g = jnp.dot(member_over_n, sums, preferred_element_type=jnp.float32)
    mean = g[:, 0:1]
    var = g[:, 1:2] - mean * mean                               # biased (PyTorch GN)
    scale = jax.lax.rsqrt(var + eps) * gamma
    return (x - mean) * scale + beta


# ----------------------------------------------------------------------------
# Fused forward kernel (one batch element per grid step)
# ----------------------------------------------------------------------------
def _uaenet_kernel(x_ref, masks_ref,
                   w1_ref, b1_ref, w2_ref, b2_ref, w3_ref, b3_ref,
                   w4_ref, b4_ref, g4_ref, be4_ref,
                   w5_ref, b5_ref, g5_ref, be5_ref,
                   w6_ref, b6_ref, g6_ref, be6_ref,
                   wf6_ref, wfx_ref, bf_ref,
                   m32_ref, m64_ref,
                   o_ref, *, W):
    masks = masks_ref[...]                                      # (9, S)
    m32 = m32_ref[...]                                          # (32, 32) / n
    m64 = m64_ref[...]                                          # (64, 64) / n

    x0 = x_ref[0]                                               # (3, S)
    taps_x = _shifted_taps(x0, masks, W)                        # shared: conv1 + final

    # conv1: 3 -> 32, 3x3, LeakyReLU(0.2)
    x1 = _lrelu(_conv_per_tap(taps_x, w1_ref[...], b1_ref[...]))
    # conv2: 32 -> 32, 3x3 (im2col, one 288-deep matmul), LeakyReLU
    x2 = _lrelu(_conv_im2col(_shifted_taps(x1, masks, W), w2_ref[...], b2_ref[...]))
    # conv3: 1x1, LeakyReLU
    x3 = _lrelu(jnp.dot(w3_ref[...], x2, preferred_element_type=jnp.float32)
                + b3_ref[...])

    taps3 = _shifted_taps(x3, masks, W)                         # shared by dw4/dw5
    # depthwise conv4 -> GroupNorm(8, 32) -> LeakyReLU
    x4 = _dwconv(taps3, w4_ref[...], b4_ref[...])
    x4 = _lrelu(_group_norm(x4, g4_ref[...], be4_ref[...], m32))
    # depthwise conv5 -> LeakyReLU -> GroupNorm(8, 32)
    x5 = _lrelu(_dwconv(taps3, w5_ref[...], b5_ref[...]))
    x5 = _group_norm(x5, g5_ref[...], be5_ref[...], m32)

    # depthwise conv6 on cat(x5, x4) -> LeakyReLU -> GroupNorm(8, 64)
    x45 = jnp.concatenate([x5, x4], axis=0)                     # (64, S), VMEM concat
    x6 = _lrelu(_dwconv(_shifted_taps(x45, masks, W), w6_ref[...], b6_ref[...]))
    x6 = _group_norm(x6, g6_ref[...], be6_ref[...], m64)

    # final conv on cat(x6, x) -> tanh; split weights avoid a 67-channel tensor
    out = _conv_im2col(_shifted_taps(x6, masks, W), wf6_ref[...], bf_ref[...])
    out = out + _conv_per_tap(taps_x, wfx_ref[...], None)
    o_ref[0] = jnp.tanh(out).astype(o_ref.dtype)                # (3, S) = NCHW-flat


# ----------------------------------------------------------------------------
# Host-side constant helpers
# ----------------------------------------------------------------------------
def _tap_masks(H, W):
    """(9, S) border-validity masks for the 9 conv taps (row-major (dy, dx))."""
    S = H * W
    xi = jnp.arange(S, dtype=jnp.int32) % W
    yi = jnp.arange(S, dtype=jnp.int32) // W
    rows = []
    for dy in (-1, 0, 1):
        for dx in (-1, 0, 1):
            valid = ((xi + dx >= 0) & (xi + dx < W) &
                     (yi + dy >= 0) & (yi + dy < H))
            rows.append(valid.astype(jnp.float32))
    return jnp.stack(rows, axis=0)


def _member_over_n(C, G, S):
    """Block-diagonal group membership (C, C), pre-scaled by 1/(cp*S)."""
    cp = C // G
    gid = jnp.arange(C, dtype=jnp.int32) // cp
    member = (gid[:, None] == gid[None, :]).astype(jnp.float32)
    return member / float(cp * S)


def _const_index_map(nd):
    return lambda n: (0,) * nd


# ----------------------------------------------------------------------------
# Wrapper
# ----------------------------------------------------------------------------
@jax.jit
def uaenet_forward(x_nchw, params):
    N, C, H, W = x_nchw.shape
    S = H * W
    x = x_nchw.reshape(N, C, S).astype(jnp.float32)             # free reshape, no transpose

    def cw(w):   # (K, K, Cin, Cout) HWIO -> (Cout, K*K*Cin)
        kh, kw, ci, co = w.shape
        return w.reshape(kh * kw * ci, co).T

    def dwv(w):  # (K, K, C) -> (C, K*K)
        kh, kw, c = w.shape
        return w.reshape(kh * kw, c).T

    def col(v):  # (C,) -> (C, 1)
        return v.reshape(v.shape[0], 1)

    p = params
    operands = [
        x,
        _tap_masks(H, W),
        cw(p["w1"]), col(p["b1"]),
        cw(p["w2"]), col(p["b2"]),
        cw(p["w3"]), col(p["b3"]),
        dwv(p["w4"]), col(p["b4"]), col(p["g4"]), col(p["be4"]),
        dwv(p["w5"]), col(p["b5"]), col(p["g5"]), col(p["be5"]),
        dwv(p["w6"]), col(p["b6"]), col(p["g6"]), col(p["be6"]),
        cw(p["wf6"]), cw(p["wfx"]), col(p["bf"]),
        _member_over_n(32, 8, S), _member_over_n(64, 8, S),
    ]

    in_specs = [pl.BlockSpec((1, C, S), lambda n: (n, 0, 0))]
    in_specs += [pl.BlockSpec(a.shape, _const_index_map(a.ndim))
                 for a in operands[1:]]

    out = pl.pallas_call(
        functools.partial(_uaenet_kernel, W=W),
        out_shape=jax.ShapeDtypeStruct((N, 3, S), jnp.float32),
        grid=(N,),
        in_specs=in_specs,
        out_specs=pl.BlockSpec((1, 3, S), lambda n: (n, 0, 0)),
        compiler_params=pltpu.CompilerParams(
            dimension_semantics=("parallel",)),
    )(*operands)
    return out.reshape(N, 3, H, W)                              # free reshape (NCHW)


# ----------------------------------------------------------------------------
# Pure-JAX reference (mirrors the PyTorch forward), for validation
# ----------------------------------------------------------------------------
@jax.jit
def uaenet_reference(x_nchw, params):
    p = params
    x = jnp.transpose(x_nchw, (0, 2, 3, 1)).astype(jnp.float32)

    def conv(v, w, b, groups=1):
        out = jax.lax.conv_general_dilated(
            v, w, window_strides=(1, 1), padding="SAME",
            dimension_numbers=("NHWC", "HWIO", "NHWC"),
            feature_group_count=groups,
            precision=jax.lax.Precision.HIGHEST)
        return out + b

    def gn(v, gamma, beta, G, eps=_GN_EPS):
        N, H, W, C = v.shape
        cp = C // G
        vg = v.reshape(N, H, W, G, cp)
        mean = jnp.mean(vg, axis=(1, 2, 4), keepdims=True)
        var = jnp.mean((vg - mean) ** 2, axis=(1, 2, 4), keepdims=True)
        vn = ((vg - mean) / jnp.sqrt(var + eps)).reshape(N, H, W, C)
        return vn * gamma + beta

    lr = lambda v: jnp.where(v > 0, v, _NEG_SLOPE * v)

    x1 = lr(conv(x, p["w1"], p["b1"]))
    x2 = lr(conv(x1, p["w2"], p["b2"]))
    x3 = lr(conv(x2, p["w3"], p["b3"]))
    x4 = conv(x3, p["w4"][:, :, None, :], p["b4"], groups=32)
    x4 = lr(gn(x4, p["g4"], p["be4"], 8))
    x5 = lr(conv(x3, p["w5"][:, :, None, :], p["b5"], groups=32))
    x5 = gn(x5, p["g5"], p["be5"], 8)
    x6 = lr(conv(jnp.concatenate([x5, x4], axis=-1),
                 p["w6"][:, :, None, :], p["b6"], groups=64))
    x6 = gn(x6, p["g6"], p["be6"], 8)
    wf = jnp.concatenate([p["wf6"], p["wfx"]], axis=2)          # 67-ch final weight
    out = jnp.tanh(conv(jnp.concatenate([x6, x], axis=-1), wf, p["bf"]))
    return jnp.transpose(out, (0, 3, 1, 2))


# ----------------------------------------------------------------------------
# Parameter init (HWIO conv weights, (K,K,C) depthwise weights)
# ----------------------------------------------------------------------------
def init_params(key):
    ks = jax.random.split(key, 20)

    def w(k, shape, fan_in):
        return jax.random.normal(k, shape, jnp.float32) / jnp.sqrt(float(fan_in))

    def small(k, shape):
        return 0.1 * jax.random.normal(k, shape, jnp.float32)

    p = {}
    p["w1"] = w(ks[0], (3, 3, 3, 32), 3 * 9);     p["b1"] = small(ks[1], (32,))
    p["w2"] = w(ks[2], (3, 3, 32, 32), 32 * 9);   p["b2"] = small(ks[3], (32,))
    p["w3"] = w(ks[4], (1, 1, 32, 32), 32);       p["b3"] = small(ks[5], (32,))
    p["w4"] = w(ks[6], (3, 3, 32), 9);            p["b4"] = small(ks[7], (32,))
    p["g4"] = 1.0 + small(ks[8], (32,));          p["be4"] = 0.5 * small(ks[8], (32,))
    p["w5"] = w(ks[9], (3, 3, 32), 9);            p["b5"] = small(ks[10], (32,))
    p["g5"] = 1.0 + small(ks[11], (32,));         p["be5"] = 0.5 * small(ks[11], (32,))
    p["w6"] = w(ks[12], (3, 3, 64), 9);           p["b6"] = small(ks[13], (64,))
    p["g6"] = 1.0 + small(ks[14], (64,));         p["be6"] = 0.5 * small(ks[14], (64,))
    # final conv (67 -> 3) stored split: 64 channels from x6, 3 channels from x
    p["wf6"] = w(ks[15], (3, 3, 64, 3), 67 * 9)
    p["wfx"] = w(ks[16], (3, 3, 3, 3), 67 * 9)
    p["bf"] = small(ks[17], (3,))
    return p


if __name__ == "__main__":
    key = jax.random.PRNGKey(0)
    pkey, xkey = jax.random.split(key)
    params = init_params(pkey)
    x = jax.random.normal(xkey, (2, 3, 16, 16), jnp.float32)    # NCHW, like PyTorch

    out = jax.block_until_ready(uaenet_forward(x, params))
    assert out.shape == (2, 3, 16, 16)
    assert bool(jnp.all(jnp.isfinite(out)))

    ref = jax.block_until_ready(uaenet_reference(x, params))
    err = float(jnp.max(jnp.abs(out - ref)))
    assert err < 5e-2, f"kernel/reference mismatch: max abs err = {err}"

    print("KERNEL_OK")
</pallas_src>

<mosaic_0001>
module attributes {stable_mosaic.version = 11 : i64} {
  func.func @_uaenet_kernel(%arg0: i32, %arg1: memref<1x3x256xf32, #tpu.memory_space<vmem>>, %arg2: memref<9x256xf32, #tpu.memory_space<vmem>>, %arg3: memref<32x27xf32, #tpu.memory_space<vmem>>, %arg4: memref<32x1xf32, #tpu.memory_space<vmem>>, %arg5: memref<32x288xf32, #tpu.memory_space<vmem>>, %arg6: memref<32x1xf32, #tpu.memory_space<vmem>>, %arg7: memref<32x32xf32, #tpu.memory_space<vmem>>, %arg8: memref<32x1xf32, #tpu.memory_space<vmem>>, %arg9: memref<32x9xf32, #tpu.memory_space<vmem>>, %arg10: memref<32x1xf32, #tpu.memory_space<vmem>>, %arg11: memref<32x1xf32, #tpu.memory_space<vmem>>, %arg12: memref<32x1xf32, #tpu.memory_space<vmem>>, %arg13: memref<32x9xf32, #tpu.memory_space<vmem>>, %arg14: memref<32x1xf32, #tpu.memory_space<vmem>>, %arg15: memref<32x1xf32, #tpu.memory_space<vmem>>, %arg16: memref<32x1xf32, #tpu.memory_space<vmem>>, %arg17: memref<64x9xf32, #tpu.memory_space<vmem>>, %arg18: memref<64x1xf32, #tpu.memory_space<vmem>>, %arg19: memref<64x1xf32, #tpu.memory_space<vmem>>, %arg20: memref<64x1xf32, #tpu.memory_space<vmem>>, %arg21: memref<3x576xf32, #tpu.memory_space<vmem>>, %arg22: memref<3x27xf32, #tpu.memory_space<vmem>>, %arg23: memref<3x1xf32, #tpu.memory_space<vmem>>, %arg24: memref<32x32xf32, #tpu.memory_space<vmem>>, %arg25: memref<64x64xf32, #tpu.memory_space<vmem>>, %arg26: memref<1x3x256xf32, #tpu.memory_space<vmem>>) attributes {dimension_semantics = [#tpu.dimension_semantics<parallel>], iteration_bounds = array<i64: 2>, scalar_prefetch = 0 : i64, scratch_operands = 0 : i64, tpu.core_type = #tpu.core_type<tc>, window_params = [{transform_indices = @transform_0, window_bounds = array<i64: 1, 3, 256>}, {pipeline_mode = #tpu.pipeline_mode<synchronous>, transform_indices = @transform_1, window_bounds = array<i64: 9, 256>}, {pipeline_mode = #tpu.pipeline_mode<synchronous>, transform_indices = @transform_2, window_bounds = array<i64: 32, 27>}, {pipeline_mode = #tpu.pipeline_mode<synchronous>, transform_indices = @transform_3, window_bounds = array<i64: 32, 1>}, {pipeline_mode = #tpu.pipeline_mode<synchronous>, transform_indices = @transform_4, window_bounds = array<i64: 32, 288>}, {pipeline_mode = #tpu.pipeline_mode<synchronous>, transform_indices = @transform_5, window_bounds = array<i64: 32, 1>}, {pipeline_mode = #tpu.pipeline_mode<synchronous>, transform_indices = @transform_6, window_bounds = array<i64: 32, 32>}, {pipeline_mode = #tpu.pipeline_mode<synchronous>, transform_indices = @transform_7, window_bounds = array<i64: 32, 1>}, {pipeline_mode = #tpu.pipeline_mode<synchronous>, transform_indices = @transform_8, window_bounds = array<i64: 32, 9>}, {pipeline_mode = #tpu.pipeline_mode<synchronous>, transform_indices = @transform_9, window_bounds = array<i64: 32, 1>}, {pipeline_mode = #tpu.pipeline_mode<synchronous>, transform_indices = @transform_10, window_bounds = array<i64: 32, 1>}, {pipeline_mode = #tpu.pipeline_mode<synchronous>, transform_indices = @transform_11, window_bounds = array<i64: 32, 1>}, {pipeline_mode = #tpu.pipeline_mode<synchronous>, transform_indices = @transform_12, window_bounds = array<i64: 32, 9>}, {pipeline_mode = #tpu.pipeline_mode<synchronous>, transform_indices = @transform_13, window_bounds = array<i64: 32, 1>}, {pipeline_mode = #tpu.pipeline_mode<synchronous>, transform_indices = @transform_14, window_bounds = array<i64: 32, 1>}, {pipeline_mode = #tpu.pipeline_mode<synchronous>, transform_indices = @transform_15, window_bounds = array<i64: 32, 1>}, {pipeline_mode = #tpu.pipeline_mode<synchronous>, transform_indices = @transform_16, window_bounds = array<i64: 64, 9>}, {pipeline_mode = #tpu.pipeline_mode<synchronous>, transform_indices = @transform_17, window_bounds = array<i64: 64, 1>}, {pipeline_mode = #tpu.pipeline_mode<synchronous>, transform_indices = @transform_18, window_bounds = array<i64: 64, 1>}, {pipeline_mode = #tpu.pipeline_mode<synchronous>, transform_indices = @transform_19, window_bounds = array<i64: 64, 1>}, {pipeline_mode = #tpu.pipeline_mode<synchronous>, transform_indices = @transform_20, window_bounds = array<i64: 3, 576>}, {pipeline_mode = #tpu.pipeline_mode<synchronous>, transform_indices = @transform_21, window_bounds = array<i64: 3, 27>}, {pipeline_mode = #tpu.pipeline_mode<synchronous>, transform_indices = @transform_22, window_bounds = array<i64: 3, 1>}, {pipeline_mode = #tpu.pipeline_mode<synchronous>, transform_indices = @transform_23, window_bounds = array<i64: 32, 32>}, {pipeline_mode = #tpu.pipeline_mode<synchronous>, transform_indices = @transform_24, window_bounds = array<i64: 64, 64>}, {transform_indices = @transform_25, window_bounds = array<i64: 1, 3, 256>}]} {
    %c0 = arith.constant 0 : index
    %c0_0 = arith.constant 0 : index
    %0 = vector.load %arg2[%c0, %c0_0] : memref<9x256xf32, #tpu.memory_space<vmem>>, vector<9x256xf32>
    %c0_1 = arith.constant 0 : index
    %c0_2 = arith.constant 0 : index
    %1 = vector.load %arg24[%c0_1, %c0_2] : memref<32x32xf32, #tpu.memory_space<vmem>>, vector<32x32xf32>
    %c0_3 = arith.constant 0 : index
    %c0_4 = arith.constant 0 : index
    %2 = vector.load %arg25[%c0_3, %c0_4] : memref<64x64xf32, #tpu.memory_space<vmem>>, vector<64x64xf32>
    %c0_5 = arith.constant 0 : index
    %c0_6 = arith.constant 0 : index
    %c0_7 = arith.constant 0 : index
    %3 = vector.load %arg1[%c0_5, %c0_6, %c0_7] : memref<1x3x256xf32, #tpu.memory_space<vmem>>, vector<1x3x256xf32>
    %4 = vector.shape_cast %3 : vector<1x3x256xf32> to vector<3x256xf32>
    %c17_i32 = arith.constant 17 : i32
    %5 = tpu.dynamic_rotate %4 by %c17_i32 dim 1 : vector<3x256xf32>, i32 -> vector<3x256xf32>
    %6 = vector.extract_strided_slice %0 {offsets = [0, 0], sizes = [1, 256], strides = [1, 1]} : vector<9x256xf32> to vector<1x256xf32>
    %7 = vector.broadcast %6 : vector<1x256xf32> to vector<3x256xf32>
    %8 = arith.mulf %5, %7 : vector<3x256xf32>
    %c16_i32 = arith.constant 16 : i32
    %9 = tpu.dynamic_rotate %4 by %c16_i32 dim 1 : vector<3x256xf32>, i32 -> vector<3x256xf32>
    %10 = vector.extract_strided_slice %0 {offsets = [1, 0], sizes = [1, 256], strides = [1, 1]} : vector<9x256xf32> to vector<1x256xf32>
    %11 = vector.broadcast %10 : vector<1x256xf32> to vector<3x256xf32>
    %12 = arith.mulf %9, %11 : vector<3x256xf32>
    %c15_i32 = arith.constant 15 : i32
    %13 = tpu.dynamic_rotate %4 by %c15_i32 dim 1 : vector<3x256xf32>, i32 -> vector<3x256xf32>
    %14 = vector.extract_strided_slice %0 {offsets = [2, 0], sizes = [1, 256], strides = [1, 1]} : vector<9x256xf32> to vector<1x256xf32>
    %15 = vector.broadcast %14 : vector<1x256xf32> to vector<3x256xf32>
    %16 = arith.mulf %13, %15 : vector<3x256xf32>
    %c1_i32 = arith.constant 1 : i32
    %17 = tpu.dynamic_rotate %4 by %c1_i32 dim 1 : vector<3x256xf32>, i32 -> vector<3x256xf32>
    %18 = vector.extract_strided_slice %0 {offsets = [3, 0], sizes = [1, 256], strides = [1, 1]} : vector<9x256xf32> to vector<1x256xf32>
    %19 = vector.broadcast %18 : vector<1x256xf32> to vector<3x256xf32>
    %20 = arith.mulf %17, %19 : vector<3x256xf32>
    %c255_i32 = arith.constant 255 : i32
    %21 = tpu.dynamic_rotate %4 by %c255_i32 dim 1 : vector<3x256xf32>, i32 -> vector<3x256xf32>
    %22 = vector.extract_strided_slice %0 {offsets = [5, 0], sizes = [1, 256], strides = [1, 1]} : vector<9x256xf32> to vector<1x256xf32>
    %23 = vector.broadcast %22 : vector<1x256xf32> to vector<3x256xf32>
    %24 = arith.mulf %21, %23 : vector<3x256xf32>
    %c241_i32 = arith.constant 241 : i32
    %25 = tpu.dynamic_rotate %4 by %c241_i32 dim 1 : vector<3x256xf32>, i32 -> vector<3x256xf32>
    %26 = vector.extract_strided_slice %0 {offsets = [6, 0], sizes = [1, 256], strides = [1, 1]} : vector<9x256xf32> to vector<1x256xf32>
    %27 = vector.broadcast %26 : vector<1x256xf32> to vector<3x256xf32>
    %28 = arith.mulf %25, %27 : vector<3x256xf32>
    %c240_i32 = arith.constant 240 : i32
    %29 = tpu.dynamic_rotate %4 by %c240_i32 dim 1 : vector<3x256xf32>, i32 -> vector<3x256xf32>
    %30 = vector.extract_strided_slice %0 {offsets = [7, 0], sizes = [1, 256], strides = [1, 1]} : vector<9x256xf32> to vector<1x256xf32>
    %31 = vector.broadcast %30 : vector<1x256xf32> to vector<3x256xf32>
    %32 = arith.mulf %29, %31 : vector<3x256xf32>
    %c239_i32 = arith.constant 239 : i32
    %33 = tpu.dynamic_rotate %4 by %c239_i32 dim 1 : vector<3x256xf32>, i32 -> vector<3x256xf32>
    %34 = vector.extract_strided_slice %0 {offsets = [8, 0], sizes = [1, 256], strides = [1, 1]} : vector<9x256xf32> to vector<1x256xf32>
    %35 = vector.broadcast %34 : vector<1x256xf32> to vector<3x256xf32>
    %36 = arith.mulf %33, %35 : vector<3x256xf32>
    %c0_8 = arith.constant 0 : index
    %c0_9 = arith.constant 0 : index
    %37 = vector.load %arg3[%c0_8, %c0_9] : memref<32x27xf32, #tpu.memory_space<vmem>>, vector<32x27xf32>
    %c0_10 = arith.constant 0 : index
    %c0_11 = arith.constant 0 : index
    %38 = vector.load %arg4[%c0_10, %c0_11] : memref<32x1xf32, #tpu.memory_space<vmem>>, vector<32x1xf32>
    %39 = vector.extract_strided_slice %37 {offsets = [0, 0], sizes = [32, 3], strides = [1, 1]} : vector<32x27xf32> to vector<32x3xf32>
    %cst = arith.constant dense<0.000000e+00> : vector<32x256xf32>
    %40 = tpu.matmul %39, %8, %cst {dimension_numbers = #tpu.dot_dimension_numbers<[1], [0], [0], [1], [0, 0, 1, 1], [], []>} : vector<32x3xf32>, vector<3x256xf32>, vector<32x256xf32> -> vector<32x256xf32>
    %41 = vector.extract_strided_slice %37 {offsets = [0, 3], sizes = [32, 3], strides = [1, 1]} : vector<32x27xf32> to vector<32x3xf32>
    %cst_12 = arith.constant dense<0.000000e+00> : vector<32x256xf32>
    %42 = tpu.matmul %41, %12, %cst_12 {dimension_numbers = #tpu.dot_dimension_numbers<[1], [0], [0], [1], [0, 0, 1, 1], [], []>} : vector<32x3xf32>, vector<3x256xf32>, vector<32x256xf32> -> vector<32x256xf32>
    %43 = arith.addf %40, %42 : vector<32x256xf32>
    %44 = vector.extract_strided_slice %37 {offsets = [0, 6], sizes = [32, 3], strides = [1, 1]} : vector<32x27xf32> to vector<32x3xf32>
    %cst_13 = arith.constant dense<0.000000e+00> : vector<32x256xf32>
    %45 = tpu.matmul %44, %16, %cst_13 {dimension_numbers = #tpu.dot_dimension_numbers<[1], [0], [0], [1], [0, 0, 1, 1], [], []>} : vector<32x3xf32>, vector<3x256xf32>, vector<32x256xf32> -> vector<32x256xf32>
    %46 = arith.addf %43, %45 : vector<32x256xf32>
    %47 = vector.extract_strided_slice %37 {offsets = [0, 9], sizes = [32, 3], strides = [1, 1]} : vector<32x27xf32> to vector<32x3xf32>
    %cst_14 = arith.constant dense<0.000000e+00> : vector<32x256xf32>
    %48 = tpu.matmul %47, %20, %cst_14 {dimension_numbers = #tpu.dot_dimension_numbers<[1], [0], [0], [1], [0, 0, 1, 1], [], []>} : vector<32x3xf32>, vector<3x256xf32>, vector<32x256xf32> -> vector<32x256xf32>
    %49 = arith.addf %46, %48 : vector<32x256xf32>
    %50 = vector.extract_strided_slice %37 {offsets = [0, 12], sizes = [32, 3], strides = [1, 1]} : vector<32x27xf32> to vector<32x3xf32>
    %cst_15 = arith.constant dense<0.000000e+00> : vector<32x256xf32>
    %51 = tpu.matmul %50, %4, %cst_15 {dimension_numbers = #tpu.dot_dimension_numbers<[1], [0], [0], [1], [0, 0, 1, 1], [], []>} : vector<32x3xf32>, vector<3x256xf32>, vector<32x256xf32> -> vector<32x256xf32>
    %52 = arith.addf %49, %51 : vector<32x256xf32>
    %53 = vector.extract_strided_slice %37 {offsets = [0, 15], sizes = [32, 3], strides = [1, 1]} : vector<32x27xf32> to vector<32x3xf32>
    %cst_16 = arith.constant dense<0.000000e+00> : vector<32x256xf32>
    %54 = tpu.matmul %53, %24, %cst_16 {dimension_numbers = #tpu.dot_dimension_numbers<[1], [0], [0], [1], [0, 0, 1, 1], [], []>} : vector<32x3xf32>, vector<3x256xf32>, vector<32x256xf32> -> vector<32x256xf32>
    %55 = arith.addf %52, %54 : vector<32x256xf32>
    %56 = vector.extract_strided_slice %37 {offsets = [0, 18], sizes = [32, 3], strides = [1, 1]} : vector<32x27xf32> to vector<32x3xf32>
    %cst_17 = arith.constant dense<0.000000e+00> : vector<32x256xf32>
    %57 = tpu.matmul %56, %28, %cst_17 {dimension_numbers = #tpu.dot_dimension_numbers<[1], [0], [0], [1], [0, 0, 1, 1], [], []>} : vector<32x3xf32>, vector<3x256xf32>, vector<32x256xf32> -> vector<32x256xf32>
    %58 = arith.addf %55, %57 : vector<32x256xf32>
    %59 = vector.extract_strided_slice %37 {offsets = [0, 21], sizes = [32, 3], strides = [1, 1]} : vector<32x27xf32> to vector<32x3xf32>
    %cst_18 = arith.constant dense<0.000000e+00> : vector<32x256xf32>
    %60 = tpu.matmul %59, %32, %cst_18 {dimension_numbers = #tpu.dot_dimension_numbers<[1], [0], [0], [1], [0, 0, 1, 1], [], []>} : vector<32x3xf32>, vector<3x256xf32>, vector<32x256xf32> -> vector<32x256xf32>
    %61 = arith.addf %58, %60 : vector<32x256xf32>
    %62 = vector.extract_strided_slice %37 {offsets = [0, 24], sizes = [32, 3], strides = [1, 1]} : vector<32x27xf32> to vector<32x3xf32>
    %cst_19 = arith.constant dense<0.000000e+00> : vector<32x256xf32>
    %63 = tpu.matmul %62, %36, %cst_19 {dimension_numbers = #tpu.dot_dimension_numbers<[1], [0], [0], [1], [0, 0, 1, 1], [], []>} : vector<32x3xf32>, vector<3x256xf32>, vector<32x256xf32> -> vector<32x256xf32>
    %64 = arith.addf %61, %63 : vector<32x256xf32>
    %65 = vector.broadcast %38 : vector<32x1xf32> to vector<32x256xf32>
    %66 = arith.addf %64, %65 : vector<32x256xf32>
    %cst_20 = arith.constant 0.000000e+00 : f32
    %67 = vector.broadcast %cst_20 : f32 to vector<32x256xf32>
    %68 = arith.cmpf ogt, %66, %67 : vector<32x256xf32>
    %cst_21 = arith.constant 2.000000e-01 : f32
    %69 = vector.broadcast %cst_21 : f32 to vector<32x256xf32>
    %70 = arith.mulf %69, %66 : vector<32x256xf32>
    %71 = arith.select %68, %66, %70 : vector<32x256xi1>, vector<32x256xf32>
    %c17_i32_22 = arith.constant 17 : i32
    %72 = tpu.dynamic_rotate %71 by %c17_i32_22 dim 1 : vector<32x256xf32>, i32 -> vector<32x256xf32>
    %73 = vector.extract_strided_slice %0 {offsets = [0, 0], sizes = [1, 256], strides = [1, 1]} : vector<9x256xf32> to vector<1x256xf32>
    %74 = vector.broadcast %73 : vector<1x256xf32> to vector<32x256xf32>
    %75 = arith.mulf %72, %74 : vector<32x256xf32>
    %c16_i32_23 = arith.constant 16 : i32
    %76 = tpu.dynamic_rotate %71 by %c16_i32_23 dim 1 : vector<32x256xf32>, i32 -> vector<32x256xf32>
    %77 = vector.extract_strided_slice %0 {offsets = [1, 0], sizes = [1, 256], strides = [1, 1]} : vector<9x256xf32> to vector<1x256xf32>
    %78 = vector.broadcast %77 : vector<1x256xf32> to vector<32x256xf32>
    %79 = arith.mulf %76, %78 : vector<32x256xf32>
    %c15_i32_24 = arith.constant 15 : i32
    %80 = tpu.dynamic_rotate %71 by %c15_i32_24 dim 1 : vector<32x256xf32>, i32 -> vector<32x256xf32>
    %81 = vector.extract_strided_slice %0 {offsets = [2, 0], sizes = [1, 256], strides = [1, 1]} : vector<9x256xf32> to vector<1x256xf32>
    %82 = vector.broadcast %81 : vector<1x256xf32> to vector<32x256xf32>
    %83 = arith.mulf %80, %82 : vector<32x256xf32>
    %c1_i32_25 = arith.constant 1 : i32
    %84 = tpu.dynamic_rotate %71 by %c1_i32_25 dim 1 : vector<32x256xf32>, i32 -> vector<32x256xf32>
    %85 = vector.extract_strided_slice %0 {offsets = [3, 0], sizes = [1, 256], strides = [1, 1]} : vector<9x256xf32> to vector<1x256xf32>
    %86 = vector.broadcast %85 : vector<1x256xf32> to vector<32x256xf32>
    %87 = arith.mulf %84, %86 : vector<32x256xf32>
    %c255_i32_26 = arith.constant 255 : i32
    %88 = tpu.dynamic_rotate %71 by %c255_i32_26 dim 1 : vector<32x256xf32>, i32 -> vector<32x256xf32>
    %89 = vector.extract_strided_slice %0 {offsets = [5, 0], sizes = [1, 256], strides = [1, 1]} : vector<9x256xf32> to vector<1x256xf32>
    %90 = vector.broadcast %89 : vector<1x256xf32> to vector<32x256xf32>
    %91 = arith.mulf %88, %90 : vector<32x256xf32>
    %c241_i32_27 = arith.constant 241 : i32
    %92 = tpu.dynamic_rotate %71 by %c241_i32_27 dim 1 : vector<32x256xf32>, i32 -> vector<32x256xf32>
    %93 = vector.extract_strided_slice %0 {offsets = [6, 0], sizes = [1, 256], strides = [1, 1]} : vector<9x256xf32> to vector<1x256xf32>
    %94 = vector.broadcast %93 : vector<1x256xf32> to vector<32x256xf32>
    %95 = arith.mulf %92, %94 : vector<32x256xf32>
    %c240_i32_28 = arith.constant 240 : i32
    %96 = tpu.dynamic_rotate %71 by %c240_i32_28 dim 1 : vector<32x256xf32>, i32 -> vector<32x256xf32>
    %97 = vector.extract_strided_slice %0 {offsets = [7, 0], sizes = [1, 256], strides = [1, 1]} : vector<9x256xf32> to vector<1x256xf32>
    %98 = vector.broadcast %97 : vector<1x256xf32> to vector<32x256xf32>
    %99 = arith.mulf %96, %98 : vector<32x256xf32>
    %c239_i32_29 = arith.constant 239 : i32
    %100 = tpu.dynamic_rotate %71 by %c239_i32_29 dim 1 : vector<32x256xf32>, i32 -> vector<32x256xf32>
    %101 = vector.extract_strided_slice %0 {offsets = [8, 0], sizes = [1, 256], strides = [1, 1]} : vector<9x256xf32> to vector<1x256xf32>
    %102 = vector.broadcast %101 : vector<1x256xf32> to vector<32x256xf32>
    %103 = arith.mulf %100, %102 : vector<32x256xf32>
    %c0_30 = arith.constant 0 : index
    %c0_31 = arith.constant 0 : index
    %104 = vector.load %arg5[%c0_30, %c0_31] : memref<32x288xf32, #tpu.memory_space<vmem>>, vector<32x288xf32>
    %c0_32 = arith.constant 0 : index
    %c0_33 = arith.constant 0 : index
    %105 = vector.load %arg6[%c0_32, %c0_33] : memref<32x1xf32, #tpu.memory_space<vmem>>, vector<32x1xf32>
    %106 = tpu.concatenate %75, %79, %83, %87, %71, %91, %95, %99, %103 in 0 : vector<32x256xf32>, vector<32x256xf32>, vector<32x256xf32>, vector<32x256xf32>, vector<32x256xf32>, vector<32x256xf32>, vector<32x256xf32>, vector<32x256xf32>, vector<32x256xf32> -> vector<288x256xf32>
    %cst_34 = arith.constant dense<0.000000e+00> : vector<32x256xf32>
    %107 = tpu.matmul %104, %106, %cst_34 {dimension_numbers = #tpu.dot_dimension_numbers<[1], [0], [0], [1], [0, 0, 1, 1], [], []>} : vector<32x288xf32>, vector<288x256xf32>, vector<32x256xf32> -> vector<32x256xf32>
    %108 = vector.broadcast %105 : vector<32x1xf32> to vector<32x256xf32>
    %109 = arith.addf %107, %108 : vector<32x256xf32>
    %cst_35 = arith.constant 0.000000e+00 : f32
    %110 = vector.broadcast %cst_35 : f32 to vector<32x256xf32>
    %111 = arith.cmpf ogt, %109, %110 : vector<32x256xf32>
    %cst_36 = arith.constant 2.000000e-01 : f32
    %112 = vector.broadcast %cst_36 : f32 to vector<32x256xf32>
    %113 = arith.mulf %112, %109 : vector<32x256xf32>
    %114 = arith.select %111, %109, %113 : vector<32x256xi1>, vector<32x256xf32>
    %c0_37 = arith.constant 0 : index
    %c0_38 = arith.constant 0 : index
    %115 = vector.load %arg7[%c0_37, %c0_38] : memref<32x32xf32, #tpu.memory_space<vmem>>, vector<32x32xf32>
    %cst_39 = arith.constant dense<0.000000e+00> : vector<32x256xf32>
    %116 = tpu.matmul %115, %114, %cst_39 {dimension_numbers = #tpu.dot_dimension_numbers<[1], [0], [0], [1], [0, 0, 1, 1], [], []>} : vector<32x32xf32>, vector<32x256xf32>, vector<32x256xf32> -> vector<32x256xf32>
    %c0_40 = arith.constant 0 : index
    %c0_41 = arith.constant 0 : index
    %117 = vector.load %arg8[%c0_40, %c0_41] : memref<32x1xf32, #tpu.memory_space<vmem>>, vector<32x1xf32>
    %118 = vector.broadcast %117 : vector<32x1xf32> to vector<32x256xf32>
    %119 = arith.addf %116, %118 : vector<32x256xf32>
    %cst_42 = arith.constant 0.000000e+00 : f32
    %120 = vector.broadcast %cst_42 : f32 to vector<32x256xf32>
    %121 = arith.cmpf ogt, %119, %120 : vector<32x256xf32>
    %cst_43 = arith.constant 2.000000e-01 : f32
    %122 = vector.broadcast %cst_43 : f32 to vector<32x256xf32>
    %123 = arith.mulf %122, %119 : vector<32x256xf32>
    %124 = arith.select %121, %119, %123 : vector<32x256xi1>, vector<32x256xf32>
    %c17_i32_44 = arith.constant 17 : i32
    %125 = tpu.dynamic_rotate %124 by %c17_i32_44 dim 1 : vector<32x256xf32>, i32 -> vector<32x256xf32>
    %126 = vector.extract_strided_slice %0 {offsets = [0, 0], sizes = [1, 256], strides = [1, 1]} : vector<9x256xf32> to vector<1x256xf32>
    %127 = vector.broadcast %126 : vector<1x256xf32> to vector<32x256xf32>
    %128 = arith.mulf %125, %127 : vector<32x256xf32>
    %c16_i32_45 = arith.constant 16 : i32
    %129 = tpu.dynamic_rotate %124 by %c16_i32_45 dim 1 : vector<32x256xf32>, i32 -> vector<32x256xf32>
    %130 = vector.extract_strided_slice %0 {offsets = [1, 0], sizes = [1, 256], strides = [1, 1]} : vector<9x256xf32> to vector<1x256xf32>
    %131 = vector.broadcast %130 : vector<1x256xf32> to vector<32x256xf32>
    %132 = arith.mulf %129, %131 : vector<32x256xf32>
    %c15_i32_46 = arith.constant 15 : i32
    %133 = tpu.dynamic_rotate %124 by %c15_i32_46 dim 1 : vector<32x256xf32>, i32 -> vector<32x256xf32>
    %134 = vector.extract_strided_slice %0 {offsets = [2, 0], sizes = [1, 256], strides = [1, 1]} : vector<9x256xf32> to vector<1x256xf32>
    %135 = vector.broadcast %134 : vector<1x256xf32> to vector<32x256xf32>
    %136 = arith.mulf %133, %135 : vector<32x256xf32>
    %c1_i32_47 = arith.constant 1 : i32
    %137 = tpu.dynamic_rotate %124 by %c1_i32_47 dim 1 : vector<32x256xf32>, i32 -> vector<32x256xf32>
    %138 = vector.extract_strided_slice %0 {offsets = [3, 0], sizes = [1, 256], strides = [1, 1]} : vector<9x256xf32> to vector<1x256xf32>
    %139 = vector.broadcast %138 : vector<1x256xf32> to vector<32x256xf32>
    %140 = arith.mulf %137, %139 : vector<32x256xf32>
    %c255_i32_48 = arith.constant 255 : i32
    %141 = tpu.dynamic_rotate %124 by %c255_i32_48 dim 1 : vector<32x256xf32>, i32 -> vector<32x256xf32>
    %142 = vector.extract_strided_slice %0 {offsets = [5, 0], sizes = [1, 256], strides = [1, 1]} : vector<9x256xf32> to vector<1x256xf32>
    %143 = vector.broadcast %142 : vector<1x256xf32> to vector<32x256xf32>
    %144 = arith.mulf %141, %143 : vector<32x256xf32>
    %c241_i32_49 = arith.constant 241 : i32
    %145 = tpu.dynamic_rotate %124 by %c241_i32_49 dim 1 : vector<32x256xf32>, i32 -> vector<32x256xf32>
    %146 = vector.extract_strided_slice %0 {offsets = [6, 0], sizes = [1, 256], strides = [1, 1]} : vector<9x256xf32> to vector<1x256xf32>
    %147 = vector.broadcast %146 : vector<1x256xf32> to vector<32x256xf32>
    %148 = arith.mulf %145, %147 : vector<32x256xf32>
    %c240_i32_50 = arith.constant 240 : i32
    %149 = tpu.dynamic_rotate %124 by %c240_i32_50 dim 1 : vector<32x256xf32>, i32 -> vector<32x256xf32>
    %150 = vector.extract_strided_slice %0 {offsets = [7, 0], sizes = [1, 256], strides = [1, 1]} : vector<9x256xf32> to vector<1x256xf32>
    %151 = vector.broadcast %150 : vector<1x256xf32> to vector<32x256xf32>
    %152 = arith.mulf %149, %151 : vector<32x256xf32>
    %c239_i32_51 = arith.constant 239 : i32
    %153 = tpu.dynamic_rotate %124 by %c239_i32_51 dim 1 : vector<32x256xf32>, i32 -> vector<32x256xf32>
    %154 = vector.extract_strided_slice %0 {offsets = [8, 0], sizes = [1, 256], strides = [1, 1]} : vector<9x256xf32> to vector<1x256xf32>
    %155 = vector.broadcast %154 : vector<1x256xf32> to vector<32x256xf32>
    %156 = arith.mulf %153, %155 : vector<32x256xf32>
    %c0_52 = arith.constant 0 : index
    %c0_53 = arith.constant 0 : index
    %157 = vector.load %arg9[%c0_52, %c0_53] : memref<32x9xf32, #tpu.memory_space<vmem>>, vector<32x9xf32>
    %c0_54 = arith.constant 0 : index
    %c0_55 = arith.constant 0 : index
    %158 = vector.load %arg10[%c0_54, %c0_55] : memref<32x1xf32, #tpu.memory_space<vmem>>, vector<32x1xf32>
    %159 = vector.extract_strided_slice %157 {offsets = [0, 0], sizes = [32, 1], strides = [1, 1]} : vector<32x9xf32> to vector<32x1xf32>
    %160 = vector.broadcast %159 : vector<32x1xf32> to vector<32x256xf32>
    %161 = arith.mulf %128, %160 : vector<32x256xf32>
    %162 = vector.extract_strided_slice %157 {offsets = [0, 1], sizes = [32, 1], strides = [1, 1]} : vector<32x9xf32> to vector<32x1xf32>
    %163 = vector.broadcast %162 : vector<32x1xf32> to vector<32x256xf32>
    %164 = arith.mulf %132, %163 : vector<32x256xf32>
    %165 = arith.addf %161, %164 : vector<32x256xf32>
    %166 = vector.extract_strided_slice %157 {offsets = [0, 2], sizes = [32, 1], strides = [1, 1]} : vector<32x9xf32> to vector<32x1xf32>
    %167 = vector.broadcast %166 : vector<32x1xf32> to vector<32x256xf32>
    %168 = arith.mulf %136, %167 : vector<32x256xf32>
    %169 = arith.addf %165, %168 : vector<32x256xf32>
    %170 = vector.extract_strided_slice %157 {offsets = [0, 3], sizes = [32, 1], strides = [1, 1]} : vector<32x9xf32> to vector<32x1xf32>
    %171 = vector.broadcast %170 : vector<32x1xf32> to vector<32x256xf32>
    %172 = arith.mulf %140, %171 : vector<32x256xf32>
    %173 = arith.addf %169, %172 : vector<32x256xf32>
    %174 = vector.extract_strided_slice %157 {offsets = [0, 4], sizes = [32, 1], strides = [1, 1]} : vector<32x9xf32> to vector<32x1xf32>
    %175 = vector.broadcast %174 : vector<32x1xf32> to vector<32x256xf32>
    %176 = arith.mulf %124, %175 : vector<32x256xf32>
    %177 = arith.addf %173, %176 : vector<32x256xf32>
    %178 = vector.extract_strided_slice %157 {offsets = [0, 5], sizes = [32, 1], strides = [1, 1]} : vector<32x9xf32> to vector<32x1xf32>
    %179 = vector.broadcast %178 : vector<32x1xf32> to vector<32x256xf32>
    %180 = arith.mulf %144, %179 : vector<32x256xf32>
    %181 = arith.addf %177, %180 : vector<32x256xf32>
    %182 = vector.extract_strided_slice %157 {offsets = [0, 6], sizes = [32, 1], strides = [1, 1]} : vector<32x9xf32> to vector<32x1xf32>
    %183 = vector.broadcast %182 : vector<32x1xf32> to vector<32x256xf32>
    %184 = arith.mulf %148, %183 : vector<32x256xf32>
    %185 = arith.addf %181, %184 : vector<32x256xf32>
    %186 = vector.extract_strided_slice %157 {offsets = [0, 7], sizes = [32, 1], strides = [1, 1]} : vector<32x9xf32> to vector<32x1xf32>
    %187 = vector.broadcast %186 : vector<32x1xf32> to vector<32x256xf32>
    %188 = arith.mulf %152, %187 : vector<32x256xf32>
    %189 = arith.addf %185, %188 : vector<32x256xf32>
    %190 = vector.extract_strided_slice %157 {offsets = [0, 8], sizes = [32, 1], strides = [1, 1]} : vector<32x9xf32> to vector<32x1xf32>
    %191 = vector.broadcast %190 : vector<32x1xf32> to vector<32x256xf32>
    %192 = arith.mulf %156, %191 : vector<32x256xf32>
    %193 = arith.addf %189, %192 : vector<32x256xf32>
    %194 = vector.broadcast %158 : vector<32x1xf32> to vector<32x256xf32>
    %195 = arith.addf %193, %194 : vector<32x256xf32>
    %c0_56 = arith.constant 0 : index
    %c0_57 = arith.constant 0 : index
    %196 = vector.load %arg11[%c0_56, %c0_57] : memref<32x1xf32, #tpu.memory_space<vmem>>, vector<32x1xf32>
    %c0_58 = arith.constant 0 : index
    %c0_59 = arith.constant 0 : index
    %197 = vector.load %arg12[%c0_58, %c0_59] : memref<32x1xf32, #tpu.memory_space<vmem>>, vector<32x1xf32>
    %cst_60 = arith.constant dense<0.000000e+00> : vector<32xf32>
    %198 = vector.multi_reduction <add>, %195, %cst_60 [1] : vector<32x256xf32> to vector<32xf32>
    %199 = vector.shape_cast %198 : vector<32xf32> to vector<32x1xf32>
    %200 = arith.mulf %195, %195 : vector<32x256xf32>
    %cst_61 = arith.constant dense<0.000000e+00> : vector<32xf32>
    %201 = vector.multi_reduction <add>, %200, %cst_61 [1] : vector<32x256xf32> to vector<32xf32>
    %202 = vector.shape_cast %201 : vector<32xf32> to vector<32x1xf32>
    %203 = tpu.concatenate %199, %202 in 1 : vector<32x1xf32>, vector<32x1xf32> -> vector<32x2xf32>
    %cst_62 = arith.constant dense<0.000000e+00> : vector<32x2xf32>
    %204 = tpu.matmul %1, %203, %cst_62 {dimension_numbers = #tpu.dot_dimension_numbers<[1], [0], [0], [1], [0, 0, 1, 1], [], []>} : vector<32x32xf32>, vector<32x2xf32>, vector<32x2xf32> -> vector<32x2xf32>
    %205 = vector.extract_strided_slice %204 {offsets = [0, 0], sizes = [32, 1], strides = [1, 1]} : vector<32x2xf32> to vector<32x1xf32>
    %206 = vector.extract_strided_slice %204 {offsets = [0, 1], sizes = [32, 1], strides = [1, 1]} : vector<32x2xf32> to vector<32x1xf32>
    %207 = arith.mulf %205, %205 : vector<32x1xf32>
    %208 = arith.subf %206, %207 : vector<32x1xf32>
    %cst_63 = arith.constant 9.99999974E-6 : f32
    %209 = vector.broadcast %cst_63 : f32 to vector<32x1xf32>
    %210 = arith.addf %208, %209 : vector<32x1xf32>
    %211 = math.rsqrt %210 : vector<32x1xf32>
    %212 = arith.mulf %211, %196 : vector<32x1xf32>
    %213 = vector.broadcast %205 : vector<32x1xf32> to vector<32x256xf32>
    %214 = arith.subf %195, %213 : vector<32x256xf32>
    %215 = vector.broadcast %212 : vector<32x1xf32> to vector<32x256xf32>
    %216 = arith.mulf %214, %215 : vector<32x256xf32>
    %217 = vector.broadcast %197 : vector<32x1xf32> to vector<32x256xf32>
    %218 = arith.addf %216, %217 : vector<32x256xf32>
    %cst_64 = arith.constant 0.000000e+00 : f32
    %219 = vector.broadcast %cst_64 : f32 to vector<32x256xf32>
    %220 = arith.cmpf ogt, %218, %219 : vector<32x256xf32>
    %cst_65 = arith.constant 2.000000e-01 : f32
    %221 = vector.broadcast %cst_65 : f32 to vector<32x256xf32>
    %222 = arith.mulf %221, %218 : vector<32x256xf32>
    %223 = arith.select %220, %218, %222 : vector<32x256xi1>, vector<32x256xf32>
    %c0_66 = arith.constant 0 : index
    %c0_67 = arith.constant 0 : index
    %224 = vector.load %arg13[%c0_66, %c0_67] : memref<32x9xf32, #tpu.memory_space<vmem>>, vector<32x9xf32>
    %c0_68 = arith.constant 0 : index
    %c0_69 = arith.constant 0 : index
    %225 = vector.load %arg14[%c0_68, %c0_69] : memref<32x1xf32, #tpu.memory_space<vmem>>, vector<32x1xf32>
    %226 = vector.extract_strided_slice %224 {offsets = [0, 0], sizes = [32, 1], strides = [1, 1]} : vector<32x9xf32> to vector<32x1xf32>
    %227 = vector.broadcast %226 : vector<32x1xf32> to vector<32x256xf32>
    %228 = arith.mulf %128, %227 : vector<32x256xf32>
    %229 = vector.extract_strided_slice %224 {offsets = [0, 1], sizes = [32, 1], strides = [1, 1]} : vector<32x9xf32> to vector<32x1xf32>
    %230 = vector.broadcast %229 : vector<32x1xf32> to vector<32x256xf32>
    %231 = arith.mulf %132, %230 : vector<32x256xf32>
    %232 = arith.addf %228, %231 : vector<32x256xf32>
    %233 = vector.extract_strided_slice %224 {offsets = [0, 2], sizes = [32, 1], strides = [1, 1]} : vector<32x9xf32> to vector<32x1xf32>
    %234 = vector.broadcast %233 : vector<32x1xf32> to vector<32x256xf32>
    %235 = arith.mulf %136, %234 : vector<32x256xf32>
    %236 = arith.addf %232, %235 : vector<32x256xf32>
    %237 = vector.extract_strided_slice %224 {offsets = [0, 3], sizes = [32, 1], strides = [1, 1]} : vector<32x9xf32> to vector<32x1xf32>
    %238 = vector.broadcast %237 : vector<32x1xf32> to vector<32x256xf32>
    %239 = arith.mulf %140, %238 : vector<32x256xf32>
    %240 = arith.addf %236, %239 : vector<32x256xf32>
    %241 = vector.extract_strided_slice %224 {offsets = [0, 4], sizes = [32, 1], strides = [1, 1]} : vector<32x9xf32> to vector<32x1xf32>
    %242 = vector.broadcast %241 : vector<32x1xf32> to vector<32x256xf32>
    %243 = arith.mulf %124, %242 : vector<32x256xf32>
    %244 = arith.addf %240, %243 : vector<32x256xf32>
    %245 = vector.extract_strided_slice %224 {offsets = [0, 5], sizes = [32, 1], strides = [1, 1]} : vector<32x9xf32> to vector<32x1xf32>
    %246 = vector.broadcast %245 : vector<32x1xf32> to vector<32x256xf32>
    %247 = arith.mulf %144, %246 : vector<32x256xf32>
    %248 = arith.addf %244, %247 : vector<32x256xf32>
    %249 = vector.extract_strided_slice %224 {offsets = [0, 6], sizes = [32, 1], strides = [1, 1]} : vector<32x9xf32> to vector<32x1xf32>
    %250 = vector.broadcast %249 : vector<32x1xf32> to vector<32x256xf32>
    %251 = arith.mulf %148, %250 : vector<32x256xf32>
    %252 = arith.addf %248, %251 : vector<32x256xf32>
    %253 = vector.extract_strided_slice %224 {offsets = [0, 7], sizes = [32, 1], strides = [1, 1]} : vector<32x9xf32> to vector<32x1xf32>
    %254 = vector.broadcast %253 : vector<32x1xf32> to vector<32x256xf32>
    %255 = arith.mulf %152, %254 : vector<32x256xf32>
    %256 = arith.addf %252, %255 : vector<32x256xf32>
    %257 = vector.extract_strided_slice %224 {offsets = [0, 8], sizes = [32, 1], strides = [1, 1]} : vector<32x9xf32> to vector<32x1xf32>
    %258 = vector.broadcast %257 : vector<32x1xf32> to vector<32x256xf32>
    %259 = arith.mulf %156, %258 : vector<32x256xf32>
    %260 = arith.addf %256, %259 : vector<32x256xf32>
    %261 = vector.broadcast %225 : vector<32x1xf32> to vector<32x256xf32>
    %262 = arith.addf %260, %261 : vector<32x256xf32>
    %cst_70 = arith.constant 0.000000e+00 : f32
    %263 = vector.broadcast %cst_70 : f32 to vector<32x256xf32>
    %264 = arith.cmpf ogt, %262, %263 : vector<32x256xf32>
    %cst_71 = arith.constant 2.000000e-01 : f32
    %265 = vector.broadcast %cst_71 : f32 to vector<32x256xf32>
    %266 = arith.mulf %265, %262 : vector<32x256xf32>
    %267 = arith.select %264, %262, %266 : vector<32x256xi1>, vector<32x256xf32>
    %c0_72 = arith.constant 0 : index
    %c0_73 = arith.constant 0 : index
    %268 = vector.load %arg15[%c0_72, %c0_73] : memref<32x1xf32, #tpu.memory_space<vmem>>, vector<32x1xf32>
    %c0_74 = arith.constant 0 : index
    %c0_75 = arith.constant 0 : index
    %269 = vector.load %arg16[%c0_74, %c0_75] : memref<32x1xf32, #tpu.memory_space<vmem>>, vector<32x1xf32>
    %cst_76 = arith.constant dense<0.000000e+00> : vector<32xf32>
    %270 = vector.multi_reduction <add>, %267, %cst_76 [1] : vector<32x256xf32> to vector<32xf32>
    %271 = vector.shape_cast %270 : vector<32xf32> to vector<32x1xf32>
    %272 = arith.mulf %267, %267 : vector<32x256xf32>
    %cst_77 = arith.constant dense<0.000000e+00> : vector<32xf32>
    %273 = vector.multi_reduction <add>, %272, %cst_77 [1] : vector<32x256xf32> to vector<32xf32>
    %274 = vector.shape_cast %273 : vector<32xf32> to vector<32x1xf32>
    %275 = tpu.concatenate %271, %274 in 1 : vector<32x1xf32>, vector<32x1xf32> -> vector<32x2xf32>
    %cst_78 = arith.constant dense<0.000000e+00> : vector<32x2xf32>
    %276 = tpu.matmul %1, %275, %cst_78 {dimension_numbers = #tpu.dot_dimension_numbers<[1], [0], [0], [1], [0, 0, 1, 1], [], []>} : vector<32x32xf32>, vector<32x2xf32>, vector<32x2xf32> -> vector<32x2xf32>
    %277 = vector.extract_strided_slice %276 {offsets = [0, 0], sizes = [32, 1], strides = [1, 1]} : vector<32x2xf32> to vector<32x1xf32>
    %278 = vector.extract_strided_slice %276 {offsets = [0, 1], sizes = [32, 1], strides = [1, 1]} : vector<32x2xf32> to vector<32x1xf32>
    %279 = arith.mulf %277, %277 : vector<32x1xf32>
    %280 = arith.subf %278, %279 : vector<32x1xf32>
    %cst_79 = arith.constant 9.99999974E-6 : f32
    %281 = vector.broadcast %cst_79 : f32 to vector<32x1xf32>
    %282 = arith.addf %280, %281 : vector<32x1xf32>
    %283 = math.rsqrt %282 : vector<32x1xf32>
    %284 = arith.mulf %283, %268 : vector<32x1xf32>
    %285 = vector.broadcast %277 : vector<32x1xf32> to vector<32x256xf32>
    %286 = arith.subf %267, %285 : vector<32x256xf32>
    %287 = vector.broadcast %284 : vector<32x1xf32> to vector<32x256xf32>
    %288 = arith.mulf %286, %287 : vector<32x256xf32>
    %289 = vector.broadcast %269 : vector<32x1xf32> to vector<32x256xf32>
    %290 = arith.addf %288, %289 : vector<32x256xf32>
    %291 = tpu.concatenate %290, %223 in 0 : vector<32x256xf32>, vector<32x256xf32> -> vector<64x256xf32>
    %c17_i32_80 = arith.constant 17 : i32
    %292 = tpu.dynamic_rotate %291 by %c17_i32_80 dim 1 : vector<64x256xf32>, i32 -> vector<64x256xf32>
    %293 = vector.extract_strided_slice %0 {offsets = [0, 0], sizes = [1, 256], strides = [1, 1]} : vector<9x256xf32> to vector<1x256xf32>
    %294 = vector.broadcast %293 : vector<1x256xf32> to vector<64x256xf32>
    %295 = arith.mulf %292, %294 : vector<64x256xf32>
    %c16_i32_81 = arith.constant 16 : i32
    %296 = tpu.dynamic_rotate %291 by %c16_i32_81 dim 1 : vector<64x256xf32>, i32 -> vector<64x256xf32>
    %297 = vector.extract_strided_slice %0 {offsets = [1, 0], sizes = [1, 256], strides = [1, 1]} : vector<9x256xf32> to vector<1x256xf32>
    %298 = vector.broadcast %297 : vector<1x256xf32> to vector<64x256xf32>
    %299 = arith.mulf %296, %298 : vector<64x256xf32>
    %c15_i32_82 = arith.constant 15 : i32
    %300 = tpu.dynamic_rotate %291 by %c15_i32_82 dim 1 : vector<64x256xf32>, i32 -> vector<64x256xf32>
    %301 = vector.extract_strided_slice %0 {offsets = [2, 0], sizes = [1, 256], strides = [1, 1]} : vector<9x256xf32> to vector<1x256xf32>
    %302 = vector.broadcast %301 : vector<1x256xf32> to vector<64x256xf32>
    %303 = arith.mulf %300, %302 : vector<64x256xf32>
    %c1_i32_83 = arith.constant 1 : i32
    %304 = tpu.dynamic_rotate %291 by %c1_i32_83 dim 1 : vector<64x256xf32>, i32 -> vector<64x256xf32>
    %305 = vector.extract_strided_slice %0 {offsets = [3, 0], sizes = [1, 256], strides = [1, 1]} : vector<9x256xf32> to vector<1x256xf32>
    %306 = vector.broadcast %305 : vector<1x256xf32> to vector<64x256xf32>
    %307 = arith.mulf %304, %306 : vector<64x256xf32>
    %c255_i32_84 = arith.constant 255 : i32
    %308 = tpu.dynamic_rotate %291 by %c255_i32_84 dim 1 : vector<64x256xf32>, i32 -> vector<64x256xf32>
    %309 = vector.extract_strided_slice %0 {offsets = [5, 0], sizes = [1, 256], strides = [1, 1]} : vector<9x256xf32> to vector<1x256xf32>
    %310 = vector.broadcast %309 : vector<1x256xf32> to vector<64x256xf32>
    %311 = arith.mulf %308, %310 : vector<64x256xf32>
    %c241_i32_85 = arith.constant 241 : i32
    %312 = tpu.dynamic_rotate %291 by %c241_i32_85 dim 1 : vector<64x256xf32>, i32 -> vector<64x256xf32>
    %313 = vector.extract_strided_slice %0 {offsets = [6, 0], sizes = [1, 256], strides = [1, 1]} : vector<9x256xf32> to vector<1x256xf32>
    %314 = vector.broadcast %313 : vector<1x256xf32> to vector<64x256xf32>
    %315 = arith.mulf %312, %314 : vector<64x256xf32>
    %c240_i32_86 = arith.constant 240 : i32
    %316 = tpu.dynamic_rotate %291 by %c240_i32_86 dim 1 : vector<64x256xf32>, i32 -> vector<64x256xf32>
    %317 = vector.extract_strided_slice %0 {offsets = [7, 0], sizes = [1, 256], strides = [1, 1]} : vector<9x256xf32> to vector<1x256xf32>
    %318 = vector.broadcast %317 : vector<1x256xf32> to vector<64x256xf32>
    %319 = arith.mulf %316, %318 : vector<64x256xf32>
    %c239_i32_87 = arith.constant 239 : i32
    %320 = tpu.dynamic_rotate %291 by %c239_i32_87 dim 1 : vector<64x256xf32>, i32 -> vector<64x256xf32>
    %321 = vector.extract_strided_slice %0 {offsets = [8, 0], sizes = [1, 256], strides = [1, 1]} : vector<9x256xf32> to vector<1x256xf32>
    %322 = vector.broadcast %321 : vector<1x256xf32> to vector<64x256xf32>
    %323 = arith.mulf %320, %322 : vector<64x256xf32>
    %c0_88 = arith.constant 0 : index
    %c0_89 = arith.constant 0 : index
    %324 = vector.load %arg17[%c0_88, %c0_89] : memref<64x9xf32, #tpu.memory_space<vmem>>, vector<64x9xf32>
    %c0_90 = arith.constant 0 : index
    %c0_91 = arith.constant 0 : index
    %325 = vector.load %arg18[%c0_90, %c0_91] : memref<64x1xf32, #tpu.memory_space<vmem>>, vector<64x1xf32>
    %326 = vector.extract_strided_slice %324 {offsets = [0, 0], sizes = [64, 1], strides = [1, 1]} : vector<64x9xf32> to vector<64x1xf32>
    %327 = vector.broadcast %326 : vector<64x1xf32> to vector<64x256xf32>
    %328 = arith.mulf %295, %327 : vector<64x256xf32>
    %329 = vector.extract_strided_slice %324 {offsets = [0, 1], sizes = [64, 1], strides = [1, 1]} : vector<64x9xf32> to vector<64x1xf32>
    %330 = vector.broadcast %329 : vector<64x1xf32> to vector<64x256xf32>
    %331 = arith.mulf %299, %330 : vector<64x256xf32>
    %332 = arith.addf %328, %331 : vector<64x256xf32>
    %333 = vector.extract_strided_slice %324 {offsets = [0, 2], sizes = [64, 1], strides = [1, 1]} : vector<64x9xf32> to vector<64x1xf32>
    %334 = vector.broadcast %333 : vector<64x1xf32> to vector<64x256xf32>
    %335 = arith.mulf %303, %334 : vector<64x256xf32>
    %336 = arith.addf %332, %335 : vector<64x256xf32>
    %337 = vector.extract_strided_slice %324 {offsets = [0, 3], sizes = [64, 1], strides = [1, 1]} : vector<64x9xf32> to vector<64x1xf32>
    %338 = vector.broadcast %337 : vector<64x1xf32> to vector<64x256xf32>
    %339 = arith.mulf %307, %338 : vector<64x256xf32>
    %340 = arith.addf %336, %339 : vector<64x256xf32>
    %341 = vector.extract_strided_slice %324 {offsets = [0, 4], sizes = [64, 1], strides = [1, 1]} : vector<64x9xf32> to vector<64x1xf32>
    %342 = vector.broadcast %341 : vector<64x1xf32> to vector<64x256xf32>
    %343 = arith.mulf %291, %342 : vector<64x256xf32>
    %344 = arith.addf %340, %343 : vector<64x256xf32>
    %345 = vector.extract_strided_slice %324 {offsets = [0, 5], sizes = [64, 1], strides = [1, 1]} : vector<64x9xf32> to vector<64x1xf32>
    %346 = vector.broadcast %345 : vector<64x1xf32> to vector<64x256xf32>
    %347 = arith.mulf %311, %346 : vector<64x256xf32>
    %348 = arith.addf %344, %347 : vector<64x256xf32>
    %349 = vector.extract_strided_slice %324 {offsets = [0, 6], sizes = [64, 1], strides = [1, 1]} : vector<64x9xf32> to vector<64x1xf32>
    %350 = vector.broadcast %349 : vector<64x1xf32> to vector<64x256xf32>
    %351 = arith.mulf %315, %350 : vector<64x256xf32>
    %352 = arith.addf %348, %351 : vector<64x256xf32>
    %353 = vector.extract_strided_slice %324 {offsets = [0, 7], sizes = [64, 1], strides = [1, 1]} : vector<64x9xf32> to vector<64x1xf32>
    %354 = vector.broadcast %353 : vector<64x1xf32> to vector<64x256xf32>
    %355 = arith.mulf %319, %354 : vector<64x256xf32>
    %356 = arith.addf %352, %355 : vector<64x256xf32>
    %357 = vector.extract_strided_slice %324 {offsets = [0, 8], sizes = [64, 1], strides = [1, 1]} : vector<64x9xf32> to vector<64x1xf32>
    %358 = vector.broadcast %357 : vector<64x1xf32> to vector<64x256xf32>
    %359 = arith.mulf %323, %358 : vector<64x256xf32>
    %360 = arith.addf %356, %359 : vector<64x256xf32>
    %361 = vector.broadcast %325 : vector<64x1xf32> to vector<64x256xf32>
    %362 = arith.addf %360, %361 : vector<64x256xf32>
    %cst_92 = arith.constant 0.000000e+00 : f32
    %363 = vector.broadcast %cst_92 : f32 to vector<64x256xf32>
    %364 = arith.cmpf ogt, %362, %363 : vector<64x256xf32>
    %cst_93 = arith.constant 2.000000e-01 : f32
    %365 = vector.broadcast %cst_93 : f32 to vector<64x256xf32>
    %366 = arith.mulf %365, %362 : vector<64x256xf32>
    %367 = arith.select %364, %362, %366 : vector<64x256xi1>, vector<64x256xf32>
    %c0_94 = arith.constant 0 : index
    %c0_95 = arith.constant 0 : index
    %368 = vector.load %arg19[%c0_94, %c0_95] : memref<64x1xf32, #tpu.memory_space<vmem>>, vector<64x1xf32>
    %c0_96 = arith.constant 0 : index
    %c0_97 = arith.constant 0 : index
    %369 = vector.load %arg20[%c0_96, %c0_97] : memref<64x1xf32, #tpu.memory_space<vmem>>, vector<64x1xf32>
    %cst_98 = arith.constant dense<0.000000e+00> : vector<64xf32>
    %370 = vector.multi_reduction <add>, %367, %cst_98 [1] : vector<64x256xf32> to vector<64xf32>
    %371 = vector.shape_cast %370 : vector<64xf32> to vector<64x1xf32>
    %372 = arith.mulf %367, %367 : vector<64x256xf32>
    %cst_99 = arith.constant dense<0.000000e+00> : vector<64xf32>
    %373 = vector.multi_reduction <add>, %372, %cst_99 [1] : vector<64x256xf32> to vector<64xf32>
    %374 = vector.shape_cast %373 : vector<64xf32> to vector<64x1xf32>
    %375 = tpu.concatenate %371, %374 in 1 : vector<64x1xf32>, vector<64x1xf32> -> vector<64x2xf32>
    %cst_100 = arith.constant dense<0.000000e+00> : vector<64x2xf32>
    %376 = tpu.matmul %2, %375, %cst_100 {dimension_numbers = #tpu.dot_dimension_numbers<[1], [0], [0], [1], [0, 0, 1, 1], [], []>} : vector<64x64xf32>, vector<64x2xf32>, vector<64x2xf32> -> vector<64x2xf32>
    %377 = vector.extract_strided_slice %376 {offsets = [0, 0], sizes = [64, 1], strides = [1, 1]} : vector<64x2xf32> to vector<64x1xf32>
    %378 = vector.extract_strided_slice %376 {offsets = [0, 1], sizes = [64, 1], strides = [1, 1]} : vector<64x2xf32> to vector<64x1xf32>
    %379 = arith.mulf %377, %377 : vector<64x1xf32>
    %380 = arith.subf %378, %379 : vector<64x1xf32>
    %cst_101 = arith.constant 9.99999974E-6 : f32
    %381 = vector.broadcast %cst_101 : f32 to vector<64x1xf32>
    %382 = arith.addf %380, %381 : vector<64x1xf32>
    %383 = math.rsqrt %382 : vector<64x1xf32>
    %384 = arith.mulf %383, %368 : vector<64x1xf32>
    %385 = vector.broadcast %377 : vector<64x1xf32> to vector<64x256xf32>
    %386 = arith.subf %367, %385 : vector<64x256xf32>
    %387 = vector.broadcast %384 : vector<64x1xf32> to vector<64x256xf32>
    %388 = arith.mulf %386, %387 : vector<64x256xf32>
    %389 = vector.broadcast %369 : vector<64x1xf32> to vector<64x256xf32>
    %390 = arith.addf %388, %389 : vector<64x256xf32>
    %c17_i32_102 = arith.constant 17 : i32
    %391 = tpu.dynamic_rotate %390 by %c17_i32_102 dim 1 : vector<64x256xf32>, i32 -> vector<64x256xf32>
    %392 = vector.extract_strided_slice %0 {offsets = [0, 0], sizes = [1, 256], strides = [1, 1]} : vector<9x256xf32> to vector<1x256xf32>
    %393 = vector.broadcast %392 : vector<1x256xf32> to vector<64x256xf32>
    %394 = arith.mulf %391, %393 : vector<64x256xf32>
    %c16_i32_103 = arith.constant 16 : i32
    %395 = tpu.dynamic_rotate %390 by %c16_i32_103 dim 1 : vector<64x256xf32>, i32 -> vector<64x256xf32>
    %396 = vector.extract_strided_slice %0 {offsets = [1, 0], sizes = [1, 256], strides = [1, 1]} : vector<9x256xf32> to vector<1x256xf32>
    %397 = vector.broadcast %396 : vector<1x256xf32> to vector<64x256xf32>
    %398 = arith.mulf %395, %397 : vector<64x256xf32>
    %c15_i32_104 = arith.constant 15 : i32
    %399 = tpu.dynamic_rotate %390 by %c15_i32_104 dim 1 : vector<64x256xf32>, i32 -> vector<64x256xf32>
    %400 = vector.extract_strided_slice %0 {offsets = [2, 0], sizes = [1, 256], strides = [1, 1]} : vector<9x256xf32> to vector<1x256xf32>
    %401 = vector.broadcast %400 : vector<1x256xf32> to vector<64x256xf32>
    %402 = arith.mulf %399, %401 : vector<64x256xf32>
    %c1_i32_105 = arith.constant 1 : i32
    %403 = tpu.dynamic_rotate %390 by %c1_i32_105 dim 1 : vector<64x256xf32>, i32 -> vector<64x256xf32>
    %404 = vector.extract_strided_slice %0 {offsets = [3, 0], sizes = [1, 256], strides = [1, 1]} : vector<9x256xf32> to vector<1x256xf32>
    %405 = vector.broadcast %404 : vector<1x256xf32> to vector<64x256xf32>
    %406 = arith.mulf %403, %405 : vector<64x256xf32>
    %c255_i32_106 = arith.constant 255 : i32
    %407 = tpu.dynamic_rotate %390 by %c255_i32_106 dim 1 : vector<64x256xf32>, i32 -> vector<64x256xf32>
    %408 = vector.extract_strided_slice %0 {offsets = [5, 0], sizes = [1, 256], strides = [1, 1]} : vector<9x256xf32> to vector<1x256xf32>
    %409 = vector.broadcast %408 : vector<1x256xf32> to vector<64x256xf32>
    %410 = arith.mulf %407, %409 : vector<64x256xf32>
    %c241_i32_107 = arith.constant 241 : i32
    %411 = tpu.dynamic_rotate %390 by %c241_i32_107 dim 1 : vector<64x256xf32>, i32 -> vector<64x256xf32>
    %412 = vector.extract_strided_slice %0 {offsets = [6, 0], sizes = [1, 256], strides = [1, 1]} : vector<9x256xf32> to vector<1x256xf32>
    %413 = vector.broadcast %412 : vector<1x256xf32> to vector<64x256xf32>
    %414 = arith.mulf %411, %413 : vector<64x256xf32>
    %c240_i32_108 = arith.constant 240 : i32
    %415 = tpu.dynamic_rotate %390 by %c240_i32_108 dim 1 : vector<64x256xf32>, i32 -> vector<64x256xf32>
    %416 = vector.extract_strided_slice %0 {offsets = [7, 0], sizes = [1, 256], strides = [1, 1]} : vector<9x256xf32> to vector<1x256xf32>
    %417 = vector.broadcast %416 : vector<1x256xf32> to vector<64x256xf32>
    %418 = arith.mulf %415, %417 : vector<64x256xf32>
    %c239_i32_109 = arith.constant 239 : i32
    %419 = tpu.dynamic_rotate %390 by %c239_i32_109 dim 1 : vector<64x256xf32>, i32 -> vector<64x256xf32>
    %420 = vector.extract_strided_slice %0 {offsets = [8, 0], sizes = [1, 256], strides = [1, 1]} : vector<9x256xf32> to vector<1x256xf32>
    %421 = vector.broadcast %420 : vector<1x256xf32> to vector<64x256xf32>
    %422 = arith.mulf %419, %421 : vector<64x256xf32>
    %c0_110 = arith.constant 0 : index
    %c0_111 = arith.constant 0 : index
    %423 = vector.load %arg21[%c0_110, %c0_111] : memref<3x576xf32, #tpu.memory_space<vmem>>, vector<3x576xf32>
    %c0_112 = arith.constant 0 : index
    %c0_113 = arith.constant 0 : index
    %424 = vector.load %arg23[%c0_112, %c0_113] : memref<3x1xf32, #tpu.memory_space<vmem>>, vector<3x1xf32>
    %425 = tpu.concatenate %394, %398, %402, %406, %390, %410, %414, %418, %422 in 0 : vector<64x256xf32>, vector<64x256xf32>, vector<64x256xf32>, vector<64x256xf32>, vector<64x256xf32>, vector<64x256xf32>, vector<64x256xf32>, vector<64x256xf32>, vector<64x256xf32> -> vector<576x256xf32>
    %cst_114 = arith.constant dense<0.000000e+00> : vector<3x256xf32>
    %426 = tpu.matmul %423, %425, %cst_114 {dimension_numbers = #tpu.dot_dimension_numbers<[1], [0], [0], [1], [0, 0, 1, 1], [], []>} : vector<3x576xf32>, vector<576x256xf32>, vector<3x256xf32> -> vector<3x256xf32>
    %427 = vector.broadcast %424 : vector<3x1xf32> to vector<3x256xf32>
    %428 = arith.addf %426, %427 : vector<3x256xf32>
    %c0_115 = arith.constant 0 : index
    %c0_116 = arith.constant 0 : index
    %429 = vector.load %arg22[%c0_115, %c0_116] : memref<3x27xf32, #tpu.memory_space<vmem>>, vector<3x27xf32>
    %430 = vector.extract_strided_slice %429 {offsets = [0, 0], sizes = [3, 3], strides = [1, 1]} : vector<3x27xf32> to vector<3x3xf32>
    %cst_117 = arith.constant dense<0.000000e+00> : vector<3x256xf32>
    %431 = tpu.matmul %430, %8, %cst_117 {dimension_numbers = #tpu.dot_dimension_numbers<[1], [0], [0], [1], [0, 0, 1, 1], [], []>} : vector<3x3xf32>, vector<3x256xf32>, vector<3x256xf32> -> vector<3x256xf32>
    %432 = vector.extract_strided_slice %429 {offsets = [0, 3], sizes = [3, 3], strides = [1, 1]} : vector<3x27xf32> to vector<3x3xf32>
    %cst_118 = arith.constant dense<0.000000e+00> : vector<3x256xf32>
    %433 = tpu.matmul %432, %12, %cst_118 {dimension_numbers = #tpu.dot_dimension_numbers<[1], [0], [0], [1], [0, 0, 1, 1], [], []>} : vector<3x3xf32>, vector<3x256xf32>, vector<3x256xf32> -> vector<3x256xf32>
    %434 = arith.addf %431, %433 : vector<3x256xf32>
    %435 = vector.extract_strided_slice %429 {offsets = [0, 6], sizes = [3, 3], strides = [1, 1]} : vector<3x27xf32> to vector<3x3xf32>
    %cst_119 = arith.constant dense<0.000000e+00> : vector<3x256xf32>
    %436 = tpu.matmul %435, %16, %cst_119 {dimension_numbers = #tpu.dot_dimension_numbers<[1], [0], [0], [1], [0, 0, 1, 1], [], []>} : vector<3x3xf32>, vector<3x256xf32>, vector<3x256xf32> -> vector<3x256xf32>
    %437 = arith.addf %434, %436 : vector<3x256xf32>
    %438 = vector.extract_strided_slice %429 {offsets = [0, 9], sizes = [3, 3], strides = [1, 1]} : vector<3x27xf32> to vector<3x3xf32>
    %cst_120 = arith.constant dense<0.000000e+00> : vector<3x256xf32>
    %439 = tpu.matmul %438, %20, %cst_120 {dimension_numbers = #tpu.dot_dimension_numbers<[1], [0], [0], [1], [0, 0, 1, 1], [], []>} : vector<3x3xf32>, vector<3x256xf32>, vector<3x256xf32> -> vector<3x256xf32>
    %440 = arith.addf %437, %439 : vector<3x256xf32>
    %441 = vector.extract_strided_slice %429 {offsets = [0, 12], sizes = [3, 3], strides = [1, 1]} : vector<3x27xf32> to vector<3x3xf32>
    %cst_121 = arith.constant dense<0.000000e+00> : vector<3x256xf32>
    %442 = tpu.matmul %441, %4, %cst_121 {dimension_numbers = #tpu.dot_dimension_numbers<[1], [0], [0], [1], [0, 0, 1, 1], [], []>} : vector<3x3xf32>, vector<3x256xf32>, vector<3x256xf32> -> vector<3x256xf32>
    %443 = arith.addf %440, %442 : vector<3x256xf32>
    %444 = vector.extract_strided_slice %429 {offsets = [0, 15], sizes = [3, 3], strides = [1, 1]} : vector<3x27xf32> to vector<3x3xf32>
    %cst_122 = arith.constant dense<0.000000e+00> : vector<3x256xf32>
    %445 = tpu.matmul %444, %24, %cst_122 {dimension_numbers = #tpu.dot_dimension_numbers<[1], [0], [0], [1], [0, 0, 1, 1], [], []>} : vector<3x3xf32>, vector<3x256xf32>, vector<3x256xf32> -> vector<3x256xf32>
    %446 = arith.addf %443, %445 : vector<3x256xf32>
    %447 = vector.extract_strided_slice %429 {offsets = [0, 18], sizes = [3, 3], strides = [1, 1]} : vector<3x27xf32> to vector<3x3xf32>
    %cst_123 = arith.constant dense<0.000000e+00> : vector<3x256xf32>
    %448 = tpu.matmul %447, %28, %cst_123 {dimension_numbers = #tpu.dot_dimension_numbers<[1], [0], [0], [1], [0, 0, 1, 1], [], []>} : vector<3x3xf32>, vector<3x256xf32>, vector<3x256xf32> -> vector<3x256xf32>
    %449 = arith.addf %446, %448 : vector<3x256xf32>
    %450 = vector.extract_strided_slice %429 {offsets = [0, 21], sizes = [3, 3], strides = [1, 1]} : vector<3x27xf32> to vector<3x3xf32>
    %cst_124 = arith.constant dense<0.000000e+00> : vector<3x256xf32>
    %451 = tpu.matmul %450, %32, %cst_124 {dimension_numbers = #tpu.dot_dimension_numbers<[1], [0], [0], [1], [0, 0, 1, 1], [], []>} : vector<3x3xf32>, vector<3x256xf32>, vector<3x256xf32> -> vector<3x256xf32>
    %452 = arith.addf %449, %451 : vector<3x256xf32>
    %453 = vector.extract_strided_slice %429 {offsets = [0, 24], sizes = [3, 3], strides = [1, 1]} : vector<3x27xf32> to vector<3x3xf32>
    %cst_125 = arith.constant dense<0.000000e+00> : vector<3x256xf32>
    %454 = tpu.matmul %453, %36, %cst_125 {dimension_numbers = #tpu.dot_dimension_numbers<[1], [0], [0], [1], [0, 0, 1, 1], [], []>} : vector<3x3xf32>, vector<3x256xf32>, vector<3x256xf32> -> vector<3x256xf32>
    %455 = arith.addf %452, %454 : vector<3x256xf32>
    %456 = arith.addf %428, %455 : vector<3x256xf32>
    %457 = math.tanh %456 : vector<3x256xf32>
    %c0_126 = arith.constant 0 : index
    %c0_127 = arith.constant 0 : index
    %c0_128 = arith.constant 0 : index
    %458 = vector.load %arg26[%c0_126, %c0_127, %c0_128] : memref<1x3x256xf32, #tpu.memory_space<vmem>>, vector<1x3x256xf32>
    %459 = vector.shape_cast %458 : vector<1x3x256xf32> to vector<3x256xf32>
    %460 = vector.shape_cast %457 : vector<3x256xf32> to vector<1x3x256xf32>
    tpu.vector_store %arg26[%c0_126, %c0_127, %c0_128], %460 {strides = array<i32>} : memref<1x3x256xf32, #tpu.memory_space<vmem>>, vector<1x3x256xf32>,
    return
  }
  func.func @transform_0(%arg0: i32) -> (i32, i32, i32) {
    %c0_i32 = arith.constant 0 : i32
    %c0_i32_0 = arith.constant 0 : i32
    %c0_i32_1 = arith.constant 0 : i32
    return %arg0, %c0_i32, %c0_i32_0 : i32, i32, i32
  }
  func.func @transform_1(%arg0: i32) -> (i32, i32) {
    %c0_i32 = arith.constant 0 : i32
    %c0_i32_0 = arith.constant 0 : i32
    %c0_i32_1 = arith.constant 0 : i32
    return %c0_i32, %c0_i32_0 : i32, i32
  }
  func.func @transform_2(%arg0: i32) -> (i32, i32) {
    %c0_i32 = arith.constant 0 : i32
    %c0_i32_0 = arith.constant 0 : i32
    %c0_i32_1 = arith.constant 0 : i32
    return %c0_i32, %c0_i32_0 : i32, i32
  }
  func.func @transform_3(%arg0: i32) -> (i32, i32) {
    %c0_i32 = arith.constant 0 : i32
    %c0_i32_0 = arith.constant 0 : i32
    %c0_i32_1 = arith.constant 0 : i32
    return %c0_i32, %c0_i32_0 : i32, i32
  }
  func.func @transform_4(%arg0: i32) -> (i32, i32) {
    %c0_i32 = arith.constant 0 : i32
    %c0_i32_0 = arith.constant 0 : i32
    %c0_i32_1 = arith.constant 0 : i32
    return %c0_i32, %c0_i32_0 : i32, i32
  }
  func.func @transform_5(%arg0: i32) -> (i32, i32) {
    %c0_i32 = arith.constant 0 : i32
    %c0_i32_0 = arith.constant 0 : i32
    %c0_i32_1 = arith.constant 0 : i32
    return %c0_i32, %c0_i32_0 : i32, i32
  }
  func.func @transform_6(%arg0: i32) -> (i32, i32) {
    %c0_i32 = arith.constant 0 : i32
    %c0_i32_0 = arith.constant 0 : i32
    %c0_i32_1 = arith.constant 0 : i32
    return %c0_i32, %c0_i32_0 : i32, i32
  }
  func.func @transform_7(%arg0: i32) -> (i32, i32) {
    %c0_i32 = arith.constant 0 : i32
    %c0_i32_0 = arith.constant 0 : i32
    %c0_i32_1 = arith.constant 0 : i32
    return %c0_i32, %c0_i32_0 : i32, i32
  }
  func.func @transform_8(%arg0: i32) -> (i32, i32) {
    %c0_i32 = arith.constant 0 : i32
    %c0_i32_0 = arith.constant 0 : i32
    %c0_i32_1 = arith.constant 0 : i32
    return %c0_i32, %c0_i32_0 : i32, i32
  }
  func.func @transform_9(%arg0: i32) -> (i32, i32) {
    %c0_i32 = arith.constant 0 : i32
    %c0_i32_0 = arith.constant 0 : i32
    %c0_i32_1 = arith.constant 0 : i32
    return %c0_i32, %c0_i32_0 : i32, i32
  }
  func.func @transform_10(%arg0: i32) -> (i32, i32) {
    %c0_i32 = arith.constant 0 : i32
    %c0_i32_0 = arith.constant 0 : i32
    %c0_i32_1 = arith.constant 0 : i32
    return %c0_i32, %c0_i32_0 : i32, i32
  }
  func.func @transform_11(%arg0: i32) -> (i32, i32) {
    %c0_i32 = arith.constant 0 : i32
    %c0_i32_0 = arith.constant 0 : i32
    %c0_i32_1 = arith.constant 0 : i32
    return %c0_i32, %c0_i32_0 : i32, i32
  }
  func.func @transform_12(%arg0: i32) -> (i32, i32) {
    %c0_i32 = arith.constant 0 : i32
    %c0_i32_0 = arith.constant 0 : i32
    %c0_i32_1 = arith.constant 0 : i32
    return %c0_i32, %c0_i32_0 : i32, i32
  }
  func.func @transform_13(%arg0: i32) -> (i32, i32) {
    %c0_i32 = arith.constant 0 : i32
    %c0_i32_0 = arith.constant 0 : i32
    %c0_i32_1 = arith.constant 0 : i32
    return %c0_i32, %c0_i32_0 : i32, i32
  }
  func.func @transform_14(%arg0: i32) -> (i32, i32) {
    %c0_i32 = arith.constant 0 : i32
    %c0_i32_0 = arith.constant 0 : i32
    %c0_i32_1 = arith.constant 0 : i32
    return %c0_i32, %c0_i32_0 : i32, i32
  }
  func.func @transform_15(%arg0: i32) -> (i32, i32) {
    %c0_i32 = arith.constant 0 : i32
    %c0_i32_0 = arith.constant 0 : i32
    %c0_i32_1 = arith.constant 0 : i32
    return %c0_i32, %c0_i32_0 : i32, i32
  }
  func.func @transform_16(%arg0: i32) -> (i32, i32) {
    %c0_i32 = arith.constant 0 : i32
    %c0_i32_0 = arith.constant 0 : i32
    %c0_i32_1 = arith.constant 0 : i32
    return %c0_i32, %c0_i32_0 : i32, i32
  }
  func.func @transform_17(%arg0: i32) -> (i32, i32) {
    %c0_i32 = arith.constant 0 : i32
    %c0_i32_0 = arith.constant 0 : i32
    %c0_i32_1 = arith.constant 0 : i32
    return %c0_i32, %c0_i32_0 : i32, i32
  }
  func.func @transform_18(%arg0: i32) -> (i32, i32) {
    %c0_i32 = arith.constant 0 : i32
    %c0_i32_0 = arith.constant 0 : i32
    %c0_i32_1 = arith.constant 0 : i32
    return %c0_i32, %c0_i32_0 : i32, i32
  }
  func.func @transform_19(%arg0: i32) -> (i32, i32) {
    %c0_i32 = arith.constant 0 : i32
    %c0_i32_0 = arith.constant 0 : i32
    %c0_i32_1 = arith.constant 0 : i32
    return %c0_i32, %c0_i32_0 : i32, i32
  }
  func.func @transform_20(%arg0: i32) -> (i32, i32) {
    %c0_i32 = arith.constant 0 : i32
    %c0_i32_0 = arith.constant 0 : i32
    %c0_i32_1 = arith.constant 0 : i32
    return %c0_i32, %c0_i32_0 : i32, i32
  }
  func.func @transform_21(%arg0: i32) -> (i32, i32) {
    %c0_i32 = arith.constant 0 : i32
    %c0_i32_0 = arith.constant 0 : i32
    %c0_i32_1 = arith.constant 0 : i32
    return %c0_i32, %c0_i32_0 : i32, i32
  }
  func.func @transform_22(%arg0: i32) -> (i32, i32) {
    %c0_i32 = arith.constant 0 : i32
    %c0_i32_0 = arith.constant 0 : i32
    %c0_i32_1 = arith.constant 0 : i32
    return %c0_i32, %c0_i32_0 : i32, i32
  }
  func.func @transform_23(%arg0: i32) -> (i32, i32) {
    %c0_i32 = arith.constant 0 : i32
    %c0_i32_0 = arith.constant 0 : i32
    %c0_i32_1 = arith.constant 0 : i32
    return %c0_i32, %c0_i32_0 : i32, i32
  }
  func.func @transform_24(%arg0: i32) -> (i32, i32) {
    %c0_i32 = arith.constant 0 : i32
    %c0_i32_0 = arith.constant 0 : i32
    %c0_i32_1 = arith.constant 0 : i32
    return %c0_i32, %c0_i32_0 : i32, i32
  }
  func.func @transform_25(%arg0: i32) -> (i32, i32, i32) {
    %c0_i32 = arith.constant 0 : i32
    %c0_i32_0 = arith.constant 0 : i32
    %c0_i32_1 = arith.constant 0 : i32
    return %arg0, %c0_i32, %c0_i32_0 : i32, i32, i32
  }
}

</mosaic_0001>

<bundles_post_ra>
// kernel: uaenet_forward.1
= control target key start
LH: loop header
LB: loop body
LE: loop exit
PB: predicated region body
PF: predicated region fallthrough
CT: control target
= control target key end

     0   :  { %s7249_s29 = smov 0   ;;  %s13459_s0 = inlined_call_operand.vmem [shape: f32[2,3,256], index: 0, kind: input, shape index: {}]   ;;  %s13460_s1 = inlined_call_operand.vmem [shape: f32[9,256], index: 1, kind: input, shape index: {}]   ;;  %s13461_s2 = inlined_call_operand.vmem [shape: f32[32,27], index: 2, kind: input, shape index: {}]   ;;  %s13462_s3 = inlined_call_operand.vmem [shape: f32[32,1], index: 3, kind: input, shape index: {}]   ;;  %s13463_s4 = inlined_call_operand.vmem [shape: f32[32,288], index: 4, kind: input, shape index: {}]   ;;  %s13464_s5 = inlined_call_operand.vmem [shape: f32[32,1], index: 5, kind: input, shape index: {}]   ;;  %s13465_s6 = inlined_call_operand.vmem [shape: f32[32,32], index: 6, kind: input, shape index: {}]   ;;  %s13466_s7 = inlined_call_operand.vmem [shape: f32[32,1], index: 7, kind: input, shape index: {}]   ;;  %s13467_s8 = inlined_call_operand.vmem [shape: f32[32,9], index: 8, kind: input, shape index: {}]   ;;  %s13468_s9 = inlined_call_operand.vmem [shape: f32[32,1], index: 9, kind: input, shape index: {}]   ;;  %s13469_s10 = inlined_call_operand.vmem [shape: f32[32,1], index: 10, kind: input, shape index: {}]   ;;  %s13470_s11 = inlined_call_operand.vmem [shape: f32[32,1], index: 11, kind: input, shape index: {}]   ;;  %s13471_s12 = inlined_call_operand.vmem [shape: f32[32,9], index: 12, kind: input, shape index: {}]   ;;  %s13472_s13 = inlined_call_operand.vmem [shape: f32[32,1], index: 13, kind: input, shape index: {}]   ;;  %s13473_s14 = inlined_call_operand.vmem [shape: f32[32,1], index: 14, kind: input, shape index: {}]   ;;  %s13474_s15 = inlined_call_operand.vmem [shape: f32[32,1], index: 15, kind: input, shape index: {}]   ;;  %s13475_s16 = inlined_call_operand.vmem [shape: f32[64,9], index: 16, kind: input, shape index: {}]   ;;  %s13476_s17 = inlined_call_operand.vmem [shape: f32[64,1], index: 17, kind: input, shape index: {}]   ;;  %s13477_s18 = inlined_call_operand.vmem [shape: f32[64,1], index: 18, kind: input, shape index: {}]   ;;  %s13478_s19 = inlined_call_operand.vmem [shape: f32[64,1], index: 19, kind: input, shape index: {}]   ;;  %s13479_s20 = inlined_call_operand.vmem [shape: f32[3,576], index: 20, kind: input, shape index: {}]   ;;  %s13480_s21 = inlined_call_operand.vmem [shape: f32[3,27], index: 21, kind: input, shape index: {}]   ;;  %s13481_s22 = inlined_call_operand.vmem [shape: f32[3,1], index: 22, kind: input, shape index: {}]   ;;  %s13482_s23 = inlined_call_operand.vmem [shape: f32[32,32], index: 23, kind: input, shape index: {}]   ;;  %s13483_s24 = inlined_call_operand.vmem [shape: f32[64,64], index: 24, kind: input, shape index: {}]   ;;  %s13484_s25 = inlined_call_operand.vmem [shape: f32[2,3,256], index: 25, kind: output, shape index: {}]  }
   0x1   :  { %13952 = sst [smem:[#allocation188_spill]] %s13459_s0 }
   0x2   :  { %13953 = sst [smem:[#allocation189_spill]] %s13460_s1 }
   0x3   :  { %13954 = sst [smem:[#allocation190_spill]] %s13461_s2 }
   0x4   :  { %13955 = sst [smem:[#allocation191_spill]] %s13462_s3 }
   0x5   :  { %13956 = sst [smem:[#allocation192_spill]] %s13463_s4 }
   0x6   :  { %13957 = sst [smem:[#allocation193_spill]] %s13464_s5 }
   0x7   :  { %13958 = sst [smem:[#allocation194_spill]] %s13465_s6 }
   0x8   :  { %13959 = sst [smem:[#allocation195_spill]] %s13466_s7 }
   0x9   :  { %13960 = sst [smem:[#allocation196_spill]] %s13467_s8 }
   0xa   :  { %13961 = sst [smem:[#allocation197_spill]] %s13468_s9 }
   0xb   :  { %13962 = sst [smem:[#allocation198_spill]] %s13469_s10 }
   0xc   :  { %13963 = sst [smem:[#allocation199_spill]] %s13478_s19 }
   0xd   :  { %13964 = sst [smem:[#allocation200_spill]] %s13479_s20 }
   0xe   :  { %13965 = sst [smem:[#allocation201_spill]] %s13480_s21 }
   0xf   :  { %13966 = sst [smem:[#allocation202_spill]] %s13481_s22 }
  0x10   :  { %13967 = sst [smem:[#allocation203_spill]] %s13483_s24 }
  0x11   :  { %13968 = sst [smem:[#allocation204_spill]] %s13484_s25 }
  0x12 LB: > { %13969 = sst [smem:[#allocation2_spill]] %s7093_s29  ;;  %s6741_s2 = sadd.s32 4294967295, %s7093_s29   ;;  %s7093_s29 = sphi %s7249_s29, %s35_s29  }
  0x13   : > { %p6745_p0 = scmp.ge.s32.totalorder %s7093_s29, 1  ;;  %p687_p1 = scmp.lt.s32.totalorder %s7093_s29, 3 }
  0x15   : > { %p688_p2 = pnand %p6745_p0, %p687_p1 }
  0x17   : > { %691 = sbr.rel (%p688_p2) target bundleno = 3587 (0xe03), region = 120 }
  0x1c   : > { %s13970_s7 = sld [smem:[#allocation190_spill]]  ;;  %p755_p3 = scmp.lt.s32.totalorder %s6741_s2, 1  ;;  %v792_v24 = vlaneseq  ;;  %vm13839_vm1 = vcmask 1042432   ;;  %vm13835_vm2 = vcmask 23552  }
  0x1d   : > { %s13499_s1 = smov 125   ;;  %s13972_s28 = sld [smem:[#allocation188_spill]] }
  0x1e   : > { %s14933_s2 = smov (!%p755_p3, %s6741_s2), 1  ;;  %s13497_s5 = smov 122   ;;  %v7374_v26 = vand.u32 127, %v792_v24 }
  0x1f   : > { %13971 = sst [smem:[#allocation3_spill]] %s14933_s2  ;;  %s13494_s8 = sshll.u32 %s14933_s2, 3 }
  0x20   : > { %s13590_s0 = smov 17   ;;  %s13514_s6 = smov 16   ;;  %13974 = vst [vmem:[#allocation5_spill] sm:$0xff] %v7374_v26  ;;  %vm794_vm0 = vcmp.lt.s32.totalorder %v7374_v26, 17  ;;  %vm826_vm3 = vcmp.lt.s32.totalorder %v7374_v26, 15  ;;  %vm810_vm4 = vcmp.lt.s32.totalorder %v7374_v26, 16 }
  0x21   : > { %s13512_s26 = smov 15   ;;  %s13495_s30 = smov 119   ;;  %vm842_vm5 = vcmp.lt.s32.totalorder %v7374_v26, 1  ;;  %vm858_vm6 = vcmp.lt.s32.totalorder %v7374_v26, 127  ;;  %vm874_vm7 = vcmp.lt.s32.totalorder %v7374_v26, 113  ;;  %vm890_vm8 = vcmp.lt.s32.totalorder %v7374_v26, 112 }
  0x22   : > { %v7260_v0 = vld [vmem:[%s13970_s7] sm:$0xff]  ;;  %v7265_v1 = vld [vmem:[%s13970_s7 + $0x8] sm:$0xff]  ;;  %v7292_v7 = vld [vmem:[%s13970_s7 + $0x10] sm:$0xff]  ;;  %s13504_s3 = smov 113   ;;  %s13502_s27 = smov 112   ;;  %vm906_vm9 = vcmp.lt.s32.totalorder %v7374_v26, 111 }
  0x23   : > { %925 = vrot.lane.b32.xlu1 %v7260_v0, %s13499_s1  ;;  %927 = vrot.lane.b32.xlu2 %v7265_v1, %s13499_s1  ;;  %s759_s9 = scalar_lea.vmem %s13972_s28, %s13494_s8  ;;  %v7302_v10 = vld [vmem:[%s13970_s7 + $0x18] sm:$0xff]  ;;  %s13510_s28 = smov 1  }
  0x24   : > { %v7279_v2 = vld [vmem:[%s759_s9] sm:$0x77]  ;;  %s13508_s9 = smov 127   ;;  %s13500_s4 = smov 111  }
  0x25   : > { %13973 = vst [vmem:[#allocation4_spill] sm:$0xff] %v7279_v2  ;;  %s13496_s8 = smov 116   ;;  %s14044_s7 = smov 17  }
  0x26   : > { %783 = vst [vmem:[#allocation1] ss:$2 sm:$0xff] %v7279_v2  ;;  %s14067_s10 = sld [smem:[#allocation198_spill]] }
  0x27   : > { %s14079_s22 = sld [smem:[#allocation197_spill]] }
  0x28   : > { %s14094_s21 = sld [smem:[#allocation192_spill]] }
  0x29   : > { %s14157_s25 = sld [smem:[#allocation194_spill]] }
  0x2a   : > { %s14695_s2 = sld [smem:[#allocation203_spill]] }
  0x2b   : > { %1079 = vrot.lane.b32.xlu2 %v7260_v0, %s13497_s5  ;;  %s14790_s19 = sld [smem:[#allocation200_spill]] }
  0x2c   : > { %s14930_s20 = sld [smem:[#allocation204_spill]] }
  0x2d   : > { %v784_v3 = vld.sshfl [vmem:[#allocation1] sm:$0xff pattern:$0x75316420]  ;;  %v785_v4 = vld.sshfl [vmem:[#allocation1 + $0x8] sm:$0xff pattern:$0x75316420] }
  0x2e   : > { %788 = vrot.lane.b32.xlu0 %v784_v3, %s13590_s0  ;;  %801 = vst [vmem:[#allocation1] ss:$2 sm:$0xff] %v7279_v2 }
  0x35   : > { %v802_v5 = vld.sshfl [vmem:[#allocation1] sm:$0xff pattern:$0x75316420]  ;;  %v803_v6 = vld.sshfl [vmem:[#allocation1 + $0x8] sm:$0xff pattern:$0x75316420] }
  0x36   : > { %790 = vrot.lane.b32.xlu0 %v785_v4, %s13590_s0  ;;  %806 = vrot.lane.b32.xlu1 %v802_v5, %s13514_s6  ;;  %817 = vst [vmem:[#allocation1] ss:$2 sm:$0xff] %v7279_v2 }
  0x3d   : > { %v818_v8 = vld.sshfl [vmem:[#allocation1] sm:$0xff pattern:$0x75316420]  ;;  %v819_v9 = vld.sshfl [vmem:[#allocation1 + $0x8] sm:$0xff pattern:$0x75316420] }
  0x3e   : > { %929 = vrot.lane.b32.xlu0 %v7292_v7, %s13499_s1  ;;  %808 = vrot.lane.b32.xlu1 %v803_v6, %s13514_s6  ;;  %833 = vst [vmem:[#allocation1] ss:$2 sm:$0xff] %v7279_v2  ;;  %s14033_s6 = smov 1  }
  0x3f   : > { %822 = vrot.lane.b32.xlu2 %v818_v8, %s13512_s26 }
  0x45   : > { %v835_v11 = vld.sshfl [vmem:[#allocation1 + $0x8] sm:$0xff pattern:$0x75316420]  ;;  %v834_v12 = vld.sshfl [vmem:[#allocation1] sm:$0xff pattern:$0x75316420] }
  0x46   : > { %1081 = vrot.lane.b32.xlu0 %v7265_v1, %s13497_s5  ;;  %931 = vrot.lane.b32.xlu1 %v7302_v10, %s13499_s1  ;;  %849 = vst [vmem:[#allocation1] ss:$2 sm:$0xff] %v7279_v2  ;;  %s14027_s1 = smov 16  }
  0x47   : > { %824 = vrot.lane.b32.xlu2 %v819_v9, %s13512_s26  ;;  %s14034_s26 = smov 127  }
  0x4d   : > { %v850_v13 = vld.sshfl [vmem:[#allocation1] sm:$0xff pattern:$0x75316420]  ;;  %v851_v14 = vld.sshfl [vmem:[#allocation1 + $0x8] sm:$0xff pattern:$0x75316420] }
  0x4e   : > { %840 = vrot.lane.b32.xlu1 %v835_v11, %s13510_s28  ;;  %838 = vrot.lane.b32.xlu0 %v834_v12, %s13510_s28  ;;  %865 = vst [vmem:[#allocation1] ss:$2 sm:$0xff] %v7279_v2  ;;  %s14009_s28 = sld [smem:[#allocation196_spill]] }
  0x4f   : > { %1085 = vrot.lane.b32.xlu2 %v7302_v10, %s13497_s5 }
  0x55   : > { %v866_v15 = vld.sshfl [vmem:[#allocation1] sm:$0xff pattern:$0x75316420]  ;;  %v867_v16 = vld.sshfl [vmem:[#allocation1 + $0x8] sm:$0xff pattern:$0x75316420] }
  0x56   : > { %1083 = vrot.lane.b32.xlu1 %v7292_v7, %s13497_s5  ;;  %856 = vrot.lane.b32.xlu0 %v851_v14, %s13508_s9  ;;  %881 = vst [vmem:[#allocation1] ss:$2 sm:$0xff] %v7279_v2  ;;  %s13506_s5 = smov 104  }
  0x57   : > { %854 = vrot.lane.b32.xlu2 %v850_v13, %s13508_s9  ;;  %s14004_s9 = sld [smem:[#allocation191_spill]] }
  0x5d   : > { %v883_v17 = vld.sshfl [vmem:[#allocation1 + $0x8] sm:$0xff pattern:$0x75316420]  ;;  %v882_v18 = vld.sshfl [vmem:[#allocation1] sm:$0xff pattern:$0x75316420] }
  0x5e   : > { %1167 = vrot.lane.b32.xlu0 %v7260_v0, %s13495_s30  ;;  %870 = vrot.lane.b32.xlu1 %v866_v15, %s13504_s3  ;;  %897 = vst [vmem:[#allocation1] ss:$2 sm:$0xff] %v7279_v2 }
  0x5f   : > { %872 = vrot.lane.b32.xlu2 %v867_v16, %s13504_s3 }
  0x65   : > { %v899_v19 = vld.sshfl [vmem:[#allocation1 + $0x8] sm:$0xff pattern:$0x75316420]  ;;  %v898_v20 = vld.sshfl [vmem:[#allocation1] sm:$0xff pattern:$0x75316420] }
  0x66   : > { %888 = vrot.lane.b32.xlu1 %v883_v17, %s13502_s27  ;;  %886 = vrot.lane.b32.xlu0 %v882_v18, %s13502_s27  ;;  %1263 = vst [vmem:[#allocation1] ss:$2 sm:$0xff] %v7279_v2  ;;  %s14036_s27 = smov 113  }
  0x67   : > { %1171 = vrot.lane.b32.xlu2 %v7292_v7, %s13495_s30 }
  0x6d   : > { %v1264_v56 = vld.sshfl [vmem:[#allocation1] sm:$0xff pattern:$0x75316420]  ;;  %v1265_v57 = vld.sshfl [vmem:[#allocation1 + $0x8] sm:$0xff pattern:$0x75316420] }
  0x6e   : > { %1169 = vrot.lane.b32.xlu1 %v7265_v1, %s13495_s30  ;;  %904 = vrot.lane.b32.xlu0 %v899_v19, %s13500_s4 }
  0x6f   : > { %902 = vrot.lane.b32.xlu2 %v898_v20, %s13500_s4  ;;  %s13975_s4 = sld [smem:[#allocation189_spill]] }
  0x75   : > { %v7379_v27 = vld [vmem:[%s13975_s4] sm:$0xff]  ;;  %v7384_v28 = vld [vmem:[%s13975_s4 + $0x8] sm:$0xff] }
  0x76   : > { %1173 = vrot.lane.b32.xlu0 %v7302_v10, %s13495_s30  ;;  %1255 = vrot.lane.b32.xlu1 %v7260_v0, %s13496_s8  ;;  %s13498_s30 = smov 110   ;;  %v7388_v30 = vperm.slane %v7379_v27, 0  ;;  %v7391_v31 = vperm.slane %v7384_v28, 0  ;;  %v7420_v38 = vperm.slane %v7379_v27, 1  ;;  %v7423_v39 = vperm.slane %v7384_v28, 1 }
  0x77   : > { %1257 = vrot.lane.b32.xlu2 %v7265_v1, %s13496_s8  ;;  %v7426_v41 = vperm.slane %v7379_v27, 2  ;;  %v7429_v42 = vperm.slane %v7384_v28, 2  ;;  %v7479_v58 = vperm.slane %v7379_v27, 3  ;;  %v7482_v59 = vperm.slane %v7384_v28, 3 }
  0x78   : > { %13976 = vst [vmem:[#allocation6_spill] sm:$0xff] %v7388_v30  ;;  %v7508_v4 = vperm.slane %v7379_v27, 5  ;;  %v7511_v5 = vperm.slane %v7384_v28, 5  ;;  %v7531_v13 = vperm.slane %v7379_v27, 6  ;;  %v7534_v14 = vperm.slane %v7384_v28, 6 }
  0x79   : > { %13977 = vst [vmem:[#allocation7_spill] sm:$0xff] %v7391_v31 }
  0x7a   : > { %13980 = vst [vmem:[#allocation10_spill] sm:$0xff] %v7420_v38 }
  0x7b   : > { %13981 = vst [vmem:[#allocation11_spill] sm:$0xff] %v7423_v39 }
  0x7c   : > { %13982 = vst [vmem:[#allocation12_spill] sm:$0xff] %v7426_v41 }
  0x7d   : > { %v7358_v21 = vpop.permute.xlu2 %927  ;;  %13983 = vst [vmem:[#allocation13_spill] sm:$0xff] %v7429_v42 }
  0x7e   : > { %1259 = vrot.lane.b32.xlu0 %v7292_v7, %s13496_s8  ;;  %1261 = vrot.lane.b32.xlu1 %v7302_v10, %s13496_s8  ;;  %s13507_s8 = smov 107   ;;  %13988 = vst [vmem:[#allocation18_spill] sm:$0xff] %v7479_v58 }
  0x7f   : > { %1344 = vrot.lane.b32.xlu2 %v7260_v0, %s13504_s3  ;;  %13989 = vst [vmem:[#allocation19_spill] sm:$0xff] %v7482_v59 }
  0x80   : > { %13992 = vst [vmem:[#allocation22_spill] sm:$0xff] %v7508_v4 }
  0x81   : > { %13993 = vst [vmem:[#allocation23_spill] sm:$0xff] %v7511_v5 }
  0x82   : > { %13996 = vst [vmem:[#allocation26_spill] sm:$0xff] %v7531_v13 }
  0x83   : > { %13997 = vst [vmem:[#allocation27_spill] sm:$0xff] %v7534_v14 }
  0x85   : > { %v7366_v22 = vpop.permute.xlu2 %1079 }
  0x86   : > { %1346 = vrot.lane.b32.xlu0 %v7265_v1, %s13504_s3  ;;  %1348 = vrot.lane.b32.xlu1 %v7292_v7, %s13504_s3 }
  0x87   : > { %1350 = vrot.lane.b32.xlu2 %v7302_v10, %s13504_s3  ;;  %s14007_s3 = sld [smem:[#allocation193_spill]] }
  0x8e   : > { %1434 = vrot.lane.b32.xlu1 %v7265_v1, %s13498_s30  ;;  %1432 = vrot.lane.b32.xlu0 %v7260_v0, %s13498_s30 }
  0x8f   : > { %1436 = vrot.lane.b32.xlu2 %v7292_v7, %s13498_s30 }
  0x95   : > { %v926_v23 = vpop.permute.xlu1 %925 }
  0x96   : > { %1520 = vrot.lane.b32.xlu1 %v7260_v0, %s13507_s8  ;;  %1438 = vrot.lane.b32.xlu0 %v7302_v10, %s13498_s30  ;;  %s14030_s30 = smov 15  }
  0x97   : > { %1522 = vrot.lane.b32.xlu2 %v7265_v1, %s13507_s8 }
  0x99   : > { %v823_v29 = vpop.permute.xlu2 %822 }
  0x9e   : > { %1524 = vrot.lane.b32.xlu0 %v7292_v7, %s13507_s8  ;;  %1526 = vrot.lane.b32.xlu1 %v7302_v10, %s13507_s8  ;;  %s14039_s8 = smov 112  }
  0x9f   : > { %1608 = vrot.lane.b32.xlu2 %v7260_v0, %s13506_s5 }
  0xa0   : > { %v789_v25 = vpop.permute.xlu0 %788 }
  0xa1   : > { %v825_v40 = vpop.permute.xlu2 %824 }
  0xa2   : > { %v827_v45 = vsel %vm826_vm3, %v823_v29, %v825_v40  ;;  %v828_v46 = vsel %vm826_vm3, %v825_v40, %v823_v29 }
  0xa3   : > { %v7446_v51 = vmul.f32 %v7426_v41, %v828_v46  ;;  %v7449_v52 = vmul.f32 %v7429_v42, %v827_v45  ;;  %v7027_v45 = vld [vmem:[%s13975_s4 + $0x18] ss:$0 sm:$0xff] }
  0xa5   : > { %13986 = vst [vmem:[#allocation16_spill] sm:$0xff] %v7446_v51 }
  0xa6   : > { %1610 = vrot.lane.b32.xlu0 %v7265_v1, %s13506_s5  ;;  %1612 = vrot.lane.b32.xlu1 %v7292_v7, %s13506_s5  ;;  %13987 = vst [vmem:[#allocation17_spill] sm:$0xff] %v7449_v52 }
  0xa7   : > { %1614 = vrot.lane.b32.xlu2 %v7302_v10, %s13506_s5  ;;  %s14008_s5 = sld [smem:[#allocation195_spill]] }
  0xa8   : > { %v791_v32 = vpop.permute.xlu0 %790  ;;  %v807_v33 = vpop.permute.xlu1 %806 }
  0xa9   : > { %v796_v34 = vsel %vm794_vm0, %v791_v32, %v789_v25  ;;  %v795_v35 = vsel %vm794_vm0, %v789_v25, %v791_v32  ;;  %v7467_v55 = vpop.permute.xlu2 %1085 }
  0xaa   : > { %v7404_v36 = vmul.f32 %v7388_v30, %v796_v34  ;;  %v7407_v37 = vmul.f32 %v7391_v31, %v795_v35 }
  0xac   : > { %13978 = vst [vmem:[#allocation8_spill] sm:$0xff] %v7404_v36  ;;  %6760 = vmatpush.msk.msra.mxu2 %vm13839_vm1, %v7404_v36  ;;  %6765 = vmatpush.msk.msra.mxu3 %vm13839_vm1, %v7407_v37 }
  0xad   : > { %13979 = vst [vmem:[#allocation9_spill] sm:$0xff] %v7407_v37  ;;  %6761 = vmatmul.msk.f32.vlgmr.msra.gmra.mxu2 %vm13835_vm2, %v7260_v0  ;;  %6766 = vmatmul.msk.f32.vlgmr.msra.gmra.mxu3 %vm13835_vm2, %v7260_v0  ;;  %v13545_v37 = vmov 6  }
  0xb0   : > { %v930_v43 = vpop.permute.xlu0 %929  ;;  %v809_v44 = vpop.permute.xlu1 %808 }
  0xb1   : > { %v812_v47 = vsel %vm810_vm4, %v809_v44, %v807_v33  ;;  %v811_v48 = vsel %vm810_vm4, %v807_v33, %v809_v44  ;;  %v855_v3 = vpop.permute.xlu2 %854  ;;  %v7026_v44 = vld [vmem:[%s13975_s4 + $0x10] ss:$0 sm:$0xff] }
  0xb2   : > { %v7440_v49 = vmul.f32 %v7420_v38, %v812_v47  ;;  %v7443_v50 = vmul.f32 %v7423_v39, %v811_v48 }
  0xb4   : > { %13984 = vst [vmem:[#allocation14_spill] sm:$0xff] %v7440_v49  ;;  %6750 = vmatpush.msk.msra.mxu0 %vm13839_vm1, %v7440_v49  ;;  %6755 = vmatpush.msk.msra.mxu1 %vm13839_vm1, %v7443_v50 }
  0xb5   : > { %13985 = vst [vmem:[#allocation15_spill] sm:$0xff] %v7443_v50  ;;  %6751 = vmatmul.msk.f32.vlgmr.msra.gmra.mxu0 %vm13835_vm2, %v926_v23  ;;  %6756 = vmatmul.msk.f32.vlgmr.msra.gmra.mxu1 %vm13835_vm2, %v926_v23  ;;  %v7557_v23 = vperm.slane %v7384_v28, 7 }
  0xb6   : > { %6762 = vmatmul.msk.f32.gmra.mxu2 %vm13835_vm2, %v7265_v1  ;;  %6767 = vmatmul.msk.f32.gmra.mxu3 %vm13835_vm2, %v7265_v1 }
  0xb7   : > { %6770 = vmatpush.msk.msrb.mxu0 %vm13839_vm1, %v7446_v51  ;;  %6775 = vmatpush.msk.msrb.mxu1 %vm13839_vm1, %v7449_v52  ;;  %14001 = vst [vmem:[#allocation31_spill] sm:$0xff] %v7557_v23  ;;  %v13572_v51 = vmov 7  }
  0xb8   : > { %v7465_v53 = vpop.permute.xlu0 %1081  ;;  %v932_v54 = vpop.permute.xlu1 %931 }
  0xb9   : > { %6790 = vmatpush.msk.msra.mxu0 %vm13839_vm1, %v1264_v56  ;;  %6795 = vmatpush.msk.msra.mxu1 %vm13839_vm1, %v1265_v57  ;;  %v873_v12 = vpop.permute.xlu2 %872  ;;  %v13522_v56 = vmov 0  }
  0xba   : > { %6947 = vset.pattern.permute.xlu1 %v13522_v56  ;;  %6948 = vset.pattern.permute.xlu2 %v13522_v56 }
  0xbb   : > { %6946 = vset.pattern.permute.xlu0 %v13522_v56 }
  0xbd   : > { %6752 = vmatmul.msk.f32.gmra.mxu0 %vm13835_vm2, %v7358_v21  ;;  %6757 = vmatmul.msk.f32.gmra.mxu1 %vm13835_vm2, %v7358_v21  ;;  %v7554_v21 = vperm.slane %v7379_v27, 7 }
  0xbe   : > { %6763 = vmatmul.msk.f32.gmra.mxu2 %vm13835_vm2, %v7292_v7  ;;  %6768 = vmatmul.msk.f32.gmra.mxu3 %vm13835_vm2, %v7292_v7 }
  0xbf   : > { %14000 = vst [vmem:[#allocation30_spill] sm:$0xff] %v7554_v21 }
  0xc0   : > { %v841_v60 = vpop.permute.xlu1 %840  ;;  %v839_v61 = vpop.permute.xlu0 %838 }
  0xc1   : > { %v843_v62 = vsel %vm842_vm5, %v839_v61, %v841_v60  ;;  %v844_v63 = vsel %vm842_vm5, %v841_v60, %v839_v61  ;;  %v1172_v24 = vpop.permute.xlu2 %1171 }
  0xc2   : > { %v7491_v0 = vmul.f32 %v7479_v58, %v844_v63  ;;  %v7494_v1 = vmul.f32 %v7482_v59, %v843_v62  ;;  %v920_v62 = vld [vmem:[%s14004_s9 + $0x18] sm:$0xff] }
  0xc4   : > { %13990 = vst [vmem:[#allocation20_spill] sm:$0xff] %v7491_v0  ;;  %6780 = vmatpush.msk.msrb.mxu2 %vm13839_vm1, %v7491_v0  ;;  %6785 = vmatpush.msk.msrb.mxu3 %vm13839_vm1, %v7494_v1 }
  0xc5   : > { %13991 = vst [vmem:[#allocation21_spill] sm:$0xff] %v7494_v1  ;;  %6753 = vmatmul.msk.f32.gmra.mxu0 %vm13835_vm2, %v930_v43  ;;  %6758 = vmatmul.msk.f32.gmra.mxu1 %vm13835_vm2, %v930_v43 }
  0xc6   : > { %6764 = vmatmul.msk.f32.gmra.mxu2 %vm13835_vm2, %v7302_v10  ;;  %6769 = vmatmul.msk.f32.gmra.mxu3 %vm13835_vm2, %v7302_v10 }
  0xc8   : > { %v1084_v6 = vpop.permute.xlu1 %1083  ;;  %v857_v7 = vpop.permute.xlu0 %856 }
  0xc9   : > { %v859_v8 = vsel %vm858_vm6, %v855_v3, %v857_v7  ;;  %v860_v9 = vsel %vm858_vm6, %v857_v7, %v855_v3  ;;  %v903_v35 = vpop.permute.xlu2 %902  ;;  %v2017_v3 = vld [vmem:[%s14007_s3 + $0x8] sm:$0xff]  ;;  %v2255_v7 = vld [vmem:[%s14008_s5] sm:$0xff] }
  0xca   : > { %v7518_v11 = vmul.f32 %v7508_v4, %v859_v8  ;;  %v7521_v10 = vmul.f32 %v7511_v5, %v860_v9 }
  0xcc   : > { %13994 = vst [vmem:[#allocation24_spill] sm:$0xff] %v7518_v11  ;;  %6800 = vmatpush.msk.msra.mxu2 %vm13839_vm1, %v7518_v11  ;;  %6805 = vmatpush.msk.msra.mxu3 %vm13839_vm1, %v7521_v10 }
  0xcd   : > { %13995 = vst [vmem:[#allocation25_spill] sm:$0xff] %v7521_v10  ;;  %6754 = vmatmul.msk.f32.gmra.mxu0 %vm13835_vm2, %v932_v54  ;;  %6759 = vmatmul.msk.f32.gmra.mxu1 %vm13835_vm2, %v932_v54 }
  0xd0   : > { %v1168_v15 = vpop.permute.xlu0 %1167  ;;  %v871_v16 = vpop.permute.xlu1 %870 }
  0xd1   : > { %6781 = vmatmul.msk.f32.vlgmr.msrb.gmra.mxu2 %vm13835_vm2, %v1168_v15  ;;  %6786 = vmatmul.msk.f32.vlgmr.msrb.gmra.mxu3 %vm13835_vm2, %v1168_v15  ;;  %v875_v17 = vsel %vm874_vm7, %v871_v16, %v873_v12  ;;  %v876_v18 = vsel %vm874_vm7, %v873_v12, %v871_v16  ;;  %v1258_v43 = vpop.permute.xlu2 %1257  ;;  %v2258_v15 = vld [vmem:[%s14008_s5 + $0x18] sm:$0xff] }
  0xd2   : > { %v7543_v19 = vmul.f32 %v7531_v13, %v875_v17  ;;  %v7546_v20 = vmul.f32 %v7534_v14, %v876_v18  ;;  %v7653_v18 = vld [vmem:[%s14009_s28 + $0x8] sm:$0xff] }
  0xd3   : > { %14010 = vst [vmem:[#allocation36_spill] sm:$0xff] %v7653_v18 }
  0xd4   : > { %13998 = vst [vmem:[#allocation28_spill] sm:$0xff] %v7543_v19 }
  0xd5   : > { %13999 = vst [vmem:[#allocation29_spill] sm:$0xff] %v7546_v20  ;;  %6771 = vmatmul.msk.f32.vlgmr.msrb.gmra.mxu0 %vm13835_vm2, %v7366_v22  ;;  %6776 = vmatmul.msk.f32.vlgmr.msrb.gmra.mxu1 %vm13835_vm2, %v7366_v22 }
  0xd6   : > { %6810 = vmatpush.msk.msrb.mxu0 %vm13839_vm1, %v7543_v19  ;;  %6815 = vmatpush.msk.msrb.mxu1 %vm13839_vm1, %v7546_v20  ;;  %v13538_v20 = vmov 5  }
  0xd8   : > { %v889_v25 = vpop.permute.xlu1 %888  ;;  %v887_v29 = vpop.permute.xlu0 %886 }
  0xd9   : > { %v891_v22 = vsel %vm890_vm8, %v887_v29, %v889_v25  ;;  %v892_v32 = vsel %vm890_vm8, %v889_v25, %v887_v29  ;;  %v1345_v60 = vpop.permute.xlu2 %1344 }
  0xda   : > { %v7568_v27 = vmul.f32 %v7554_v21, %v891_v22  ;;  %v7571_v28 = vmul.f32 %v7557_v23, %v892_v32  ;;  %v917_v22 = vld [vmem:[%s14004_s9] sm:$0xff]  ;;  %v2018_v32 = vld [vmem:[%s14007_s3 + $0x10] sm:$0xff] }
  0xdb   : > { %1698 = vperm.xlu0 %6946, %v917_v22   ;;  %v13516_v22 = vmov 3  }
  0xdc   : > { %14002 = vst [vmem:[#allocation32_spill] sm:$0xff] %v7568_v27  ;;  %6820 = vmatpush.msk.msrb.mxu2 %vm13839_vm1, %v7568_v27  ;;  %6825 = vmatpush.msk.msrb.mxu3 %vm13839_vm1, %v7571_v28 }
  0xdd   : > { %14003 = vst [vmem:[#allocation33_spill] sm:$0xff] %v7571_v28  ;;  %6772 = vmatmul.msk.f32.gmra.mxu0 %vm13835_vm2, %v7465_v53  ;;  %6777 = vmatmul.msk.f32.gmra.mxu1 %vm13835_vm2, %v7465_v53  ;;  %v918_v53 = vld [vmem:[%s14004_s9 + $0x8] sm:$0xff] }
  0xde   : > { %1703 = vperm.xlu1 %6947, %v918_v53  }
  0xe0   : > { %v1170_v33 = vpop.permute.xlu1 %1169  ;;  %v905_v34 = vpop.permute.xlu0 %904 }
  0xe1   : > { %6782 = vmatmul.msk.f32.gmra.mxu2 %vm13835_vm2, %v1170_v33  ;;  %6787 = vmatmul.msk.f32.gmra.mxu3 %vm13835_vm2, %v1170_v33  ;;  %v907_v46 = vsel %vm906_vm9, %v903_v35, %v905_v34  ;;  %v908_v47 = vsel %vm906_vm9, %v905_v34, %v903_v35  ;;  %v1351_v8 = vpop.permute.xlu2 %1350  ;;  %v2256_v34 = vld [vmem:[%s14008_s5 + $0x8] sm:$0xff] }
  0xe2   : > { %v7607_v54 = vmul.f32 %v7026_v44, %v907_v46 }
  0xe3   : > { %6963 = vset.pattern.permute.xlu0 %v13572_v51 }
  0xe4   : > { %14005 = vst [vmem:[#allocation34_spill] sm:$0xff] %v7607_v54 }
  0xe5   : > { %6773 = vmatmul.msk.f32.gmra.mxu0 %vm13835_vm2, %v1084_v6  ;;  %6778 = vmatmul.msk.f32.gmra.mxu1 %vm13835_vm2, %v1084_v6 }
  0xe6   : > { %1713 = vperm.xlu1 %6947, %v920_v62  }
  0xe8   : > { %v1174_v40 = vpop.permute.xlu0 %1173  ;;  %v1256_v48 = vpop.permute.xlu1 %1255 }
  0xe9   : > { %6783 = vmatmul.msk.f32.gmra.mxu2 %vm13835_vm2, %v1172_v24  ;;  %6788 = vmatmul.msk.f32.gmra.mxu3 %vm13835_vm2, %v1172_v24  ;;  %v1437_v16 = vpop.permute.xlu2 %1436  ;;  %v919_v24 = vld [vmem:[%s14004_s9 + $0x10] sm:$0xff] }
  0xea   : > { %1708 = vperm.xlu2 %6948, %v919_v24  }
  0xed   : > { %6774 = vmatmul.msk.f32.gmra.mxu0 %vm13835_vm2, %v7467_v55  ;;  %6779 = vmatmul.msk.f32.gmra.mxu1 %vm13835_vm2, %v7467_v55  ;;  %v7609_v55 = vmul.f32 %v7027_v45, %v908_v47  ;;  %v7687_v45 = vld [vmem:[%s14009_s28 + $0x10] sm:$0xff] }
  0xee   : > { %2027 = vperm.xlu1 %6947, %v2017_v3   ;;  %14011 = vst [vmem:[#allocation37_spill] sm:$0xff] %v7687_v45 }
  0xef   : > { %14006 = vst [vmem:[#allocation35_spill] sm:$0xff] %v7609_v55 }
  0xf0   : > { %v1260_v57 = vpop.permute.xlu0 %1259  ;;  %v1262_v61 = vpop.permute.xlu1 %1261 }
  0xf1   : > { %6784 = vmatmul.msk.f32.gmra.mxu2 %vm13835_vm2, %v1174_v40  ;;  %6789 = vmatmul.msk.f32.gmra.mxu3 %vm13835_vm2, %v1174_v40  ;;  %v1523_v29 = vpop.permute.xlu2 %1522 }
  0xf2   : > { %2032 = vperm.xlu2 %6948, %v2018_v32  }
  0xf5   : > { %6791 = vmatmul.msk.f32.vlgmr.msra.gmra.mxu0 %vm13835_vm2, %v1256_v48  ;;  %6796 = vmatmul.msk.f32.vlgmr.msra.gmra.mxu1 %vm13835_vm2, %v1256_v48 }
  0xf6   : > { %6830 = vmatpush.msk.msra.mxu0 %vm13839_vm1, %v7607_v54  ;;  %6835 = vmatpush.msk.msra.mxu1 %vm13839_vm1, %v7609_v55 }
  0xf7   : > { %2261 = vperm.xlu1 %6947, %v2255_v7  }
  0xf8   : > { %v1347_v63 = vpop.permute.xlu0 %1346  ;;  %v1349_v6 = vpop.permute.xlu1 %1348 }
  0xf9   : > { %6801 = vmatmul.msk.f32.vlgmr.msra.gmra.mxu2 %vm13835_vm2, %v1345_v60  ;;  %6806 = vmatmul.msk.f32.vlgmr.msra.gmra.mxu3 %vm13835_vm2, %v1345_v60  ;;  %v1609_v40 = vpop.permute.xlu2 %1608  ;;  %v13520_v60 = vmov 1  }
  0xfa   : > { %2266 = vperm.xlu2 %6948, %v2256_v34  }
  0xfd   : > { %6792 = vmatmul.msk.f32.gmra.mxu0 %vm13835_vm2, %v1258_v43  ;;  %6797 = vmatmul.msk.f32.gmra.mxu1 %vm13835_vm2, %v1258_v43 }
  0xff   : > { %2276 = vperm.xlu1 %6947, %v2258_v15  }
 0x100   : > { %v1435_v9 = vpop.permute.xlu1 %1434  ;;  %v1433_v12 = vpop.permute.xlu0 %1432 }
 0x101   : > { %6802 = vmatmul.msk.f32.gmra.mxu2 %vm13835_vm2, %v1347_v63  ;;  %6807 = vmatmul.msk.f32.gmra.mxu3 %vm13835_vm2, %v1347_v63 }
 0x102   : > { %2649 = vperm.xlu2 %6948, %v7687_v45  }
 0x105   : > { %6793 = vmatmul.msk.f32.gmra.mxu0 %vm13835_vm2, %v1260_v57  ;;  %6798 = vmatmul.msk.f32.gmra.mxu1 %vm13835_vm2, %v1260_v57 }
 0x107   : > { %2644 = vperm.xlu1 %6947, %v7653_v18  }
 0x108   : > { %v1521_v17 = vpop.permute.xlu1 %1520  ;;  %v1439_v25 = vpop.permute.xlu0 %1438 }
 0x109   : > { %6803 = vmatmul.msk.f32.gmra.mxu2 %vm13835_vm2, %v1349_v6  ;;  %6808 = vmatmul.msk.f32.gmra.mxu3 %vm13835_vm2, %v1349_v6 }
 0x10a   : > { %6950 = vset.pattern.permute.xlu2 %v13520_v60 }
 0x10b   : > { %2670 = vperm.xlu2 %6950, %v7653_v18  }
 0x10d   : > { %6794 = vmatmul.msk.f32.gmra.mxu0 %vm13835_vm2, %v1262_v61  ;;  %6799 = vmatmul.msk.f32.gmra.mxu1 %vm13835_vm2, %v1262_v61  ;;  %v7705_v61 = vld [vmem:[%s14009_s28] sm:$0xff] }
 0x10e   : > { %14012 = vst [vmem:[#allocation38_spill] sm:$0xff] %v7705_v61 }
 0x10f   : > { %6949 = vset.pattern.permute.xlu1 %v13520_v60  ;;  %v13529_v60 = vmov 4  }
 0x110   : > { %v1525_v33 = vpop.permute.xlu0 %1524  ;;  %v1527_v35 = vpop.permute.xlu1 %1526  ;;  %2666 = vperm.xlu1 %6949, %v7705_v61  }
 0x111   : > { %6804 = vmatmul.msk.f32.gmra.mxu2 %vm13835_vm2, %v1351_v8  ;;  %6809 = vmatmul.msk.f32.gmra.mxu3 %vm13835_vm2, %v1351_v8  ;;  %v7722_v8 = vld [vmem:[%s14009_s28 + $0x18] sm:$0xff] }
 0x112   : > { %14013 = vst [vmem:[#allocation39_spill] sm:$0xff] %v7722_v8  ;;  %2870 = vperm.xlu0 %6963, %v7722_v8  }
 0x115   : > { %6811 = vmatmul.msk.f32.vlgmr.msrb.gmra.mxu0 %vm13835_vm2, %v1433_v12  ;;  %6816 = vmatmul.msk.f32.vlgmr.msrb.gmra.mxu1 %vm13835_vm2, %v1433_v12  ;;  %v1615_v12 = vpop.permute.xlu2 %1614 }
 0x118   : > { %v1611_v46 = vpop.permute.xlu0 %1610  ;;  %v1613_v62 = vpop.permute.xlu1 %1612  ;;  %2678 = vperm.xlu1 %6949, %v7722_v8  }
 0x119   : > { %6821 = vmatmul.msk.f32.vlgmr.msrb.gmra.mxu2 %vm13835_vm2, %v1521_v17  ;;  %6826 = vmatmul.msk.f32.vlgmr.msrb.gmra.mxu3 %vm13835_vm2, %v1521_v17 }
 0x11d   : > { %6812 = vmatmul.msk.f32.gmra.mxu0 %vm13835_vm2, %v1435_v9  ;;  %6817 = vmatmul.msk.f32.gmra.mxu1 %vm13835_vm2, %v1435_v9  ;;  %v13518_v9 = vmov 2  }
 0x11e   : > { %6951 = vset.pattern.permute.xlu2 %v13518_v9 }
 0x11f   : > { %2698 = vperm.xlu2 %6951, %v7705_v61  }
 0x120   : > { %6952 = vset.pattern.permute.xlu1 %v13518_v9 }
 0x121   : > { %6822 = vmatmul.msk.f32.gmra.mxu2 %vm13835_vm2, %v1523_v29  ;;  %6827 = vmatmul.msk.f32.gmra.mxu3 %vm13835_vm2, %v1523_v29 }
 0x122   : > { %2702 = vperm.xlu1 %6952, %v7653_v18  }
 0x125   : > { %6813 = vmatmul.msk.f32.gmra.mxu0 %vm13835_vm2, %v1437_v16  ;;  %6818 = vmatmul.msk.f32.gmra.mxu1 %vm13835_vm2, %v1437_v16 }
 0x127   : > { %2706 = vperm.xlu2 %6951, %v7687_v45  }
 0x129   : > { %6823 = vmatmul.msk.f32.gmra.mxu2 %vm13835_vm2, %v1525_v33  ;;  %6828 = vmatmul.msk.f32.gmra.mxu3 %vm13835_vm2, %v1525_v33 }
 0x12a   : > { %6953 = vset.pattern.permute.xlu1 %v13516_v22 }
 0x12b   : > { %2730 = vperm.xlu1 %6953, %v7705_v61  }
 0x12d   : > { %6814 = vmatmul.msk.f32.gmra.mxu0 %vm13835_vm2, %v1439_v25  ;;  %6819 = vmatmul.msk.f32.gmra.mxu1 %vm13835_vm2, %v1439_v25 }
 0x12f   : > { %6954 = vset.pattern.permute.xlu2 %v13516_v22 }
 0x130   : > { %v7692_v47 = vpop.f32.mrf.mxu2  ;;  %v7694_v48 = vpop.f32.mrf.mxu3  ;;  %2734 = vperm.xlu2 %6954, %v7653_v18  }
 0x131   : > { %6824 = vmatmul.msk.f32.gmra.mxu2 %vm13835_vm2, %v1527_v35  ;;  %6829 = vmatmul.msk.f32.gmra.mxu3 %vm13835_vm2, %v1527_v35 }
 0x132   : > { %v7680_v43 = vpop.f32.mrf.mxu0  ;;  %v7682_v44 = vpop.f32.mrf.mxu1 }
 0x133   : > { %2738 = vperm.xlu1 %6953, %v7687_v45   ;;  %v1068_v26 = vadd.f32 %v7694_v48, %v7682_v44 }
 0x135   : > { %6831 = vmatmul.msk.f32.vlgmr.msra.gmra.mxu0 %vm13835_vm2, %v1609_v40  ;;  %6836 = vmatmul.msk.f32.vlgmr.msra.gmra.mxu1 %vm13835_vm2, %v1609_v40 }
 0x138   : > { %2742 = vperm.xlu2 %6954, %v7722_v8  }
 0x139   : > { %v7715_v6 = vpop.f32.mrf.mxu2  ;;  %v7717_v7 = vpop.f32.mrf.mxu3 }
 0x13a   : > { %v7696_v53 = vpop.f32.mrf.mxu0  ;;  %v7698_v57 = vpop.f32.mrf.mxu1 }
 0x13b   : > { %6955 = vset.pattern.permute.xlu1 %v13529_v60 }
 0x13c   : > { %2766 = vperm.xlu1 %6955, %v7653_v18  }
 0x13d   : > { %6832 = vmatmul.msk.f32.gmra.mxu0 %vm13835_vm2, %v1611_v46  ;;  %6837 = vmatmul.msk.f32.gmra.mxu1 %vm13835_vm2, %v1611_v46 }
 0x140   : > { %6956 = vset.pattern.permute.xlu2 %v13529_v60 }
 0x141   : > { %v7734_v17 = vpop.f32.mrf.mxu2  ;;  %v7736_v24 = vpop.f32.mrf.mxu3  ;;  %2770 = vperm.xlu2 %6956, %v7687_v45  }
 0x142   : > { %v7711_v63 = vpop.f32.mrf.mxu0  ;;  %v7713_v3 = vpop.f32.mrf.mxu1 }
 0x144   : > { %2774 = vperm.xlu1 %6955, %v7722_v8   ;;  %v7798_v36 = vpop.permute.xlu2 %1708 }
 0x145   : > { %6833 = vmatmul.msk.f32.gmra.mxu0 %vm13835_vm2, %v1613_v62  ;;  %6838 = vmatmul.msk.f32.gmra.mxu1 %vm13835_vm2, %v1613_v62 }
 0x149   : > { %v7748_v32 = vpop.f32.mrf.mxu2  ;;  %v7750_v33 = vpop.f32.mrf.mxu3  ;;  %6957 = vset.pattern.permute.xlu2 %v13538_v20 }
 0x14a   : > { %v7729_v15 = vpop.f32.mrf.mxu0  ;;  %v7731_v16 = vpop.f32.mrf.mxu1  ;;  %2794 = vperm.xlu2 %6957, %v7705_v61  }
 0x14c   : > { %6958 = vset.pattern.permute.xlu1 %v13538_v20  ;;  %v7816_v5 = vpop.permute.xlu2 %2032 }
 0x14d   : > { %6834 = vmatmul.msk.f32.gmra.mxu0 %vm13835_vm2, %v1615_v12  ;;  %6839 = vmatmul.msk.f32.gmra.mxu1 %vm13835_vm2, %v1615_v12  ;;  %14015 = vst [vmem:[#allocation41_spill] sm:$0xff] %v7816_v5 }
 0x14e   : > { %2802 = vperm.xlu1 %6958, %v7687_v45  }
 0x150   : > { %v7808_v50 = vpop.permute.xlu1 %1703 }
 0x152   : > { %v7742_v25 = vpop.f32.mrf.mxu0  ;;  %v7744_v29 = vpop.f32.mrf.mxu1  ;;  %2806 = vperm.xlu2 %6957, %v7722_v8  }
 0x154   : > { %v7758_v40 = vpop.f32.mrf.mxu2  ;;  %v7760_v46 = vpop.f32.mrf.mxu3 }
 0x155   : > { %v7828_v30 = vpop.permute.xlu2 %2266 }
 0x156   : > { %6959 = vset.pattern.permute.xlu1 %v13545_v37  ;;  %14017 = vst [vmem:[#allocation43_spill] sm:$0xff] %v7828_v30 }
 0x157   : > { %2826 = vperm.xlu1 %6959, %v7705_v61  }
 0x158   : > { %v7819_v14 = vpop.permute.xlu1 %1713 }
 0x159   : > { %14016 = vst [vmem:[#allocation42_spill] sm:$0xff] %v7819_v14 }
 0x15a   : > { %v7754_v34 = vpop.f32.mrf.mxu0  ;;  %v7756_v35 = vpop.f32.mrf.mxu1  ;;  %6960 = vset.pattern.permute.xlu2 %v13545_v37 }
 0x15b   : > { %2830 = vperm.xlu2 %6960, %v7653_v18  }
 0x15d   : > { %v7840_v41 = vpop.permute.xlu2 %2649 }
 0x15e   : > { %14019 = vst [vmem:[#allocation45_spill] sm:$0xff] %v7840_v41 }
 0x15f   : > { %2838 = vperm.xlu1 %6959, %v7722_v8  }
 0x160   : > { %v7830_v39 = vpop.permute.xlu1 %2027 }
 0x161   : > { %14018 = vst [vmem:[#allocation44_spill] sm:$0xff] %v7830_v39  ;;  %v1039_v39 = vadd.f32 %v7692_v47, %v7680_v43 }
 0x162   : > { %v7764_v62 = vpop.f32.mrf.mxu0  ;;  %v7766_v12 = vpop.f32.mrf.mxu1 }
 0x163   : > { %6961 = vset.pattern.permute.xlu2 %v13572_v51  ;;  %v1159_v41 = vadd.f32 %v7742_v25, %v1039_v39 }
 0x164   : > { %v7768_v22 = vpop.f32.mrf.mxu2  ;;  %v7770_v9 = vpop.f32.mrf.mxu3  ;;  %2858 = vperm.xlu2 %6961, %v7705_v61  }
 0x165   : > { %v7858_v61 = vpop.permute.xlu2 %2670  ;;  %v1247_v14 = vadd.f32 %v7758_v40, %v1159_v41 }
 0x166   : > { %14021 = vst [vmem:[#allocation47_spill] sm:$0xff] %v7858_v61 }
 0x167   : > { %6962 = vset.pattern.permute.xlu1 %v13572_v51  ;;  %v1077_v51 = vadd.f32 %v7750_v33, %v7731_v16  ;;  %v1160_v16 = vadd.f32 %v7744_v29, %v1068_v26 }
 0x168   : > { %2862 = vperm.xlu1 %6962, %v7653_v18  }
 0x169   : > { %v7844_v59 = vpop.permute.xlu1 %2261 }
 0x16a   : > { %v7776_v56 = vpop.f32.mrf.mxu0  ;;  %v1156_v55 = vpop.f32.mrf.mxu1  ;;  %14020 = vst [vmem:[#allocation46_spill] sm:$0xff] %v7844_v59 }
 0x16b   : > { %v1166_v8 = vadd.f32 %v1156_v55, %v1077_v51 }
 0x16c   : > { %v7780_v27 = vpop.f32.mrf.mxu2  ;;  %v7782_v28 = vpop.f32.mrf.mxu3  ;;  %2866 = vperm.xlu2 %6961, %v7687_v45  }
 0x171   : > { %v7868_v39 = vpop.permute.xlu1 %2276 }
 0x172   : > { %v7785_v52 = vpop.f32.mrf.mxu0  ;;  %v7787_v60 = vpop.f32.mrf.mxu1  ;;  %14022 = vst [vmem:[#allocation48_spill] sm:$0xff] %v7868_v39 }
 0x173   : > { %v1336_v51 = vadd.f32 %v7785_v52, %v1247_v14 }
 0x174   : > { %v7796_v0 = vpop.f32.mrf.mxu2  ;;  %v1244_v1 = vpop.f32.mrf.mxu3 }
 0x175   : > { %v1254_v33 = vadd.f32 %v1244_v1, %v1166_v8 }
 0x17a   : > { %v7792_v11 = vpop.f32.mrf.mxu0  ;;  %v7794_v10 = vpop.f32.mrf.mxu1 }
 0x17c   : > { %v1383_v54 = vpop.f32.mrf.mxu2  ;;  %v1412_v19 = vpop.f32.mrf.mxu3 }
 0x17d   : > { %v1424_v26 = vadd.f32 %v1383_v54, %v1336_v51 }
 0x182   : > { %v7802_v49 = vpop.f32.mrf.mxu0  ;;  %v7804_v20 = vpop.f32.mrf.mxu1 }
 0x184   : > { %v7821_v4 = vpop.f32.mrf.mxu2  ;;  %v7823_v23 = vpop.f32.mrf.mxu3 }
 0x18a   : > { %v7812_v2 = vpop.f32.mrf.mxu0  ;;  %v1333_v37 = vpop.f32.mrf.mxu1 }
 0x18b   : > { %14014 = vst [vmem:[#allocation40_spill] sm:$0xff] %v7812_v2  ;;  %v1343_v59 = vadd.f32 %v1333_v37, %v1254_v33  ;;  %v1248_v2 = vadd.f32 %v7760_v46, %v1160_v16  ;;  %v7872_v33 = vpop.permute.xlu1 %2644 }
 0x18c   : > { %v7832_v5 = vpop.f32.mrf.mxu2  ;;  %v7834_v21 = vpop.f32.mrf.mxu3  ;;  %14024 = vst [vmem:[#allocation50_spill] sm:$0xff] %v7872_v33 }
 0x18d   : > { %v1337_v55 = vadd.f32 %v7787_v60, %v1248_v2 }
 0x18f   : > { %v1425_v37 = vadd.f32 %v1412_v19, %v1337_v55  ;;  %v1042_v55 = vadd.f32 %v7715_v6, %v7696_v53 }
 0x192   : > { %v1471_v31 = vpop.f32.mrf.mxu0  ;;  %v1500_v13 = vpop.f32.mrf.mxu1 }
 0x193   : > { %v1512_v25 = vadd.f32 %v1471_v31, %v1424_v26  ;;  %v1513_v41 = vadd.f32 %v1500_v13, %v1425_v37  ;;  %v1071_v26 = vadd.f32 %v7717_v7, %v7698_v57 }
 0x194   : > { %v7854_v45 = vpop.f32.mrf.mxu2  ;;  %v1421_v18 = vpop.f32.mrf.mxu3 }
 0x195   : > { %v1431_v43 = vadd.f32 %v1421_v18, %v1343_v59  ;;  %v1699_v59 = vpop.permute.xlu0 %1698  ;;  %v7870_v18 = vpop.permute.xlu2 %2698 }
 0x196   : > { %14023 = vst [vmem:[#allocation49_spill] sm:$0xff] %v7870_v18 }
 0x19a   : > { %v7836_v38 = vpop.f32.mrf.mxu0  ;;  %v7838_v42 = vpop.f32.mrf.mxu1 }
 0x19c   : > { %v1559_v1 = vpop.f32.mrf.mxu2  ;;  %v1588_v8 = vpop.f32.mrf.mxu3 }
 0x19d   : > { %v1600_v29 = vadd.f32 %v1559_v1, %v1512_v25  ;;  %v1601_v40 = vadd.f32 %v1588_v8, %v1513_v41  ;;  %v7884_v13 = vpop.permute.xlu2 %2706  ;;  %v1161_v1 = vadd.f32 %v7754_v34, %v1042_v55  ;;  %v1162_v8 = vadd.f32 %v7756_v35, %v1071_v26 }
 0x19e   : > { %14028 = vst [vmem:[#allocation53_spill] sm:$0xff] %v7884_v13  ;;  %v1045_v26 = vadd.f32 %v7734_v17, %v7711_v63  ;;  %v1074_v63 = vadd.f32 %v7736_v24, %v7713_v3 }
 0x19f   : > { %v1249_v25 = vadd.f32 %v7768_v22, %v1161_v1  ;;  %v1250_v41 = vadd.f32 %v7770_v9, %v1162_v8 }
 0x1a0   : > { %v1163_v8 = vadd.f32 %v7764_v62, %v1045_v26 }
 0x1a1   : > { %v1338_v53 = vadd.f32 %v7792_v11, %v1249_v25  ;;  %v1339_v57 = vadd.f32 %v7794_v10, %v1250_v41 }
 0x1a2   : > { %v7846_v58 = vpop.f32.mrf.mxu0  ;;  %v7848_v30 = vpop.f32.mrf.mxu1  ;;  %v1251_v25 = vadd.f32 %v7780_v27, %v1163_v8 }
 0x1a3   : > { %v1426_v6 = vadd.f32 %v7821_v4, %v1338_v53  ;;  %v1427_v7 = vadd.f32 %v7823_v23, %v1339_v57  ;;  %v1164_v57 = vadd.f32 %v7766_v12, %v1074_v63  ;;  %v8047_v8 = vpop.permute.xlu0 %2870 }
 0x1a4   : > { %v1562_v35 = vpop.f32.mrf.mxu2  ;;  %v1340_v41 = vadd.f32 %v7802_v49, %v1251_v25  ;;  %14059 = vst [vmem:[#allocation77_spill] sm:$0xff] %v8047_v8  ;;  %v14071_v8 = vld [vmem:[#allocation37_spill] sm:$0xff] }
 0x1a5   : > { %v7894_v51 = vpop.permute.xlu2 %2734  ;;  %v1515_v22 = vadd.f32 %v7838_v42, %v1427_v7  ;;  %v1252_v27 = vadd.f32 %v7782_v28, %v1164_v57 }
 0x1a6   : > { %14031 = vst [vmem:[#allocation55_spill] sm:$0xff] %v7894_v51  ;;  %v1428_v17 = vadd.f32 %v7832_v5, %v1340_v41  ;;  %v14060_v41 = vld [vmem:[#allocation40_spill] sm:$0xff] }
 0x1a7   : > { %v1341_v5 = vadd.f32 %v7804_v20, %v1252_v27 }
 0x1aa   : > { %v7862_v47 = vpop.f32.mrf.mxu0  ;;  %v1509_v44 = vpop.f32.mrf.mxu1 }
 0x1ab   : > { %v7866_v48 = vadd.f32 %v1509_v44, %v1431_v43  ;;  %v7886_v44 = vpop.permute.xlu1 %2666 }
 0x1ac   : > { %14029 = vst [vmem:[#allocation54_spill] sm:$0xff] %v7886_v44  ;;  %v1565_v62 = vpop.f32.mrf.mxu2 }
 0x1ad   : > { %v7916_v34 = vpop.permute.xlu2 %2742 }
 0x1ae   : > { %14035 = vst [vmem:[#allocation57_spill] sm:$0xff] %v7916_v34  ;;  %v14075_v34 = vld [vmem:[#allocation39_spill] sm:$0xff] }
 0x1b2   : > { %v1647_v46 = vpop.f32.mrf.mxu0  ;;  %v1676_v16 = vpop.f32.mrf.mxu1 }
 0x1b3   : > { %v1688_v52 = vadd.f32 %v1647_v46, %v1600_v29  ;;  %v1689_v14 = vadd.f32 %v1676_v16, %v1601_v40  ;;  %v7900_v37 = vpop.permute.xlu1 %2678  ;;  %v1591_v29 = vpop.f32.mrf.mxu3  ;;  %v1514_v40 = vadd.f32 %v7836_v38, %v1426_v6  ;;  %v1516_v6 = vadd.f32 %v7846_v58, %v1428_v17 }
 0x1b4   : > { %14032 = vst [vmem:[#allocation56_spill] sm:$0xff] %v7900_v37  ;;  %v1603_v10 = vadd.f32 %v1591_v29, %v1515_v22  ;;  %v1429_v58 = vadd.f32 %v7834_v21, %v1341_v5 }
 0x1b5   : > { %v1716_v2 = vadd.f32 %v1699_v59, %v1688_v52  ;;  %v1717_v60 = vadd.f32 %v1699_v59, %v1689_v14  ;;  %v1602_v4 = vadd.f32 %v1562_v35, %v1514_v40  ;;  %v7930_v16 = vpop.permute.xlu2 %2770  ;;  %v1604_v3 = vadd.f32 %v1565_v62, %v1516_v6 }
 0x1b6   : > { %14038 = vst [vmem:[#allocation59_spill] sm:$0xff] %v7930_v16  ;;  %v1517_v35 = vadd.f32 %v7848_v30, %v1429_v58 }
 0x1b7   : > { %vm1724_vm10 = vcmp.gt.f32.partialorder %v1716_v2, 0.0  ;;  %vm1725_vm11 = vcmp.gt.f32.partialorder %v1717_v60, 0.0  ;;  %v1732_v19 = vmul.f32 0.2, %v1716_v2  ;;  %v1733_v54 = vmul.f32 0.2, %v1717_v60 }
 0x1b9   : > { %v7874_v43 = vsel %vm1724_vm10, %v1716_v2, %v1732_v19  ;;  %v7876_v31 = vsel %vm1725_vm11, %v1717_v60, %v1733_v54 }
 0x1ba   : > { %14025 = vst [vmem:[#allocation51_spill] sm:$0xff] %v7874_v43  ;;  %1756 = vrot.lane.b32.xlu0 %v7876_v31, %s13590_s0  ;;  %1780 = vrot.lane.b32.xlu1 %v7874_v43, %s14027_s1  ;;  %v1679_v9 = vpop.f32.mrf.mxu1  ;;  %v1650_v59 = vpop.f32.mrf.mxu0 }
 0x1bb   : > { %14026 = vst [vmem:[#allocation52_spill] sm:$0xff] %v7876_v31  ;;  %1748 = vrot.lane.b32.xlu2 %v7874_v43, %s13590_s0  ;;  %v7924_v11 = vpop.permute.xlu1 %2702  ;;  %v1691_v23 = vadd.f32 %v1679_v9, %v1603_v10  ;;  %v1690_v46 = vadd.f32 %v1650_v59, %v1602_v4  ;;  %s14040_s0 = smov 111   ;;  %v1594_v12 = vpop.f32.mrf.mxu3 }
 0x1bc   : > { %14037 = vst [vmem:[#allocation58_spill] sm:$0xff] %v7924_v11  ;;  %v1605_v28 = vadd.f32 %v1594_v12, %v1517_v35 }
 0x1bd   : > { %v1719_v38 = vadd.f32 %v7808_v50, %v1691_v23  ;;  %v1718_v42 = vadd.f32 %v7808_v50, %v1690_v46  ;;  %v7950_v19 = vpop.permute.xlu2 %2794 }
 0x1be   : > { %14045 = vst [vmem:[#allocation63_spill] sm:$0xff] %v7950_v19 }
 0x1bf   : > { %v1735_v14 = vmul.f32 0.2, %v1719_v38  ;;  %v1734_v2 = vmul.f32 0.2, %v1718_v42  ;;  %vm1727_vm12 = vcmp.gt.f32.partialorder %v1719_v38, 0.0  ;;  %vm1726_vm13 = vcmp.gt.f32.partialorder %v1718_v42, 0.0 }
 0x1c1   : > { %v7940_v60 = vsel %vm1727_vm12, %v1719_v38, %v1735_v14  ;;  %v7942_v50 = vsel %vm1726_vm13, %v1718_v42, %v1734_v2  ;;  %v1048_v14 = vadd.f32 %v7748_v32, %v7729_v15  ;;  %v1568_v32 = vpop.f32.mrf.mxu2  ;;  %vm2040_vm12 = vcmask 261120  }
 0x1c2   : > { %1812 = vrot.lane.b32.xlu0 %v7874_v43, %s14030_s30  ;;  %1820 = vrot.lane.b32.xlu1 %v7876_v31, %s14030_s30  ;;  %14042 = vst [vmem:[#allocation61_spill] sm:$0xff] %v7940_v60  ;;  %v1653_v7 = vpop.f32.mrf.mxu0  ;;  %v1682_v22 = vpop.f32.mrf.mxu1 }
 0x1c3   : > { %1788 = vrot.lane.b32.xlu2 %v7876_v31, %s14027_s1  ;;  %v7938_v52 = vpop.permute.xlu1 %2730  ;;  %14043 = vst [vmem:[#allocation62_spill] sm:$0xff] %v7942_v50  ;;  %v1692_v24 = vadd.f32 %v1653_v7, %v1604_v3  ;;  %v1693_v21 = vadd.f32 %v1682_v22, %v1605_v28  ;;  %v1165_v2 = vadd.f32 %v7776_v56, %v1048_v14  ;;  %v1597_v17 = vpop.f32.mrf.mxu3 }
 0x1c4   : > { %14041 = vst [vmem:[#allocation60_spill] sm:$0xff] %v7938_v52  ;;  %v1607_v7 = vadd.f32 %v1597_v17, %v7866_v48 }
 0x1c5   : > { %v7960_v55 = vpop.permute.xlu2 %2806  ;;  %v1720_v29 = vadd.f32 %v7798_v36, %v1692_v24  ;;  %v1721_v30 = vadd.f32 %v7798_v36, %v1693_v21  ;;  %v1253_v25 = vadd.f32 %v7796_v0, %v1165_v2  ;;  %v14062_v24 = vld [vmem:[#allocation42_spill] sm:$0xff]  ;;  %v13596_v2 = vmov 8  }
 0x1c6   : > { %14047 = vst [vmem:[#allocation65_spill] sm:$0xff] %v7960_v55  ;;  %6965 = vset.pattern.permute.xlu2 %v13596_v2  ;;  %6964 = vset.pattern.permute.xlu1 %v13596_v2  ;;  %v8161_v2 = vld [vmem:[%s13471_s12 + $0x8] sm:$0xff]  ;;  %v14073_v55 = vmov 8  }
 0x1c7   : > { %v1736_v9 = vmul.f32 0.2, %v1720_v29  ;;  %vm1728_vm14 = vcmp.gt.f32.partialorder %v1720_v29, 0.0  ;;  %v1737_v10 = vmul.f32 0.2, %v1721_v30  ;;  %vm1729_vm15 = vcmp.gt.f32.partialorder %v1721_v30, 0.0 }
 0x1c8   : > { %v1342_v63 = vadd.f32 %v14060_v41, %v1253_v25 }
 0x1c9   : > { %v8006_v59 = vsel %vm1728_vm14, %v1720_v29, %v1736_v9  ;;  %v8018_v46 = vsel %vm1729_vm15, %v1721_v30, %v1737_v10 }
 0x1ca   : > { %1852 = vrot.lane.b32.xlu0 %v7876_v31, %s14033_s6  ;;  %1876 = vrot.lane.b32.xlu1 %v7874_v43, %s14034_s26  ;;  %14053 = vst [vmem:[#allocation71_spill] sm:$0xff] %v8006_v59  ;;  %v1430_v56 = vadd.f32 %v7854_v45, %v1342_v63  ;;  %v1685_v57 = vpop.f32.mrf.mxu1  ;;  %v1656_v6 = vpop.f32.mrf.mxu0 }
 0x1cb   : > { %1844 = vrot.lane.b32.xlu2 %v7874_v43, %s14033_s6  ;;  %v7952_v54 = vpop.permute.xlu1 %2738  ;;  %14056 = vst [vmem:[#allocation74_spill] sm:$0xff] %v8018_v46  ;;  %v1695_v3 = vadd.f32 %v1685_v57, %v1607_v7 }
 0x1cc   : > { %14046 = vst [vmem:[#allocation64_spill] sm:$0xff] %v7952_v54  ;;  %v1518_v62 = vadd.f32 %v7862_v47, %v1430_v56 }
 0x1cd   : > { %v7978_v53 = vpop.permute.xlu2 %2830  ;;  %v1723_v58 = vadd.f32 %v14062_v24, %v1695_v3 }
 0x1ce   : > { %14049 = vst [vmem:[#allocation67_spill] sm:$0xff] %v7978_v53  ;;  %v1606_v0 = vadd.f32 %v1568_v32, %v1518_v62 }
 0x1cf   : > { %v1739_v29 = vmul.f32 0.2, %v1723_v58  ;;  %vm1731_vm10 = vcmp.gt.f32.partialorder %v1723_v58, 0.0 }
 0x1d0   : > { %v1694_v47 = vadd.f32 %v1656_v6, %v1606_v0 }
 0x1d1   : > { %v8084_v21 = vsel %vm1731_vm10, %v1723_v58, %v1739_v29  ;;  %v14069_v58 = vld [vmem:[#allocation36_spill] sm:$0xff] }
 0x1d2   : > { %1908 = vrot.lane.b32.xlu0 %v7874_v43, %s14036_s27  ;;  %1916 = vrot.lane.b32.xlu1 %v7876_v31, %s14036_s27  ;;  %v1722_v12 = vadd.f32 %v14062_v24, %v1694_v47  ;;  %14063 = vst [vmem:[#allocation42_spill] sm:$0xff] %v8084_v21  ;;  %v2950_v47 = vld [vmem:[%s14067_s10 + $0x8] sm:$0xff]  ;;  %v14068_v24 = vld [vmem:[#allocation38_spill] sm:$0xff] }
 0x1d3   : > { %1884 = vrot.lane.b32.xlu2 %v7876_v31, %s14034_s26  ;;  %v7964_v1 = vpop.permute.xlu1 %2766  ;;  %14070 = vst [vmem:[#allocation38_spill] sm:$0xff] %v8161_v2 }
 0x1d4   : > { %14048 = vst [vmem:[#allocation66_spill] sm:$0xff] %v7964_v1  ;;  %v1738_v22 = vmul.f32 0.2, %v1722_v12  ;;  %vm1730_vm11 = vcmp.gt.f32.partialorder %v1722_v12, 0.0 }
 0x1d5   : > { %v7995_v40 = vpop.permute.xlu2 %2858 }
 0x1d6   : > { %14051 = vst [vmem:[#allocation69_spill] sm:$0xff] %v7995_v40  ;;  %v8086_v9 = vsel %vm1730_vm11, %v1722_v12, %v1738_v22 }
 0x1d7   : > { %14064 = vst [vmem:[#allocation78_spill] sm:$0xff] %v8086_v9 }
 0x1da   : > { %1948 = vrot.lane.b32.xlu0 %v7876_v31, %s14039_s8  ;;  %1972 = vrot.lane.b32.xlu1 %v7874_v43, %s14040_s0 }
 0x1db   : > { %1940 = vrot.lane.b32.xlu2 %v7874_v43, %s14039_s8  ;;  %v7986_v49 = vpop.permute.xlu1 %2774 }
 0x1dc   : > { %14050 = vst [vmem:[#allocation68_spill] sm:$0xff] %v7986_v49  ;;  %v14074_v49 = vmov 0  }
 0x1dd   : > { %v8014_v4 = vpop.permute.xlu2 %2866 }
 0x1de   : > { %14054 = vst [vmem:[#allocation72_spill] sm:$0xff] %v8014_v4 }
 0x1e2   : > { %1758 = vrot.lane.b32.xlu1 %v7940_v60, %s14044_s7  ;;  %1750 = vrot.lane.b32.xlu0 %v7942_v50, %s14044_s7 }
 0x1e3   : > { %1980 = vrot.lane.b32.xlu2 %v7876_v31, %s14040_s0  ;;  %v8003_v20 = vpop.permute.xlu1 %2802 }
 0x1e4   : > { %14052 = vst [vmem:[#allocation70_spill] sm:$0xff] %v8003_v20 }
 0x1ea   : > { %1814 = vrot.lane.b32.xlu1 %v7942_v50, %s14030_s30  ;;  %1790 = vrot.lane.b32.xlu0 %v7940_v60, %s14027_s1 }
 0x1eb   : > { %1782 = vrot.lane.b32.xlu2 %v7942_v50, %s14027_s1  ;;  %v8016_v23 = vpop.permute.xlu1 %2826 }
 0x1ec   : > { %14055 = vst [vmem:[#allocation73_spill] sm:$0xff] %v8016_v23 }
 0x1f2   : > { %1854 = vrot.lane.b32.xlu1 %v7940_v60, %s14033_s6  ;;  %1846 = vrot.lane.b32.xlu0 %v7942_v50, %s14033_s6 }
 0x1f3   : > { %1822 = vrot.lane.b32.xlu2 %v7940_v60, %s14030_s30  ;;  %v8028_v38 = vpop.permute.xlu1 %2838 }
 0x1f4   : > { %14057 = vst [vmem:[#allocation75_spill] sm:$0xff] %v8028_v38 }
 0x1fa   : > { %1910 = vrot.lane.b32.xlu1 %v7942_v50, %s14036_s27  ;;  %1886 = vrot.lane.b32.xlu0 %v7940_v60, %s14034_s26 }
 0x1fb   : > { %1878 = vrot.lane.b32.xlu2 %v7942_v50, %s14034_s26  ;;  %v8045_v26 = vpop.permute.xlu1 %2862 }
 0x1fc   : > { %14058 = vst [vmem:[#allocation76_spill] sm:$0xff] %v8045_v26 }
 0x202   : > { %1950 = vrot.lane.b32.xlu1 %v7940_v60, %s14039_s8  ;;  %1942 = vrot.lane.b32.xlu0 %v7942_v50, %s14039_s8 }
 0x203   : > { %1918 = vrot.lane.b32.xlu2 %v7940_v60, %s14036_s27 }
 0x20a   : > { %1982 = vrot.lane.b32.xlu0 %v7940_v60, %s14040_s0  ;;  %1752 = vrot.lane.b32.xlu1 %v8006_v59, %s14044_s7  ;;  %v8220_v60 = vld [vmem:[%s13471_s12 + $0x10] sm:$0xff] }
 0x20b   : > { %1974 = vrot.lane.b32.xlu2 %v7942_v50, %s14040_s0  ;;  %14078 = vst [vmem:[#allocation81_spill] sm:$0xff] %v8220_v60  ;;  %v2016_v50 = vld [vmem:[%s14007_s3] sm:$0xff] }
 0x212   : > { %1784 = vrot.lane.b32.xlu0 %v8006_v59, %s14027_s1  ;;  %1792 = vrot.lane.b32.xlu1 %v8018_v46, %s14027_s1 }
 0x213   : > { %1760 = vrot.lane.b32.xlu2 %v8018_v46, %s14044_s7 }
 0x215   : > { %v8026_v36 = vpop.permute.xlu2 %1748 }
 0x21a   : > { %1824 = vrot.lane.b32.xlu0 %v8018_v46, %s14030_s30  ;;  %1848 = vrot.lane.b32.xlu1 %v8006_v59, %s14033_s6 }
 0x21b   : > { %1816 = vrot.lane.b32.xlu2 %v8006_v59, %s14030_s30 }
 0x21d   : > { %v8036_v42 = vpop.permute.xlu2 %1788 }
 0x222   : > { %1880 = vrot.lane.b32.xlu0 %v8006_v59, %s14034_s26  ;;  %1888 = vrot.lane.b32.xlu1 %v8018_v46, %s14034_s26 }
 0x223   : > { %1856 = vrot.lane.b32.xlu2 %v8018_v46, %s14033_s6 }
 0x225   : > { %v8053_v15 = vpop.permute.xlu2 %1844 }
 0x22a   : > { %1920 = vrot.lane.b32.xlu0 %v8018_v46, %s14036_s27  ;;  %1944 = vrot.lane.b32.xlu1 %v8006_v59, %s14039_s8 }
 0x22b   : > { %1912 = vrot.lane.b32.xlu2 %v8006_v59, %s14036_s27 }
 0x22c   : > { %v8064_v27 = vpop.permute.xlu0 %1756  ;;  %v8066_v45 = vpop.permute.xlu1 %1780 }
 0x22d   : > { %v8068_v5 = vpop.permute.xlu2 %1884 }
 0x22e   : > { %14061 = vst [vmem:[#allocation40_spill] sm:$0xff] %v8068_v5 }
 0x232   : > { %1976 = vrot.lane.b32.xlu0 %v8006_v59, %s14040_s0  ;;  %1984 = vrot.lane.b32.xlu1 %v8018_v46, %s14040_s0  ;;  %v2636_v59 = vld [vmem:[%s14079_s22 + $0x18] sm:$0xff] }
 0x233   : > { %1952 = vrot.lane.b32.xlu2 %v8018_v46, %s14039_s8  ;;  %v2634_v46 = vld [vmem:[%s14079_s22 + $0x8] sm:$0xff] }
 0x234   : > { %v8078_v48 = vpop.permute.xlu0 %1812  ;;  %v8080_v35 = vpop.permute.xlu1 %1820 }
 0x235   : > { %v8082_v28 = vpop.permute.xlu2 %1940 }
 0x23a   : > { %1762 = vrot.lane.b32.xlu0 %v8084_v21, %s14044_s7  ;;  %1786 = vrot.lane.b32.xlu1 %v8086_v9, %s14027_s1 }
 0x23b   : > { %1754 = vrot.lane.b32.xlu2 %v8086_v9, %s14044_s7 }
 0x23c   : > { %v8094_v30 = vpop.permute.xlu0 %1852  ;;  %v8096_v10 = vpop.permute.xlu1 %1876 }
 0x23d   : > { %14065 = vst [vmem:[#allocation79_spill] sm:$0xff] %v8096_v10  ;;  %v8098_v14 = vpop.permute.xlu2 %1980 }
 0x242   : > { %1818 = vrot.lane.b32.xlu0 %v8086_v9, %s14030_s30  ;;  %1826 = vrot.lane.b32.xlu1 %v8084_v21, %s14030_s30 }
 0x243   : > { %1794 = vrot.lane.b32.xlu2 %v8084_v21, %s14027_s1 }
 0x244   : > { %v8108_v25 = vpop.permute.xlu0 %1908  ;;  %v8110_v41 = vpop.permute.xlu1 %1916 }
 0x245   : > { %v8112_v63 = vpop.permute.xlu2 %1782 }
 0x24a   : > { %1858 = vrot.lane.b32.xlu0 %v8084_v21, %s14033_s6  ;;  %1882 = vrot.lane.b32.xlu1 %v8086_v9, %s14034_s26 }
 0x24b   : > { %1850 = vrot.lane.b32.xlu2 %v8086_v9, %s14033_s6 }
 0x24c   : > { %v8120_v56 = vpop.permute.xlu0 %1948  ;;  %v8122_v32 = vpop.permute.xlu1 %1972 }
 0x24d   : > { %v8124_v17 = vpop.permute.xlu2 %1822 }
 0x252   : > { %1914 = vrot.lane.b32.xlu0 %v8086_v9, %s14036_s27  ;;  %1922 = vrot.lane.b32.xlu1 %v8084_v21, %s14036_s27 }
 0x253   : > { %1890 = vrot.lane.b32.xlu2 %v8084_v21, %s14034_s26 }
 0x254   : > { %v8132_v62 = vpop.permute.xlu1 %1758  ;;  %v8134_v57 = vpop.permute.xlu0 %1750 }
 0x255   : > { %v8136_v6 = vpop.permute.xlu2 %1878 }
 0x256   : > { %14066 = vst [vmem:[#allocation80_spill] sm:$0xff] %v8136_v6 }
 0x25a   : > { %1954 = vrot.lane.b32.xlu0 %v8084_v21, %s14039_s8  ;;  %1978 = vrot.lane.b32.xlu1 %v8086_v9, %s14040_s0 }
 0x25b   : > { %1946 = vrot.lane.b32.xlu2 %v8086_v9, %s14039_s8 }
 0x25c   : > { %v8144_v0 = vpop.permute.xlu1 %1814  ;;  %v8146_v7 = vpop.permute.xlu0 %1790 }
 0x25d   : > { %v8148_v3 = vpop.permute.xlu2 %1918 }
 0x262   : > { %3109 = vrot.lane.b32.xlu0 %v2950_v47, %s14033_s6  ;;  %2890 = vperm.xlu1 %6964, %v14068_v24  }
 0x263   : > { %2894 = vperm.xlu2 %6965, %v14069_v58  }
 0x264   : > { %v1855_v12 = vpop.permute.xlu1 %1854  ;;  %v1847_v29 = vpop.permute.xlu0 %1846 }
 0x265   : > { %v8156_v22 = vpop.permute.xlu2 %1974 }
 0x26a   : > { %3464 = vperm.xlu0 %6963, %v8161_v2   ;;  %2898 = vperm.xlu1 %6964, %v14071_v8  }
 0x26b   : > { %1986 = vrot.lane.b32.xlu2 %v8084_v21, %s14040_s0 }
 0x26c   : > { %v8167_v47 = vpop.permute.xlu1 %1910  ;;  %v8169_v38 = vpop.permute.xlu0 %1886 }
 0x26d   : > { %14072 = vst [vmem:[#allocation36_spill] sm:$0xff] %v8169_v38  ;;  %v8171_v58 = vpop.permute.xlu2 %1760 }
 0x272   : > { %6984 = vset.pattern.permute.xlu0 %v14073_v55  ;;  %6966 = vset.pattern.permute.xlu1 %v14074_v49 }
 0x273   : > { %2902 = vperm.xlu2 %6965, %v14075_v34   ;;  %3500 = vperm.xlu0 %6984, %v8220_v60  }
 0x274   : > { %v8176_v37 = vpop.permute.xlu1 %1950  ;;  %v8178_v4 = vpop.permute.xlu0 %1942  ;;  %2928 = vperm.xlu1 %6966, %v2634_v46   ;;  %v14906_v46 = vld [vmem:[#allocation24_spill] sm:$0xff] }
 0x275   : > { %v8180_v8 = vpop.permute.xlu2 %1816 }
 0x27b   : > { %6967 = vset.pattern.permute.xlu2 %v14074_v49  ;;  %6985 = vset.pattern.permute.xlu0 %v14074_v49  ;;  %v14082_v49 = vld [vmem:[#allocation18_spill] sm:$0xff] }
 0x27c   : > { %v8183_v20 = vpop.permute.xlu0 %1982  ;;  %v8185_v16 = vpop.permute.xlu1 %1752  ;;  %2022 = vperm.xlu0 %6985, %v2016_v50   ;;  %2938 = vperm.xlu1 %6966, %v2636_v59   ;;  %v2019_v50 = vld [vmem:[%s14007_s3 + $0x18] sm:$0xff]  ;;  %v2949_v59 = vld [vmem:[%s14067_s10] sm:$0xff]  ;;  %s14579_s3 = sld [smem:[#allocation199_spill]] }
 0x27d   : > { %v1857_v54 = vpop.permute.xlu2 %1856 }
 0x284   : > { %v8187_v13 = vpop.permute.xlu0 %1784  ;;  %v8189_v26 = vpop.permute.xlu1 %1792  ;;  %2037 = vperm.xlu0 %6985, %v2019_v50   ;;  %3107 = vrot.lane.b32.xlu1 %v2949_v59, %s14033_s6 }
 0x285   : > { %v8191_v53 = vpop.permute.xlu2 %1912 }
 0x28c   : > { %v1825_v34 = vpop.permute.xlu0 %1824  ;;  %v1849_v40 = vpop.permute.xlu1 %1848 }
 0x28d   : > { %v8193_v51 = vpop.permute.xlu2 %1952  ;;  %v1862_v10 = vsel %vm842_vm5, %v1849_v40, %v1857_v54  ;;  %v1866_v5 = vsel %vm842_vm5, %v1857_v54, %v1849_v40  ;;  %v1861_v54 = vsel %vm842_vm5, %v1847_v29, %v1855_v12  ;;  %v1865_v40 = vsel %vm842_vm5, %v1855_v12, %v1847_v29 }
 0x28e   : > { %v1830_v59 = vsel %vm826_vm3, %v8180_v8, %v1825_v34 }
 0x294   : > { %v8195_v23 = vpop.permute.xlu0 %1880  ;;  %v8197_v11 = vpop.permute.xlu1 %1888 }
 0x295   : > { %14076 = vst [vmem:[#allocation37_spill] sm:$0xff] %v8195_v23  ;;  %v8199_v19 = vpop.permute.xlu2 %1754 }
 0x296   : > { %14077 = vst [vmem:[#allocation39_spill] sm:$0xff] %v8197_v11  ;;  %v14083_v11 = vld [vmem:[#allocation19_spill] sm:$0xff] }
 0x29c   : > { %v8201_v1 = vpop.permute.xlu0 %1920  ;;  %v8203_v33 = vpop.permute.xlu1 %1944 }
 0x29d   : > { %v8205_v61 = vpop.permute.xlu2 %1794 }
 0x2a4   : > { %v8207_v52 = vpop.permute.xlu0 %1976  ;;  %v8209_v18 = vpop.permute.xlu1 %1984 }
 0x2a5   : > { %v1851_v44 = vpop.permute.xlu2 %1850 }
 0x2ac   : > { %v8211_v39 = vpop.permute.xlu0 %1762  ;;  %v8213_v55 = vpop.permute.xlu1 %1786 }
 0x2ad   : > { %v8215_v31 = vpop.permute.xlu2 %1890 }
 0x2b4   : > { %v1819_v21 = vpop.permute.xlu0 %1818  ;;  %v1827_v43 = vpop.permute.xlu1 %1826 }
 0x2b5   : > { %v8233_v2 = vpop.permute.xlu2 %1946 }
 0x2bc   : > { %v1859_v60 = vpop.permute.xlu0 %1858  ;;  %v8235_v9 = vpop.permute.xlu1 %1882 }
 0x2bd   : > { %14080 = vst [vmem:[#allocation82_spill] sm:$0xff] %v8235_v9  ;;  %v1863_v6 = vsel %vm842_vm5, %v1851_v44, %v1859_v60  ;;  %v1867_v38 = vsel %vm842_vm5, %v1859_v60, %v1851_v44  ;;  %v1872_v44 = vmul.f32 %v1866_v5, %v14082_v49  ;;  %v1873_v60 = vmul.f32 %v1862_v10, %v14083_v11  ;;  %v8268_v12 = vpop.permute.xlu2 %2894 }
 0x2be   : > { %v1874_v23 = vmul.f32 %v1867_v38, %v14082_v49  ;;  %v1875_v9 = vmul.f32 %v1863_v6, %v14083_v11  ;;  %v1860_v38 = vsel %vm842_vm5, %v8053_v15, %v8094_v30  ;;  %v1864_v6 = vsel %vm842_vm5, %v8094_v30, %v8053_v15  ;;  %14084 = vst [vmem:[#allocation5_spill] sm:$0xff] %v8268_v12 }
 0x2bf   : > { %v1871_v5 = vmul.f32 %v1861_v54, %v14083_v11  ;;  %v1835_v10 = vsel %vm826_vm3, %v1827_v43, %v1819_v21  ;;  %v1868_v15 = vmul.f32 %v1864_v6, %v14082_v49  ;;  %v1869_v30 = vmul.f32 %v1860_v38, %v14083_v11  ;;  %v2257_v38 = vld [vmem:[%s14008_s5 + $0x10] sm:$0xff]  ;;  %v2952_v6 = vld [vmem:[%s14067_s10 + $0x18] sm:$0xff]  ;;  %s14785_s5 = smov 104  }
 0x2c0   : > { %2053 = vmatpush.msra.mxu2 %v1874_v23  ;;  %2140 = vmatpush.msrb.mxu1 %v1875_v9  ;;  %v1870_v23 = vmul.f32 %v1865_v40, %v14082_v49  ;;  %v1831_v9 = vsel %vm826_vm3, %v1819_v21, %v1827_v43  ;;  %v1834_v54 = vsel %vm826_vm3, %v1825_v34, %v8180_v8  ;;  %v14085_v21 = vld [vmem:[#allocation12_spill] sm:$0xff]  ;;  %v2635_v8 = vld [vmem:[%s14079_s22 + $0x10] sm:$0xff] }
 0x2c1   : > { %v1800_v43 = vsel %vm810_vm4, %v8036_v42, %v8066_v45  ;;  %v1842_v40 = vmul.f32 %v1835_v10, %v14085_v21  ;;  %v1828_v34 = vsel %vm826_vm3, %v8078_v48, %v8080_v35  ;;  %2271 = vperm.xlu0 %6985, %v2257_v38   ;;  %3113 = vrot.lane.b32.xlu1 %v2952_v6, %s14033_s6  ;;  %v14087_v38 = vld [vmem:[#allocation10_spill] sm:$0xff] }
 0x2c2   : > { %2054 = vmatpush.msra.mxu2 %v1872_v44  ;;  %2141 = vmatpush.msrb.mxu1 %v1873_v60  ;;  %v14086_v44 = vld [vmem:[#allocation13_spill] sm:$0xff]  ;;  %v1840_v10 = vmul.f32 %v1834_v54, %v14085_v21 }
 0x2c3   : > { %v1843_v60 = vmul.f32 %v1831_v9, %v14086_v44  ;;  %v1832_v9 = vsel %vm826_vm3, %v8080_v35, %v8078_v48  ;;  %2933 = vperm.xlu2 %6967, %v2635_v8   ;;  %v1804_v48 = vmul.f32 %v1800_v43, %v14087_v38  ;;  %v1956_v35 = vsel %vm890_vm8, %v8082_v28, %v8120_v56 }
 0x2c4   : > { %v8276_v29 = vpop.permute.xlu0 %1914  ;;  %v8278_v50 = vpop.permute.xlu1 %1922  ;;  %2055 = vmatpush.msra.mxu2 %v1870_v23  ;;  %2142 = vmatpush.msrb.mxu1 %v1871_v5  ;;  %v1829_v23 = vsel %vm826_vm3, %v8144_v0, %v8124_v17  ;;  %v1833_v5 = vsel %vm826_vm3, %v8124_v17, %v8144_v0  ;;  %v1837_v54 = vmul.f32 %v1828_v34, %v14086_v44 }
 0x2c5   : > { %v1838_v17 = vmul.f32 %v1833_v5, %v14085_v21  ;;  %v1839_v0 = vmul.f32 %v1829_v23, %v14086_v44  ;;  %v1797_v43 = vsel %vm810_vm4, %v8112_v63, %v8146_v7  ;;  %v1802_v34 = vsel %vm810_vm4, %v8189_v26, %v8187_v13 }
 0x2c6   : > { %2056 = vmatpush.msra.mxu2 %v1868_v15  ;;  %2143 = vmatpush.msrb.mxu1 %v1869_v30  ;;  %v1841_v15 = vmul.f32 %v1830_v59, %v14086_v44  ;;  %v1796_v30 = vsel %vm810_vm4, %v8066_v45, %v8036_v42  ;;  %v1803_v59 = vsel %vm810_vm4, %v8205_v61, %v8213_v55  ;;  %v8337_v42 = vpop.permute.xlu2 %1986 }
 0x2c7   : > { %v1836_v45 = vmul.f32 %v1832_v9, %v14085_v21  ;;  %v1958_v23 = vsel %vm890_vm8, %v8203_v33, %v8193_v51  ;;  %v7064_v9 = vld [vmem:[%s13975_s4 + $0x10] ss:$0 sm:$0xff] }
 0x2c8   : > { %2057 = vmatpush.msra.mxu2 %v1842_v40  ;;  %2144 = vmatpush.msrb.mxu1 %v1843_v60  ;;  %v1798_v40 = vsel %vm810_vm4, %v8187_v13, %v8189_v26  ;;  %v1799_v60 = vsel %vm810_vm4, %v8213_v55, %v8205_v61  ;;  %v1990_v13 = vsel %vm906_vm9, %v8207_v52, %v8209_v18  ;;  %v14088_v26 = vld [vmem:[#allocation30_spill] sm:$0xff] }
 0x2c9   : > { %2639 = vperm.xlu0 %6985, %v14068_v24  }
 0x2ca   : > { %2058 = vmatpush.msra.mxu2 %v1840_v10  ;;  %2145 = vmatpush.msrb.mxu1 %v1841_v15  ;;  %v1810_v15 = vmul.f32 %v1803_v59, %v14087_v38  ;;  %v1989_v59 = vsel %vm906_vm9, %v8156_v22, %v8183_v20 }
 0x2cc   : > { %v8353_v6 = vpop.permute.xlu0 %1954  ;;  %v8355_v8 = vpop.permute.xlu1 %1978  ;;  %2059 = vmatpush.msra.mxu2 %v1838_v17  ;;  %2146 = vmatpush.msrb.mxu1 %v1839_v0  ;;  %v1801_v17 = vsel %vm810_vm4, %v8146_v7, %v8112_v63  ;;  %v1957_v0 = vsel %vm890_vm8, %v8178_v4, %v8176_v37  ;;  %v1968_v63 = vmul.f32 %v1958_v23, %v14088_v26 }
 0x2cd   : > { %v1959_v61 = vsel %vm890_vm8, %v8233_v2, %v8353_v6  ;;  %v1991_v55 = vsel %vm906_vm9, %v8355_v8, %v8337_v42  ;;  %v1988_v7 = vsel %vm906_vm9, %v8122_v32, %v8098_v14  ;;  %v1771_v23 = vsel %vm794_vm0, %v8211_v39, %v8199_v19 }
 0x2ce   : > { %v1970_v5 = vmul.f32 %v1959_v61, %v14088_v26  ;;  %v2002_v10 = vmul.f32 %v7064_v9, %v1991_v55  ;;  %2060 = vmatpush.msra.mxu2 %v1836_v45  ;;  %2147 = vmatpush.msrb.mxu1 %v1837_v54  ;;  %v14089_v61 = vld [vmem:[#allocation11_spill] sm:$0xff]  ;;  %v1808_v45 = vmul.f32 %v1802_v34, %v14087_v38 }
 0x2cf   : > { %v1811_v12 = vmul.f32 %v1799_v60, %v14089_v61  ;;  %v2000_v54 = vmul.f32 %v7064_v9, %v1990_v13  ;;  %v1809_v24 = vmul.f32 %v1798_v40, %v14089_v61  ;;  %v1806_v60 = vmul.f32 %v1801_v17, %v14087_v38 }
 0x2d0   : > { %2061 = vmatpush.msra.mxu2 %v1810_v15  ;;  %2082 = vmatpush.msra.mxu3 %v1970_v5  ;;  %v1966_v55 = vmul.f32 %v1957_v0, %v14088_v26  ;;  %v1807_v34 = vmul.f32 %v1797_v43, %v14089_v61  ;;  %v1998_v40 = vmul.f32 %v7064_v9, %v1989_v59  ;;  %v2953_v59 = vld [vmem:[%s13470_s11] sm:$0xff] }
 0x2d1   : > { %2123 = vmatpush.msrb.mxu0 %v2002_v10  ;;  %2148 = vmatpush.msrb.mxu1 %v1811_v12  ;;  %v1927_v12 = vsel %vm874_vm7, %v8276_v29, %v8278_v50  ;;  %v1767_v13 = vsel %vm794_vm0, %v8199_v19, %v8211_v39  ;;  %v1964_v43 = vmul.f32 %v1956_v35, %v14088_v26  ;;  %v14090_v19 = vld [vmem:[#allocation6_spill] sm:$0xff] }
 0x2d2   : > { %2062 = vmatpush.msra.mxu2 %v1808_v45  ;;  %2083 = vmatpush.msra.mxu3 %v1968_v63  ;;  %v1805_v5 = vmul.f32 %v1796_v30, %v14089_v61  ;;  %v1770_v10 = vsel %vm794_vm0, %v8171_v58, %v8185_v16  ;;  %v1926_v15 = vsel %vm874_vm7, %v8191_v53, %v8201_v1  ;;  %v14091_v35 = vld [vmem:[#allocation26_spill] sm:$0xff] }
 0x2d3   : > { %2124 = vmatpush.msrb.mxu0 %v2000_v54  ;;  %2149 = vmatpush.msrb.mxu1 %v1809_v24  ;;  %v1996_v17 = vmul.f32 %v7064_v9, %v1988_v7  ;;  %v1766_v39 = vsel %vm794_vm0, %v8185_v16, %v8171_v58  ;;  %v1778_v30 = vmul.f32 %v1771_v23, %v14090_v19  ;;  %v14092_v58 = vld [vmem:[#allocation7_spill] sm:$0xff]  ;;  %v2951_v54 = vld [vmem:[%s14067_s10 + $0x10] sm:$0xff] }
 0x2d4   : > { %2063 = vmatpush.msra.mxu2 %v1806_v60  ;;  %2084 = vmatpush.msra.mxu3 %v1966_v55  ;;  %v1938_v0 = vmul.f32 %v1927_v12, %v14091_v35  ;;  %v1769_v9 = vsel %vm794_vm0, %v8132_v62, %v8134_v57  ;;  %v1925_v16 = vsel %vm874_vm7, %v8167_v47, %v8148_v3 }
 0x2d5   : > { %2125 = vmatpush.msrb.mxu0 %v1998_v40  ;;  %2150 = vmatpush.msrb.mxu1 %v1807_v34  ;;  %v1765_v45 = vsel %vm794_vm0, %v8134_v57, %v8132_v62  ;;  %v1776_v63 = vmul.f32 %v1770_v10, %v14090_v19  ;;  %v1936_v7 = vmul.f32 %v1926_v15, %v14091_v35  ;;  %v14093_v40 = vld [vmem:[#allocation82_spill] sm:$0xff]  ;;  %v14095_v10 = vld [vmem:[#allocation39_spill] sm:$0xff]  ;;  %v14096_v15 = vld [vmem:[#allocation37_spill] sm:$0xff] }
 0x2d6   : > { %2064 = vmatpush.msra.mxu2 %v1804_v48  ;;  %2085 = vmatpush.msra.mxu3 %v1964_v43  ;;  %v1779_v48 = vmul.f32 %v1767_v13, %v14092_v58  ;;  %v1768_v24 = vsel %vm794_vm0, %v8064_v27, %v8026_v36  ;;  %v1924_v62 = vsel %vm874_vm7, %v8108_v25, %v8110_v41 }
 0x2d7   : > { %2126 = vmatpush.msrb.mxu0 %v1996_v17  ;;  %2151 = vmatpush.msrb.mxu1 %v1805_v5  ;;  %v1777_v57 = vmul.f32 %v1766_v39, %v14092_v58  ;;  %v1764_v60 = vsel %vm794_vm0, %v8026_v36, %v8064_v27  ;;  %v1774_v55 = vmul.f32 %v1769_v9, %v14090_v19  ;;  %v8493_v5 = vld [vmem:[%s14009_s28 + $0x18] sm:$0xff]  ;;  %v14097_v39 = vld [vmem:[#allocation31_spill] sm:$0xff]  ;;  %v8512_v9 = vld [vmem:[%s14094_s21 + $0x10] sm:$0xff] }
 0x2d8   : > { %2065 = vmatpush.msra.mxu2 %v1778_v30  ;;  %2086 = vmatpush.msra.mxu3 %v1938_v0  ;;  %v1934_v34 = vmul.f32 %v1925_v16, %v14091_v35  ;;  %v1963_v23 = vsel %vm890_vm8, %v8353_v6, %v8233_v2  ;;  %v1775_v12 = vmul.f32 %v1765_v45, %v14092_v58  ;;  %v2004_v2 = vld [vmem:[%s14094_s21] sm:$0xff]  ;;  %v14098_v0 = vld [vmem:[#allocation22_spill] sm:$0xff]  ;;  %v14099_v16 = vld [vmem:[#allocation36_spill] sm:$0xff] }
 0x2d9   : > { %2152 = vmatpush.msrb.mxu1 %v1779_v48  ;;  %3181 = vperm.xlu1 %6966, %v2953_v59   ;;  %v1895_v36 = vsel %vm858_vm6, %v14093_v40, %v8215_v31  ;;  %v1772_v27 = vmul.f32 %v1768_v24, %v14090_v19  ;;  %v1932_v13 = vmul.f32 %v1924_v62, %v14091_v35  ;;  %v14100_v48 = vld [vmem:[#allocation80_spill] sm:$0xff]  ;;  %v14102_v24 = vld [vmem:[#allocation79_spill] sm:$0xff] }
 0x2da   : > { %2066 = vmatpush.msra.mxu2 %v1776_v63  ;;  %2087 = vmatpush.msra.mxu3 %v1936_v7  ;;  %v1962_v6 = vsel %vm890_vm8, %v8193_v51, %v8203_v33  ;;  %v1773_v43 = vmul.f32 %v1764_v60, %v14092_v58  ;;  %v1894_v17 = vsel %vm858_vm6, %v14096_v15, %v14095_v10  ;;  %v2955_v33 = vld [vmem:[%s13470_s11 + $0x10] sm:$0xff]  ;;  %v2633_v60 = vld [vmem:[%s14079_s22] sm:$0xff] }
 0x2db   : > { %2153 = vmatpush.msrb.mxu1 %v1777_v57  ;;  %3111 = vrot.lane.b32.xlu2 %v2951_v54, %s14033_s6  ;;  %v1971_v30 = vmul.f32 %v1963_v23, %v14097_v39  ;;  %v1961_v51 = vsel %vm890_vm8, %v8176_v37, %v8178_v4  ;;  %v1906_v59 = vmul.f32 %v1895_v36, %v14098_v0  ;;  %v2954_v37 = vld [vmem:[%s13470_s11 + $0x8] sm:$0xff] }
 0x2dc   : > { %2067 = vmatpush.msra.mxu2 %v1774_v55  ;;  %2088 = vmatpush.msra.mxu3 %v1934_v34  ;;  %v1893_v45 = vsel %vm858_vm6, %v14100_v48, %v14099_v16  ;;  %v1969_v63 = vmul.f32 %v1962_v6, %v14097_v39  ;;  %v1960_v4 = vsel %vm890_vm8, %v8120_v56, %v8082_v28  ;;  %v14101_v54 = vld [vmem:[#allocation40_spill] sm:$0xff]  ;;  %v2007_v34 = vld [vmem:[%s14094_s21 + $0x18] sm:$0xff] }
 0x2dd   : > { %2154 = vmatpush.msrb.mxu1 %v1775_v12  ;;  %2654 = vperm.xlu0 %6985, %v8493_v5   ;;  %v1904_v7 = vmul.f32 %v1894_v17, %v14098_v0  ;;  %v1892_v62 = vsel %vm858_vm6, %v14102_v24, %v14101_v54  ;;  %v1967_v57 = vmul.f32 %v1961_v51, %v14097_v39  ;;  %v2956_v6 = vld [vmem:[%s13470_s11 + $0x18] sm:$0xff]  ;;  %v2005_v51 = vld [vmem:[%s14094_s21 + $0x8] sm:$0xff] }
 0x2de   : > { %2068 = vmatpush.msra.mxu2 %v1772_v27  ;;  %2089 = vmatpush.msra.mxu3 %v1932_v13  ;;  %v1931_v28 = vsel %vm874_vm7, %v8278_v50, %v8276_v29  ;;  %v1902_v56 = vmul.f32 %v1893_v45, %v14098_v0  ;;  %v1965_v55 = vmul.f32 %v1960_v4, %v14097_v39  ;;  %v14103_v29 = vld [vmem:[#allocation27_spill] sm:$0xff]  ;;  %v8559_v27 = vld [vmem:[%s14094_s21 + $0x28] sm:$0xff]  ;;  %v14105_v13 = vld [vmem:[#allocation38_spill] sm:$0xff] }
 0x2df   : > { %2155 = vmatpush.msrb.mxu1 %v1773_v43  ;;  %2069 = vmatmul.f32.vlgmr.msra.gmra.mxu2 %v2004_v2  ;;  %v1930_v23 = vsel %vm874_vm7, %v8201_v1, %v8191_v53  ;;  %v1900_v12 = vmul.f32 %v1892_v62, %v14098_v0  ;;  %v1939_v50 = vmul.f32 %v1931_v28, %v14103_v29  ;;  %v8565_v53 = vld [vmem:[%s13471_s12] sm:$0xff]  ;;  %v14112_v28 = vmov 1  }
 0x2e0   : > { %2156 = vmatmul.f32.vlgmr.msrb.gmra.mxu1 %v2004_v2  ;;  %2169 = vmatpush.msrb.mxu2 %v1971_v30  ;;  %v1929_v36 = vsel %vm874_vm7, %v8148_v3, %v8167_v47  ;;  %v1937_v1 = vmul.f32 %v1930_v23, %v14103_v29  ;;  %v1928_v3 = vsel %vm874_vm7, %v8110_v41, %v8108_v25  ;;  %v14104_v47 = vld [vmem:[#allocation78_spill] sm:$0xff]  ;;  %v14106_v43 = vld [vmem:[#allocation71_spill] sm:$0xff]  ;;  %v2010_v30 = vld [vmem:[%s14094_s21 + $0x30] sm:$0xff] }
 0x2e1   : > { %2090 = vmatpush.msra.mxu3 %v1906_v59  ;;  %3191 = vperm.xlu1 %6966, %v2955_v33   ;;  %v1935_v2 = vmul.f32 %v1929_v36, %v14103_v29  ;;  %v1899_v25 = vsel %vm858_vm6, %v8215_v31, %v14093_v40  ;;  %v1995_v41 = vsel %vm906_vm9, %v8337_v42, %v8355_v8  ;;  %v14107_v33 = vld [vmem:[#allocation62_spill] sm:$0xff]  ;;  %v14108_v59 = vld [vmem:[#allocation51_spill] sm:$0xff]  ;;  %v14115_v23 = vld [vmem:[#allocation52_spill] sm:$0xff] }
 0x2e2   : > { %2170 = vmatpush.msrb.mxu2 %v1969_v63  ;;  %6840 = vmatmul.msk.f32.vlgmr.msrb.gmra.mxu0 %vm2040_vm12, %v8512_v9  ;;  %v1933_v17 = vmul.f32 %v1928_v3, %v14103_v29  ;;  %v1898_v31 = vsel %vm858_vm6, %v14095_v10, %v14096_v15  ;;  %v1994_v42 = vsel %vm906_vm9, %v8209_v18, %v8207_v52  ;;  %v7066_v8 = vld [vmem:[%s13975_s4 + $0x18] ss:$0 sm:$0xff]  ;;  %v14109_v45 = vld [vmem:[#allocation23_spill] sm:$0xff]  ;;  %v2014_v36 = vld [vmem:[%s14094_s21 + $0x50] sm:$0xff]  ;;  %v14117_v3 = vmov 3  }
 0x2e3   : > { %2091 = vmatpush.msra.mxu3 %v1904_v7  ;;  %3186 = vperm.xlu2 %6967, %v2954_v37   ;;  %v2003_v40 = vmul.f32 %v7066_v8, %v1995_v41  ;;  %v1907_v63 = vmul.f32 %v1899_v25, %v14109_v45  ;;  %v8613_v10 = vld [vmem:[%s13471_s12 + $0x18] sm:$0xff]  ;;  %v8618_v18 = vld [vmem:[%s14094_s21 + $0x40] sm:$0xff]  ;;  %v1897_v52 = vsel %vm858_vm6, %v14099_v16, %v14100_v48 }
 0x2e4   : > { %2171 = vmatpush.msrb.mxu2 %v1967_v57  ;;  %v1993_v15 = vsel %vm906_vm9, %v8183_v20, %v8156_v22  ;;  %v1905_v37 = vmul.f32 %v1898_v31, %v14109_v45  ;;  %v2001_v4 = vmul.f32 %v7066_v8, %v1994_v42  ;;  %v1896_v7 = vsel %vm858_vm6, %v14101_v54, %v14102_v24  ;;  %v3238_v48 = vld [vmem:[%s13472_s13 + $0x18] sm:$0xff]  ;;  %v14110_v54 = vld [vmem:[#allocation81_spill] sm:$0xff]  ;;  %v2013_v24 = vld [vmem:[%s14094_s21 + $0x48] sm:$0xff] }
 0x2e5   : > { %2092 = vmatpush.msra.mxu3 %v1902_v56  ;;  %2923 = vperm.xlu0 %6985, %v2633_v60   ;;  %v1992_v16 = vsel %vm906_vm9, %v8098_v14, %v8122_v32  ;;  %v1903_v20 = vmul.f32 %v1897_v52, %v14109_v45  ;;  %v1999_v22 = vmul.f32 %v7066_v8, %v1993_v15  ;;  %v2008_v62 = vld [vmem:[%s14094_s21 + $0x20] sm:$0xff]  ;;  %v2015_v57 = vld [vmem:[%s14094_s21 + $0x58] sm:$0xff]  ;;  %v14128_v42 = vmov 6  }
 0x2e6   : > { %2172 = vmatpush.msrb.mxu2 %v1965_v55  ;;  %v1901_v14 = vmul.f32 %v1896_v7, %v14109_v45  ;;  %v1997_v32 = vmul.f32 %v7066_v8, %v1992_v16  ;;  %v14111_v60 = vld [vmem:[#allocation42_spill] sm:$0xff]  ;;  %v14114_v55 = vld [vmem:[#allocation61_spill] sm:$0xff]  ;;  %v3235_v7 = vld [vmem:[%s13472_s13] sm:$0xff] }
 0x2e7   : > { %2093 = vmatpush.msra.mxu3 %v1900_v12  ;;  %2072 = vmatmul.f32.gmra.mxu2 %v2007_v34  ;;  %v14113_v56 = vld [vmem:[#allocation74_spill] sm:$0xff]  ;;  %v8671_v12 = vld [vmem:[%s14009_s28 + $0x10] sm:$0xff] }
 0x2e8   : > { %2159 = vmatmul.f32.gmra.mxu1 %v2007_v34  ;;  %2173 = vmatpush.msrb.mxu2 %v1939_v50  ;;  %v2011_v34 = vld [vmem:[%s14094_s21 + $0x38] sm:$0xff]  ;;  %v14116_v50 = vmov 2  }
 0x2e9   : > { %2094 = vmatpush.msra.mxu3 %v14104_v47  ;;  %3246 = vperm.xlu1 %6966, %v14105_v13  }
 0x2ea   : > { %2174 = vmatpush.msrb.mxu2 %v1937_v1  ;;  %6841 = vmatmul.msk.f32.gmra.mxu0 %vm2040_vm12, %v8559_v27  ;;  %v8684_v1 = vpop.permute.xlu1 %2890 }
 0x2eb   : > { %2095 = vmatpush.msra.mxu3 %v14106_v43  ;;  %3241 = vperm.xlu2 %6967, %v8565_v53  }
 0x2ec   : > { %2175 = vmatpush.msrb.mxu2 %v1935_v2  ;;  %v3575_v2 = vld [vmem:[%s13473_s14] sm:$0xff] }
 0x2ed   : > { %2096 = vmatpush.msra.mxu3 %v14107_v33  ;;  %3196 = vperm.xlu0 %6985, %v2956_v6   ;;  %v8708_v6 = vpop.permute.xlu2 %2902 }
 0x2ee   : > { %2176 = vmatpush.msrb.mxu2 %v1933_v17  ;;  %14120 = vst [vmem:[#allocation39_spill] sm:$0xff] %v8708_v6  ;;  %v14124_v17 = vmov 5   ;;  %v14152_v6 = vld [vmem:[#allocation44_spill] sm:$0xff] }
 0x2ef   : > { %2097 = vmatpush.msra.mxu3 %v14108_v59  ;;  %2075 = vmatmul.f32.gmra.mxu2 %v2010_v30 }
 0x2f0   : > { %2098 = vmatmul.f32.vlgmr.msra.gmra.mxu3 %v2005_v51  ;;  %2162 = vmatmul.f32.gmra.mxu1 %v2010_v30 }
 0x2f1   : > { %2177 = vmatpush.msrb.mxu2 %v1907_v63  ;;  %2210 = vmatpush.msrb.mxu3 %v2003_v40  ;;  %v8748_v40 = vld [vmem:[%s13475_s16 + $0x38] sm:$0xff]  ;;  %v14131_v63 = vmov 7  }
 0x2f2   : > { %3256 = vperm.xlu1 %6966, %v8613_v10   ;;  %6842 = vmatmul.msk.f32.gmra.mxu0 %vm2040_vm12, %v8618_v18  ;;  %v8694_v47 = vpop.permute.xlu1 %2898 }
 0x2f3   : > { %2178 = vmatpush.msrb.mxu2 %v1905_v37  ;;  %2211 = vmatpush.msrb.mxu3 %v2001_v4  ;;  %14118 = vst [vmem:[#allocation82_spill] sm:$0xff] %v8694_v47  ;;  %v14136_v4 = vmov 8  }
 0x2f4   : > { %3251 = vperm.xlu2 %6967, %v14110_v54  }
 0x2f5   : > { %2179 = vmatpush.msrb.mxu2 %v1903_v20  ;;  %2212 = vmatpush.msrb.mxu3 %v1999_v22  ;;  %v14139_v22 = vmov 0  }
 0x2f6   : > { %3540 = vperm.xlu0 %6985, %v3238_v48   ;;  %v8783_v48 = vpop.permute.xlu0 %3109 }
 0x2f7   : > { %2180 = vmatpush.msrb.mxu2 %v1901_v14  ;;  %2213 = vmatpush.msrb.mxu3 %v1997_v32  ;;  %14140 = vst [vmem:[#allocation61_spill] sm:$0xff] %v8783_v48  ;;  %v3236_v32 = vld [vmem:[%s13472_s13 + $0x8] sm:$0xff] }
 0x2f8   : > { %2078 = vmatmul.f32.gmra.mxu2 %v2013_v24  ;;  %2101 = vmatmul.f32.gmra.mxu3 %v2008_v62 }
 0x2f9   : > { %2181 = vmatpush.msrb.mxu2 %v14111_v60  ;;  %2165 = vmatmul.f32.gmra.mxu1 %v2013_v24  ;;  %v3576_v60 = vld [vmem:[%s13473_s14 + $0x8] sm:$0xff] }
 0x2fa   : > { %6969 = vset.pattern.permute.xlu1 %v14112_v28  ;;  %6843 = vmatmul.msk.f32.gmra.mxu0 %vm2040_vm12, %v2015_v57  ;;  %v8710_v43 = vpop.permute.xlu1 %2928 }
 0x2fb   : > { %2182 = vmatpush.msrb.mxu2 %v14113_v56  ;;  %3276 = vperm.xlu1 %6969, %v14110_v54   ;;  %14121 = vst [vmem:[#allocation37_spill] sm:$0xff] %v8710_v43 }
 0x2fc   : > { %6968 = vset.pattern.permute.xlu2 %v14112_v28 }
 0x2fd   : > { %2183 = vmatpush.msrb.mxu2 %v14114_v55  ;;  %3272 = vperm.xlu2 %6968, %v14105_v13  }
 0x2fe   : > { %6988 = vset.pattern.permute.xlu0 %v14112_v28 }
 0x2ff   : > { %2184 = vmatpush.msrb.mxu2 %v14115_v23  ;;  %2674 = vperm.xlu0 %6988, %v8671_v12  }
 0x300   : > { %2104 = vmatmul.f32.gmra.mxu3 %v2011_v34  ;;  %2185 = vmatmul.f32.vlgmr.msrb.gmra.mxu2 %v2005_v51  ;;  %v8734_v51 = vld [vmem:[%s13475_s16 + $0x10] sm:$0xff] }
 0x302   : > { %v8719_v41 = vpop.permute.xlu1 %2938 }
 0x303   : > { %6970 = vset.pattern.permute.xlu1 %v14116_v50  ;;  %14123 = vst [vmem:[#allocation36_spill] sm:$0xff] %v8719_v41 }
 0x304   : > { %3300 = vperm.xlu1 %6970, %v8565_v53  }
 0x305   : > { %3280 = vperm.xlu2 %6968, %v8613_v10  }
 0x307   : > { %3268 = vperm.xlu0 %6988, %v8565_v53  }
 0x308   : > { %2107 = vmatmul.f32.gmra.mxu3 %v2014_v36  ;;  %2188 = vmatmul.f32.gmra.mxu2 %v2008_v62  ;;  %v8798_v62 = vpop.permute.xlu0 %3464 }
 0x309   : > { %14143 = vst [vmem:[#allocation84_spill] sm:$0xff] %v8798_v62 }
 0x30a   : > { %v8728_v33 = vpop.permute.xlu1 %3107 }
 0x30b   : > { %14126 = vst [vmem:[#allocation40_spill] sm:$0xff] %v8728_v33 }
 0x30c   : > { %3312 = vperm.xlu1 %6970, %v8613_v10  }
 0x30d   : > { %6971 = vset.pattern.permute.xlu2 %v14116_v50 }
 0x30e   : > { %3308 = vperm.xlu2 %6971, %v14110_v54  }
 0x30f   : > { %3720 = vrot.lane.b32.xlu0 %v3575_v2, %s14033_s6 }
 0x310   : > { %2191 = vmatmul.f32.gmra.mxu2 %v2011_v34  ;;  %6844 = vmatmul.msk.f32.vlgmr.msrb.gmra.mxu3 %vm2040_vm12, %v8512_v9  ;;  %v14119_v9 = vmov 4   ;;  %v3577_v34 = vld [vmem:[%s13473_s14 + $0x10] sm:$0xff] }
 0x314   : > { %6973 = vset.pattern.permute.xlu1 %v14117_v3 }
 0x315   : > { %3336 = vperm.xlu1 %6973, %v14105_v13  }
 0x316   : > { %6972 = vset.pattern.permute.xlu2 %v14117_v3 }
 0x317   : > { %3332 = vperm.xlu2 %6972, %v8565_v53  }
 0x318   : > { %2194 = vmatmul.f32.gmra.mxu2 %v2014_v36  ;;  %6845 = vmatmul.msk.f32.gmra.mxu3 %vm2040_vm12, %v8559_v27  ;;  %v3578_v27 = vld [vmem:[%s13473_s14 + $0x18] sm:$0xff]  ;;  %v8813_v36 = vpop.permute.xlu0 %3500 }
 0x319   : > { %3726 = vrot.lane.b32.xlu0 %v3578_v27, %s14033_s6  ;;  %14146 = vst [vmem:[#allocation87_spill] sm:$0xff] %v8813_v36 }
 0x31d   : > { %6974 = vset.pattern.permute.xlu1 %v14119_v9  ;;  %v8717_v25 = vpop.permute.xlu2 %2933 }
 0x31e   : > { %3364 = vperm.xlu1 %6974, %v8565_v53   ;;  %14122 = vst [vmem:[#allocation22_spill] sm:$0xff] %v8717_v25 }
 0x31f   : > { %3344 = vperm.xlu2 %6972, %v8613_v10  }
 0x320   : > { %6846 = vmatmul.msk.f32.gmra.mxu3 %vm2040_vm12, %v8618_v18 }
 0x321   : > { %4413 = vperm.xlu0 %6988, %v8734_v51  }
 0x326   : > { %3372 = vperm.xlu1 %6974, %v14110_v54  }
 0x327   : > { %6975 = vset.pattern.permute.xlu2 %v14119_v9 }
 0x328   : > { %6847 = vmatmul.msk.f32.gmra.mxu3 %vm2040_vm12, %v2015_v57  ;;  %3368 = vperm.xlu2 %6975, %v14105_v13  }
 0x329   : > { %4433 = vperm.xlu0 %6988, %v8748_v40  }
 0x32e   : > { %6977 = vset.pattern.permute.xlu1 %v14124_v17 }
 0x32f   : > { %3400 = vperm.xlu1 %6977, %v14105_v13  }
 0x330   : > { %6976 = vset.pattern.permute.xlu2 %v14124_v17 }
 0x331   : > { %3396 = vperm.xlu2 %6976, %v8565_v53   ;;  %6991 = vset.pattern.permute.xlu0 %v14116_v50 }
 0x332   : > { %2710 = vperm.xlu0 %6991, %v8493_v5  }
 0x333   : > { %v8742_v8 = vpop.permute.xlu1 %3113 }
 0x334   : > { %14129 = vst [vmem:[#allocation78_spill] sm:$0xff] %v8742_v8 }
 0x335   : > { %v8725_v30 = vpop.permute.xlu2 %3111 }
 0x336   : > { %14125 = vst [vmem:[#allocation80_spill] sm:$0xff] %v8725_v30  ;;  %v8838_v30 = vld [vmem:[%s13475_s16] sm:$0xff] }
 0x337   : > { %3408 = vperm.xlu1 %6977, %v8613_v10  }
 0x339   : > { %3404 = vperm.xlu2 %6976, %v14110_v54  }
 0x33a   : > { %3304 = vperm.xlu0 %6991, %v14105_v13  }
 0x33d   : > { %v8736_v31 = vpop.permute.xlu2 %3186 }
 0x33e   : > { %14127 = vst [vmem:[#allocation79_spill] sm:$0xff] %v8736_v31  ;;  %v3582_v31 = vld [vmem:[%s13474_s15 + $0x18] sm:$0xff] }
 0x33f   : > { %6979 = vset.pattern.permute.xlu1 %v14128_v42 }
 0x340   : > { %3436 = vperm.xlu1 %6979, %v14110_v54  }
 0x341   : > { %6978 = vset.pattern.permute.xlu2 %v14128_v42 }
 0x342   : > { %3432 = vperm.xlu2 %6978, %v14105_v13   ;;  %4477 = vperm.xlu0 %6991, %v8734_v51  }
 0x345   : > { %v8750_v59 = vpop.permute.xlu2 %3241 }
 0x346   : > { %14130 = vst [vmem:[#allocation38_spill] sm:$0xff] %v8750_v59 }
 0x348   : > { %6980 = vset.pattern.permute.xlu1 %v14131_v63 }
 0x349   : > { %3460 = vperm.xlu1 %6980, %v8565_v53  }
 0x34a   : > { %3440 = vperm.xlu2 %6978, %v8613_v10   ;;  %4497 = vperm.xlu0 %6991, %v8748_v40  }
 0x34b   : > { %v8756_v18 = vpop.permute.xlu1 %3181 }
 0x34c   : > { %14132 = vst [vmem:[#allocation71_spill] sm:$0xff] %v8756_v18 }
 0x34e   : > { %v8758_v52 = vpop.permute.xlu2 %3251 }
 0x34f   : > { %14133 = vst [vmem:[#allocation62_spill] sm:$0xff] %v8758_v52 }
 0x351   : > { %3472 = vperm.xlu1 %6980, %v8613_v10  }
 0x352   : > { %6981 = vset.pattern.permute.xlu2 %v14131_v63  ;;  %6994 = vset.pattern.permute.xlu0 %v14117_v3 }
 0x353   : > { %3468 = vperm.xlu2 %6981, %v14110_v54   ;;  %v8765_v15 = vpop.permute.xlu1 %3191  ;;  %3340 = vperm.xlu0 %6994, %v14110_v54  }
 0x354   : > { %14134 = vst [vmem:[#allocation51_spill] sm:$0xff] %v8765_v15  ;;  %v8827_v15 = vpop.permute.xlu0 %2022 }
 0x357   : > { %v8767_v37 = vpop.permute.xlu2 %3272 }
 0x358   : > { %14135 = vst [vmem:[#allocation81_spill] sm:$0xff] %v8767_v37 }
 0x359   : > { %6983 = vset.pattern.permute.xlu1 %v14136_v4 }
 0x35a   : > { %3496 = vperm.xlu1 %6983, %v14105_v13  }
 0x35b   : > { %6982 = vset.pattern.permute.xlu2 %v14136_v4  ;;  %v8774_v5 = vpop.permute.xlu1 %3246  ;;  %4541 = vperm.xlu0 %6994, %v8734_v51  }
 0x35c   : > { %3492 = vperm.xlu2 %6982, %v8565_v53   ;;  %14137 = vst [vmem:[#allocation42_spill] sm:$0xff] %v8774_v5  ;;  %v3237_v53 = vld [vmem:[%s13472_s13 + $0x10] sm:$0xff] }
 0x35f   : > { %v8779_v16 = vpop.permute.xlu2 %3280  ;;  %v2128_v57 = vpop.f32.mrf.mxu0 }
 0x360   : > { %14138 = vst [vmem:[#allocation74_spill] sm:$0xff] %v8779_v16  ;;  %v8850_v16 = vpop.permute.xlu0 %2037 }
 0x362   : > { %v2070_v20 = vpop.f32.mrf.mxu2  ;;  %6986 = vset.pattern.permute.xlu1 %v14139_v22 }
 0x363   : > { %3525 = vperm.xlu1 %6986, %v3235_v7   ;;  %v3579_v7 = vld [vmem:[%s13474_s15] sm:$0xff]  ;;  %4561 = vperm.xlu0 %6994, %v8748_v40   ;;  %v2071_v41 = vadd.f32 %v2070_v20, %v8827_v15 }
 0x364   : > { %3504 = vperm.xlu2 %6982, %v8613_v10   ;;  %v8786_v13 = vpop.permute.xlu1 %3256 }
 0x365   : > { %14141 = vst [vmem:[#allocation52_spill] sm:$0xff] %v8786_v13 }
 0x367   : > { %v2131_v27 = vpop.f32.mrf.mxu0 }
 0x368   : > { %v8791_v14 = vpop.permute.xlu2 %3308 }
 0x369   : > { %14142 = vst [vmem:[#allocation83_spill] sm:$0xff] %v8791_v14 }
 0x36a   : > { %v2073_v24 = vpop.f32.mrf.mxu2 }
 0x36b   : > { %3535 = vperm.xlu1 %6986, %v3237_v53   ;;  %6997 = vset.pattern.permute.xlu0 %v14119_v9 }
 0x36c   : > { %6987 = vset.pattern.permute.xlu2 %v14139_v22  ;;  %v8844_v22 = vpop.f32.mrf.mxu1 }
 0x36d   : > { %3530 = vperm.xlu2 %6987, %v3236_v32   ;;  %v8803_v56 = vpop.permute.xlu1 %3276  ;;  %v3580_v32 = vld [vmem:[%s13474_s15 + $0x8] sm:$0xff] }
 0x36e   : > { %14144 = vst [vmem:[#allocation85_spill] sm:$0xff] %v8803_v56 }
 0x36f   : > { %v2134_v8 = vpop.f32.mrf.mxu0 }
 0x371   : > { %v8806_v55 = vpop.permute.xlu2 %3332 }
 0x372   : > { %14145 = vst [vmem:[#allocation86_spill] sm:$0xff] %v8806_v55  ;;  %v2076_v2 = vpop.f32.mrf.mxu2 }
 0x373   : > { %v2099_v23 = vpop.f32.mrf.mxu3  ;;  %3722 = vrot.lane.b32.xlu1 %v3576_v60, %s14033_s6 }
 0x375   : > { %3724 = vrot.lane.b32.xlu2 %v3577_v34, %s14033_s6 }
 0x376   : > { %v8819_v53 = vpop.permute.xlu1 %3300 }
 0x377   : > { %14147 = vst [vmem:[#allocation88_spill] sm:$0xff] %v8819_v53 }
 0x379   : > { %v8821_v54 = vpop.permute.xlu2 %3344 }
 0x37a   : > { %14148 = vst [vmem:[#allocation89_spill] sm:$0xff] %v8821_v54  ;;  %v2074_v54 = vadd.f32 %v2073_v24, %v14152_v6  ;;  %v2137_v24 = vpop.f32.mrf.mxu0 }
 0x37b   : > { %v2102_v60 = vpop.f32.mrf.mxu3  ;;  %3794 = vperm.xlu1 %6986, %v3579_v7   ;;  %v2079_v34 = vpop.f32.mrf.mxu2 }
 0x37c   : > { %v2103_v25 = vadd.f32 %v2102_v60, %v2074_v54 }
 0x37d   : > { %3799 = vperm.xlu2 %6987, %v3580_v32   ;;  %v14151_v32 = vld [vmem:[#allocation41_spill] sm:$0xff] }
 0x37e   : > { %v8832_v18 = vpop.permute.xlu1 %3312  ;;  %v2077_v33 = vadd.f32 %v2076_v2, %v14151_v32  ;;  %v8859_v2 = vld [vmem:[%s13475_s16 + $0x18] sm:$0xff]  ;;  %v2132_v54 = vadd.f32 %v2131_v27, %v2103_v25  ;;  %v8878_v25 = vld [vmem:[%s13475_s16 + $0x30] sm:$0xff] }
 0x37f   : > { %14149 = vst [vmem:[#allocation90_spill] sm:$0xff] %v8832_v18 }
 0x380   : > { %vm2229_vm15 = vcmp.gt.f32.partialorder %v2132_v54, 0.0 }
 0x382   : > { %v8840_v48 = vpop.permute.xlu2 %3368 }
 0x383   : > { %14150 = vst [vmem:[#allocation91_spill] sm:$0xff] %v8840_v48  ;;  %v2105_v7 = vpop.f32.mrf.mxu3  ;;  %3809 = vperm.xlu1 %6986, %v3582_v31   ;;  %v8852_v13 = vpop.f32.mrf.mxu2  ;;  %v2080_v31 = vadd.f32 %v2079_v34, %v8850_v16 }
 0x384   : > { %v2106_v4 = vadd.f32 %v2105_v7, %v2077_v33  ;;  %v7068_v33 = vld [vmem:[%s14009_s28] sm:$0xff]  ;;  %v2100_v7 = vadd.f32 %v2099_v23, %v2071_v41  ;;  %v2160_v41 = vpop.f32.mrf.mxu1 }
 0x385   : > { %4350 = vperm.xlu2 %6987, %v8838_v30   ;;  %2762 = vperm.xlu0 %6997, %v7068_v33   ;;  %v8871_v33 = vld [vmem:[%s13475_s16 + $0x28] sm:$0xff] }
 0x386   : > { %v2135_v47 = vadd.f32 %v2134_v8, %v2106_v4  ;;  %v2129_v34 = vadd.f32 %v2128_v57, %v2100_v7  ;;  %v2237_v8 = vmul.f32 0.2, %v2132_v54 }
 0x387   : > { %v8848_v18 = vpop.permute.xlu1 %3336 }
 0x388   : > { %14153 = vst [vmem:[#allocation41_spill] sm:$0xff] %v8848_v18  ;;  %v2239_v55 = vmul.f32 0.2, %v2135_v47  ;;  %vm2231_vm14 = vcmp.gt.f32.partialorder %v2135_v47, 0.0  ;;  %v2235_v23 = vmul.f32 0.2, %v2129_v34 }
 0x389   : > { %vm2227_vm10 = vcmp.gt.f32.partialorder %v2129_v34, 0.0 }
 0x38a   : > { %v2247_v27 = vsel %vm2231_vm14, %v2135_v47, %v2239_v55  ;;  %v8899_v55 = vld [vmem:[%s13475_s16 + $0x8] sm:$0xff] }
 0x38b   : > { %v2108_v20 = vpop.f32.mrf.mxu3  ;;  %4360 = vperm.xlu1 %6986, %v8734_v51   ;;  %v8865_v62 = vpop.permute.xlu2 %3396 }
 0x38c   : > { %v2109_v63 = vadd.f32 %v2108_v20, %v2080_v31  ;;  %14154 = vst [vmem:[#allocation44_spill] sm:$0xff] %v8865_v62  ;;  %v2243_v20 = vsel %vm2227_vm10, %v2129_v34, %v2235_v23  ;;  %v8906_v34 = vpop.permute.xlu0 %2271 }
 0x38d   : > { %4365 = vperm.xlu2 %6987, %v8859_v2   ;;  %3376 = vperm.xlu0 %6997, %v8613_v10   ;;  %v8888_v10 = vld [vmem:[%s14157_s25] sm:$0xff] }
 0x38e   : > { %v2138_v60 = vadd.f32 %v2137_v24, %v2109_v63  ;;  %v2189_v63 = vpop.f32.mrf.mxu2 }
 0x390   : > { %vm2233_vm13 = vcmp.gt.f32.partialorder %v2138_v60, 0.0  ;;  %v2241_v53 = vmul.f32 0.2, %v2138_v60  ;;  %v8873_v48 = vpop.permute.xlu1 %3364 }
 0x391   : > { %14155 = vst [vmem:[#allocation92_spill] sm:$0xff] %v8873_v48  ;;  %v2253_v48 = vld [vmem:[%s14157_s25 + $0x10] sm:$0xff] }
 0x392   : > { %v2249_v4 = vsel %vm2233_vm13, %v2138_v60, %v2241_v53  ;;  %v2245_v53 = vsel %vm2229_vm15, %v2132_v54, %v2237_v8  ;;  %v2163_v54 = vpop.f32.mrf.mxu1  ;;  %v8911_v8 = vld [vmem:[%s14157_s25 + $0x8] sm:$0xff] }
 0x393   : > { %v2215_v57 = vpop.f32.mrf.mxu3  ;;  %2303 = vmatpush.msra.mxu0 %v2249_v4  ;;  %4375 = vperm.xlu1 %6986, %v8871_v33   ;;  %v8882_v31 = vpop.permute.xlu2 %3404 }
 0x394   : > { %14156 = vst [vmem:[#allocation93_spill] sm:$0xff] %v8882_v31  ;;  %v8935_v18 = vpop.permute.xlu0 %2639 }
 0x395   : > { %2304 = vmatpush.msra.mxu0 %v2247_v27  ;;  %4380 = vperm.xlu2 %6987, %v8878_v25   ;;  %v8921_v27 = vld [vmem:[%s13475_s16 + $0x20] sm:$0xff] }
 0x396   : > { %4605 = vperm.xlu0 %6997, %v8734_v51   ;;  %v2192_v60 = vpop.f32.mrf.mxu2 }
 0x397   : > { %2305 = vmatpush.msra.mxu0 %v2245_v53 }
 0x398   : > { %v8890_v24 = vpop.permute.xlu1 %3372 }
 0x399   : > { %14158 = vst [vmem:[#allocation94_spill] sm:$0xff] %v8890_v24  ;;  %2306 = vmatpush.msra.mxu0 %v2243_v20 }
 0x39a   : > { %6848 = vmatmul.msk.f32.vlgmr.msra.gmra.mxu0 %vm2040_vm12, %v8888_v10  ;;  %v2166_v20 = vpop.f32.mrf.mxu1 }
 0x39b   : > { %v2218_v47 = vpop.f32.mrf.mxu3  ;;  %6989 = vset.pattern.permute.xlu1 %v14112_v28  ;;  %v2167_v59 = vadd.f32 %v2166_v20, %v8850_v16 }
 0x39c   : > { %4405 = vperm.xlu1 %6989, %v8838_v30   ;;  %v8902_v7 = vpop.permute.xlu2 %3432 }
 0x39d   : > { %14159 = vst [vmem:[#allocation95_spill] sm:$0xff] %v8902_v7  ;;  %6990 = vset.pattern.permute.xlu2 %v14112_v28  ;;  %v2164_v28 = vadd.f32 %v2163_v54, %v14151_v32  ;;  %v2158_v7 = vadd.f32 %v8844_v22, %v8827_v15  ;;  %v7069_v15 = vld [vmem:[%s14009_s28 + $0x8] sm:$0xff] }
 0x39e   : > { %4409 = vperm.xlu2 %6990, %v8899_v55   ;;  %4625 = vperm.xlu0 %6997, %v8748_v40   ;;  %v2195_v62 = vpop.f32.mrf.mxu2 }
 0x39f   : > { %v2193_v36 = vadd.f32 %v2192_v60, %v2164_v28  ;;  %v2196_v54 = vadd.f32 %v2195_v62, %v2167_v59 }
 0x3a1   : > { %v8913_v4 = vpop.permute.xlu1 %3400 }
 0x3a2   : > { %14160 = vst [vmem:[#allocation96_spill] sm:$0xff] %v8913_v4  ;;  %6849 = vmatmul.msk.f32.gmra.mxu0 %vm2040_vm12, %v8911_v8  ;;  %v2161_v4 = vadd.f32 %v2160_v41, %v14152_v6  ;;  %v2187_v6 = vadd.f32 %v8852_v13, %v2158_v7  ;;  %v2254_v41 = vld [vmem:[%s14157_s25 + $0x18] sm:$0xff] }
 0x3a3   : > { %v2221_v23 = vpop.f32.mrf.mxu3 }
 0x3a4   : > { %4417 = vperm.xlu1 %6989, %v8859_v2   ;;  %v8924_v53 = vpop.permute.xlu2 %3440  ;;  %v2190_v32 = vadd.f32 %v2189_v63, %v2161_v4  ;;  %v2222_v5 = vadd.f32 %v2221_v23, %v2193_v36  ;;  %v2216_v59 = vadd.f32 %v2215_v57, %v2187_v6  ;;  %v8955_v57 = vpop.permute.xlu0 %2654 }
 0x3a5   : > { %14161 = vst [vmem:[#allocation97_spill] sm:$0xff] %v8924_v53 }
 0x3a6   : > { %4421 = vperm.xlu2 %6990, %v8921_v27   ;;  %7000 = vset.pattern.permute.xlu0 %v14124_v17  ;;  %v2219_v28 = vadd.f32 %v2218_v47, %v2190_v32  ;;  %v2240_v62 = vmul.f32 0.2, %v2222_v5  ;;  %vm2232_vm13 = vcmp.gt.f32.partialorder %v2222_v5, 0.0  ;;  %v2236_v13 = vmul.f32 0.2, %v2216_v59  ;;  %14165 = vst [vmem:[#allocation101_spill] sm:$0xff] %v8955_v57 }
 0x3a7   : > { %2798 = vperm.xlu0 %7000, %v7069_v15   ;;  %vm2228_vm15 = vcmp.gt.f32.partialorder %v2216_v59, 0.0 }
 0x3a8   : > { %v2238_v63 = vmul.f32 0.2, %v2219_v28  ;;  %vm2230_vm14 = vcmp.gt.f32.partialorder %v2219_v28, 0.0  ;;  %v2244_v4 = vsel %vm2228_vm15, %v2216_v59, %v2236_v13 }
 0x3a9   : > { %v8937_v53 = vpop.permute.xlu1 %3408 }
 0x3aa   : > { %14162 = vst [vmem:[#allocation98_spill] sm:$0xff] %v8937_v53  ;;  %6850 = vmatmul.msk.f32.gmra.mxu0 %vm2040_vm12, %v2253_v48  ;;  %v2246_v7 = vsel %vm2230_vm14, %v2219_v28, %v2238_v63 }
 0x3ab   : > { %v2224_v31 = vpop.f32.mrf.mxu3 }
 0x3ac   : > { %v2225_v16 = vadd.f32 %v2224_v31, %v2196_v54  ;;  %4425 = vperm.xlu1 %6989, %v8871_v33   ;;  %v2248_v31 = vsel %vm2232_vm13, %v2222_v5, %v2240_v62  ;;  %v8968_v20 = vpop.permute.xlu0 %2923 }
 0x3ad   : > { %v8946_v22 = vpop.permute.xlu2 %3468 }
 0x3ae   : > { %14163 = vst [vmem:[#allocation99_spill] sm:$0xff] %v8946_v22  ;;  %vm2234_vm11 = vcmp.gt.f32.partialorder %v2225_v16, 0.0  ;;  %v2242_v36 = vmul.f32 0.2, %v2225_v16  ;;  %4429 = vperm.xlu2 %6990, %v8878_v25  }
 0x3af   : > { %4669 = vperm.xlu0 %7000, %v8734_v51  }
 0x3b0   : > { %v2250_v60 = vsel %vm2234_vm11, %v2225_v16, %v2242_v36 }
 0x3b1   : > { %2332 = vmatpush.msra.mxu1 %v2250_v60 }
 0x3b2   : > { %6851 = vmatmul.msk.f32.gmra.mxu0 %vm2040_vm12, %v2254_v41  ;;  %v8953_v47 = vpop.permute.xlu1 %3436 }
 0x3b3   : > { %14164 = vst [vmem:[#allocation100_spill] sm:$0xff] %v8953_v47  ;;  %2333 = vmatpush.msra.mxu1 %v2248_v31 }
 0x3b4   : > { %6992 = vset.pattern.permute.xlu1 %v14116_v50  ;;  %v8979_v54 = vpop.permute.xlu0 %3196 }
 0x3b5   : > { %2334 = vmatpush.msra.mxu1 %v2246_v7  ;;  %4469 = vperm.xlu1 %6992, %v8838_v30   ;;  %14170 = vst [vmem:[#allocation106_spill] sm:$0xff] %v8979_v54 }
 0x3b6   : > { %6993 = vset.pattern.permute.xlu2 %v14116_v50  ;;  %v8961_v23 = vpop.permute.xlu2 %3492 }
 0x3b7   : > { %14166 = vst [vmem:[#allocation102_spill] sm:$0xff] %v8961_v23  ;;  %2335 = vmatpush.msra.mxu1 %v2244_v4  ;;  %4473 = vperm.xlu2 %6993, %v8899_v55  }
 0x3b8   : > { %6852 = vmatmul.msk.f32.vlgmr.msra.gmra.mxu1 %vm2040_vm12, %v8888_v10 }
 0x3bb   : > { %v8966_v5 = vpop.permute.xlu1 %3460 }
 0x3bc   : > { %14167 = vst [vmem:[#allocation103_spill] sm:$0xff] %v8966_v5  ;;  %v8994_v6 = vpop.permute.xlu0 %3540 }
 0x3bd   : > { %4481 = vperm.xlu1 %6992, %v8859_v2   ;;  %14174 = vst [vmem:[#allocation110_spill] sm:$0xff] %v8994_v6 }
 0x3be   : > { %v8971_v32 = vpop.permute.xlu2 %3504 }
 0x3bf   : > { %14168 = vst [vmem:[#allocation104_spill] sm:$0xff] %v8971_v32  ;;  %4485 = vperm.xlu2 %6993, %v8921_v27  }
 0x3c0   : > { %6853 = vmatmul.msk.f32.gmra.mxu1 %vm2040_vm12, %v8911_v8 }
 0x3c3   : > { %v8976_v50 = vpop.permute.xlu1 %3472 }
 0x3c4   : > { %14169 = vst [vmem:[#allocation105_spill] sm:$0xff] %v8976_v50  ;;  %v9002_v16 = vpop.permute.xlu0 %2674 }
 0x3c5   : > { %4489 = vperm.xlu1 %6992, %v8871_v33   ;;  %14177 = vst [vmem:[#allocation113_spill] sm:$0xff] %v9002_v16 }
 0x3c7   : > { %4493 = vperm.xlu2 %6993, %v8878_v25   ;;  %v8982_v10 = vpop.permute.xlu2 %3530 }
 0x3c8   : > { %14171 = vst [vmem:[#allocation107_spill] sm:$0xff] %v8982_v10  ;;  %6854 = vmatmul.msk.f32.gmra.mxu1 %vm2040_vm12, %v2253_v48 }
 0x3cc   : > { %v8985_v15 = vpop.permute.xlu1 %3496  ;;  %v9010_v62 = vpop.permute.xlu0 %3268 }
 0x3cd   : > { %14172 = vst [vmem:[#allocation108_spill] sm:$0xff] %v8985_v15  ;;  %6995 = vset.pattern.permute.xlu1 %v14117_v3 }
 0x3ce   : > { %4533 = vperm.xlu1 %6995, %v8838_v30   ;;  %14180 = vst [vmem:[#allocation116_spill] sm:$0xff] %v9010_v62 }
 0x3cf   : > { %6996 = vset.pattern.permute.xlu2 %v14117_v3  ;;  %v8990_v8 = vpop.permute.xlu2 %3724 }
 0x3d0   : > { %14173 = vst [vmem:[#allocation109_spill] sm:$0xff] %v8990_v8  ;;  %6855 = vmatmul.msk.f32.gmra.mxu1 %vm2040_vm12, %v2254_v41  ;;  %4537 = vperm.xlu2 %6996, %v8899_v55  }
 0x3d4   : > { %v9020_v63 = vpop.permute.xlu0 %3720 }
 0x3d5   : > { %v8996_v28 = vpop.permute.xlu1 %3525  ;;  %14183 = vst [vmem:[#allocation119_spill] sm:$0xff] %v9020_v63 }
 0x3d6   : > { %14175 = vst [vmem:[#allocation111_spill] sm:$0xff] %v8996_v28  ;;  %4545 = vperm.xlu1 %6995, %v8859_v2  }
 0x3d7   : > { %v8999_v48 = vpop.permute.xlu2 %3799 }
 0x3d8   : > { %14176 = vst [vmem:[#allocation112_spill] sm:$0xff] %v8999_v48  ;;  %4549 = vperm.xlu2 %6996, %v8921_v27  }
 0x3dc   : > { %v9030_v7 = vpop.permute.xlu0 %3726 }
 0x3dd   : > { %v9004_v59 = vpop.permute.xlu1 %3535  ;;  %14187 = vst [vmem:[#allocation123_spill] sm:$0xff] %v9030_v7 }
 0x3de   : > { %14178 = vst [vmem:[#allocation114_spill] sm:$0xff] %v9004_v59  ;;  %4553 = vperm.xlu1 %6995, %v8871_v33  }
 0x3df   : > { %v9007_v3 = vpop.permute.xlu2 %4350 }
 0x3e0   : > { %14179 = vst [vmem:[#allocation115_spill] sm:$0xff] %v9007_v3  ;;  %4557 = vperm.xlu2 %6996, %v8878_v25  }
 0x3e5   : > { %v9012_v36 = vpop.permute.xlu1 %3722 }
 0x3e6   : > { %14181 = vst [vmem:[#allocation117_spill] sm:$0xff] %v9012_v36  ;;  %6998 = vset.pattern.permute.xlu1 %v14119_v9 }
 0x3e7   : > { %4597 = vperm.xlu1 %6998, %v8838_v30   ;;  %v9016_v41 = vpop.permute.xlu2 %4365 }
 0x3e8   : > { %14182 = vst [vmem:[#allocation118_spill] sm:$0xff] %v9016_v41  ;;  %6999 = vset.pattern.permute.xlu2 %v14119_v9 }
 0x3e9   : > { %4601 = vperm.xlu2 %6999, %v8899_v55  }
 0x3ed   : > { %v9022_v60 = vpop.permute.xlu1 %3794 }
 0x3ee   : > { %14184 = vst [vmem:[#allocation120_spill] sm:$0xff] %v9022_v60 }
 0x3ef   : > { %4609 = vperm.xlu1 %6998, %v8859_v2   ;;  %v9025_v13 = vpop.permute.xlu2 %4380 }
 0x3f0   : > { %14185 = vst [vmem:[#allocation121_spill] sm:$0xff] %v9025_v13  ;;  %v9042_v13 = vpop.permute.xlu0 %4413 }
 0x3f1   : > { %4613 = vperm.xlu2 %6999, %v8921_v27   ;;  %14191 = vst [vmem:[#allocation127_spill] sm:$0xff] %v9042_v13  ;;  %v14199_v13 = vld [vmem:[#allocation46_spill] sm:$0xff] }
 0x3f5   : > { %v9028_v31 = vpop.permute.xlu1 %3809 }
 0x3f6   : > { %14186 = vst [vmem:[#allocation122_spill] sm:$0xff] %v9028_v31 }
 0x3f7   : > { %4617 = vperm.xlu1 %6998, %v8871_v33  }
 0x3f8   : > { %v9033_v4 = vpop.permute.xlu2 %4409 }
 0x3f9   : > { %14188 = vst [vmem:[#allocation124_spill] sm:$0xff] %v9033_v4  ;;  %4621 = vperm.xlu2 %6999, %v8878_v25   ;;  %v9050_v4 = vpop.permute.xlu0 %4433 }
 0x3fa   : > { %14194 = vst [vmem:[#allocation130_spill] sm:$0xff] %v9050_v4 }
 0x3fd   : > { %v9036_v9 = vpop.permute.xlu1 %4360 }
 0x3fe   : > { %14189 = vst [vmem:[#allocation125_spill] sm:$0xff] %v9036_v9 }
 0x3ff   : > { %7001 = vset.pattern.permute.xlu1 %v14124_v17 }
 0x400   : > { %4661 = vperm.xlu1 %7001, %v8838_v30   ;;  %v9040_v41 = vpop.permute.xlu2 %4421 }
 0x401   : > { %14190 = vst [vmem:[#allocation126_spill] sm:$0xff] %v9040_v41  ;;  %7002 = vset.pattern.permute.xlu2 %v14124_v17  ;;  %v9056_v48 = vpop.permute.xlu0 %2710 }
 0x402   : > { %4665 = vperm.xlu2 %7002, %v8899_v55   ;;  %14197 = vst [vmem:[#allocation133_spill] sm:$0xff] %v9056_v48 }
 0x405   : > { %v9046_v3 = vpop.permute.xlu1 %4375 }
 0x406   : > { %14192 = vst [vmem:[#allocation128_spill] sm:$0xff] %v9046_v3 }
 0x408   : > { %v9048_v54 = vpop.permute.xlu2 %4429 }
 0x409   : > { %14193 = vst [vmem:[#allocation129_spill] sm:$0xff] %v9048_v54  ;;  %v9071_v54 = vpop.permute.xlu0 %3304 }
 0x40a   : > { %14202 = vst [vmem:[#allocation136_spill] sm:$0xff] %v9071_v54 }
 0x40e   : > { %v9052_v31 = vpop.permute.xlu1 %4405 }
 0x40f   : > { %14195 = vst [vmem:[#allocation131_spill] sm:$0xff] %v9052_v31 }
 0x411   : > { %v9054_v9 = vpop.permute.xlu2 %4473 }
 0x412   : > { %14196 = vst [vmem:[#allocation132_spill] sm:$0xff] %v9054_v9 }
 0x416   : > { %v9058_v41 = vpop.permute.xlu1 %4417 }
 0x417   : > { %v2308_v60 = vpop.f32.mrf.mxu0  ;;  %14198 = vst [vmem:[#allocation134_spill] sm:$0xff] %v9058_v41 }
 0x418   : > { %v2309_v7 = vadd.f32 %v2308_v60, %v14199_v13  ;;  %v14204_v60 = vld [vmem:[#allocation43_spill] sm:$0xff] }
 0x419   : > { %v9069_v4 = vpop.permute.xlu2 %4485 }
 0x41a   : > { %vm2349_vm10 = vcmp.gt.f32.partialorder %v2309_v7, 0.0  ;;  %v2357_v17 = vmul.f32 0.2, %v2309_v7  ;;  %14201 = vst [vmem:[#allocation135_spill] sm:$0xff] %v9069_v4  ;;  %v9084_v4 = vpop.permute.xlu0 %4477 }
 0x41b   : > { %14206 = vst [vmem:[#allocation138_spill] sm:$0xff] %v9084_v4 }
 0x41c   : > { %v9061_v8 = vsel %vm2349_vm10, %v2309_v7, %v2357_v17 }
 0x41d   : > { %14200 = vst [vmem:[#allocation46_spill] sm:$0xff] %v9061_v8  ;;  %2437 = vrot.lane.b32.xlu0 %v9061_v8, %s14030_s30  ;;  %2405 = vrot.lane.b32.xlu1 %v9061_v8, %s14027_s1 }
 0x41e   : > { %2373 = vrot.lane.b32.xlu2 %v9061_v8, %s14044_s7  ;;  %v9073_v3 = vpop.permute.xlu1 %4425 }
 0x41f   : > { %v2311_v41 = vpop.f32.mrf.mxu0  ;;  %14203 = vst [vmem:[#allocation137_spill] sm:$0xff] %v9073_v3 }
 0x420   : > { %v2312_v9 = vadd.f32 %v2311_v41, %v14204_v60 }
 0x421   : > { %v9082_v17 = vpop.permute.xlu2 %4493 }
 0x422   : > { %v2359_v7 = vmul.f32 0.2, %v2312_v9  ;;  %14205 = vst [vmem:[#allocation43_spill] sm:$0xff] %v9082_v17  ;;  %vm2351_vm11 = vcmp.gt.f32.partialorder %v2312_v9, 0.0  ;;  %v9098_v36 = vpop.permute.xlu0 %4497 }
 0x423   : > { %14210 = vst [vmem:[#allocation142_spill] sm:$0xff] %v9098_v36 }
 0x424   : > { %v9088_v3 = vsel %vm2351_vm11, %v2312_v9, %v2359_v7 }
 0x425   : > { %2533 = vrot.lane.b32.xlu0 %v9061_v8, %s14036_s27  ;;  %2501 = vrot.lane.b32.xlu1 %v9061_v8, %s14034_s26  ;;  %14208 = vst [vmem:[#allocation140_spill] sm:$0xff] %v9088_v3 }
 0x426   : > { %2469 = vrot.lane.b32.xlu2 %v9061_v8, %s14033_s6 }
 0x427   : > { %v9086_v31 = vpop.permute.xlu1 %4469  ;;  %v2314_v7 = vpop.f32.mrf.mxu0 }
 0x428   : > { %14207 = vst [vmem:[#allocation139_spill] sm:$0xff] %v9086_v31  ;;  %v2315_v4 = vadd.f32 %v2314_v7, %v8906_v34 }
 0x42a   : > { %v9096_v41 = vpop.permute.xlu2 %4537  ;;  %v9111_v31 = vpop.permute.xlu0 %3340  ;;  %vm2353_vm13 = vcmp.gt.f32.partialorder %v2315_v4, 0.0 }
 0x42b   : > { %14209 = vst [vmem:[#allocation141_spill] sm:$0xff] %v9096_v41 }
 0x42c   : > { %14213 = vst [vmem:[#allocation145_spill] sm:$0xff] %v9111_v31 }
 0x42d   : > { %2375 = vrot.lane.b32.xlu0 %v9088_v3, %s14044_s7  ;;  %2597 = vrot.lane.b32.xlu1 %v9061_v8, %s14040_s0 }
 0x42e   : > { %2565 = vrot.lane.b32.xlu2 %v9061_v8, %s14039_s8 }
 0x42f   : > { %v9104_v9 = vpop.permute.xlu1 %4481 }
 0x430   : > { %14211 = vst [vmem:[#allocation143_spill] sm:$0xff] %v9104_v9  ;;  %v2361_v9 = vmul.f32 0.2, %v2315_v4 }
 0x432   : > { %v9109_v17 = vpop.permute.xlu2 %4549  ;;  %v9121_v41 = vsel %vm2353_vm13, %v2315_v4, %v2361_v9 }
 0x433   : > { %14212 = vst [vmem:[#allocation144_spill] sm:$0xff] %v9109_v17  ;;  %v9131_v17 = vpop.permute.xlu0 %4541 }
 0x434   : > { %14215 = vst [vmem:[#allocation147_spill] sm:$0xff] %v9121_v41 }
 0x435   : > { %2471 = vrot.lane.b32.xlu0 %v9088_v3, %s14033_s6  ;;  %2439 = vrot.lane.b32.xlu1 %v9088_v3, %s14030_s30  ;;  %14217 = vst [vmem:[#allocation149_spill] sm:$0xff] %v9131_v17 }
 0x436   : > { %2407 = vrot.lane.b32.xlu2 %v9088_v3, %s14027_s1 }
 0x437   : > { %v9119_v36 = vpop.permute.xlu1 %4489 }
 0x438   : > { %14214 = vst [vmem:[#allocation146_spill] sm:$0xff] %v9119_v36  ;;  %v2317_v36 = vpop.f32.mrf.mxu0 }
 0x43a   : > { %v9129_v7 = vpop.permute.xlu2 %4557 }
 0x43b   : > { %14216 = vst [vmem:[#allocation148_spill] sm:$0xff] %v9129_v7  ;;  %v9143_v9 = vpop.permute.xlu0 %4561  ;;  %v14222_v7 = vld [vmem:[#allocation48_spill] sm:$0xff] }
 0x43c   : > { %14220 = vst [vmem:[#allocation152_spill] sm:$0xff] %v9143_v9  ;;  %v2318_v17 = vadd.f32 %v2317_v36, %v14222_v7 }
 0x43d   : > { %2567 = vrot.lane.b32.xlu0 %v9088_v3, %s14039_s8  ;;  %2535 = vrot.lane.b32.xlu1 %v9088_v3, %s14036_s27 }
 0x43e   : > { %2503 = vrot.lane.b32.xlu2 %v9088_v3, %s14034_s26  ;;  %vm2355_vm14 = vcmp.gt.f32.partialorder %v2318_v17, 0.0 }
 0x440   : > { %v9133_v63 = vpop.permute.xlu1 %4533 }
 0x441   : > { %14218 = vst [vmem:[#allocation150_spill] sm:$0xff] %v9133_v63  ;;  %v2363_v63 = vmul.f32 0.2, %v2318_v17 }
 0x443   : > { %v9141_v4 = vpop.permute.xlu2 %4601  ;;  %v9158_v9 = vsel %vm2355_vm14, %v2318_v17, %v2363_v63 }
 0x444   : > { %14219 = vst [vmem:[#allocation151_spill] sm:$0xff] %v9141_v4  ;;  %v9156_v4 = vpop.permute.xlu0 %2762 }
 0x445   : > { %2409 = vrot.lane.b32.xlu0 %v9121_v41, %s14027_s1  ;;  %2377 = vrot.lane.b32.xlu1 %v9121_v41, %s14044_s7  ;;  %14224 = vst [vmem:[#allocation154_spill] sm:$0xff] %v9158_v9 }
 0x446   : > { %2599 = vrot.lane.b32.xlu2 %v9088_v3, %s14040_s0 }
 0x448   : > { %v9145_v6 = vpop.permute.xlu1 %4545 }
 0x449   : > { %14221 = vst [vmem:[#allocation153_spill] sm:$0xff] %v9145_v6  ;;  %v2337_v6 = vpop.f32.mrf.mxu1 }
 0x44b   : > { %v9154_v48 = vpop.permute.xlu2 %4613 }
 0x44c   : > { %14223 = vst [vmem:[#allocation48_spill] sm:$0xff] %v9154_v48  ;;  %v9168_v57 = vpop.permute.xlu0 %3376  ;;  %v2338_v48 = vadd.f32 %v2337_v6, %v14199_v13 }
 0x44d   : > { %2505 = vrot.lane.b32.xlu0 %v9121_v41, %s14034_s26  ;;  %2473 = vrot.lane.b32.xlu1 %v9121_v41, %s14033_s6  ;;  %14226 = vst [vmem:[#allocation156_spill] sm:$0xff] %v9168_v57 }
 0x44e   : > { %2441 = vrot.lane.b32.xlu2 %v9121_v41, %s14030_s30  ;;  %v2358_v17 = vmul.f32 0.2, %v2338_v48  ;;  %vm2350_vm15 = vcmp.gt.f32.partialorder %v2338_v48, 0.0 }
 0x450   : > { %v9164_v36 = vpop.permute.xlu1 %4553  ;;  %v9183_v50 = vsel %vm2350_vm15, %v2338_v48, %v2358_v17 }
 0x451   : > { %14225 = vst [vmem:[#allocation155_spill] sm:$0xff] %v9164_v36  ;;  %v2340_v17 = vpop.f32.mrf.mxu1 }
 0x452   : > { %14230 = vst [vmem:[#allocation160_spill] sm:$0xff] %v9183_v50 }
 0x453   : > { %v9171_v32 = vpop.permute.xlu2 %4621 }
 0x454   : > { %14227 = vst [vmem:[#allocation157_spill] sm:$0xff] %v9171_v32  ;;  %v9181_v36 = vpop.permute.xlu0 %4605 }
 0x455   : > { %2601 = vrot.lane.b32.xlu0 %v9121_v41, %s14040_s0  ;;  %2569 = vrot.lane.b32.xlu1 %v9121_v41, %s14039_s8  ;;  %14229 = vst [vmem:[#allocation159_spill] sm:$0xff] %v9181_v36 }
 0x456   : > { %2537 = vrot.lane.b32.xlu2 %v9121_v41, %s14036_s27 }
 0x459   : > { %v9179_v63 = vpop.permute.xlu1 %4597  ;;  %v2343_v57 = vpop.f32.mrf.mxu1 }
 0x45a   : > { %14228 = vst [vmem:[#allocation158_spill] sm:$0xff] %v9179_v63 }
 0x45c   : > { %v9191_v6 = vpop.permute.xlu2 %4665  ;;  %v9195_v32 = vpop.permute.xlu0 %4625 }
 0x45d   : > { %2443 = vrot.lane.b32.xlu0 %v9158_v9, %s14030_s30  ;;  %2411 = vrot.lane.b32.xlu1 %v9158_v9, %s14027_s1  ;;  %14231 = vst [vmem:[#allocation161_spill] sm:$0xff] %v9191_v6  ;;  %v2341_v6 = vadd.f32 %v2340_v17, %v14204_v60 }
 0x45e   : > { %2379 = vrot.lane.b32.xlu2 %v9158_v9, %s14044_s7  ;;  %14233 = vst [vmem:[#allocation163_spill] sm:$0xff] %v9195_v32 }
 0x45f   : > { %v2360_v32 = vmul.f32 0.2, %v2341_v6  ;;  %vm2352_vm10 = vcmp.gt.f32.partialorder %v2341_v6, 0.0 }
 0x461   : > { %v9193_v13 = vpop.permute.xlu1 %4609  ;;  %v9218_v53 = vsel %vm2352_vm10, %v2341_v6, %v2360_v32  ;;  %v2346_v16 = vpop.f32.mrf.mxu1 }
 0x462   : > { %14232 = vst [vmem:[#allocation162_spill] sm:$0xff] %v9193_v13  ;;  %v2347_v62 = vadd.f32 %v2346_v16, %v14222_v7 }
 0x464   : > { %v9208_v63 = vpop.permute.xlu0 %2798  ;;  %v2364_v59 = vmul.f32 0.2, %v2347_v62  ;;  %vm2356_vm13 = vcmp.gt.f32.partialorder %v2347_v62, 0.0 }
 0x465   : > { %2539 = vrot.lane.b32.xlu0 %v9158_v9, %s14036_s27  ;;  %2507 = vrot.lane.b32.xlu1 %v9158_v9, %s14034_s26 }
 0x466   : > { %2475 = vrot.lane.b32.xlu2 %v9158_v9, %s14033_s6  ;;  %v9284_v54 = vsel %vm2356_vm13, %v2347_v62, %v2364_v59 }
 0x467   : > { %14238 = vst [vmem:[#allocation168_spill] sm:$0xff] %v9284_v54 }
 0x469   : > { %v9205_v36 = vpop.permute.xlu1 %4617 }
 0x46a   : > { %14234 = vst [vmem:[#allocation164_spill] sm:$0xff] %v9205_v36 }
 0x46c   : > { %v9228_v17 = vpop.permute.xlu0 %4669 }
 0x46d   : > { %2381 = vrot.lane.b32.xlu0 %v9183_v50, %s14044_s7  ;;  %2603 = vrot.lane.b32.xlu1 %v9158_v9, %s14040_s0  ;;  %14236 = vst [vmem:[#allocation166_spill] sm:$0xff] %v9228_v17  ;;  %v2344_v17 = vadd.f32 %v2343_v57, %v8906_v34 }
 0x46e   : > { %2571 = vrot.lane.b32.xlu2 %v9158_v9, %s14039_s8 }
 0x46f   : > { %v2362_v10 = vmul.f32 0.2, %v2344_v17  ;;  %vm2354_vm11 = vcmp.gt.f32.partialorder %v2344_v17, 0.0 }
 0x471   : > { %v9257_v5 = vsel %vm2354_vm11, %v2344_v17, %v2362_v10 }
 0x472   : > { %v9224_v60 = vpop.permute.xlu1 %4661  ;;  %14237 = vst [vmem:[#allocation167_spill] sm:$0xff] %v9257_v5 }
 0x473   : > { %14235 = vst [vmem:[#allocation165_spill] sm:$0xff] %v9224_v60 }
 0x475   : > { %2477 = vrot.lane.b32.xlu0 %v9183_v50, %s14033_s6  ;;  %2445 = vrot.lane.b32.xlu1 %v9183_v50, %s14030_s30 }
 0x476   : > { %2413 = vrot.lane.b32.xlu2 %v9183_v50, %s14027_s1 }
 0x478   : > { %v9203_v48 = vpop.permute.xlu2 %2373 }
 0x47d   : > { %2573 = vrot.lane.b32.xlu0 %v9183_v50, %s14039_s8  ;;  %2541 = vrot.lane.b32.xlu1 %v9183_v50, %s14036_s27 }
 0x47e   : > { %2509 = vrot.lane.b32.xlu2 %v9183_v50, %s14034_s26 }
 0x480   : > { %v9216_v13 = vpop.permute.xlu2 %2469 }
 0x485   : > { %2415 = vrot.lane.b32.xlu0 %v9218_v53, %s14027_s1  ;;  %2383 = vrot.lane.b32.xlu1 %v9218_v53, %s14044_s7 }
 0x486   : > { %2605 = vrot.lane.b32.xlu2 %v9183_v50, %s14040_s0 }
 0x488   : > { %v9230_v36 = vpop.permute.xlu2 %2565 }
 0x48d   : > { %2511 = vrot.lane.b32.xlu0 %v9218_v53, %s14034_s26  ;;  %2479 = vrot.lane.b32.xlu1 %v9218_v53, %s14033_s6 }
 0x48e   : > { %2447 = vrot.lane.b32.xlu2 %v9218_v53, %s14030_s30 }
 0x48f   : > { %v9238_v32 = vpop.permute.xlu0 %2437  ;;  %v9240_v6 = vpop.permute.xlu1 %2405 }
 0x490   : > { %v9242_v60 = vpop.permute.xlu2 %2407 }
 0x495   : > { %2607 = vrot.lane.b32.xlu0 %v9218_v53, %s14040_s0  ;;  %2575 = vrot.lane.b32.xlu1 %v9218_v53, %s14039_s8 }
 0x496   : > { %2543 = vrot.lane.b32.xlu2 %v9218_v53, %s14036_s27 }
 0x497   : > { %v9251_v9 = vpop.permute.xlu0 %2533  ;;  %v9253_v28 = vpop.permute.xlu1 %2501 }
 0x498   : > { %v9255_v23 = vpop.permute.xlu2 %2503 }
 0x49d   : > { %2449 = vrot.lane.b32.xlu0 %v9257_v5, %s14030_s30  ;;  %2417 = vrot.lane.b32.xlu1 %v9257_v5, %s14027_s1 }
 0x49e   : > { %2385 = vrot.lane.b32.xlu2 %v9257_v5, %s14044_s7 }
 0x49f   : > { %v9265_v34 = vpop.permute.xlu0 %2375  ;;  %v9267_v57 = vpop.permute.xlu1 %2597 }
 0x4a0   : > { %v9269_v15 = vpop.permute.xlu2 %2599 }
 0x4a5   : > { %2545 = vrot.lane.b32.xlu0 %v9257_v5, %s14036_s27  ;;  %2513 = vrot.lane.b32.xlu1 %v9257_v5, %s14034_s26 }
 0x4a6   : > { %2481 = vrot.lane.b32.xlu2 %v9257_v5, %s14033_s6 }
 0x4a7   : > { %v9278_v10 = vpop.permute.xlu0 %2471  ;;  %v9280_v17 = vpop.permute.xlu1 %2439 }
 0x4a8   : > { %v9282_v22 = vpop.permute.xlu2 %2441 }
 0x4ad   : > { %2387 = vrot.lane.b32.xlu0 %v9284_v54, %s14044_s7  ;;  %2609 = vrot.lane.b32.xlu1 %v9257_v5, %s14040_s0 }
 0x4ae   : > { %2577 = vrot.lane.b32.xlu2 %v9257_v5, %s14039_s8 }
 0x4af   : > { %v9292_v16 = vpop.permute.xlu0 %2567  ;;  %v9294_v7 = vpop.permute.xlu1 %2535 }
 0x4b0   : > { %v9296_v47 = vpop.permute.xlu2 %2537 }
 0x4b1   : > { %14239 = vst [vmem:[#allocation169_spill] sm:$0xff] %v9296_v47 }
 0x4b5   : > { %2483 = vrot.lane.b32.xlu0 %v9284_v54, %s14033_s6  ;;  %2451 = vrot.lane.b32.xlu1 %v9284_v54, %s14030_s30 }
 0x4b6   : > { %2419 = vrot.lane.b32.xlu2 %v9284_v54, %s14027_s1 }
 0x4b7   : > { %v9304_v59 = vpop.permute.xlu0 %2409  ;;  %v9306_v62 = vpop.permute.xlu1 %2377 }
 0x4b8   : > { %v9308_v37 = vpop.permute.xlu2 %2379 }
 0x4b9   : > { %14240 = vst [vmem:[#allocation170_spill] sm:$0xff] %v9308_v37 }
 0x4bd   : > { %4689 = vperm.xlu0 %7000, %v8748_v40   ;;  %2547 = vrot.lane.b32.xlu1 %v9284_v54, %s14036_s27 }
 0x4be   : > { %2515 = vrot.lane.b32.xlu2 %v9284_v54, %s14034_s26 }
 0x4bf   : > { %v9315_v47 = vpop.permute.xlu0 %2505  ;;  %v9317_v43 = vpop.permute.xlu1 %2473 }
 0x4c0   : > { %14241 = vst [vmem:[#allocation171_spill] sm:$0xff] %v9315_v47  ;;  %v9319_v31 = vpop.permute.xlu2 %2475 }
 0x4c1   : > { %14242 = vst [vmem:[#allocation172_spill] sm:$0xff] %v9319_v31  ;;  %v7070_v31 = vld [vmem:[%s13471_s12] sm:$0xff] }
 0x4c5   : > { %7003 = vset.pattern.permute.xlu0 %v14128_v42  ;;  %4673 = vperm.xlu1 %7001, %v8859_v2  }
 0x4c6   : > { %4677 = vperm.xlu2 %7002, %v8921_v27   ;;  %2834 = vperm.xlu0 %7003, %v8671_v12  }
 0x4c7   : > { %v9325_v40 = vpop.permute.xlu0 %2601  ;;  %v9327_v37 = vpop.permute.xlu1 %2569 }
 0x4c8   : > { %14243 = vst [vmem:[#allocation173_spill] sm:$0xff] %v9325_v40  ;;  %v9329_v5 = vpop.permute.xlu2 %2571 }
 0x4c9   : > { %14244 = vst [vmem:[#allocation174_spill] sm:$0xff] %v9327_v37 }
 0x4ca   : > { %14245 = vst [vmem:[#allocation175_spill] sm:$0xff] %v9329_v5 }
 0x4cd   : > { %4681 = vperm.xlu1 %7001, %v8871_v33  }
 0x4ce   : > { %4685 = vperm.xlu2 %7002, %v8878_v25   ;;  %3428 = vperm.xlu0 %7003, %v7070_v31  }
 0x4cf   : > { %v9336_v47 = vpop.permute.xlu0 %2443  ;;  %v9338_v24 = vpop.permute.xlu1 %2411 }
 0x4d0   : > { %14246 = vst [vmem:[#allocation176_spill] sm:$0xff] %v9336_v47  ;;  %v2414_v12 = vpop.permute.xlu2 %2413 }
 0x4d1   : > { %14247 = vst [vmem:[#allocation177_spill] sm:$0xff] %v9338_v24 }
 0x4d5   : > { %7004 = vset.pattern.permute.xlu1 %v14128_v42 }
 0x4d6   : > { %7005 = vset.pattern.permute.xlu2 %v14128_v42  ;;  %4733 = vperm.xlu0 %7003, %v8734_v51  }
 0x4d7   : > { %4729 = vperm.xlu2 %7005, %v8899_v55   ;;  %v9344_v33 = vpop.permute.xlu0 %2539  ;;  %v9346_v25 = vpop.permute.xlu1 %2507  ;;  %4725 = vperm.xlu1 %7004, %v8838_v30  }
 0x4d8   : > { %14248 = vst [vmem:[#allocation178_spill] sm:$0xff] %v9344_v33  ;;  %v2510_v51 = vpop.permute.xlu2 %2509 }
 0x4d9   : > { %14249 = vst [vmem:[#allocation179_spill] sm:$0xff] %v9346_v25 }
 0x4de   : > { %2579 = vrot.lane.b32.xlu0 %v9284_v54, %s14039_s8 }
 0x4df   : > { %2611 = vrot.lane.b32.xlu2 %v9284_v54, %s14040_s0  ;;  %v2382_v31 = vpop.permute.xlu0 %2381  ;;  %v9353_v5 = vpop.permute.xlu1 %2603  ;;  %4737 = vperm.xlu1 %7004, %v8859_v2  }
 0x4e0   : > { %14250 = vst [vmem:[#allocation180_spill] sm:$0xff] %v9353_v5  ;;  %v2393_v30 = vsel %vm794_vm0, %v2382_v31, %v9203_v48  ;;  %v9360_v33 = vpop.permute.xlu2 %2605  ;;  %v2389_v54 = vsel %vm794_vm0, %v9203_v48, %v2382_v31  ;;  %v2425_v5 = vsel %vm810_vm4, %v2414_v12, %v9240_v6 }
 0x4e1   : > { %v9375_v25 = vmul.f32 %v2393_v30, %v14090_v19  ;;  %v9381_v48 = vmul.f32 %v2389_v54, %v14092_v58  ;;  %v9384_v31 = vmul.f32 %v2425_v5, %v14087_v38  ;;  %v14257_v30 = vld [vmem:[#allocation54_spill] sm:$0xff] }
 0x4e3   : > { %14251 = vst [vmem:[#allocation181_spill] sm:$0xff] %v9375_v25  ;;  %v2658_v54 = vmul.f32 %v8935_v18, %v9381_v48 }
 0x4e4   : > { %14252 = vst [vmem:[#allocation182_spill] sm:$0xff] %v9381_v48 }
 0x4e5   : > { %14253 = vst [vmem:[#allocation183_spill] sm:$0xff] %v9384_v31 }
 0x4e7   : > { %4741 = vperm.xlu2 %7005, %v8921_v27   ;;  %v2478_v42 = vpop.permute.xlu0 %2477  ;;  %v2446_v55 = vpop.permute.xlu1 %2445  ;;  %v2421_v27 = vsel %vm810_vm4, %v9240_v6, %v2414_v12 }
 0x4e8   : > { %v2457_v2 = vsel %vm826_vm3, %v2446_v55, %v9238_v32  ;;  %v2453_v47 = vsel %vm826_vm3, %v9238_v32, %v2446_v55  ;;  %v9392_v6 = vmul.f32 %v2421_v27, %v14089_v61  ;;  %v2657_v32 = vmul.f32 %v8935_v18, %v9375_v25  ;;  %v2448_v48 = vpop.permute.xlu2 %2447 }
 0x4e9   : > { %v9387_v24 = vmul.f32 %v2457_v2, %v14085_v21  ;;  %v9395_v12 = vmul.f32 %v2453_v47, %v14086_v44  ;;  %v2485_v5 = vsel %vm842_vm5, %v9216_v13, %v2478_v42  ;;  %v2489_v55 = vsel %vm842_vm5, %v2478_v42, %v9216_v13  ;;  %v14258_v47 = vld [vmem:[#allocation49_spill] sm:$0xff] }
 0x4ea   : > { %14255 = vst [vmem:[#allocation185_spill] sm:$0xff] %v9392_v6  ;;  %v2681_v2 = vmul.f32 %v14257_v30, %v9384_v31  ;;  %v2682_v25 = vmul.f32 %v14257_v30, %v9392_v6  ;;  %v9416_v14 = vmul.f32 %v2489_v55, %v14082_v49  ;;  %v9419_v56 = vmul.f32 %v2485_v5, %v14083_v11 }
 0x4eb   : > { %14254 = vst [vmem:[#allocation184_spill] sm:$0xff] %v9387_v24  ;;  %v2713_v27 = vmul.f32 %v14258_v47, %v9387_v24  ;;  %v2714_v18 = vmul.f32 %v14258_v47, %v9395_v12  ;;  %v2777_v24 = vmul.f32 %v9156_v4, %v9061_v8  ;;  %v2517_v30 = vsel %vm858_vm6, %v9253_v28, %v2510_v51 }
 0x4ec   : > { %14256 = vst [vmem:[#allocation186_spill] sm:$0xff] %v9395_v12  ;;  %v2689_v41 = vadd.f32 %v2681_v2, %v2657_v32  ;;  %v2690_v13 = vadd.f32 %v2682_v25, %v2658_v54  ;;  %v2521_v32 = vsel %vm858_vm6, %v2510_v51, %v9253_v28  ;;  %v14261_v2 = vld [vmem:[#allocation60_spill] sm:$0xff] }
 0x4ed   : > { %14259 = vst [vmem:[#allocation54_spill] sm:$0xff] %v9416_v14  ;;  %v2745_v5 = vmul.f32 %v14261_v2, %v9416_v14 }
 0x4ee   : > { %14260 = vst [vmem:[#allocation49_spill] sm:$0xff] %v9419_v56  ;;  %v2721_v42 = vadd.f32 %v2713_v27, %v2689_v41  ;;  %v2722_v55 = vadd.f32 %v2714_v18, %v2690_v13  ;;  %v2746_v41 = vmul.f32 %v14261_v2, %v9419_v56  ;;  %v9452_v18 = vmul.f32 %v2517_v30, %v14098_v0  ;;  %v14264_v30 = vld [vmem:[#allocation47_spill] sm:$0xff]  ;;  %v14267_v56 = vld [vmem:[#allocation66_spill] sm:$0xff] }
 0x4ef   : > { %v9389_v40 = vpop.permute.xlu0 %2573  ;;  %v2542_v37 = vpop.permute.xlu1 %2541  ;;  %v9461_v2 = vmul.f32 %v2521_v32, %v14109_v45  ;;  %v2779_v14 = vmul.f32 %v14267_v56, %v9088_v3 }
 0x4f0   : > { %14262 = vst [vmem:[#allocation60_spill] sm:$0xff] %v9452_v18  ;;  %v2753_v13 = vadd.f32 %v2745_v5, %v2721_v42  ;;  %v2553_v42 = vsel %vm874_vm7, %v2542_v37, %v9251_v9 }
 0x4f1   : > { %14263 = vst [vmem:[#allocation187_spill] sm:$0xff] %v9461_v2 }
 0x4f7   : > { %v2416_v31 = vpop.permute.xlu0 %2415  ;;  %v2384_v52 = vpop.permute.xlu1 %2383 }
 0x4f8   : > { %v2422_v25 = vsel %vm810_vm4, %v9242_v60, %v2416_v31  ;;  %v2426_v54 = vsel %vm810_vm4, %v2416_v31, %v9242_v60  ;;  %v2390_v51 = vsel %vm794_vm0, %v9265_v34, %v2384_v52  ;;  %v2394_v27 = vsel %vm794_vm0, %v2384_v52, %v9265_v34 }
 0x4f9   : > { %v9440_v47 = vmul.f32 %v2426_v54, %v14087_v38  ;;  %v9443_v28 = vmul.f32 %v2422_v25, %v14089_v61  ;;  %v9455_v60 = vmul.f32 %v2394_v27, %v14090_v19  ;;  %v9458_v31 = vmul.f32 %v2390_v51, %v14092_v58  ;;  %v2544_v51 = vpop.permute.xlu2 %2543 }
 0x4fa   : > { %v2754_v25 = vadd.f32 %v2746_v41, %v2722_v55  ;;  %v2458_v54 = vsel %vm826_vm3, %v2448_v48, %v9280_v17  ;;  %v2549_v52 = vsel %vm874_vm7, %v9251_v9, %v2542_v37  ;;  %v2454_v34 = vsel %vm826_vm3, %v9280_v17, %v2448_v48  ;;  %v14265_v55 = vld [vmem:[#allocation50_spill] sm:$0xff] }
 0x4fb   : > { %v2683_v32 = vmul.f32 %v14264_v30, %v9440_v47  ;;  %v2659_v5 = vmul.f32 %v14265_v55, %v9455_v60  ;;  %v2778_v41 = vmul.f32 %v9156_v4, %v9183_v50  ;;  %v2684_v27 = vmul.f32 %v14264_v30, %v9443_v28  ;;  %v14268_v4 = vld [vmem:[#allocation63_spill] sm:$0xff] }
 0x4fc   : > { %v2660_v17 = vmul.f32 %v14265_v55, %v9458_v31  ;;  %v9486_v48 = vmul.f32 %v2458_v54, %v14085_v21  ;;  %v9489_v37 = vmul.f32 %v2549_v52, %v14091_v35  ;;  %v2785_v9 = vadd.f32 %v2777_v24, %v2753_v13 }
 0x4fd   : > { %v2809_v50 = vmul.f32 %v14268_v4, %v9452_v18  ;;  %v9496_v30 = vmul.f32 %v2454_v34, %v14086_v44  ;;  %v9499_v55 = vmul.f32 %v2553_v42, %v14103_v29  ;;  %v2786_v54 = vadd.f32 %v2778_v41, %v2754_v25 }
 0x4fe   : > { %14266 = vst [vmem:[#allocation47_spill] sm:$0xff] %v9489_v37  ;;  %v2810_v52 = vmul.f32 %v14268_v4, %v9461_v2  ;;  %v2691_v6 = vadd.f32 %v2683_v32, %v2659_v5  ;;  %v2581_v34 = vsel %vm890_vm8, %v9230_v36, %v9389_v40  ;;  %v2692_v42 = vadd.f32 %v2684_v27, %v2660_v17  ;;  %v14270_v32 = vld [vmem:[#allocation58_spill] sm:$0xff]  ;;  %v14271_v4 = vld [vmem:[#allocation73_spill] sm:$0xff] }
 0x4ff   : > { %v2512_v8 = vpop.permute.xlu0 %2511  ;;  %v2480_v12 = vpop.permute.xlu1 %2479  ;;  %14269 = vst [vmem:[#allocation50_spill] sm:$0xff] %v9499_v55  ;;  %v2715_v5 = vmul.f32 %v14270_v32, %v9486_v48  ;;  %v2841_v2 = vmul.f32 %v14271_v4, %v9489_v37  ;;  %v2716_v27 = vmul.f32 %v14270_v32, %v9496_v30  ;;  %v9535_v18 = vmul.f32 %v2581_v34, %v14088_v26 }
 0x500   : > { %v2486_v24 = vsel %vm842_vm5, %v9278_v10, %v2480_v12  ;;  %v2490_v13 = vsel %vm842_vm5, %v2480_v12, %v9278_v10  ;;  %v2585_v10 = vsel %vm890_vm8, %v9389_v40, %v9230_v36  ;;  %v2817_v12 = vadd.f32 %v2809_v50, %v2785_v9  ;;  %v14272_v50 = vld [vmem:[#allocation55_spill] sm:$0xff] }
 0x501   : > { %v9514_v25 = vmul.f32 %v2490_v13, %v14082_v49  ;;  %v9517_v41 = vmul.f32 %v2486_v24, %v14083_v11  ;;  %v2818_v17 = vadd.f32 %v2810_v52, %v2786_v54  ;;  %v2842_v24 = vmul.f32 %v14271_v4, %v9499_v55 }
 0x502   : > { %v2518_v13 = vsel %vm858_vm6, %v9255_v23, %v2512_v8  ;;  %v2723_v3 = vadd.f32 %v2715_v5, %v2691_v6  ;;  %v2613_v9 = vsel %vm906_vm9, %v9267_v57, %v9360_v33  ;;  %v2617_v54 = vsel %vm906_vm9, %v9360_v33, %v9267_v57 }
 0x503   : > { %v2747_v36 = vmul.f32 %v14272_v50, %v9514_v25  ;;  %v2748_v40 = vmul.f32 %v14272_v50, %v9517_v41  ;;  %v9550_v52 = vmul.f32 %v2585_v10, %v14097_v39  ;;  %v2724_v6 = vadd.f32 %v2716_v27, %v2692_v42  ;;  %v9576_v27 = vld [vmem:[%s13975_s4 + $0x18] ss:$0 sm:$0xff] }
 0x504   : > { %v2849_v34 = vadd.f32 %v2841_v2, %v2817_v12  ;;  %v2522_v32 = vsel %vm858_vm6, %v2512_v8, %v9255_v23  ;;  %v9556_v5 = vmul.f32 %v2518_v13, %v14098_v0  ;;  %v2850_v37 = vadd.f32 %v2842_v24, %v2818_v17  ;;  %v9564_v2 = vld [vmem:[%s13975_s4 + $0x10] ss:$0 sm:$0xff] }
 0x505   : > { %14273 = vst [vmem:[#allocation66_spill] sm:$0xff] %v9550_v52  ;;  %v2755_v4 = vadd.f32 %v2747_v36, %v2723_v3  ;;  %v2550_v57 = vsel %vm874_vm7, %v9294_v7, %v2544_v51  ;;  %v2756_v33 = vadd.f32 %v2748_v40, %v2724_v6  ;;  %v9567_v42 = vmul.f32 %v9564_v2, %v2613_v9  ;;  %v14276_v23 = vld [vmem:[#allocation69_spill] sm:$0xff]  ;;  %v2386_v3 = vpop.permute.xlu2 %2385 }
 0x506   : > { %14274 = vst [vmem:[#allocation63_spill] sm:$0xff] %v9564_v2  ;;  %v2873_v8 = vmul.f32 %v14276_v23, %v9535_v18  ;;  %v2780_v10 = vmul.f32 %v14267_v56, %v9218_v53  ;;  %v9579_v17 = vmul.f32 %v9576_v27, %v2617_v54  ;;  %v2874_v24 = vmul.f32 %v14276_v23, %v9550_v52 }
 0x507   : > { %v2608_v50 = vpop.permute.xlu0 %2607  ;;  %v2576_v55 = vpop.permute.xlu1 %2575  ;;  %14275 = vst [vmem:[#allocation58_spill] sm:$0xff] %v9567_v42  ;;  %v2787_v12 = vadd.f32 %v2779_v14, %v2755_v4  ;;  %v2554_v13 = vsel %vm874_vm7, %v2544_v51, %v9294_v7  ;;  %v9587_v36 = vmul.f32 %v2522_v32, %v14109_v45  ;;  %v9590_v14 = vmul.f32 %v2550_v57, %v14091_v35 }
 0x508   : > { %14277 = vst [vmem:[#allocation73_spill] sm:$0xff] %v9579_v17  ;;  %v2881_v56 = vadd.f32 %v2873_v8, %v2849_v34  ;;  %v2811_v40 = vmul.f32 %v9208_v63, %v9556_v5  ;;  %v2582_v9 = vsel %vm890_vm8, %v9292_v16, %v2576_v55  ;;  %v2882_v54 = vadd.f32 %v2874_v24, %v2850_v37 }
 0x509   : > { %v2788_v6 = vadd.f32 %v2780_v10, %v2756_v33  ;;  %v2905_v4 = vmul.f32 %v8684_v1, %v9567_v42  ;;  %v9600_v7 = vmul.f32 %v2554_v13, %v14103_v29  ;;  %v2906_v34 = vmul.f32 %v8684_v1, %v9579_v17  ;;  %v14278_v33 = vld [vmem:[#allocation67_spill] sm:$0xff]  ;;  %v14289_v42 = vld [vmem:[#allocation145_spill] sm:$0xff] }
 0x50a   : > { %v2819_v51 = vadd.f32 %v2811_v40, %v2787_v12  ;;  %v2812_v32 = vmul.f32 %v9208_v63, %v9587_v36  ;;  %v2586_v57 = vsel %vm890_vm8, %v2576_v55, %v9292_v16  ;;  %v9610_v37 = vmul.f32 %v2582_v9, %v14088_v26  ;;  %v14279_v9 = vld [vmem:[#allocation76_spill] sm:$0xff]  ;;  %v14286_v17 = vld [vmem:[#allocation147_spill] sm:$0xff] }
 0x50b   : > { %v2843_v23 = vmul.f32 %v14278_v33, %v9590_v14  ;;  %v2913_v24 = vadd.f32 %v2905_v4, %v2881_v56  ;;  %v2391_v1 = vsel %vm794_vm0, %v9306_v62, %v2386_v3  ;;  %v2395_v63 = vsel %vm794_vm0, %v2386_v3, %v9306_v62 }
 0x50c   : > { %v2820_v12 = vadd.f32 %v2812_v32, %v2788_v6  ;;  %v2914_v13 = vadd.f32 %v2906_v34, %v2882_v54  ;;  %v2844_v16 = vmul.f32 %v14278_v33, %v9600_v7  ;;  %v2614_v55 = vsel %vm906_vm9, %v9269_v15, %v2608_v50 }
 0x50d   : > { %v9626_v40 = vmul.f32 %v2586_v57, %v14097_v39  ;;  %v2851_v56 = vadd.f32 %v2843_v23, %v2819_v51  ;;  %v2875_v4 = vmul.f32 %v14279_v9, %v9610_v37  ;;  %v9640_v6 = vmul.f32 %v2395_v63, %v14090_v19  ;;  %v2482_v34 = vpop.permute.xlu2 %2481 }
 0x50e   : > { %v9643_v51 = vmul.f32 %v2391_v1, %v14092_v58  ;;  %v9649_v57 = vadd.f32 %v8968_v20, %v2913_v24  ;;  %v2618_v33 = vsel %vm906_vm9, %v2608_v50, %v9269_v15  ;;  %v2852_v23 = vadd.f32 %v2844_v16, %v2820_v12  ;;  %v14282_v12 = vld [vmem:[#allocation62_spill] sm:$0xff] }
 0x50f   : > { %v2450_v8 = vpop.permute.xlu0 %2449  ;;  %v2418_v10 = vpop.permute.xlu1 %2417  ;;  %v2876_v1 = vmul.f32 %v14279_v9, %v9626_v40  ;;  %v2487_v15 = vsel %vm842_vm5, %v9317_v43, %v2482_v34  ;;  %v2883_v50 = vadd.f32 %v2875_v4, %v2851_v56 }
 0x510   : > { %v2459_v62 = vsel %vm826_vm3, %v2450_v8, %v9282_v22  ;;  %v2423_v3 = vsel %vm810_vm4, %v9304_v59, %v2418_v10  ;;  %v2427_v54 = vsel %vm810_vm4, %v2418_v10, %v9304_v59  ;;  %v2455_v32 = vsel %vm826_vm3, %v9282_v22, %v2450_v8  ;;  %14280 = vst [vmem:[#allocation55_spill] sm:$0xff] %v9649_v57 }
 0x511   : > { %v9655_v59 = vmul.f32 %v9564_v2, %v2614_v55  ;;  %v9658_v10 = vadd.f32 %v8968_v20, %v2914_v13  ;;  %v9663_v63 = vmul.f32 %v2459_v62, %v14085_v21  ;;  %v9666_v22 = vmul.f32 %v2427_v54, %v14087_v38  ;;  %v14283_v62 = vld [vmem:[#allocation5_spill] sm:$0xff] }
 0x512   : > { %v9669_v8 = vmul.f32 %v2423_v3, %v14089_v61  ;;  %v2491_v20 = vsel %vm842_vm5, %v2482_v34, %v9317_v43  ;;  %v9678_v24 = vmul.f32 %v2455_v32, %v14086_v44  ;;  %v3263_v13 = vmul.f32 %v14282_v12, %v9640_v6  ;;  %v14284_v54 = vld [vmem:[#allocation85_spill] sm:$0xff] }
 0x513   : > { %14281 = vst [vmem:[#allocation69_spill] sm:$0xff] %v9658_v10  ;;  %v3264_v16 = vmul.f32 %v14282_v12, %v9643_v51  ;;  %v9685_v55 = vmul.f32 %v9576_v27, %v2618_v33  ;;  %v2907_v3 = vmul.f32 %v14283_v62, %v9655_v59  ;;  %v3287_v43 = vmul.f32 %v14284_v54, %v9666_v22  ;;  %v14285_v12 = vld [vmem:[#allocation83_spill] sm:$0xff] }
 0x514   : > { %v3288_v56 = vmul.f32 %v14284_v54, %v9669_v8  ;;  %v2957_v4 = vadd.f32 %v9658_v10, %v9649_v57  ;;  %v9696_v34 = vmul.f32 %v2491_v20, %v14082_v49  ;;  %v9699_v32 = vmul.f32 %v2487_v15, %v14083_v11  ;;  %v14287_v15 = vld [vmem:[#allocation94_spill] sm:$0xff] }
 0x515   : > { %v2884_v33 = vadd.f32 %v2876_v1, %v2852_v23  ;;  %v3319_v44 = vmul.f32 %v14285_v12, %v9663_v63  ;;  %v3320_v21 = vmul.f32 %v14285_v12, %v9678_v24  ;;  %v3295_v61 = vadd.f32 %v3287_v43, %v3263_v13  ;;  %v14288_v23 = vld [vmem:[#allocation167_spill] sm:$0xff] }
 0x516   : > { %v3296_v38 = vadd.f32 %v3288_v56, %v3264_v16  ;;  %2958 = vadd.xlane.f32.xlu2 %v2957_v4  ;;  %v2915_v54 = vadd.f32 %v2907_v3, %v2883_v50  ;;  %v2908_v58 = vmul.f32 %v14283_v62, %v9685_v55  ;;  %v3383_v11 = vmul.f32 %v14287_v15, %v14286_v17  ;;  %v14290_v50 = vld [vmem:[#allocation37_spill] sm:$0xff] }
 0x517   : > { %v2546_v9 = vpop.permute.xlu0 %2545  ;;  %v2514_v19 = vpop.permute.xlu1 %2513  ;;  %v3327_v20 = vadd.f32 %v3319_v44, %v3295_v61  ;;  %v3384_v1 = vmul.f32 %v14287_v15, %v14288_v23  ;;  %v3351_v52 = vmul.f32 %v14289_v42, %v9696_v34  ;;  %v3352_v13 = vmul.f32 %v14289_v42, %v9699_v32  ;;  %v14292_v62 = vld [vmem:[#allocation169_spill] sm:$0xff] }
 0x518   : > { %v3328_v49 = vadd.f32 %v3320_v21, %v3296_v38  ;;  %v2916_v16 = vadd.f32 %v2908_v58, %v2884_v33  ;;  %v9716_v3 = vadd.f32 %v14290_v50, %v2915_v54  ;;  %v2551_v21 = vsel %vm874_vm7, %v14292_v62, %v2546_v9  ;;  %v14293_v38 = vld [vmem:[#allocation171_spill] sm:$0xff]  ;;  %v2578_v15 = vpop.permute.xlu2 %2577 }
 0x519   : > { %v2555_v44 = vsel %vm874_vm7, %v2546_v9, %v14292_v62  ;;  %v2519_v61 = vsel %vm858_vm6, %v14293_v38, %v2514_v19  ;;  %v2523_v42 = vsel %vm858_vm6, %v2514_v19, %v14293_v38  ;;  %v3359_v4 = vadd.f32 %v3351_v52, %v3327_v20  ;;  %v14295_v9 = vld [vmem:[#allocation81_spill] sm:$0xff] }
 0x51a   : > { %14291 = vst [vmem:[#allocation67_spill] sm:$0xff] %v9716_v3  ;;  %v9731_v58 = vadd.f32 %v14290_v50, %v2916_v16  ;;  %v9734_v43 = vmul.f32 %v2519_v61, %v14098_v0  ;;  %v9737_v56 = vmul.f32 %v2523_v42, %v14109_v45  ;;  %v3285_v12 = vmul.f32 %v14295_v9, %v9440_v47  ;;  %v14296_v47 = vld [vmem:[#allocation93_spill] sm:$0xff] }
 0x51b   : > { %v3286_v54 = vmul.f32 %v14295_v9, %v9443_v28  ;;  %v3360_v19 = vadd.f32 %v3352_v13, %v3328_v49  ;;  %v2969_v16 = vmul.f32 %v9649_v57, %v9649_v57  ;;  %v9750_v62 = vmul.f32 %v2551_v21, %v14091_v35  ;;  %v14297_v13 = vld [vmem:[#allocation42_spill] sm:$0xff]  ;;  %v14299_v57 = vld [vmem:[#allocation100_spill] sm:$0xff] }
 0x51c   : > { %14294 = vst [vmem:[#allocation76_spill] sm:$0xff] %v9731_v58  ;;  %v2960_v50 = vadd.f32 %v9731_v58, %v9716_v3  ;;  %v9753_v52 = vmul.f32 %v2555_v44, %v14103_v29  ;;  %v3391_v20 = vadd.f32 %v3383_v11, %v3359_v4  ;;  %v3415_v61 = vmul.f32 %v14296_v47, %v9734_v43  ;;  %v14298_v9 = vld [vmem:[#allocation174_spill] sm:$0xff] }
 0x51d   : > { %v3392_v38 = vadd.f32 %v3384_v1, %v3360_v19  ;;  %v3416_v49 = vmul.f32 %v14296_v47, %v9737_v56  ;;  %v2970_v28 = vmul.f32 %v9658_v10, %v9658_v10  ;;  %v3261_v42 = vmul.f32 %v14297_v13, %v9455_v60 }
 0x51e   : > { %v3262_v21 = vmul.f32 %v14297_v13, %v9458_v31  ;;  %v2583_v11 = vsel %vm890_vm8, %v14298_v9, %v2578_v15  ;;  %v2587_v1 = vsel %vm890_vm8, %v2578_v15, %v14298_v9  ;;  %2961 = vadd.xlane.f32.xlu0 %v2960_v50  ;;  %v3423_v44 = vadd.f32 %v3415_v61, %v3391_v20 }
 0x51f   : > { %v9739_v33 = vpop.permute.xlu0 %2387  ;;  %v3424_v4 = vadd.f32 %v3416_v49, %v3392_v38  ;;  %v2977_v19 = vadd.f32 %v2970_v28, %v2969_v16  ;;  %v2971_v47 = vmul.f32 %v9716_v3, %v9716_v3  ;;  %v2972_v60 = vmul.f32 %v9731_v58, %v9731_v58  ;;  %v2610_v10 = vpop.permute.xlu1 %2609  ;;  %v14300_v16 = vld [vmem:[#allocation136_spill] sm:$0xff]  ;;  %v14306_v3 = vld [vmem:[#allocation38_spill] sm:$0xff] }
 0x520   : > { %v9776_v31 = vmul.f32 %v2583_v11, %v14088_v26  ;;  %v9779_v13 = vmul.f32 %v2587_v1, %v14097_v39  ;;  %v3447_v15 = vmul.f32 %v14299_v57, %v9750_v62  ;;  %v3448_v50 = vmul.f32 %v14299_v57, %v9753_v52  ;;  %v14301_v11 = vld [vmem:[#allocation173_spill] sm:$0xff] }
 0x521   : > { %2978 = vadd.xlane.f32.xlu2 %v2977_v19  ;;  %v3317_v20 = vmul.f32 %v14300_v16, %v9486_v48  ;;  %v3293_v38 = vadd.f32 %v3285_v12, %v3261_v42  ;;  %v3294_v61 = vadd.f32 %v3286_v54, %v3262_v21  ;;  %v2615_v1 = vsel %vm906_vm9, %v14301_v11, %v2610_v10  ;;  %v14302_v19 = vld [vmem:[#allocation41_spill] sm:$0xff]  ;;  %v14303_v42 = vld [vmem:[#allocation99_spill] sm:$0xff] }
 0x522   : > { %v3455_v28 = vadd.f32 %v3447_v15, %v3423_v44  ;;  %v3456_v9 = vadd.f32 %v3448_v50, %v3424_v4  ;;  %v2619_v58 = vsel %vm906_vm9, %v2610_v10, %v14301_v11  ;;  %v3318_v57 = vmul.f32 %v14300_v16, %v9496_v30 }
 0x523   : > { %v3349_v48 = vmul.f32 %v14302_v19, %v9514_v25  ;;  %v3350_v12 = vmul.f32 %v14302_v19, %v9517_v41  ;;  %v2980_v54 = vadd.f32 %v2972_v60, %v2971_v47  ;;  %v3479_v21 = vmul.f32 %v14303_v42, %v9776_v31  ;;  %v14304_v41 = vld [vmem:[#allocation87_spill] sm:$0xff] }
 0x524   : > { %v3480_v44 = vmul.f32 %v14303_v42, %v9779_v13  ;;  %v9806_v4 = vmul.f32 %v9564_v2, %v2615_v1  ;;  %v9809_v10 = vmul.f32 %v9576_v27, %v2619_v58  ;;  %v3325_v30 = vadd.f32 %v3317_v20, %v3293_v38  ;;  %v14305_v1 = vld [vmem:[#allocation181_spill] sm:$0xff]  ;;  %v14307_v58 = vld [vmem:[#allocation182_spill] sm:$0xff] }
 0x525   : > { %v3326_v15 = vadd.f32 %v3318_v57, %v3294_v61  ;;  %v3487_v25 = vadd.f32 %v3479_v21, %v3455_v28  ;;  %v3259_v2 = vmul.f32 %v14306_v3, %v14305_v1  ;;  %v3260_v20 = vmul.f32 %v14306_v3, %v14307_v58  ;;  %v14309_v61 = vld [vmem:[#allocation140_spill] sm:$0xff]  ;;  %v14310_v28 = vld [vmem:[#allocation91_spill] sm:$0xff] }
 0x526   : > { %2981 = vadd.xlane.f32.xlu0 %v2980_v54  ;;  %v3488_v50 = vadd.f32 %v3480_v44, %v3456_v9  ;;  %v3511_v47 = vmul.f32 %v14304_v41, %v9806_v4  ;;  %v3512_v60 = vmul.f32 %v14304_v41, %v9809_v10  ;;  %v3357_v16 = vadd.f32 %v3349_v48, %v3325_v30  ;;  %v14311_v54 = vld [vmem:[#allocation114_spill] sm:$0xff]  ;;  %v14313_v44 = vld [vmem:[#allocation116_spill] sm:$0xff] }
 0x527   : > { %v9787_v49 = vpop.permute.xlu0 %2483  ;;  %v3358_v11 = vadd.f32 %v3350_v12, %v3326_v15  ;;  %v3381_v9 = vmul.f32 %v14310_v28, %v14309_v61  ;;  %v3382_v57 = vmul.f32 %v14310_v28, %v9218_v53  ;;  %v14312_v12 = vld [vmem:[#allocation183_spill] sm:$0xff]  ;;  %v14314_v15 = vld [vmem:[#allocation185_spill] sm:$0xff]  ;;  %v14316_v3 = vld [vmem:[#allocation88_spill] sm:$0xff] }
 0x528   : > { %v3519_v19 = vadd.f32 %v3511_v47, %v3487_v25  ;;  %v3520_v42 = vadd.f32 %v3512_v60, %v3488_v50  ;;  %v3283_v30 = vmul.f32 %v14313_v44, %v14312_v12  ;;  %v3284_v25 = vmul.f32 %v14313_v44, %v14314_v15  ;;  %v14315_v50 = vld [vmem:[#allocation184_spill] sm:$0xff]  ;;  %v14317_v47 = vld [vmem:[#allocation186_spill] sm:$0xff] }
 0x529   : > { %v3315_v41 = vmul.f32 %v14316_v3, %v14315_v50  ;;  %v3316_v60 = vmul.f32 %v14316_v3, %v14317_v47  ;;  %v3389_v1 = vadd.f32 %v3381_v9, %v3357_v16  ;;  %v3390_v58 = vadd.f32 %v3382_v57, %v3358_v11  ;;  %v14318_v28 = vld [vmem:[#allocation96_spill] sm:$0xff]  ;;  %v14320_v9 = vld [vmem:[#allocation86_spill] sm:$0xff] }
 0x52a   : > { %v3547_v21 = vadd.f32 %v14311_v54, %v3519_v19  ;;  %v3548_v48 = vadd.f32 %v14311_v54, %v3520_v42  ;;  %v3291_v53 = vadd.f32 %v3283_v30, %v3259_v2  ;;  %v3292_v19 = vadd.f32 %v3284_v25, %v3260_v20  ;;  %v14319_v20 = vld [vmem:[#allocation54_spill] sm:$0xff]  ;;  %v14321_v30 = vld [vmem:[#allocation49_spill] sm:$0xff]  ;;  %v14322_v25 = vld [vmem:[#allocation95_spill] sm:$0xff] }
 0x52b   : > { %v3413_v54 = vmul.f32 %v14318_v28, %v9556_v5  ;;  %v3414_v12 = vmul.f32 %v14318_v28, %v9587_v36  ;;  %v3347_v57 = vmul.f32 %v14320_v9, %v14319_v20  ;;  %v3348_v5 = vmul.f32 %v14320_v9, %v14321_v30  ;;  %v14327_v28 = vld [vmem:[#allocation92_spill] sm:$0xff] }
 0x52c   : > { %vm3555_vm14 = vcmp.gt.f32.partialorder %v3547_v21, 0.0  ;;  %vm3556_vm15 = vcmp.gt.f32.partialorder %v3548_v48, 0.0  ;;  %v3563_v61 = vmul.f32 0.2, %v3547_v21  ;;  %v3564_v42 = vmul.f32 0.2, %v3548_v48 }
 0x52d   : > { %v3323_v44 = vadd.f32 %v3315_v41, %v3291_v53  ;;  %v3324_v15 = vadd.f32 %v3316_v60, %v3292_v19  ;;  %v3421_v16 = vadd.f32 %v3413_v54, %v3389_v1  ;;  %v3422_v11 = vadd.f32 %v3414_v12, %v3390_v58  ;;  %v14324_v1 = vld [vmem:[#allocation45_spill] sm:$0xff]  ;;  %v14325_v53 = vld [vmem:[#allocation84_spill] sm:$0xff]  ;;  %v14328_v12 = vld [vmem:[#allocation46_spill] sm:$0xff] }
 0x52e   : > { %v9839_v50 = vsel %vm3555_vm14, %v3547_v21, %v3563_v61  ;;  %v3445_v36 = vmul.f32 %v14322_v25, %v9590_v14  ;;  %v3446_v21 = vmul.f32 %v14322_v25, %v9600_v7  ;;  %v2661_v58 = vmul.f32 %v14324_v1, %v9640_v6  ;;  %v14331_v30 = vld [vmem:[#allocation44_spill] sm:$0xff]  ;;  %v14332_v25 = vld [vmem:[#allocation187_spill] sm:$0xff] }
 0x52f   : > { %v9819_v38 = vpop.permute.xlu0 %4689  ;;  %v3355_v47 = vadd.f32 %v3347_v57, %v3323_v44  ;;  %v3356_v60 = vadd.f32 %v3348_v5, %v3324_v15  ;;  %v3477_v19 = vmul.f32 %v14325_v53, %v9610_v37  ;;  %v3478_v14 = vmul.f32 %v14325_v53, %v9626_v40  ;;  %v14329_v40 = vld [vmem:[#allocation53_spill] sm:$0xff]  ;;  %v14330_v57 = vld [vmem:[#allocation60_spill] sm:$0xff] }
 0x530   : > { %14308 = vst [vmem:[#allocation62_spill] sm:$0xff] %v9819_v38  ;;  %v9841_v38 = vsel %vm3556_vm15, %v3548_v48, %v3564_v42  ;;  %v14323_v48 = vld [vmem:[#allocation113_spill] sm:$0xff]  ;;  %v3453_v61 = vadd.f32 %v3445_v36, %v3421_v16  ;;  %v3454_v42 = vadd.f32 %v3446_v21, %v3422_v11  ;;  %v3379_v44 = vmul.f32 %v14327_v28, %v14328_v12  ;;  %v14333_v21 = vld [vmem:[#allocation108_spill] sm:$0xff] }
 0x531   : > { %v3589_v2 = vadd.f32 %v9841_v38, %v9839_v50  ;;  %v2685_v3 = vmul.f32 %v14323_v48, %v9666_v22  ;;  %v2686_v7 = vmul.f32 %v14323_v48, %v9669_v8  ;;  %v14326_v22 = vld [vmem:[#allocation160_spill] sm:$0xff]  ;;  %v2662_v6 = vmul.f32 %v14324_v1, %v9643_v51 }
 0x532   : > { %v3380_v54 = vmul.f32 %v14327_v28, %v14326_v22  ;;  %v3387_v37 = vadd.f32 %v3379_v44, %v3355_v47  ;;  %v3485_v11 = vadd.f32 %v3477_v19, %v3453_v61  ;;  %v3486_v20 = vadd.f32 %v3478_v14, %v3454_v42  ;;  %v14335_v19 = vld [vmem:[#allocation50_spill] sm:$0xff]  ;;  %v14336_v42 = vld [vmem:[#allocation103_spill] sm:$0xff] }
 0x533   : > { %3590 = vadd.xlane.f32.xlu0 %v3589_v2  ;;  %v2693_v15 = vadd.f32 %v2685_v3, %v2661_v58  ;;  %v9871_v2 = vpop.permute.xlu2 %2419  ;;  %v2717_v9 = vmul.f32 %v14329_v40, %v9663_v63  ;;  %v2694_v8 = vadd.f32 %v2686_v7, %v2662_v6  ;;  %v3411_v5 = vmul.f32 %v14331_v30, %v14330_v57  ;;  %v14334_v58 = vld [vmem:[#allocation47_spill] sm:$0xff]  ;;  %v14337_v28 = vld [vmem:[#allocation66_spill] sm:$0xff] }
 0x534   : > { %v3388_v16 = vadd.f32 %v3380_v54, %v3356_v60  ;;  %v3412_v36 = vmul.f32 %v14331_v30, %v14332_v25  ;;  %v3509_v51 = vmul.f32 %v14333_v21, %v9655_v59  ;;  %v3510_v48 = vmul.f32 %v14333_v21, %v9685_v55  ;;  %v14338_v54 = vld [vmem:[#allocation64_spill] sm:$0xff]  ;;  %v14339_v6 = vld [vmem:[#allocation58_spill] sm:$0xff]  ;;  %v14343_v25 = vld [vmem:[#allocation59_spill] sm:$0xff] }
 0x535   : > { %v2718_v3 = vmul.f32 %v14329_v40, %v9678_v24  ;;  %v2725_v47 = vadd.f32 %v2717_v9, %v2693_v15  ;;  %v3419_v1 = vadd.f32 %v3411_v5, %v3387_v37  ;;  %v3475_v14 = vmul.f32 %v14336_v42, %v9535_v18  ;;  %v14340_v15 = vld [vmem:[#allocation102_spill] sm:$0xff]  ;;  %v14341_v40 = vld [vmem:[#allocation73_spill] sm:$0xff] }
 0x536   : > { %v3420_v63 = vadd.f32 %v3412_v36, %v3388_v16  ;;  %v3517_v7 = vadd.f32 %v3509_v51, %v3485_v11  ;;  %v3518_v22 = vadd.f32 %v3510_v48, %v3486_v20  ;;  %v3476_v55 = vmul.f32 %v14336_v42, %v14337_v28  ;;  %v14344_v48 = vld [vmem:[#allocation70_spill] sm:$0xff] }
 0x537   : > { %v2726_v59 = vadd.f32 %v2718_v3, %v2694_v8  ;;  %v2749_v24 = vmul.f32 %v14338_v54, %v9696_v34  ;;  %v3507_v37 = vmul.f32 %v14340_v15, %v14339_v6  ;;  %v2750_v16 = vmul.f32 %v14338_v54, %v9699_v32  ;;  %v14342_v8 = vld [vmem:[#allocation107_spill] sm:$0xff]  ;;  %v14347_v6 = vld [vmem:[#allocation72_spill] sm:$0xff] }
 0x538   : > { %v9855_v41 = vpop.permute.xlu0 %2834  ;;  %v3508_v18 = vmul.f32 %v14340_v15, %v14341_v40  ;;  %v3545_v57 = vadd.f32 %v14342_v8, %v3517_v7  ;;  %v3546_v30 = vadd.f32 %v14342_v8, %v3518_v22  ;;  %v2781_v36 = vmul.f32 %v14343_v25, %v14286_v17 }
 0x539   : > { %v2757_v11 = vadd.f32 %v2749_v24, %v2725_v47  ;;  %v2758_v5 = vadd.f32 %v2750_v16, %v2726_v59  ;;  %v2782_v32 = vmul.f32 %v14343_v25, %v14288_v23  ;;  %v2813_v3 = vmul.f32 %v14344_v48, %v9734_v43  ;;  %v2452_v25 = vpop.permute.xlu1 %2451 }
 0x53a   : > { %v2845_v23 = vmul.f32 %v9855_v41, %v9750_v62  ;;  %v2846_v43 = vmul.f32 %v9855_v41, %v9753_v52  ;;  %vm3553_vm13 = vcmp.gt.f32.partialorder %v3545_v57, 0.0  ;;  %vm3554_vm14 = vcmp.gt.f32.partialorder %v3546_v30, 0.0 }
 0x53b   : > { %v9901_v34 = vpop.permute.xlu2 %2515  ;;  %v2789_v47 = vadd.f32 %v2781_v36, %v2757_v11  ;;  %v2877_v15 = vmul.f32 %v14347_v6, %v9776_v31  ;;  %v14349_v31 = vld [vmem:[#allocation82_spill] sm:$0xff] }
 0x53c   : > { %v2909_v8 = vmul.f32 %v14349_v31, %v9806_v4 }
 0x540   : > { %v3429_v60 = vpop.permute.xlu0 %3428 }
 0x541   : > { %v3443_v53 = vmul.f32 %v3429_v60, %v14334_v58  ;;  %v3444_v61 = vmul.f32 %v3429_v60, %v14335_v19  ;;  %v14345_v60 = vld [vmem:[#allocation111_spill] sm:$0xff]  ;;  %v2814_v58 = vmul.f32 %v14344_v48, %v9737_v56  ;;  %v3561_v19 = vmul.f32 0.2, %v3545_v57 }
 0x542   : > { %v2821_v56 = vadd.f32 %v2813_v3, %v2789_v47  ;;  %v14352_v3 = vld [vmem:[#allocation176_spill] sm:$0xff] }
 0x543   : > { %v3451_v12 = vadd.f32 %v3443_v53, %v3419_v1  ;;  %v3452_v44 = vadd.f32 %v3444_v61, %v3420_v63  ;;  %v2790_v53 = vadd.f32 %v2782_v32, %v2758_v5  ;;  %v3562_v61 = vmul.f32 0.2, %v3546_v30 }
 0x544   : > { %v9933_v28 = vsel %vm3553_vm13, %v3545_v57, %v3561_v19  ;;  %v2853_v54 = vadd.f32 %v2845_v23, %v2821_v56  ;;  %v2460_v47 = vsel %vm826_vm3, %v2452_v25, %v14352_v3  ;;  %v14356_v19 = vld [vmem:[#allocation22_spill] sm:$0xff]  ;;  %v14358_v23 = vld [vmem:[#allocation11_spill] sm:$0xff]  ;;  %v14359_v56 = vld [vmem:[#allocation12_spill] sm:$0xff] }
 0x545   : > { %v3483_v20 = vadd.f32 %v3475_v14, %v3451_v12  ;;  %v3484_v9 = vadd.f32 %v3476_v55, %v3452_v44  ;;  %v9920_v14 = vld [vmem:[%s13475_s16 + $0x38] sm:$0xff]  ;;  %v2822_v59 = vadd.f32 %v2814_v58, %v2790_v53  ;;  %v9935_v55 = vsel %vm3554_vm14, %v3546_v30, %v3562_v61  ;;  %v9937_v44 = vpop.permute.xlu2 %4677 }
 0x546   : > { %14346 = vst [vmem:[#allocation5_spill] sm:$0xff] %v9937_v44  ;;  %v3597_v16 = vmul.f32 %v9933_v28, %v9933_v28  ;;  %v3598_v40 = vmul.f32 %v9935_v55, %v9935_v55  ;;  %v14350_v30 = vld [vmem:[#allocation170_spill] sm:$0xff]  ;;  %v3586_v4 = vadd.f32 %v9935_v55, %v9933_v28 }
 0x547   : > { %v3515_v21 = vadd.f32 %v3507_v37, %v3483_v20  ;;  %v3516_v51 = vadd.f32 %v3508_v18, %v3484_v9  ;;  %4753 = vperm.xlu0 %7003, %v9920_v14   ;;  %v2854_v24 = vadd.f32 %v2846_v43, %v2822_v59  ;;  %v2878_v37 = vmul.f32 %v14347_v6, %v9779_v13  ;;  %v7074_v9 = vld [vmem:[%s13475_s16 + $0x10] sm:$0xff]  ;;  %v14363_v6 = vld [vmem:[#allocation172_spill] sm:$0xff] }
 0x548   : > { %v2885_v18 = vadd.f32 %v2877_v15, %v2853_v54  ;;  %v14348_v20 = vmov 7   ;;  %v2910_v13 = vmul.f32 %v14349_v31, %v9809_v10  ;;  %v3606_v57 = vadd.f32 %v3598_v40, %v3597_v16  ;;  %v14351_v10 = vld [vmem:[#allocation177_spill] sm:$0xff]  ;;  %v14364_v40 = vld [vmem:[#allocation74_spill] sm:$0xff] }
 0x549   : > { %v3543_v1 = vadd.f32 %v14345_v60, %v3515_v21  ;;  %v3544_v63 = vadd.f32 %v14345_v60, %v3516_v51  ;;  %v2886_v11 = vadd.f32 %v2878_v37, %v2854_v24  ;;  %v2392_v5 = vsel %vm794_vm0, %v14350_v30, %v9739_v33  ;;  %v14353_v60 = vld [vmem:[#allocation6_spill] sm:$0xff] }
 0x54a   : > { %v2396_v36 = vsel %vm794_vm0, %v9739_v33, %v14350_v30  ;;  %v2917_v21 = vadd.f32 %v2909_v8, %v2885_v18  ;;  %v2424_v32 = vsel %vm810_vm4, %v14351_v10, %v9871_v2  ;;  %v2428_v48 = vsel %vm810_vm4, %v9871_v2, %v14351_v10  ;;  %v14365_v31 = vld [vmem:[#allocation90_spill] sm:$0xff] }
 0x54b   : > { %vm3551_vm10 = vcmp.gt.f32.partialorder %v3543_v1, 0.0  ;;  %vm3552_vm11 = vcmp.gt.f32.partialorder %v3544_v63, 0.0  ;;  %v3559_v17 = vmul.f32 0.2, %v3543_v1  ;;  %v3560_v42 = vmul.f32 0.2, %v3544_v63 }
 0x54c   : > { %v2918_v51 = vadd.f32 %v2910_v13, %v2886_v11  ;;  %v2456_v33 = vsel %vm826_vm3, %v14352_v3, %v2452_v25  ;;  %v9988_v61 = vadd.f32 %v14356_v19, %v2917_v21  ;;  %v9997_v43 = vmul.f32 %v2424_v32, %v14358_v23  ;;  %v14367_v25 = vld [vmem:[#allocation19_spill] sm:$0xff]  ;;  %v14370_v3 = vld [vmem:[#allocation89_spill] sm:$0xff] }
 0x54d   : > { %v9923_v7 = vsel %vm3551_vm10, %v3543_v1, %v3559_v17  ;;  %v9925_v22 = vsel %vm3552_vm11, %v3544_v63, %v3560_v42  ;;  %v9980_v1 = vmul.f32 %v2396_v36, %v14353_v60  ;;  %v14354_v63 = vld [vmem:[#allocation7_spill] sm:$0xff]  ;;  %v9985_v53 = vpop.permute.xlu2 %4685  ;;  %v14357_v17 = vld [vmem:[#allocation10_spill] sm:$0xff]  ;;  %v10000_v59 = vmul.f32 %v2460_v47, %v14359_v56 }
 0x54e   : > { %v3583_v62 = vadd.f32 %v9925_v22, %v9923_v7  ;;  %v3595_v52 = vmul.f32 %v9923_v7, %v9923_v7  ;;  %v3596_v41 = vmul.f32 %v9925_v22, %v9925_v22  ;;  %v9983_v58 = vmul.f32 %v2392_v5, %v14354_v63  ;;  %14355 = vst [vmem:[#allocation85_spill] sm:$0xff] %v9985_v53  ;;  %v14366_v5 = vld [vmem:[#allocation18_spill] sm:$0xff]  ;;  %v14380_v53 = vld [vmem:[#allocation105_spill] sm:$0xff] }
 0x54f   : > { %7008 = vset.pattern.permute.xlu0 %v14348_v20  ;;  %v9991_v2 = vadd.f32 %v14356_v19, %v2918_v51  ;;  %v9994_v42 = vmul.f32 %v2428_v48, %v14357_v17  ;;  %v2488_v15 = vsel %vm842_vm5, %v14363_v6, %v9787_v49  ;;  %v2492_v37 = vsel %vm842_vm5, %v9787_v49, %v14363_v6  ;;  %v2548_v19 = vpop.permute.xlu1 %2547 }
 0x550   : > { %3584 = vadd.xlane.f32.xlu2 %v3583_v62  ;;  %v3603_v12 = vadd.f32 %v3596_v41, %v3595_v52  ;;  %4797 = vperm.xlu0 %7008, %v7074_v9   ;;  %v14360_v62 = vld [vmem:[#allocation13_spill] sm:$0xff]  ;;  %v14361_v41 = vld [vmem:[#allocation52_spill] sm:$0xff]  ;;  %v3290_v11 = vmul.f32 %v14364_v40, %v9997_v43  ;;  %v3321_v8 = vmul.f32 %v14365_v31, %v10000_v59  ;;  %v14369_v48 = vmov 8  }
 0x551   : > { %v10003_v52 = vmul.f32 %v2456_v33, %v14360_v62  ;;  %v3265_v54 = vmul.f32 %v14361_v41, %v9980_v1  ;;  %v3266_v24 = vmul.f32 %v14361_v41, %v9983_v58  ;;  %v2963_v16 = vadd.f32 %v9991_v2, %v9988_v61  ;;  %v14371_v41 = vld [vmem:[#allocation179_spill] sm:$0xff] }
 0x552   : > { %3604 = vadd.xlane.f32.xlu1 %v3603_v12  ;;  %v10010_v12 = vpop.permute.xlu0 %4733  ;;  %v3289_v18 = vmul.f32 %v14364_v40, %v9994_v42  ;;  %v10031_v49 = vmul.f32 %v2492_v37, %v14366_v5  ;;  %v10034_v36 = vmul.f32 %v2488_v15, %v14367_v25  ;;  %v2973_v21 = vmul.f32 %v9988_v61, %v9988_v61 }
 0x553   : > { %14362 = vst [vmem:[#allocation83_spill] sm:$0xff] %v10010_v12  ;;  %v3322_v13 = vmul.f32 %v14365_v31, %v10003_v52  ;;  %v3298_v30 = vadd.f32 %v3290_v11, %v3266_v24  ;;  %v2974_v51 = vmul.f32 %v9991_v2, %v9991_v2  ;;  %v2524_v24 = vsel %vm858_vm6, %v9901_v34, %v14371_v41  ;;  %v14373_v11 = vld [vmem:[#allocation154_spill] sm:$0xff]  ;;  %v14374_v31 = vld [vmem:[#allocation156_spill] sm:$0xff] }
 0x554   : > { %v3353_v33 = vmul.f32 %v14370_v3, %v10031_v49  ;;  %v3354_v47 = vmul.f32 %v14370_v3, %v10034_v36  ;;  %v3600_v3 = vmul.f32 %v9841_v38, %v9841_v38  ;;  %vm2989_vm11 = vcmask 7168  }
 0x555   : > { %v3330_v10 = vadd.f32 %v3322_v13, %v3298_v30  ;;  %v10040_v32 = vpop.permute.xlu2 %4729  ;;  %v2983_v6 = vadd.f32 %v2974_v51, %v2973_v21  ;;  %v14376_v21 = vld [vmem:[#allocation175_spill] sm:$0xff] }
 0x556   : > { %14368 = vst [vmem:[#allocation147_spill] sm:$0xff] %v10040_v32 }
 0x558   : > { %3607 = vadd.xlane.f32.xlu2 %v3606_v57  ;;  %4817 = vperm.xlu0 %7008, %v9920_v14   ;;  %v3297_v57 = vadd.f32 %v3289_v18, %v3265_v54  ;;  %v2520_v54 = vsel %vm858_vm6, %v14371_v41, %v9901_v34  ;;  %v10067_v34 = vmul.f32 %v2524_v24, %v14109_v45 }
 0x559   : > { %v10064_v13 = vmul.f32 %v2520_v54, %v14098_v0  ;;  %v14377_v54 = vld [vmem:[#allocation98_spill] sm:$0xff] }
 0x55a   : > { %3587 = vadd.xlane.f32.xlu1 %v3586_v4  ;;  %v3329_v4 = vadd.f32 %v3321_v8, %v3297_v57  ;;  %v2580_v37 = vpop.permute.xlu0 %2579  ;;  %v3385_v8 = vmul.f32 %v14374_v31, %v14373_v11  ;;  %v14375_v57 = vld [vmem:[#allocation168_spill] sm:$0xff] }
 0x55b   : > { %v3386_v30 = vmul.f32 %v14374_v31, %v14375_v57  ;;  %v2584_v51 = vsel %vm890_vm8, %v14376_v21, %v2580_v37  ;;  %v3417_v24 = vmul.f32 %v14377_v54, %v10064_v13 }
 0x55c   : > { %v3361_v15 = vadd.f32 %v3353_v33, %v3329_v4  ;;  %v2588_v4 = vsel %vm890_vm8, %v2580_v37, %v14376_v21 }
 0x55d   : > { %v2612_v37 = vpop.permute.xlu2 %2611  ;;  %v10095_v31 = vmul.f32 %v2588_v4, %v14097_v39  ;;  %v14382_v39 = vld [vmem:[#allocation104_spill] sm:$0xff] }
 0x560   : > { %7011 = vset.pattern.permute.xlu0 %v14369_v48 }
 0x561   : > { %4861 = vperm.xlu0 %7011, %v7074_v9   ;;  %v3362_v9 = vadd.f32 %v3354_v47, %v3330_v10  ;;  %v3599_v10 = vmul.f32 %v9839_v50, %v9839_v50 }
 0x562   : > { %2964 = vadd.xlane.f32.xlu1 %v2963_v16  ;;  %v14372_v16 = vld [vmem:[#allocation178_spill] sm:$0xff] }
 0x563   : > { %v2552_v40 = vsel %vm874_vm7, %v14372_v16, %v2548_v19  ;;  %v2556_v18 = vsel %vm874_vm7, %v2548_v19, %v14372_v16  ;;  %v3393_v19 = vadd.f32 %v3385_v8, %v3361_v15  ;;  %v3394_v41 = vadd.f32 %v3386_v30, %v3362_v9  ;;  %v14378_v8 = vld [vmem:[#allocation97_spill] sm:$0xff] }
 0x564   : > { %v10082_v33 = vmul.f32 %v2552_v40, %v14091_v35  ;;  %v10085_v47 = vmul.f32 %v2556_v18, %v14103_v29  ;;  %v10092_v16 = vmul.f32 %v2584_v51, %v14088_v26  ;;  %v10100_v40 = vld [vmem:[%s13475_s16 + $0x30] sm:$0xff]  ;;  %v3609_v15 = vadd.f32 %v3600_v3, %v3599_v10  ;;  %v14379_v51 = vld [vmem:[#allocation180_spill] sm:$0xff] }
 0x565   : > { %v3425_v9 = vadd.f32 %v3417_v24, %v3393_v19  ;;  %v2616_v4 = vsel %vm906_vm9, %v14379_v51, %v2612_v37  ;;  %v3482_v3 = vmul.f32 %v14380_v53, %v10095_v31  ;;  %v14381_v24 = vld [vmem:[#allocation63_spill] sm:$0xff] }
 0x566   : > { %v3449_v30 = vmul.f32 %v14378_v8, %v10082_v33  ;;  %v3450_v21 = vmul.f32 %v14378_v8, %v10085_v47  ;;  %v3481_v10 = vmul.f32 %v14380_v53, %v10092_v16 }
 0x568   : > { %v3457_v19 = vadd.f32 %v3449_v30, %v3425_v9 }
 0x56a   : > { %2984 = vadd.xlane.f32.xlu1 %v2983_v6  ;;  %v3418_v6 = vmul.f32 %v14377_v54, %v10067_v34  ;;  %v2620_v54 = vsel %vm906_vm9, %v2612_v37, %v14379_v51  ;;  %v3489_v12 = vadd.f32 %v3481_v10, %v3457_v19 }
 0x56b   : > { %v2628_v8 = vmul.f32 %v9576_v27, %v2620_v54 }
 0x56c   : > { %v3426_v18 = vadd.f32 %v3418_v6, %v3394_v41  ;;  %v2627_v6 = vmul.f32 %v14381_v24, %v2616_v4  ;;  %v14385_v4 = vld [vmem:[#allocation133_spill] sm:$0xff] }
 0x56d   : > { %v3514_v37 = vmul.f32 %v14382_v39, %v2628_v8  ;;  %v2719_v54 = vmul.f32 %v14385_v4, %v10000_v59  ;;  %v2720_v10 = vmul.f32 %v14385_v4, %v10003_v52  ;;  %v14389_v4 = vld [vmem:[#allocation65_spill] sm:$0xff] }
 0x56e   : > { %v3458_v41 = vadd.f32 %v3450_v21, %v3426_v18  ;;  %v3513_v26 = vmul.f32 %v14382_v39, %v2627_v6  ;;  %v14383_v18 = vld [vmem:[#allocation101_spill] sm:$0xff]  ;;  %v14384_v21 = vld [vmem:[#allocation56_spill] sm:$0xff] }
 0x56f   : > { %v2663_v27 = vmul.f32 %v14383_v18, %v9980_v1  ;;  %v2664_v30 = vmul.f32 %v14383_v18, %v9983_v58  ;;  %v2687_v51 = vmul.f32 %v14384_v21, %v9994_v42  ;;  %v2688_v39 = vmul.f32 %v14384_v21, %v9997_v43  ;;  %v14387_v42 = vld [vmem:[#allocation57_spill] sm:$0xff] }
 0x570   : > { %4749 = vperm.xlu2 %7005, %v10100_v40   ;;  %v3490_v32 = vadd.f32 %v3482_v3, %v3458_v41  ;;  %v3521_v53 = vadd.f32 %v3513_v26, %v3489_v12  ;;  %v14386_v26 = vld [vmem:[#allocation110_spill] sm:$0xff]  ;;  %v2752_v43 = vmul.f32 %v14387_v42, %v10034_v36 }
 0x571   : > { %v2695_v1 = vadd.f32 %v2687_v51, %v2663_v27  ;;  %v2696_v3 = vadd.f32 %v2688_v39, %v2664_v30  ;;  %v7077_v39 = vld [vmem:[%s13475_s16 + $0x28] sm:$0xff] }
 0x572   : > { %3610 = vadd.xlane.f32.xlu1 %v3609_v15  ;;  %v10125_v15 = vld [vmem:[%s13475_s16 + $0x8] sm:$0xff]  ;;  %v3522_v9 = vadd.f32 %v3514_v37, %v3490_v32  ;;  %v3549_v12 = vadd.f32 %v14386_v26, %v3521_v53  ;;  %v2751_v37 = vmul.f32 %v14387_v42, %v10031_v49 }
 0x573   : > { %v2727_v19 = vadd.f32 %v2719_v54, %v2695_v1  ;;  %v2728_v58 = vadd.f32 %v2720_v10, %v2696_v3  ;;  %v2815_v54 = vmul.f32 %v14389_v4, %v10064_v13  ;;  %v14391_v3 = vld [vmem:[#allocation77_spill] sm:$0xff] }
 0x574   : > { %v3550_v32 = vadd.f32 %v14386_v26, %v3522_v9  ;;  %v3565_v41 = vmul.f32 0.2, %v3549_v12  ;;  %vm3557_vm15 = vcmp.gt.f32.partialorder %v3549_v12, 0.0  ;;  %v14388_v9 = vld [vmem:[#allocation68_spill] sm:$0xff] }
 0x575   : > { %v2759_v59 = vadd.f32 %v2751_v37, %v2727_v19  ;;  %v2760_v52 = vadd.f32 %v2752_v43, %v2728_v58  ;;  %v2783_v27 = vmul.f32 %v14388_v9, %v14373_v11  ;;  %v2784_v30 = vmul.f32 %v14388_v9, %v14375_v57  ;;  %v14390_v57 = vld [vmem:[#allocation75_spill] sm:$0xff] }
 0x576   : > { %v3566_v24 = vmul.f32 0.2, %v3550_v32  ;;  %vm3558_vm10 = vcmp.gt.f32.partialorder %v3550_v32, 0.0  ;;  %v10146_v18 = vsel %vm3557_vm15, %v3549_v12, %v3565_v41  ;;  %v2816_v11 = vmul.f32 %v14389_v4, %v10067_v34 }
 0x577   : > { %v2791_v21 = vadd.f32 %v2783_v27, %v2759_v59  ;;  %v2792_v51 = vadd.f32 %v2784_v30, %v2760_v52  ;;  %v3601_v49 = vmul.f32 %v10146_v18, %v10146_v18  ;;  %v2847_v10 = vmul.f32 %v14390_v57, %v10082_v33  ;;  %v7078_v33 = vld [vmem:[%s13475_s16] sm:$0xff]  ;;  %v14393_v59 = vld [vmem:[#allocation36_spill] sm:$0xff] }
 0x578   : > { %7007 = vset.pattern.permute.xlu2 %v14348_v20  ;;  %v10148_v53 = vsel %vm3558_vm10, %v3550_v32, %v3566_v24  ;;  %v2848_v32 = vmul.f32 %v14390_v57, %v10085_v47  ;;  %v2879_v19 = vmul.f32 %v14391_v3, %v10092_v16  ;;  %v2880_v58 = vmul.f32 %v14391_v3, %v10095_v31  ;;  %v14392_v47 = vld [vmem:[#allocation39_spill] sm:$0xff] }
 0x579   : > { %4793 = vperm.xlu2 %7007, %v10125_v15   ;;  %v3602_v36 = vmul.f32 %v10148_v53, %v10148_v53  ;;  %v2823_v26 = vadd.f32 %v2815_v54, %v2791_v21  ;;  %v2824_v12 = vadd.f32 %v2816_v11, %v2792_v51  ;;  %v2911_v42 = vmul.f32 %v14392_v47, %v2627_v6  ;;  %v7080_v51 = vld [vmem:[%s13475_s16 + $0x20] sm:$0xff] }
 0x57a   : > { %v2912_v37 = vmul.f32 %v14392_v47, %v2628_v8  ;;  %v14394_v30 = vmov 0   ;;  %v3592_v21 = vadd.f32 %v10148_v53, %v10146_v18 }
 0x57b   : > { %v3612_v1 = vadd.f32 %v3602_v36, %v3601_v49  ;;  %v2855_v13 = vadd.f32 %v2847_v10, %v2823_v26  ;;  %v2856_v41 = vadd.f32 %v2848_v32, %v2824_v12  ;;  %v10204_v49 = vpop.permute.xlu2 %4741  ;;  %v10206_v36 = vpop.permute.xlu1 %4673 }
 0x57c   : > { %14395 = vst [vmem:[#allocation94_spill] sm:$0xff] %v10204_v49 }
 0x57d   : > { %v2887_v34 = vadd.f32 %v2879_v19, %v2855_v13  ;;  %v2888_v24 = vadd.f32 %v2880_v58, %v2856_v41  ;;  %14396 = vst [vmem:[#allocation167_spill] sm:$0xff] %v10206_v36 }
 0x57f   : > { %v2919_v16 = vadd.f32 %v2911_v42, %v2887_v34  ;;  %v2920_v43 = vadd.f32 %v2912_v37, %v2888_v24 }
 0x581   : > { %v10180_v31 = vadd.f32 %v14393_v59, %v2919_v16  ;;  %v10183_v52 = vadd.f32 %v14393_v59, %v2920_v43 }
 0x583   : > { %v2966_v9 = vadd.f32 %v10183_v52, %v10180_v31  ;;  %v2975_v6 = vmul.f32 %v10180_v31, %v10180_v31  ;;  %v2976_v8 = vmul.f32 %v10183_v52, %v10183_v52  ;;  %v10210_v54 = vpop.permute.xlu1 %4681 }
 0x584   : > { %14397 = vst [vmem:[#allocation145_spill] sm:$0xff] %v10210_v54 }
 0x585   : > { %v2986_v27 = vadd.f32 %v2976_v8, %v2975_v6 }
 0x589   : > { %v2959_v4 = vpop.xlane.xlu2 %2958 }
 0x58b   : > { %4745 = vperm.xlu1 %7004, %v7077_v39   ;;  %3613 = vadd.xlane.f32.xlu0 %v3612_v1  ;;  %v10212_v57 = vpop.permute.xlu1 %4725 }
 0x58c   : > { %14398 = vst [vmem:[#allocation37_spill] sm:$0xff] %v10212_v57 }
 0x593   : > { %7006 = vset.pattern.permute.xlu1 %v14348_v20  ;;  %v7079_v20 = vld [vmem:[%s13475_s16 + $0x18] sm:$0xff]  ;;  %v10215_v12 = vpop.permute.xlu1 %4737 }
 0x594   : > { %4789 = vperm.xlu1 %7006, %v7078_v33   ;;  %v2979_v11 = vpop.xlane.xlu2 %2978  ;;  %14399 = vst [vmem:[#allocation169_spill] sm:$0xff] %v10215_v12 }
 0x595   : > { %v2990_v6 = vsel %vm2989_vm11, %v2959_v4, %v2979_v11  ;;  %v770_v11 = vld [vmem:[%s13482_s23 + $0x8] sm:$0xff] }
 0x59c   : > { %4801 = vperm.xlu1 %7006, %v7079_v20  }
 0x59f   : > { %4881 = vperm.xlu0 %7011, %v9920_v14  }
 0x5a2   : > { %2967 = vadd.xlane.f32.xlu2 %v2966_v9 }
 0x5a4   : > { %4809 = vperm.xlu1 %7006, %v7077_v39  }
 0x5a7   : > { %7012 = vset.pattern.permute.xlu0 %v14394_v30 }
 0x5aa   : > { %2987 = vadd.xlane.f32.xlu2 %v2986_v27 }
 0x5ac   : > { %7009 = vset.pattern.permute.xlu1 %v14369_v48 }
 0x5ad   : > { %4853 = vperm.xlu1 %7009, %v7078_v33   ;;  %v3581_v33 = vld [vmem:[%s13474_s15 + $0x10] sm:$0xff] }
 0x5ae   : > { %3804 = vperm.xlu0 %7012, %v3581_v33   ;;  %v5020_v33 = vld [vmem:[%s13477_s18] sm:$0xff] }
 0x5b2   : > { %3593 = vadd.xlane.f32.xlu2 %v3592_v21 }
 0x5b5   : > { %4865 = vperm.xlu1 %7009, %v7079_v20   ;;  %v769_v20 = vld [vmem:[%s13482_s23] sm:$0xff] }
 0x5b6   : > { %4355 = vperm.xlu0 %7012, %v10125_v15  }
 0x5bd   : > { %4873 = vperm.xlu1 %7009, %v7077_v39   ;;  %v2962_v39 = vpop.xlane.xlu0 %2961 }
 0x5be   : > { %4370 = vperm.xlu0 %7012, %v7080_v51  }
 0x5c3   : > { %v3585_v26 = vpop.xlane.xlu2 %3584 }
 0x5c5   : > { %7013 = vset.pattern.permute.xlu1 %v14394_v30  ;;  %v2982_v10 = vpop.xlane.xlu0 %2981  ;;  %v3605_v1 = vpop.xlane.xlu1 %3604 }
 0x5c6   : > { %v2991_v59 = vsel %vm2989_vm11, %v2962_v39, %v2982_v10  ;;  %v4341_v39 = vld [vmem:[%s13476_s17 + $0x8] sm:$0xff]  ;;  %4385 = vperm.xlu0 %7012, %v9920_v14   ;;  %v772_v14 = vld [vmem:[%s13482_s23 + $0x18] sm:$0xff] }
 0x5ca   : > { %4805 = vperm.xlu2 %7007, %v7080_v51  }
 0x5cd   : > { %v3591_v32 = vpop.xlane.xlu0 %3590  ;;  %v3588_v58 = vpop.xlane.xlu1 %3587 }
 0x5d2   : > { %4813 = vperm.xlu2 %7007, %v10100_v40  }
 0x5d5   : > { %v10218_v3 = vpop.permute.xlu0 %4753  ;;  %v2965_v34 = vpop.xlane.xlu1 %2964 }
 0x5d6   : > { %14400 = vst [vmem:[#allocation171_spill] sm:$0xff] %v10218_v3 }
 0x5da   : > { %7010 = vset.pattern.permute.xlu2 %v14369_v48  ;;  %v3608_v48 = vpop.xlane.xlu2 %3607 }
 0x5db   : > { %4857 = vperm.xlu2 %7010, %v10125_v15   ;;  %v4340_v15 = vld [vmem:[%s13476_s17] sm:$0xff]  ;;  %v3616_v4 = vsel %vm2989_vm11, %v3588_v58, %v3608_v48  ;;  %v771_v48 = vld [vmem:[%s13482_s23 + $0x10] sm:$0xff]  ;;  %v4347_v58 = vld [vmem:[%s13476_s17 + $0x38] sm:$0xff] }
 0x5dc   : > { %4918 = vperm.xlu1 %7013, %v4340_v15  }
 0x5dd   : > { %v10222_v13 = vpop.permute.xlu0 %4797  ;;  %v2985_v47 = vpop.xlane.xlu1 %2984 }
 0x5de   : > { %14402 = vst [vmem:[#allocation93_spill] sm:$0xff] %v10222_v13  ;;  %v2992_v43 = vsel %vm2989_vm11, %v2965_v34, %v2985_v47  ;;  %v3615_v34 = vsel %vm2989_vm11, %v3585_v26, %v3605_v1  ;;  %v4342_v26 = vld [vmem:[%s13476_s17 + $0x10] sm:$0xff]  ;;  %v4345_v1 = vld [vmem:[%s13476_s17 + $0x28] sm:$0xff] }
 0x5df   : > { %4928 = vperm.xlu0 %7012, %v4342_v26   ;;  %v5022_v47 = vld [vmem:[%s13477_s18 + $0x10] sm:$0xff] }
 0x5e2   : > { %v10220_v19 = vpop.permute.xlu2 %4749 }
 0x5e3   : > { %4869 = vperm.xlu2 %7010, %v7080_v51   ;;  %14401 = vst [vmem:[#allocation81_spill] sm:$0xff] %v10220_v19  ;;  %v4343_v51 = vld [vmem:[%s13476_s17 + $0x18] sm:$0xff] }
 0x5e4   : > { %4933 = vperm.xlu1 %7013, %v4343_v51  }
 0x5e5   : > { %v3611_v9 = vpop.xlane.xlu1 %3610 }
 0x5e6   : > { %v3617_v10 = vsel %vm2989_vm11, %v3591_v32, %v3611_v9  ;;  %v4344_v32 = vld [vmem:[%s13476_s17 + $0x20] sm:$0xff]  ;;  %v5025_v9 = vld [vmem:[%s13477_s18 + $0x28] sm:$0xff] }
 0x5ea   : > { %v10224_v41 = vpop.permute.xlu2 %4793 }
 0x5eb   : > { %4877 = vperm.xlu2 %7010, %v10100_v40   ;;  %14403 = vst [vmem:[#allocation42_spill] sm:$0xff] %v10224_v41  ;;  %v10226_v40 = vpop.permute.xlu0 %4817 }
 0x5ec   : > { %14404 = vst [vmem:[#allocation174_spill] sm:$0xff] %v10226_v40  ;;  %4943 = vperm.xlu1 %7013, %v4345_v1  }
 0x5f3   : > { %7014 = vset.pattern.permute.xlu2 %v14394_v30  ;;  %v10231_v42 = vpop.permute.xlu0 %4861 }
 0x5f4   : > { %14405 = vst [vmem:[#allocation100_spill] sm:$0xff] %v10231_v42  ;;  %4923 = vperm.xlu2 %7014, %v4341_v39   ;;  %5318 = vrot.lane.b32.xlu1 %v5020_v33, %s14033_s6 }
 0x5fc   : > { %4938 = vperm.xlu2 %7014, %v4344_v32  }
 0x5fe   : > { %v3614_v8 = vpop.xlane.xlu0 %3613 }
 0x604   : > { %4953 = vperm.xlu2 %7014, %v4347_v58  }
 0x60c   : > { %5322 = vrot.lane.b32.xlu2 %v5022_v47, %s14033_s6 }
 0x611   : > { %v10348_v26 = vpop.permute.xlu0 %4881 }
 0x612   : > { %14411 = vst [vmem:[#allocation181_spill] sm:$0xff] %v10348_v26 }
 0x614   : > { %5328 = vrot.lane.b32.xlu2 %v5025_v9, %s14033_s6 }
 0x615   : > { %v2968_v24 = vpop.xlane.xlu2 %2967 }
 0x61d   : > { %v2988_v37 = vpop.xlane.xlu2 %2987 }
 0x61e   : > { %v2993_v16 = vsel %vm2989_vm11, %v2968_v24, %v2988_v37  ;;  %v4346_v24 = vld [vmem:[%s13476_s17 + $0x30] sm:$0xff]  ;;  %v5021_v37 = vld [vmem:[%s13477_s18 + $0x8] sm:$0xff] }
 0x61f   : > { %3018 = vmatpush.msra.mxu2 %v2993_v16  ;;  %4948 = vperm.xlu0 %7012, %v4346_v24   ;;  %v5023_v16 = vld [vmem:[%s13477_s18 + $0x18] sm:$0xff] }
 0x620   : > { %5324 = vrot.lane.b32.xlu1 %v5023_v16, %s14033_s6  ;;  %v10361_v24 = vpop.permute.xlu0 %3804 }
 0x621   : > { %3019 = vmatpush.msra.mxu2 %v2992_v43  ;;  %v5024_v43 = vld [vmem:[%s13477_s18 + $0x20] sm:$0xff] }
 0x623   : > { %3020 = vmatpush.msra.mxu2 %v2991_v59  ;;  %v5027_v59 = vld [vmem:[%s13477_s18 + $0x38] sm:$0xff] }
 0x625   : > { %3021 = vmatpush.msra.mxu2 %v2990_v6  ;;  %v3594_v27 = vpop.xlane.xlu2 %3593  ;;  %v10319_v6 = vpop.permute.xlu1 %4745 }
 0x626   : > { %v3618_v21 = vsel %vm2989_vm11, %v3594_v27, %v3614_v8  ;;  %6856 = vmatmul.msk.f32.vlgmr.msra.gmra.mxu2 %vm2040_vm12, %v769_v20  ;;  %14406 = vst [vmem:[#allocation136_spill] sm:$0xff] %v10319_v6 }
 0x627   : > { %3631 = vmatpush.msra.mxu3 %v3618_v21  ;;  %5320 = vrot.lane.b32.xlu0 %v5021_v37, %s14033_s6 }
 0x628   : > { %v10375_v9 = vpop.permute.xlu0 %4355 }
 0x629   : > { %3632 = vmatpush.msra.mxu3 %v3617_v10  ;;  %14417 = vst [vmem:[#allocation114_spill] sm:$0xff] %v10375_v9 }
 0x62b   : > { %3633 = vmatpush.msra.mxu3 %v3616_v4 }
 0x62d   : > { %3634 = vmatpush.msra.mxu3 %v3615_v34  ;;  %v10324_v27 = vpop.permute.xlu2 %4805  ;;  %v10326_v21 = vpop.permute.xlu1 %4789 }
 0x62e   : > { %6860 = vmatmul.msk.f32.vlgmr.msra.gmra.mxu3 %vm2040_vm12, %v769_v20  ;;  %6857 = vmatmul.msk.f32.gmra.mxu2 %vm2040_vm12, %v770_v11  ;;  %v5026_v20 = vld [vmem:[%s13477_s18 + $0x30] sm:$0xff]  ;;  %14407 = vst [vmem:[#allocation173_spill] sm:$0xff] %v10324_v27 }
 0x62f   : > { %5326 = vrot.lane.b32.xlu0 %v5024_v43, %s14033_s6  ;;  %5330 = vrot.lane.b32.xlu1 %v5026_v20, %s14033_s6  ;;  %14408 = vst [vmem:[#allocation41_spill] sm:$0xff] %v10326_v21  ;;  %v14416_v20 = vmov 1  }
 0x635   : > { %v10343_v51 = vpop.permute.xlu1 %4801 }
 0x636   : > { %6861 = vmatmul.msk.f32.gmra.mxu3 %vm2040_vm12, %v770_v11  ;;  %6858 = vmatmul.msk.f32.gmra.mxu2 %vm2040_vm12, %v771_v48  ;;  %v10339_v11 = vpop.permute.xlu2 %4813  ;;  %14410 = vst [vmem:[#allocation87_spill] sm:$0xff] %v10343_v51 }
 0x637   : > { %5332 = vrot.lane.b32.xlu0 %v5027_v59, %s14033_s6  ;;  %14409 = vst [vmem:[#allocation99_spill] sm:$0xff] %v10339_v11 }
 0x63d   : > { %v10355_v58 = vpop.permute.xlu1 %4809 }
 0x63e   : > { %6862 = vmatmul.msk.f32.gmra.mxu3 %vm2040_vm12, %v771_v48  ;;  %6859 = vmatmul.msk.f32.gmra.mxu2 %vm2040_vm12, %v772_v14  ;;  %v10353_v1 = vpop.permute.xlu2 %4857  ;;  %14413 = vst [vmem:[#allocation182_spill] sm:$0xff] %v10355_v58 }
 0x63f   : > { %14412 = vst [vmem:[#allocation38_spill] sm:$0xff] %v10353_v1 }
 0x645   : > { %v10369_v43 = vpop.permute.xlu1 %4853 }
 0x646   : > { %6863 = vmatmul.msk.f32.gmra.mxu3 %vm2040_vm12, %v772_v14  ;;  %v10366_v16 = vpop.permute.xlu2 %4869  ;;  %14415 = vst [vmem:[#allocation91_spill] sm:$0xff] %v10369_v43 }
 0x647   : > { %14414 = vst [vmem:[#allocation140_spill] sm:$0xff] %v10366_v16 }
 0x6a9   : > { %v10321_v8 = vpop.f32.mrf.mxu2 }
 0x6aa   : > { %3125 = vperm.xlu0 %7012, %v10321_v8   ;;  %v3035_v15 = vmul.f32 %v10321_v8, %v10321_v8 }
 0x6b1   : > { %v10330_v39 = vpop.f32.mrf.mxu3  ;;  %v10336_v4 = vpop.f32.mrf.mxu2 }
 0x6b2   : > { %v3648_v10 = vmul.f32 %v10330_v39, %v10330_v39  ;;  %3043 = vrot.lane.b32.xlu0 %v3035_v15, %s14033_s6  ;;  %3738 = vperm.xlu1 %7013, %v10330_v39   ;;  %v3036_v34 = vmul.f32 %v10336_v4, %v10336_v4 }
 0x6b4   : > { %3656 = vrot.lane.b32.xlu2 %v3648_v10, %s14033_s6 }
 0x6b9   : > { %v10345_v32 = vpop.f32.mrf.mxu3  ;;  %v3029_v33 = vpop.f32.mrf.mxu2 }
 0x6ba   : > { %3045 = vrot.lane.b32.xlu1 %v3036_v34, %s14033_s6  ;;  %v3649_v48 = vmul.f32 %v10345_v32, %v10345_v32  ;;  %v3037_v37 = vmul.f32 %v3029_v33, %v3029_v33  ;;  %v10383_v34 = vpop.permute.xlu2 %4877 }
 0x6bb   : > { %14418 = vst [vmem:[#allocation183_spill] sm:$0xff] %v10383_v34 }
 0x6bc   : > { %3130 = vperm.xlu2 %7014, %v10336_v4  }
 0x6c1   : > { %v10357_v14 = vpop.f32.mrf.mxu3  ;;  %v10377_v15 = vpop.f32.mrf.mxu2 }
 0x6c2   : > { %3658 = vrot.lane.b32.xlu1 %v3649_v48, %s14033_s6  ;;  %3748 = vperm.xlu0 %7012, %v10357_v14   ;;  %v3650_v47 = vmul.f32 %v10357_v14, %v10357_v14  ;;  %v10386_v48 = vpop.permute.xlu1 %4865  ;;  %v10395_v26 = vpop.permute.xlu2 %4923 }
 0x6c3   : > { %14419 = vst [vmem:[#allocation116_spill] sm:$0xff] %v10386_v48 }
 0x6c4   : > { %3743 = vperm.xlu2 %7014, %v10345_v32   ;;  %14420 = vst [vmem:[#allocation185_spill] sm:$0xff] %v10395_v26 }
 0x6c9   : > { %v10372_v59 = vpop.f32.mrf.mxu3 }
 0x6ca   : > { %3135 = vperm.xlu1 %7013, %v3029_v33   ;;  %3660 = vrot.lane.b32.xlu0 %v3650_v47, %s14033_s6  ;;  %v3651_v10 = vmul.f32 %v10372_v59, %v10372_v59  ;;  %v3038_v47 = vmul.f32 %v10377_v15, %v10377_v15  ;;  %v10397_v40 = vpop.permute.xlu1 %4873 }
 0x6cb   : > { %14421 = vst [vmem:[#allocation184_spill] sm:$0xff] %v10397_v40 }
 0x6cc   : > { %3047 = vrot.lane.b32.xlu2 %v3037_v37, %s14033_s6  ;;  %v10390_v37 = vpop.permute.xlu0 %4370 }
 0x6cd   : > { %7015 = vset.pattern.permute.xlu2 %v14416_v20 }
 0x6d2   : > { %3140 = vperm.xlu0 %7012, %v10377_v15   ;;  %3753 = vperm.xlu1 %7013, %v10372_v59   ;;  %v10403_v48 = vpop.permute.xlu1 %4918 }
 0x6d3   : > { %14424 = vst [vmem:[#allocation96_spill] sm:$0xff] %v10403_v48 }
 0x6d4   : > { %3662 = vrot.lane.b32.xlu2 %v3651_v10, %s14033_s6  ;;  %v10399_v3 = vpop.permute.xlu0 %4385  ;;  %v10401_v10 = vpop.permute.xlu2 %4938 }
 0x6d5   : > { %14422 = vst [vmem:[#allocation88_spill] sm:$0xff] %v10399_v3 }
 0x6d6   : > { %14423 = vst [vmem:[#allocation186_spill] sm:$0xff] %v10401_v10 }
 0x6da   : > { %3049 = vrot.lane.b32.xlu0 %v3038_v47, %s14033_s6  ;;  %7016 = vset.pattern.permute.xlu1 %v14416_v20  ;;  %v10409_v36 = vpop.permute.xlu1 %4933 }
 0x6db   : > { %7017 = vset.pattern.permute.xlu0 %v14416_v20  ;;  %14427 = vst [vmem:[#allocation49_spill] sm:$0xff] %v10409_v36 }
 0x6dc   : > { %v10405_v51 = vpop.permute.xlu0 %4928  ;;  %v10407_v12 = vpop.permute.xlu2 %4953 }
 0x6dd   : > { %14425 = vst [vmem:[#allocation54_spill] sm:$0xff] %v10405_v51 }
 0x6de   : > { %14426 = vst [vmem:[#allocation86_spill] sm:$0xff] %v10407_v12 }
 0x6e2   : > { %v10415_v20 = vpop.permute.xlu1 %4943 }
 0x6e3   : > { %14430 = vst [vmem:[#allocation45_spill] sm:$0xff] %v10415_v20 }
 0x6e4   : > { %v10411_v47 = vpop.permute.xlu0 %4948  ;;  %v10413_v34 = vpop.permute.xlu2 %5322 }
 0x6e5   : > { %14428 = vst [vmem:[#allocation95_spill] sm:$0xff] %v10411_v47 }
 0x6e6   : > { %14429 = vst [vmem:[#allocation113_spill] sm:$0xff] %v10413_v34 }
 0x6ea   : > { %v10421_v3 = vpop.permute.xlu1 %5318 }
 0x6eb   : > { %14433 = vst [vmem:[#allocation92_spill] sm:$0xff] %v10421_v3 }
 0x6ec   : > { %v10417_v11 = vpop.permute.xlu0 %5320  ;;  %v10419_v19 = vpop.permute.xlu2 %5328 }
 0x6ed   : > { %14431 = vst [vmem:[#allocation84_spill] sm:$0xff] %v10417_v11 }
 0x6ee   : > { %14432 = vst [vmem:[#allocation160_spill] sm:$0xff] %v10419_v19 }
 0x6f2   : > { %v10425_v51 = vpop.permute.xlu1 %5324 }
 0x6f3   : > { %14435 = vst [vmem:[#allocation53_spill] sm:$0xff] %v10425_v51 }
 0x6f4   : > { %v10423_v42 = vpop.permute.xlu0 %5326 }
 0x6f5   : > { %14434 = vst [vmem:[#allocation46_spill] sm:$0xff] %v10423_v42 }
 0x6fa   : > { %v10431_v47 = vpop.permute.xlu1 %5330 }
 0x6fb   : > { %14437 = vst [vmem:[#allocation44_spill] sm:$0xff] %v10431_v47 }
 0x6fc   : > { %v10427_v12 = vpop.permute.xlu0 %5332 }
 0x6fd   : > { %14436 = vst [vmem:[#allocation60_spill] sm:$0xff] %v10427_v12 }
 0x70e   : > { %v3657_v13 = vpop.permute.xlu2 %3656 }
 0x70f   : > { %v3668_v34 = vsub.f32 %v10330_v39, %v3657_v13 }
 0x711   : > { %v3672_v19 = vadd.f32 1e-05, %v3668_v34 }
 0x713   : > { %7028 = vrsqrt.f32 %v3672_v19  ;;  %vm3682_vm2 = vweird.f32 %v3672_v19 }
 0x716   : > { %v10429_v36 = vpop.permute.xlu2 %3130 }
 0x719   : > { %v7029_v12 = vpop.eup %7028 }
 0x71a   : > { %v3677_v47 = vmul.f32 %v7029_v12, %v3672_v19  ;;  %vm3683_vm15 = vweird.f32 %v7029_v12 }
 0x71c   : > { %v10434_v20 = vpop.permute.xlu0 %3125  ;;  %v3678_v54 = vmul.f32 %v7029_v12, %v3677_v47 }
 0x71e   : > { %v10436_v11 = vpop.permute.xlu2 %3743  ;;  %v3679_v9 = vmul.f32 0.5, %v3678_v54 }
 0x720   : > { %v3680_v47 = vsub.f32 1.5, %v3679_v9 }
 0x724   : > { %v3044_v3 = vpop.permute.xlu0 %3043  ;;  %v10438_v26 = vpop.permute.xlu1 %3738 }
 0x725   : > { %v3055_v42 = vsub.f32 %v10321_v8, %v3044_v3 }
 0x726   : > { %v3048_v1 = vpop.permute.xlu2 %3047 }
 0x727   : > { %v3059_v51 = vadd.f32 1e-05, %v3055_v42  ;;  %v3057_v40 = vsub.f32 %v3029_v33, %v3048_v1 }
 0x729   : > { %7030 = vrsqrt.f32 %v3059_v51  ;;  %v10442_v58 = vadd.f32 1e-05, %v3057_v40  ;;  %vm3069_vm13 = vweird.f32 %v3059_v51 }
 0x72c   : > { %v3046_v41 = vpop.permute.xlu1 %3045 }
 0x72d   : > { %v3056_v13 = vsub.f32 %v10336_v4, %v3046_v41 }
 0x72f   : > { %v7031_v39 = vpop.eup %7030  ;;  %v3060_v6 = vadd.f32 1e-05, %v3056_v13 }
 0x730   : > { %v3064_v34 = vmul.f32 %v7031_v39, %v3059_v51  ;;  %vm3070_vm12 = vweird.f32 %v7031_v39 }
 0x731   : > { %7032 = vrsqrt.f32 %v3060_v6  ;;  %vm3071_vm14 = vmor %vm3069_vm13, %vm3070_vm12  ;;  %vm3079_vm13 = vweird.f32 %v3060_v6 }
 0x732   : > { %v3065_v10 = vmul.f32 %v7031_v39, %v3064_v34  ;;  %7034 = vrsqrt.f32 %v10442_v58  ;;  %vm10454_vm12 = vmor %vm3682_vm2, %vm3683_vm15 }
 0x734   : > { %v3066_v3 = vmul.f32 0.5, %v3065_v10  ;;  %v3659_v42 = vpop.permute.xlu1 %3658  ;;  %v10445_v8 = vpop.permute.xlu0 %3748 }
 0x735   : > { %v3669_v1 = vsub.f32 %v10345_v32, %v3659_v42  ;;  %v14438_v32 = vld [vmem:[#allocation40_spill] sm:$0xff]  ;;  %v3681_v42 = vmul.f32 %v7029_v12, %v3680_v47  ;;  %v3760_v57 = vsub.f32 %v9839_v50, %v10445_v8 }
 0x736   : > { %v3067_v33 = vsub.f32 1.5, %v3066_v3 }
 0x737   : > { %v7033_v48 = vpop.eup %7032  ;;  %v3673_v41 = vadd.f32 1e-05, %v3669_v1 }
 0x738   : > { %v3068_v40 = vmul.f32 %v7031_v39, %v3067_v33  ;;  %v3074_v4 = vmul.f32 %v7033_v48, %v3060_v6  ;;  %v10448_v13 = vpop.eup %7034  ;;  %vm3080_vm10 = vweird.f32 %v7033_v48 }
 0x739   : > { %7036 = vrsqrt.f32 %v3673_v41  ;;  %v3084_v16 = vmul.f32 %v10448_v13, %v10442_v58  ;;  %vm3692_vm15 = vweird.f32 %v3673_v41 }
 0x73a   : > { %v3075_v34 = vmul.f32 %v7033_v48, %v3074_v4  ;;  %v3072_v10 = vsel %vm3071_vm14, %v7031_v39, %v3068_v40  ;;  %vm3081_vm14 = vmor %vm3079_vm13, %vm3080_vm10  ;;  %vm3089_vm13 = vweird.f32 %v10442_v58 }
 0x73b   : > { %v3119_v3 = vmul.f32 %v14438_v32, %v3072_v10  ;;  %v3085_v39 = vmul.f32 %v10448_v13, %v3084_v16  ;;  %v14442_v16 = vld [vmem:[#allocation119_spill] sm:$0xff] }
 0x73c   : > { %v3076_v54 = vmul.f32 0.5, %v3075_v34  ;;  %v3661_v27 = vpop.permute.xlu0 %3660  ;;  %v3663_v34 = vpop.permute.xlu2 %3662 }
 0x73d   : > { %v3670_v1 = vsub.f32 %v10357_v14, %v3661_v27  ;;  %3153 = vperm.xlu2 %7015, %v3119_v3   ;;  %v3685_v27 = vsel %vm10454_vm12, %v7029_v12, %v3681_v42  ;;  %v3671_v19 = vsub.f32 %v10372_v59, %v3663_v34  ;;  %v3086_v3 = vmul.f32 0.5, %v3085_v39  ;;  %v14443_v39 = vld [vmem:[#allocation117_spill] sm:$0xff] }
 0x73e   : > { %v3077_v33 = vsub.f32 1.5, %v3076_v54  ;;  %v14441_v54 = vld [vmem:[#allocation61_spill] sm:$0xff]  ;;  %vm3090_vm12 = vweird.f32 %v10448_v13 }
 0x73f   : > { %v7037_v9 = vpop.eup %7036  ;;  %v3674_v51 = vadd.f32 1e-05, %v3670_v1  ;;  %v3675_v21 = vadd.f32 1e-05, %v3671_v19  ;;  %v3087_v4 = vsub.f32 1.5, %v3086_v3  ;;  %vm3091_vm1 = vmor %vm3089_vm13, %vm3090_vm12  ;;  %v14444_v3 = vld [vmem:[#allocation109_spill] sm:$0xff] }
 0x740   : > { %v3078_v40 = vmul.f32 %v7033_v48, %v3077_v33  ;;  %v3687_v10 = vmul.f32 %v7037_v9, %v3673_v41  ;;  %v3732_v33 = vmul.f32 %v14442_v16, %v3685_v27  ;;  %vm3693_vm2 = vweird.f32 %v7037_v9  ;;  %v14445_v16 = vld [vmem:[#allocation80_spill] sm:$0xff] }
 0x741   : > { %7038 = vrsqrt.f32 %v3674_v51  ;;  %vm3694_vm10 = vmor %vm3692_vm15, %vm3693_vm2  ;;  %v3088_v34 = vmul.f32 %v10448_v13, %v3087_v4  ;;  %vm3702_vm2 = vweird.f32 %v3674_v51 }
 0x742   : > { %v3688_v14 = vmul.f32 %v7037_v9, %v3687_v10  ;;  %v3082_v47 = vsel %vm3081_vm14, %v7033_v48, %v3078_v40  ;;  %7040 = vrsqrt.f32 %v3675_v21 }
 0x743   : > { %v3120_v32 = vmul.f32 %v14441_v54, %v3082_v47 }
 0x744   : > { %v3689_v1 = vmul.f32 0.5, %v3688_v14  ;;  %v10463_v49 = vpop.permute.xlu0 %3140 }
 0x745   : > { %3158 = vperm.xlu1 %7016, %v3120_v32   ;;  %3766 = vperm.xlu2 %7015, %v3732_v33  }
 0x746   : > { %v3690_v6 = vsub.f32 1.5, %v3689_v1 }
 0x747   : > { %v7039_v43 = vpop.eup %7038 }
 0x748   : > { %v3691_v12 = vmul.f32 %v7037_v9, %v3690_v6  ;;  %v3697_v48 = vmul.f32 %v7039_v43, %v3674_v51  ;;  %vm3703_vm14 = vweird.f32 %v7039_v43  ;;  %v7041_v54 = vpop.eup %7040 }
 0x749   : > { %vm3704_vm15 = vmor %vm3702_vm2, %vm3703_vm14  ;;  %vm3713_vm13 = vweird.f32 %v7041_v54  ;;  %vm3712_vm14 = vweird.f32 %v3675_v21 }
 0x74a   : > { %v3698_v59 = vmul.f32 %v7039_v43, %v3697_v48  ;;  %v3695_v42 = vsel %vm3694_vm10, %v7037_v9, %v3691_v12  ;;  %v3092_v9 = vsel %vm3091_vm1, %v10448_v13, %v3088_v34  ;;  %vm3714_vm2 = vmor %vm3712_vm14, %vm3713_vm13 }
 0x74b   : > { %v3733_v40 = vmul.f32 %v14443_v39, %v3695_v42  ;;  %v3121_v33 = vmul.f32 %v14445_v16, %v3092_v9  ;;  %v14446_v39 = vld [vmem:[#allocation78_spill] sm:$0xff]  ;;  %v14450_v16 = vld [vmem:[#allocation71_spill] sm:$0xff] }
 0x74c   : > { %v3699_v10 = vmul.f32 0.5, %v3698_v59  ;;  %v3050_v27 = vpop.permute.xlu0 %3049 }
 0x74d   : > { %v3058_v14 = vsub.f32 %v10377_v15, %v3050_v27  ;;  %3771 = vperm.xlu0 %7017, %v3733_v40   ;;  %v3707_v15 = vmul.f32 %v7041_v54, %v3675_v21  ;;  %v14447_v27 = vld [vmem:[#allocation123_spill] sm:$0xff] }
 0x74e   : > { %v3700_v47 = vsub.f32 1.5, %v3699_v10 }
 0x74f   : > { %v3062_v41 = vadd.f32 1e-05, %v3058_v14  ;;  %v3708_v6 = vmul.f32 %v7041_v54, %v3707_v15 }
 0x750   : > { %v3701_v19 = vmul.f32 %v7039_v43, %v3700_v47  ;;  %v14448_v47 = vld [vmem:[#allocation55_spill] sm:$0xff] }
 0x751   : > { %7042 = vrsqrt.f32 %v3062_v41  ;;  %v3709_v48 = vmul.f32 0.5, %v3708_v6  ;;  %vm3099_vm10 = vweird.f32 %v3062_v41 }
 0x752   : > { %v3705_v32 = vsel %vm3704_vm15, %v7039_v43, %v3701_v19  ;;  %v3143_v19 = vsub.f32 %v14448_v47, %v10434_v20  ;;  %v14453_v47 = vld [vmem:[#allocation112_spill] sm:$0xff] }
 0x753   : > { %v3734_v1 = vmul.f32 %v14444_v3, %v3705_v32  ;;  %v3710_v43 = vsub.f32 1.5, %v3709_v48 }
 0x755   : > { %3776 = vperm.xlu1 %7016, %v3734_v1   ;;  %3163 = vperm.xlu0 %7017, %v3121_v33   ;;  %v3711_v34 = vmul.f32 %v7041_v54, %v3710_v43 }
 0x757   : > { %v7043_v58 = vpop.eup %7042  ;;  %v3715_v10 = vsel %vm3714_vm2, %v7041_v54, %v3711_v34 }
 0x758   : > { %v3094_v4 = vmul.f32 %v7043_v58, %v3062_v41  ;;  %vm3100_vm1 = vweird.f32 %v7043_v58  ;;  %v3735_v14 = vmul.f32 %v14447_v27, %v3715_v10  ;;  %v14449_v41 = vld [vmem:[#allocation69_spill] sm:$0xff] }
 0x759   : > { %vm3101_vm12 = vmor %vm3099_vm10, %vm3100_vm1  ;;  %v3144_v9 = vsub.f32 %v14449_v41, %v10434_v20  ;;  %v3757_v20 = vsub.f32 %v9925_v22, %v10438_v26  ;;  %v10541_v22 = vpop.permute.xlu1 %3135 }
 0x75a   : > { %v3095_v12 = vmul.f32 %v7043_v58, %v3094_v4  ;;  %v3148_v29 = vsub.f32 %v9991_v2, %v10541_v22  ;;  %v3761_v2 = vsub.f32 %v9841_v38, %v10445_v8 }
 0x75c   : > { %v3096_v59 = vmul.f32 0.5, %v3095_v12 }
 0x75d   : > { %7020 = vset.pattern.permute.xlu1 %v14394_v30  ;;  %7018 = vset.pattern.permute.xlu0 %v14394_v30 }
 0x75e   : > { %v3097_v13 = vsub.f32 1.5, %v3096_v59 }
 0x760   : > { %v3098_v51 = vmul.f32 %v7043_v58, %v3097_v13  ;;  %v14451_v13 = vld [vmem:[#allocation120_spill] sm:$0xff] }
 0x762   : > { %v3102_v42 = vsel %vm3101_vm12, %v7043_v58, %v3098_v51  ;;  %v3756_v58 = vsub.f32 %v9923_v7, %v10438_v26  ;;  %v10549_v26 = vpop.permute.xlu1 %3753 }
 0x763   : > { %v3122_v40 = vmul.f32 %v14446_v39, %v3102_v42  ;;  %v3759_v42 = vsub.f32 %v9935_v55, %v10436_v11  ;;  %v14454_v55 = vld [vmem:[#allocation79_spill] sm:$0xff] }
 0x765   : > { %3168 = vperm.xlu2 %7015, %v3122_v40   ;;  %v14452_v40 = vld [vmem:[#allocation67_spill] sm:$0xff] }
 0x766   : > { %v3145_v34 = vsub.f32 %v14452_v40, %v10429_v36 }
 0x76d   : > { %3781 = vperm.xlu2 %7015, %v3735_v14  }
 0x775   : > { %7019 = vset.pattern.permute.xlu2 %v14394_v30 }
 0x797   : > { %v3154_v32 = vpop.permute.xlu2 %3153 }
 0x798   : > { %v3171_v3 = vmul.f32 %v3154_v32, %v3143_v19  ;;  %v3172_v1 = vmul.f32 %v3154_v32, %v3144_v9  ;;  %v3758_v9 = vsub.f32 %v9933_v28, %v10436_v11  ;;  %v14455_v32 = vld [vmem:[#allocation76_spill] sm:$0xff] }
 0x79a   : > { %v3199_v33 = vadd.f32 %v14450_v16, %v3171_v3  ;;  %v3200_v21 = vadd.f32 %v14450_v16, %v3172_v1  ;;  %v3146_v3 = vsub.f32 %v14455_v32, %v10429_v36  ;;  %v3147_v32 = vsub.f32 %v9988_v61, %v10541_v22 }
 0x79c   : > { %vm3207_vm15 = vcmp.gt.f32.partialorder %v3199_v33, 0.0  ;;  %vm3208_vm1 = vcmp.gt.f32.partialorder %v3200_v21, 0.0  ;;  %v3215_v54 = vmul.f32 0.2, %v3199_v33  ;;  %v3216_v15 = vmul.f32 0.2, %v3200_v21 }
 0x79e   : > { %v10487_v6 = vsel %vm3207_vm15, %v3199_v33, %v3215_v54  ;;  %v10489_v4 = vsel %vm3208_vm1, %v3200_v21, %v3216_v15 }
 0x79f   : > { %3844 = vrot.lane.b32.xlu0 %v10489_v4, %s14044_s7  ;;  %3828 = vrot.lane.b32.xlu1 %v10487_v6, %s14044_s7  ;;  %v3767_v12 = vpop.permute.xlu2 %3766 }
 0x7a0   : > { %v3784_v48 = vmul.f32 %v3767_v12, %v3756_v58  ;;  %v3785_v59 = vmul.f32 %v3767_v12, %v3757_v20 }
 0x7a2   : > { %v10498_v43 = vadd.f32 %v14451_v13, %v3784_v48  ;;  %v10503_v7 = vadd.f32 %v14451_v13, %v3785_v59 }
 0x7a4   : > { %3820 = vrot.lane.b32.xlu2 %v10498_v43, %s14044_s7 }
 0x7a7   : > { %3900 = vrot.lane.b32.xlu0 %v10503_v7, %s14027_s1  ;;  %3884 = vrot.lane.b32.xlu1 %v10498_v43, %s14027_s1 }
 0x7ac   : > { %3836 = vrot.lane.b32.xlu2 %v10503_v7, %s14044_s7 }
 0x7af   : > { %3956 = vrot.lane.b32.xlu0 %v10487_v6, %s14030_s30  ;;  %3908 = vrot.lane.b32.xlu1 %v10489_v4, %s14027_s1 }
 0x7b4   : > { %3892 = vrot.lane.b32.xlu2 %v10487_v6, %s14027_s1 }
 0x7b7   : > { %4012 = vrot.lane.b32.xlu0 %v10498_v43, %s14033_s6  ;;  %3964 = vrot.lane.b32.xlu1 %v10503_v7, %s14030_s30  ;;  %v3159_v39 = vpop.permute.xlu1 %3158 }
 0x7b8   : > { %v3173_v27 = vmul.f32 %v3159_v39, %v3145_v34  ;;  %v3174_v33 = vmul.f32 %v3159_v39, %v3146_v3 }
 0x7ba   : > { %v3201_v41 = vadd.f32 %v14454_v55, %v3173_v27  ;;  %v3202_v28 = vadd.f32 %v14454_v55, %v3174_v33  ;;  %v14457_v33 = vld [vmem:[#allocation51_spill] sm:$0xff] }
 0x7bc   : > { %3948 = vrot.lane.b32.xlu2 %v10498_v43, %s14030_s30  ;;  %v3217_v1 = vmul.f32 0.2, %v3201_v41  ;;  %vm3209_vm10 = vcmp.gt.f32.partialorder %v3201_v41, 0.0  ;;  %v3218_v36 = vmul.f32 0.2, %v3202_v28  ;;  %vm3210_vm12 = vcmp.gt.f32.partialorder %v3202_v28, 0.0 }
 0x7be   : > { %v10583_v21 = vsel %vm3209_vm10, %v3201_v41, %v3217_v1  ;;  %v10599_v58 = vsel %vm3210_vm12, %v3202_v28, %v3218_v36 }
 0x7bf   : > { %4036 = vrot.lane.b32.xlu0 %v10489_v4, %s14033_s6  ;;  %4020 = vrot.lane.b32.xlu1 %v10487_v6, %s14033_s6  ;;  %v3772_v51 = vpop.permute.xlu0 %3771  ;;  %v10565_v14 = vpop.permute.xlu2 %3168  ;;  %14456 = vst [vmem:[#allocation187_spill] sm:$0xff] %v10583_v21 }
 0x7c0   : > { %v3787_v10 = vmul.f32 %v3772_v51, %v3759_v42  ;;  %v3786_v16 = vmul.f32 %v3772_v51, %v3758_v9 }
 0x7c2   : > { %v10570_v19 = vadd.f32 %v14453_v47, %v3787_v10  ;;  %v10586_v54 = vadd.f32 %v14453_v47, %v3786_v16 }
 0x7c4   : > { %3972 = vrot.lane.b32.xlu2 %v10489_v4, %s14030_s30 }
 0x7c7   : > { %4092 = vrot.lane.b32.xlu0 %v10503_v7, %s14034_s26  ;;  %4076 = vrot.lane.b32.xlu1 %v10498_v43, %s14034_s26  ;;  %v10588_v15 = vpop.permute.xlu2 %3781  ;;  %v3777_v12 = vpop.permute.xlu1 %3776 }
 0x7c8   : > { %v3164_v48 = vpop.permute.xlu0 %3163  ;;  %v3788_v35 = vmul.f32 %v3777_v12, %v3760_v57  ;;  %v3789_v57 = vmul.f32 %v3777_v12, %v3761_v2 }
 0x7c9   : > { %v3175_v16 = vmul.f32 %v3164_v48, %v3147_v32 }
 0x7ca   : > { %v10709_v50 = vadd.f32 %v10361_v24, %v3788_v35  ;;  %v10727_v35 = vadd.f32 %v10361_v24, %v3789_v57 }
 0x7cb   : > { %v3203_v28 = vadd.f32 %v14457_v33, %v3175_v16 }
 0x7cc   : > { %4028 = vrot.lane.b32.xlu2 %v10503_v7, %s14033_s6 }
 0x7cd   : > { %v3219_v30 = vmul.f32 0.2, %v3203_v28  ;;  %vm3211_vm13 = vcmp.gt.f32.partialorder %v3203_v28, 0.0 }
 0x7cf   : > { %4148 = vrot.lane.b32.xlu0 %v10487_v6, %s14036_s27  ;;  %4100 = vrot.lane.b32.xlu1 %v10489_v4, %s14034_s26  ;;  %v10690_v32 = vsel %vm3211_vm13, %v3203_v28, %v3219_v30 }
 0x7d4   : > { %4084 = vrot.lane.b32.xlu2 %v10487_v6, %s14034_s26 }
 0x7d7   : > { %4204 = vrot.lane.b32.xlu0 %v10498_v43, %s14039_s8  ;;  %4156 = vrot.lane.b32.xlu1 %v10503_v7, %s14036_s27 }
 0x7dc   : > { %4140 = vrot.lane.b32.xlu2 %v10498_v43, %s14036_s27 }
 0x7df   : > { %4228 = vrot.lane.b32.xlu0 %v10489_v4, %s14039_s8  ;;  %4212 = vrot.lane.b32.xlu1 %v10487_v6, %s14039_s8 }
 0x7e4   : > { %4164 = vrot.lane.b32.xlu2 %v10489_v4, %s14036_s27 }
 0x7e7   : > { %4284 = vrot.lane.b32.xlu0 %v10503_v7, %s14040_s0  ;;  %4268 = vrot.lane.b32.xlu1 %v10498_v43, %s14040_s0 }
 0x7ec   : > { %4220 = vrot.lane.b32.xlu2 %v10503_v7, %s14039_s8 }
 0x7ef   : > { %3838 = vrot.lane.b32.xlu0 %v10570_v19, %s14044_s7  ;;  %4292 = vrot.lane.b32.xlu1 %v10489_v4, %s14040_s0 }
 0x7f4   : > { %4276 = vrot.lane.b32.xlu2 %v10487_v6, %s14040_s0 }
 0x7f7   : > { %3894 = vrot.lane.b32.xlu0 %v10583_v21, %s14027_s1  ;;  %3822 = vrot.lane.b32.xlu1 %v10586_v54, %s14044_s7 }
 0x7fc   : > { %3830 = vrot.lane.b32.xlu2 %v10583_v21, %s14044_s7 }
 0x7fe   : > { %v10597_v11 = vpop.permute.xlu2 %3820 }
 0x7ff   : > { %3950 = vrot.lane.b32.xlu0 %v10586_v54, %s14030_s30  ;;  %3846 = vrot.lane.b32.xlu1 %v10599_v58, %s14044_s7 }
 0x804   : > { %3886 = vrot.lane.b32.xlu2 %v10586_v54, %s14027_s1 }
 0x806   : > { %v10607_v20 = vpop.permute.xlu2 %3836 }
 0x807   : > { %3974 = vrot.lane.b32.xlu0 %v10599_v58, %s14030_s30  ;;  %3902 = vrot.lane.b32.xlu1 %v10570_v19, %s14027_s1 }
 0x80c   : > { %3910 = vrot.lane.b32.xlu2 %v10599_v58, %s14027_s1 }
 0x80e   : > { %v10615_v59 = vpop.permute.xlu2 %3892 }
 0x80f   : > { %4030 = vrot.lane.b32.xlu0 %v10570_v19, %s14033_s6  ;;  %3958 = vrot.lane.b32.xlu1 %v10583_v21, %s14030_s30 }
 0x811   : > { %v10621_v13 = vpop.permute.xlu0 %3844  ;;  %v10623_v51 = vpop.permute.xlu1 %3828 }
 0x814   : > { %3966 = vrot.lane.b32.xlu2 %v10570_v19, %s14030_s30 }
 0x816   : > { %v10627_v42 = vpop.permute.xlu2 %3948 }
 0x817   : > { %4086 = vrot.lane.b32.xlu0 %v10583_v21, %s14034_s26  ;;  %4014 = vrot.lane.b32.xlu1 %v10586_v54, %s14033_s6 }
 0x819   : > { %v10633_v39 = vpop.permute.xlu0 %3900  ;;  %v10635_v40 = vpop.permute.xlu1 %3884 }
 0x81c   : > { %4022 = vrot.lane.b32.xlu2 %v10583_v21, %s14033_s6 }
 0x81e   : > { %v10639_v34 = vpop.permute.xlu2 %3972 }
 0x81f   : > { %4142 = vrot.lane.b32.xlu0 %v10586_v54, %s14036_s27  ;;  %4038 = vrot.lane.b32.xlu1 %v10599_v58, %s14033_s6 }
 0x821   : > { %v10645_v10 = vpop.permute.xlu0 %3956  ;;  %v10647_v27 = vpop.permute.xlu1 %3908 }
 0x824   : > { %4078 = vrot.lane.b32.xlu2 %v10586_v54, %s14034_s26 }
 0x826   : > { %v10651_v47 = vpop.permute.xlu2 %4028 }
 0x827   : > { %4166 = vrot.lane.b32.xlu0 %v10599_v58, %s14036_s27  ;;  %4094 = vrot.lane.b32.xlu1 %v10570_v19, %s14034_s26 }
 0x829   : > { %v10657_v55 = vpop.permute.xlu0 %4012  ;;  %v10659_v41 = vpop.permute.xlu1 %3964 }
 0x82c   : > { %4102 = vrot.lane.b32.xlu2 %v10599_v58, %s14034_s26 }
 0x82e   : > { %v10663_v9 = vpop.permute.xlu2 %4084 }
 0x82f   : > { %4222 = vrot.lane.b32.xlu0 %v10570_v19, %s14039_s8  ;;  %4150 = vrot.lane.b32.xlu1 %v10583_v21, %s14036_s27 }
 0x831   : > { %v10671_v3 = vpop.permute.xlu0 %4036  ;;  %v10673_v1 = vpop.permute.xlu1 %4020 }
 0x834   : > { %4158 = vrot.lane.b32.xlu2 %v10570_v19, %s14036_s27 }
 0x836   : > { %v10678_v36 = vpop.permute.xlu2 %4140 }
 0x837   : > { %4278 = vrot.lane.b32.xlu0 %v10583_v21, %s14040_s0  ;;  %4206 = vrot.lane.b32.xlu1 %v10586_v54, %s14039_s8 }
 0x839   : > { %v10684_v61 = vpop.permute.xlu0 %4092  ;;  %v10686_v44 = vpop.permute.xlu1 %4076 }
 0x83c   : > { %4214 = vrot.lane.b32.xlu2 %v10583_v21, %s14039_s8  ;;  %v3176_v21 = vmul.f32 %v3164_v48, %v3148_v29 }
 0x83e   : > { %v10692_v16 = vpop.permute.xlu2 %4164  ;;  %v3204_v28 = vadd.f32 %v14457_v33, %v3176_v21 }
 0x83f   : > { %14458 = vst [vmem:[#allocation108_spill] sm:$0xff] %v10692_v16  ;;  %3832 = vrot.lane.b32.xlu0 %v10690_v32, %s14044_s7  ;;  %4230 = vrot.lane.b32.xlu1 %v10599_v58, %s14039_s8 }
 0x840   : > { %v3220_v22 = vmul.f32 0.2, %v3204_v28  ;;  %vm3212_vm14 = vcmp.gt.f32.partialorder %v3204_v28, 0.0 }
 0x841   : > { %v10702_v45 = vpop.permute.xlu0 %4148  ;;  %v10704_v30 = vpop.permute.xlu1 %4100 }
 0x842   : > { %v10729_v21 = vsel %vm3212_vm14, %v3204_v28, %v3220_v22 }
 0x844   : > { %4270 = vrot.lane.b32.xlu2 %v10586_v54, %s14040_s0 }
 0x846   : > { %v10712_v16 = vpop.permute.xlu2 %4220 }
 0x847   : > { %14459 = vst [vmem:[#allocation47_spill] sm:$0xff] %v10712_v16  ;;  %3888 = vrot.lane.b32.xlu0 %v10709_v50, %s14027_s1  ;;  %4286 = vrot.lane.b32.xlu1 %v10570_v19, %s14040_s0 }
 0x849   : > { %v10720_v29 = vpop.permute.xlu0 %4204  ;;  %v10722_v48 = vpop.permute.xlu1 %4156 }
 0x84a   : > { %14460 = vst [vmem:[#allocation50_spill] sm:$0xff] %v10720_v29 }
 0x84c   : > { %4294 = vrot.lane.b32.xlu2 %v10599_v58, %s14040_s0 }
 0x84e   : > { %v10731_v33 = vpop.permute.xlu2 %4276 }
 0x84f   : > { %14461 = vst [vmem:[#allocation103_spill] sm:$0xff] %v10731_v33  ;;  %3912 = vrot.lane.b32.xlu0 %v10729_v21, %s14027_s1  ;;  %3840 = vrot.lane.b32.xlu1 %v10727_v35, %s14044_s7 }
 0x851   : > { %v10737_v38 = vpop.permute.xlu0 %4228  ;;  %v10739_v8 = vpop.permute.xlu1 %4212 }
 0x852   : > { %14462 = vst [vmem:[#allocation66_spill] sm:$0xff] %v10737_v38 }
 0x853   : > { %14463 = vst [vmem:[#allocation64_spill] sm:$0xff] %v10739_v8 }
 0x854   : > { %3824 = vrot.lane.b32.xlu2 %v10709_v50, %s14044_s7 }
 0x856   : > { %v10743_v12 = vpop.permute.xlu2 %3830 }
 0x857   : > { %14464 = vst [vmem:[#allocation58_spill] sm:$0xff] %v10743_v12  ;;  %3968 = vrot.lane.b32.xlu0 %v10727_v35, %s14030_s30  ;;  %3896 = vrot.lane.b32.xlu1 %v10690_v32, %s14027_s1 }
 0x859   : > { %v10749_v24 = vpop.permute.xlu0 %4284  ;;  %v10751_v28 = vpop.permute.xlu1 %4268 }
 0x85a   : > { %14465 = vst [vmem:[#allocation102_spill] sm:$0xff] %v10749_v24  ;;  %v14489_v24 = vld [vmem:[#allocation106_spill] sm:$0xff] }
 0x85b   : > { %14466 = vst [vmem:[#allocation73_spill] sm:$0xff] %v10751_v28 }
 0x85c   : > { %3848 = vrot.lane.b32.xlu2 %v10729_v21, %s14044_s7 }
 0x85e   : > { %v10755_v2 = vpop.permute.xlu2 %3886 }
 0x85f   : > { %14467 = vst [vmem:[#allocation107_spill] sm:$0xff] %v10755_v2  ;;  %4024 = vrot.lane.b32.xlu0 %v10690_v32, %s14033_s6  ;;  %3952 = vrot.lane.b32.xlu1 %v10709_v50, %s14030_s30 }
 0x861   : > { %v10761_v57 = vpop.permute.xlu0 %3838  ;;  %v10763_v22 = vpop.permute.xlu1 %4292 }
 0x862   : > { %14468 = vst [vmem:[#allocation59_spill] sm:$0xff] %v10761_v57 }
 0x863   : > { %14469 = vst [vmem:[#allocation70_spill] sm:$0xff] %v10763_v22 }
 0x864   : > { %3904 = vrot.lane.b32.xlu2 %v10727_v35, %s14027_s1 }
 0x866   : > { %v10767_v12 = vpop.permute.xlu2 %3910 }
 0x867   : > { %14470 = vst [vmem:[#allocation111_spill] sm:$0xff] %v10767_v12  ;;  %4080 = vrot.lane.b32.xlu0 %v10709_v50, %s14034_s26  ;;  %3976 = vrot.lane.b32.xlu1 %v10729_v21, %s14030_s30 }
 0x869   : > { %v10773_v2 = vpop.permute.xlu0 %3894  ;;  %v10775_v33 = vpop.permute.xlu1 %3822 }
 0x86a   : > { %14471 = vst [vmem:[#allocation72_spill] sm:$0xff] %v10773_v2 }
 0x86b   : > { %14472 = vst [vmem:[#allocation82_spill] sm:$0xff] %v10775_v33 }
 0x86c   : > { %3960 = vrot.lane.b32.xlu2 %v10690_v32, %s14030_s30 }
 0x86e   : > { %v10779_v57 = vpop.permute.xlu2 %3966 }
 0x86f   : > { %14473 = vst [vmem:[#allocation170_spill] sm:$0xff] %v10779_v57  ;;  %4104 = vrot.lane.b32.xlu0 %v10729_v21, %s14034_s26  ;;  %4032 = vrot.lane.b32.xlu1 %v10727_v35, %s14033_s6 }
 0x871   : > { %v10785_v12 = vpop.permute.xlu0 %3950  ;;  %v10787_v22 = vpop.permute.xlu1 %3846 }
 0x872   : > { %14474 = vst [vmem:[#allocation177_spill] sm:$0xff] %v10785_v12 }
 0x873   : > { %14475 = vst [vmem:[#allocation176_spill] sm:$0xff] %v10787_v22 }
 0x874   : > { %4016 = vrot.lane.b32.xlu2 %v10709_v50, %s14033_s6 }
 0x876   : > { %v10791_v2 = vpop.permute.xlu2 %4022 }
 0x877   : > { %14476 = vst [vmem:[#allocation22_spill] sm:$0xff] %v10791_v2  ;;  %4160 = vrot.lane.b32.xlu0 %v10727_v35, %s14036_s27  ;;  %4088 = vrot.lane.b32.xlu1 %v10690_v32, %s14034_s26 }
 0x879   : > { %v10797_v57 = vpop.permute.xlu0 %3974  ;;  %v10799_v33 = vpop.permute.xlu1 %3902 }
 0x87a   : > { %14477 = vst [vmem:[#allocation12_spill] sm:$0xff] %v10797_v57 }
 0x87b   : > { %14478 = vst [vmem:[#allocation52_spill] sm:$0xff] %v10799_v33 }
 0x87c   : > { %4040 = vrot.lane.b32.xlu2 %v10729_v21, %s14033_s6 }
 0x87e   : > { %v10803_v12 = vpop.permute.xlu2 %4078 }
 0x87f   : > { %14479 = vst [vmem:[#allocation172_spill] sm:$0xff] %v10803_v12  ;;  %4216 = vrot.lane.b32.xlu0 %v10690_v32, %s14039_s8  ;;  %4144 = vrot.lane.b32.xlu1 %v10709_v50, %s14036_s27 }
 0x881   : > { %v10809_v2 = vpop.permute.xlu0 %4030  ;;  %v10811_v22 = vpop.permute.xlu1 %3958 }
 0x882   : > { %14480 = vst [vmem:[#allocation74_spill] sm:$0xff] %v10809_v2 }
 0x883   : > { %14481 = vst [vmem:[#allocation90_spill] sm:$0xff] %v10811_v22  ;;  %v3762_v22 = vsub.f32 %v10146_v18, %v10549_v26 }
 0x884   : > { %4096 = vrot.lane.b32.xlu2 %v10727_v35, %s14034_s26 }
 0x886   : > { %v10815_v57 = vpop.permute.xlu2 %4102 }
 0x887   : > { %14482 = vst [vmem:[#allocation18_spill] sm:$0xff] %v10815_v57  ;;  %4272 = vrot.lane.b32.xlu0 %v10709_v50, %s14040_s0  ;;  %4168 = vrot.lane.b32.xlu1 %v10729_v21, %s14036_s27  ;;  %v3150_v57 = vsub.f32 %v10183_v52, %v10463_v49  ;;  %v14487_v52 = vld [vmem:[#allocation122_spill] sm:$0xff] }
 0x889   : > { %v10821_v12 = vpop.permute.xlu0 %4086  ;;  %v10823_v33 = vpop.permute.xlu1 %4014 }
 0x88a   : > { %14483 = vst [vmem:[#allocation89_spill] sm:$0xff] %v10821_v12  ;;  %v3149_v12 = vsub.f32 %v10180_v31, %v10463_v49 }
 0x88b   : > { %14484 = vst [vmem:[#allocation179_spill] sm:$0xff] %v10823_v33  ;;  %v3790_v33 = vmul.f32 %v10588_v15, %v3762_v22 }
 0x88c   : > { %4152 = vrot.lane.b32.xlu2 %v10690_v32, %s14036_s27  ;;  %v3177_v18 = vmul.f32 %v10565_v14, %v3149_v12 }
 0x88d   : > { %v10849_v28 = vadd.f32 %v14487_v52, %v3790_v33 }
 0x88e   : > { %v10827_v2 = vpop.permute.xlu2 %4158  ;;  %v3205_v31 = vadd.f32 %v14489_v24, %v3177_v18 }
 0x88f   : > { %14485 = vst [vmem:[#allocation178_spill] sm:$0xff] %v10827_v2  ;;  %4296 = vrot.lane.b32.xlu0 %v10729_v21, %s14040_s0  ;;  %4224 = vrot.lane.b32.xlu1 %v10727_v35, %s14039_s8  ;;  %v3178_v2 = vmul.f32 %v10565_v14, %v3150_v57  ;;  %v3763_v57 = vsub.f32 %v10148_v53, %v10549_v26 }
 0x890   : > { %14488 = vst [vmem:[#allocation156_spill] sm:$0xff] %v10849_v28  ;;  %v3221_v33 = vmul.f32 0.2, %v3205_v31  ;;  %vm3213_vm15 = vcmp.gt.f32.partialorder %v3205_v31, 0.0 }
 0x891   : > { %v10840_v8 = vpop.permute.xlu0 %4142  ;;  %v10843_v38 = vpop.permute.xlu1 %4038  ;;  %v3206_v29 = vadd.f32 %v14489_v24, %v3178_v2  ;;  %v3791_v18 = vmul.f32 %v10588_v15, %v3763_v57 }
 0x892   : > { %14486 = vst [vmem:[#allocation154_spill] sm:$0xff] %v10840_v8  ;;  %v10871_v22 = vsel %vm3213_vm15, %v3205_v31, %v3221_v33 }
 0x893   : > { %v3222_v14 = vmul.f32 0.2, %v3206_v29  ;;  %vm3214_vm2 = vcmp.gt.f32.partialorder %v3206_v29, 0.0  ;;  %14494 = vst [vmem:[#allocation180_spill] sm:$0xff] %v10871_v22 }
 0x894   : > { %4208 = vrot.lane.b32.xlu2 %v10709_v50, %s14039_s8 }
 0x895   : > { %v10865_v2 = vsel %vm3214_vm2, %v3206_v29, %v3222_v14  ;;  %v10885_v29 = vadd.f32 %v14487_v52, %v3791_v18 }
 0x896   : > { %v10852_v16 = vpop.permute.xlu2 %4214  ;;  %14492 = vst [vmem:[#allocation98_spill] sm:$0xff] %v10865_v2 }
 0x897   : > { %14490 = vst [vmem:[#allocation168_spill] sm:$0xff] %v10852_v16  ;;  %3826 = vrot.lane.b32.xlu0 %v10849_v28, %s14044_s7  ;;  %4280 = vrot.lane.b32.xlu1 %v10690_v32, %s14040_s0 }
 0x898   : > { %14497 = vst [vmem:[#allocation104_spill] sm:$0xff] %v10885_v29 }
 0x899   : > { %v10859_v49 = vpop.permute.xlu0 %4166  ;;  %v10861_v12 = vpop.permute.xlu1 %4094 }
 0x89a   : > { %14491 = vst [vmem:[#allocation175_spill] sm:$0xff] %v10859_v49 }
 0x89c   : > { %4232 = vrot.lane.b32.xlu2 %v10729_v21, %s14039_s8 }
 0x89e   : > { %v10867_v24 = vpop.permute.xlu2 %4270 }
 0x89f   : > { %14493 = vst [vmem:[#allocation97_spill] sm:$0xff] %v10867_v24  ;;  %3850 = vrot.lane.b32.xlu0 %v10865_v2, %s14044_s7  ;;  %3834 = vrot.lane.b32.xlu1 %v10871_v22, %s14044_s7  ;;  %v3860_v24 = vsel %vm794_vm0, %v10607_v20, %v10597_v11 }
 0x8a1   : > { %v10878_v16 = vpop.permute.xlu0 %4222  ;;  %v10880_v49 = vpop.permute.xlu1 %4150 }
 0x8a2   : > { %14495 = vst [vmem:[#allocation105_spill] sm:$0xff] %v10878_v16 }
 0x8a3   : > { %14496 = vst [vmem:[#allocation63_spill] sm:$0xff] %v10880_v49 }
 0x8a4   : > { %4288 = vrot.lane.b32.xlu2 %v10727_v35, %s14040_s0 }
 0x8a6   : > { %v10887_v53 = vpop.permute.xlu2 %4294 }
 0x8a7   : > { %14498 = vst [vmem:[#allocation101_spill] sm:$0xff] %v10887_v53  ;;  %3906 = vrot.lane.b32.xlu0 %v10885_v29, %s14027_s1  ;;  %3890 = vrot.lane.b32.xlu1 %v10849_v28, %s14027_s1 }
 0x8a9   : > { %v10893_v26 = vpop.permute.xlu0 %4278  ;;  %v10895_v15 = vpop.permute.xlu1 %4206 }
 0x8aa   : > { %14499 = vst [vmem:[#allocation56_spill] sm:$0xff] %v10893_v26 }
 0x8ab   : > { %14500 = vst [vmem:[#allocation133_spill] sm:$0xff] %v10895_v15 }
 0x8ac   : > { %3842 = vrot.lane.b32.xlu2 %v10885_v29, %s14044_s7 }
 0x8ae   : > { %v10899_v31 = vpop.permute.xlu2 %3824 }
 0x8af   : > { %14501 = vst [vmem:[#allocation110_spill] sm:$0xff] %v10899_v31  ;;  %3962 = vrot.lane.b32.xlu0 %v10871_v22, %s14030_s30  ;;  %3914 = vrot.lane.b32.xlu1 %v10865_v2, %s14027_s1  ;;  %v3852_v31 = vsel %vm794_vm0, %v10597_v11, %v10607_v20  ;;  %v3868_v11 = vmul.f32 %v3860_v24, %v14353_v60 }
 0x8b0   : > { %v3869_v20 = vmul.f32 %v3852_v31, %v14354_v63  ;;  %v3980_v24 = vsel %vm826_vm3, %v10627_v42, %v10659_v41  ;;  %v3988_v31 = vsel %vm826_vm3, %v10659_v41, %v10627_v42  ;;  %v14510_v42 = vld [vmem:[#allocation131_spill] sm:$0xff] }
 0x8b1   : > { %v10905_v52 = vpop.permute.xlu0 %3832  ;;  %v10907_v14 = vpop.permute.xlu1 %4230  ;;  %v3997_v16 = vmul.f32 %v3980_v24, %v14360_v62 }
 0x8b2   : > { %14502 = vst [vmem:[#allocation57_spill] sm:$0xff] %v10905_v52 }
 0x8b3   : > { %14503 = vst [vmem:[#allocation68_spill] sm:$0xff] %v10907_v14  ;;  %v14511_v14 = vld [vmem:[#allocation115_spill] sm:$0xff] }
 0x8b4   : > { %3898 = vrot.lane.b32.xlu2 %v10871_v22, %s14027_s1 }
 0x8b6   : > { %v10911_v33 = vpop.permute.xlu2 %3848 }
 0x8b7   : > { %14504 = vst [vmem:[#allocation65_spill] sm:$0xff] %v10911_v33  ;;  %4018 = vrot.lane.b32.xlu0 %v10849_v28, %s14033_s6  ;;  %3970 = vrot.lane.b32.xlu1 %v10885_v29, %s14030_s30 }
 0x8b9   : > { %v10917_v57 = vpop.permute.xlu0 %3888  ;;  %v10919_v18 = vpop.permute.xlu1 %4286 }
 0x8ba   : > { %14505 = vst [vmem:[#allocation75_spill] sm:$0xff] %v10917_v57  ;;  %v3924_v57 = vsel %vm810_vm4, %v10633_v39, %v10635_v40 }
 0x8bb   : > { %14506 = vst [vmem:[#allocation77_spill] sm:$0xff] %v10919_v18  ;;  %v3916_v18 = vsel %vm810_vm4, %v10635_v40, %v10633_v39  ;;  %v3932_v52 = vmul.f32 %v3924_v57, %v14357_v17  ;;  %v3864_v39 = vsel %vm794_vm0, %v10621_v13, %v10623_v51 }
 0x8bc   : > { %3954 = vrot.lane.b32.xlu2 %v10849_v28, %s14030_s30  ;;  %v3933_v40 = vmul.f32 %v3916_v18, %v14358_v23  ;;  %v3920_v18 = vsel %vm810_vm4, %v10615_v59, %v10647_v27  ;;  %v3876_v15 = vmul.f32 %v3864_v39, %v14353_v60  ;;  %v4044_v39 = vsel %vm842_vm5, %v10657_v55, %v10651_v47 }
 0x8bd   : > { %v4436_v41 = vmul.f32 %v14510_v42, %v3932_v52  ;;  %v3941_v52 = vmul.f32 %v3920_v18, %v14358_v23  ;;  %v14514_v18 = vld [vmem:[#allocation139_spill] sm:$0xff] }
 0x8be   : > { %v10935_v33 = vpop.permute.xlu2 %3904  ;;  %v4437_v49 = vmul.f32 %v14510_v42, %v3933_v40  ;;  %v4052_v40 = vsel %vm842_vm5, %v10651_v47, %v10657_v55  ;;  %v4396_v24 = vmul.f32 %v10390_v37, %v3876_v15  ;;  %v4048_v47 = vsel %vm842_vm5, %v10673_v1, %v10671_v3 }
 0x8bf   : > { %14507 = vst [vmem:[#allocation39_spill] sm:$0xff] %v10935_v33  ;;  %4042 = vrot.lane.b32.xlu0 %v10865_v2, %s14033_s6  ;;  %4026 = vrot.lane.b32.xlu1 %v10871_v22, %s14033_s6  ;;  %v3928_v33 = vsel %vm810_vm4, %v10647_v27, %v10615_v59 }
 0x8c0   : > { %v3940_v53 = vmul.f32 %v3928_v33, %v14357_v17  ;;  %v3992_v33 = vsel %vm826_vm3, %v10639_v34, %v10645_v10 }
 0x8c1   : > { %v10952_v26 = vpop.permute.xlu0 %3912  ;;  %v10967_v57 = vpop.permute.xlu1 %3840 }
 0x8c2   : > { %14508 = vst [vmem:[#allocation36_spill] sm:$0xff] %v10952_v26  ;;  %v3856_v26 = vsel %vm794_vm0, %v10623_v51, %v10621_v13  ;;  %v4388_v13 = vmul.f32 %v14511_v14, %v3868_v11  ;;  %v4389_v51 = vmul.f32 %v14511_v14, %v3869_v20  ;;  %v4056_v11 = vsel %vm842_vm5, %v10671_v3, %v10673_v1  ;;  %v14513_v14 = vld [vmem:[#allocation126_spill] sm:$0xff] }
 0x8c3   : > { %14509 = vst [vmem:[#allocation40_spill] sm:$0xff] %v10967_v57  ;;  %v3996_v57 = vmul.f32 %v3988_v31, %v14359_v56  ;;  %v3877_v27 = vmul.f32 %v3856_v26, %v14354_v63  ;;  %v3984_v26 = vsel %vm826_vm3, %v10645_v10, %v10639_v34  ;;  %v4444_v20 = vmul.f32 %v14513_v14, %v3940_v53 }
 0x8c4   : > { %3978 = vrot.lane.b32.xlu2 %v10865_v2, %s14030_s30  ;;  %v4452_v31 = vadd.f32 %v4436_v41, %v4388_v13  ;;  %v4501_v10 = vmul.f32 %v14514_v18, %v3997_v16  ;;  %v4453_v42 = vadd.f32 %v4437_v49, %v4389_v51  ;;  %v4068_v55 = vmul.f32 %v4056_v11, %v14366_v5  ;;  %v14515_v51 = vld [vmem:[#allocation48_spill] sm:$0xff] }
 0x8c5   : > { %v4500_v34 = vmul.f32 %v14514_v18, %v3996_v57  ;;  %v4005_v15 = vmul.f32 %v3984_v26, %v14360_v62  ;;  %v4445_v57 = vmul.f32 %v14513_v14, %v3941_v52  ;;  %v4060_v16 = vmul.f32 %v4052_v40, %v14366_v5  ;;  %v14517_v14 = vld [vmem:[#allocation144_spill] sm:$0xff]  ;;  %v14520_v18 = vld [vmem:[#allocation150_spill] sm:$0xff] }
 0x8c6   : > { %v10987_v59 = vpop.permute.xlu2 %3960  ;;  %v4061_v41 = vmul.f32 %v4044_v39, %v14367_v25  ;;  %v4397_v49 = vmul.f32 %v10390_v37, %v3877_v27  ;;  %v4460_v13 = vadd.f32 %v4444_v20, %v4396_v24  ;;  %v11038_v3 = vmul.f32 %v14515_v51, %v10489_v4  ;;  %v14516_v27 = vld [vmem:[#allocation135_spill] sm:$0xff]  ;;  %v14518_v20 = vld [vmem:[#allocation158_spill] sm:$0xff] }
 0x8c7   : > { %14512 = vst [vmem:[#allocation61_spill] sm:$0xff] %v10987_v59  ;;  %4098 = vrot.lane.b32.xlu0 %v10885_v29, %s14034_s26  ;;  %4082 = vrot.lane.b32.xlu1 %v10849_v28, %s14034_s26  ;;  %v4004_v59 = vmul.f32 %v3992_v33, %v14359_v56  ;;  %v4636_v33 = vmul.f32 %v14515_v51, %v10487_v6  ;;  %v14524_v51 = vld [vmem:[#allocation151_spill] sm:$0xff] }
 0x8c8   : > { %v4516_v1 = vadd.f32 %v4500_v34, %v4452_v31  ;;  %v4517_v11 = vadd.f32 %v4501_v10, %v4453_v42  ;;  %v4069_v52 = vmul.f32 %v4048_v47, %v14367_v25  ;;  %v4108_v37 = vsel %vm858_vm6, %v10686_v44, %v10684_v61 }
 0x8c9   : > { %v11019_v53 = vpop.permute.xlu0 %3968  ;;  %v11027_v8 = vpop.permute.xlu1 %3896  ;;  %v4508_v26 = vmul.f32 %v14516_v27, %v4004_v59  ;;  %v4572_v6 = vmul.f32 %v14517_v14, %v4068_v55  ;;  %v4629_v4 = vmul.f32 %v14518_v20, %v10503_v7  ;;  %v4628_v39 = vmul.f32 %v14518_v20, %v10498_v43  ;;  %v14528_v20 = vld [vmem:[#allocation165_spill] sm:$0xff] }
 0x8ca   : > { %v4509_v24 = vmul.f32 %v14516_v27, %v4005_v15  ;;  %v4461_v31 = vadd.f32 %v4445_v57, %v4397_v49  ;;  %v4564_v34 = vmul.f32 %v14520_v18, %v4060_v16  ;;  %v4565_v10 = vmul.f32 %v14520_v18, %v4061_v41  ;;  %v14522_v16 = vld [vmem:[#allocation187_spill] sm:$0xff]  ;;  %v14523_v41 = vld [vmem:[#allocation164_spill] sm:$0xff] }
 0x8cb   : > { %v4524_v59 = vadd.f32 %v4508_v26, %v4460_v13  ;;  %v4116_v7 = vsel %vm858_vm6, %v10684_v61, %v10686_v44  ;;  %v4124_v43 = vmul.f32 %v4108_v37, %v14098_v0  ;;  %v4172_v42 = vsel %vm874_vm7, %v10678_v36, %v10722_v48  ;;  %v14526_v37 = vld [vmem:[#allocation23_spill] sm:$0xff]  ;;  %v14527_v26 = vld [vmem:[#allocation26_spill] sm:$0xff] }
 0x8cc   : > { %4034 = vrot.lane.b32.xlu2 %v10885_v29, %s14033_s6  ;;  %v4580_v47 = vadd.f32 %v4564_v34, %v4516_v1  ;;  %v4581_v55 = vadd.f32 %v4565_v10, %v4517_v11  ;;  %v4573_v15 = vmul.f32 %v14517_v14, %v4069_v52  ;;  %v4112_v57 = vsel %vm858_vm6, %v10663_v9, %v10704_v30  ;;  %v14529_v10 = vld [vmem:[#allocation159_spill] sm:$0xff] }
 0x8cd   : > { %v4588_v61 = vadd.f32 %v4572_v6, %v4524_v59  ;;  %v11080_v49 = vmul.f32 %v14523_v41, %v14522_v16  ;;  %v11084_v13 = vmul.f32 %v14523_v41, %v10599_v58  ;;  %v11088_v1 = vmul.f32 %v14524_v51, %v10586_v54 }
 0x8ce   : > { %v11053_v40 = vpop.permute.xlu2 %4016  ;;  %v4525_v52 = vadd.f32 %v4509_v24, %v4461_v31  ;;  %v4125_v27 = vmul.f32 %v4116_v7, %v14526_v37  ;;  %v4188_v14 = vmul.f32 %v4172_v42, %v14527_v26  ;;  %v11096_v6 = vmul.f32 %v14524_v51, %v10570_v19  ;;  %v14531_v7 = vld [vmem:[#allocation108_spill] sm:$0xff]  ;;  %v14533_v42 = vld [vmem:[#allocation50_spill] sm:$0xff]  ;;  %v14539_v51 = vld [vmem:[#allocation5_spill] sm:$0xff] }
 0x8cf   : > { %14519 = vst [vmem:[#allocation119_spill] sm:$0xff] %v11053_v40  ;;  %4154 = vrot.lane.b32.xlu0 %v10871_v22, %s14036_s27  ;;  %4106 = vrot.lane.b32.xlu1 %v10865_v2, %s14034_s26  ;;  %v4692_v18 = vmul.f32 %v14528_v20, %v4124_v43  ;;  %v4120_v58 = vsel %vm858_vm6, %v10704_v30, %v10663_v9  ;;  %v14532_v43 = vld [vmem:[#allocation47_spill] sm:$0xff] }
 0x8d0   : > { %v4132_v54 = vmul.f32 %v4112_v57, %v14098_v0  ;;  %v4180_v24 = vsel %vm874_vm7, %v10722_v48, %v10678_v36  ;;  %v4589_v31 = vadd.f32 %v4573_v15, %v4525_v52  ;;  %v4644_v19 = vadd.f32 %v4628_v39, %v4580_v47  ;;  %v14534_v48 = vld [vmem:[#allocation102_spill] sm:$0xff]  ;;  %v14535_v57 = vld [vmem:[#allocation73_spill] sm:$0xff]  ;;  %v14546_v40 = vld [vmem:[#allocation31_spill] sm:$0xff] }
 0x8d1   : > { %v11076_v44 = vpop.permute.xlu0 %4024  ;;  %v11090_v11 = vpop.permute.xlu1 %3952  ;;  %v4645_v34 = vadd.f32 %v4629_v4, %v4581_v55  ;;  %v11112_v59 = vmul.f32 %v14529_v10, %v10709_v50  ;;  %v4176_v9 = vsel %vm874_vm7, %v10702_v45, %v14531_v7  ;;  %v4652_v30 = vadd.f32 %v4636_v33, %v4588_v61  ;;  %v14537_v33 = vld [vmem:[#allocation27_spill] sm:$0xff]  ;;  %v14538_v15 = vld [vmem:[#allocation37_spill] sm:$0xff] }
 0x8d2   : > { %14521 = vst [vmem:[#allocation117_spill] sm:$0xff] %v11076_v44  ;;  %v4236_v36 = vsel %vm890_vm8, %v14533_v42, %v14532_v43  ;;  %v4300_v4 = vsel %vm906_vm9, %v14535_v57, %v14534_v48  ;;  %v4184_v50 = vsel %vm874_vm7, %v14531_v7, %v10702_v45  ;;  %v4133_v47 = vmul.f32 %v4120_v58, %v14526_v37  ;;  %v14540_v45 = vld [vmem:[#allocation30_spill] sm:$0xff] }
 0x8d3   : > { %14525 = vst [vmem:[#allocation109_spill] sm:$0xff] %v11090_v11  ;;  %v4189_v55 = vmul.f32 %v4180_v24, %v14537_v33  ;;  %v4756_v61 = vmul.f32 %v14538_v15, %v4188_v14  ;;  %v4693_v16 = vmul.f32 %v14528_v20, %v4125_v27  ;;  %v4708_v41 = vadd.f32 %v4692_v18, %v4644_v19  ;;  %v14541_v24 = vld [vmem:[#allocation66_spill] sm:$0xff]  ;;  %v14542_v14 = vld [vmem:[#allocation64_spill] sm:$0xff]  ;;  %v11157_v20 = vld [vmem:[%s13975_s4 + $0x10] ss:$0 sm:$0xff] }
 0x8d4   : > { %4090 = vrot.lane.b32.xlu2 %v10871_v22, %s14034_s26  ;;  %14530 = vst [vmem:[#allocation80_spill] sm:$0xff] %v11112_v59  ;;  %v4700_v52 = vmul.f32 %v14539_v51, %v4132_v54  ;;  %v4244_v59 = vsel %vm890_vm8, %v14532_v43, %v14533_v42  ;;  %v4252_v58 = vmul.f32 %v4236_v36, %v14540_v45  ;;  %v14544_v44 = vld [vmem:[#allocation70_spill] sm:$0xff] }
 0x8d5   : > { %v4240_v7 = vsel %vm890_vm8, %v14542_v14, %v14541_v24  ;;  %v4248_v27 = vsel %vm890_vm8, %v14541_v24, %v14542_v14  ;;  %v4316_v18 = vmul.f32 %v11157_v20, %v4300_v4  ;;  %v4196_v19 = vmul.f32 %v4176_v9, %v14527_v26 }
 0x8d6   : > { %v11126_v39 = vpop.permute.xlu2 %4040  ;;  %v4197_v43 = vmul.f32 %v4184_v50, %v14537_v33  ;;  %v4653_v42 = vadd.f32 %v11038_v3, %v4589_v31  ;;  %v4308_v36 = vsel %vm906_vm9, %v14534_v48, %v14535_v57  ;;  %v4701_v14 = vmul.f32 %v14539_v51, %v4133_v47  ;;  %v14547_v57 = vld [vmem:[#allocation41_spill] sm:$0xff] }
 0x8d7   : > { %14536 = vst [vmem:[#allocation78_spill] sm:$0xff] %v11126_v39  ;;  %4210 = vrot.lane.b32.xlu0 %v10849_v28, %s14039_s8  ;;  %4162 = vrot.lane.b32.xlu1 %v10885_v29, %s14036_s27  ;;  %v4757_v39 = vmul.f32 %v14538_v15, %v4189_v55  ;;  %v4772_v4 = vadd.f32 %v4756_v61, %v4708_v41  ;;  %v11186_v55 = vld [vmem:[%s13975_s4 + $0x18] ss:$0 sm:$0xff] }
 0x8d8   : > { %v4716_v50 = vadd.f32 %v4700_v52, %v4652_v30  ;;  %v4253_v3 = vmul.f32 %v4244_v59, %v14546_v40  ;;  %v4260_v31 = vmul.f32 %v4240_v7, %v14540_v45  ;;  %v4261_v11 = vmul.f32 %v4248_v27, %v14546_v40  ;;  %v14548_v30 = vld [vmem:[#allocation91_spill] sm:$0xff]  ;;  %v14549_v59 = vld [vmem:[#allocation94_spill] sm:$0xff] }
 0x8d9   : > { %v11160_v54 = vpop.permute.xlu0 %4080  ;;  %v11169_v24 = vpop.permute.xlu1 %3976  ;;  %v4709_v48 = vadd.f32 %v4693_v16, %v4645_v34  ;;  %v4820_v47 = vmul.f32 %v14547_v57, %v4252_v58  ;;  %v4317_v15 = vmul.f32 %v11186_v55, %v4308_v36  ;;  %v4884_v61 = vmul.f32 %v14548_v30, %v4316_v18  ;;  %v14552_v36 = vld [vmem:[#allocation173_spill] sm:$0xff] }
 0x8da   : > { %14543 = vst [vmem:[#allocation123_spill] sm:$0xff] %v11160_v54  ;;  %v14545_v54 = vld [vmem:[#allocation103_spill] sm:$0xff]  ;;  %v4764_v41 = vmul.f32 %v14549_v59, %v4196_v19  ;;  %v4765_v51 = vmul.f32 %v14549_v59, %v4197_v43  ;;  %v11197_v34 = vmul.f32 %v14529_v10, %v10727_v35  ;;  %v4717_v16 = vadd.f32 %v4701_v14, %v4653_v42 }
 0x8db   : > { %v4304_v9 = vsel %vm906_vm9, %v14545_v54, %v14544_v44  ;;  %v4773_v58 = vadd.f32 %v4757_v39, %v4709_v48  ;;  %v4836_v27 = vadd.f32 %v4820_v47, %v4772_v4  ;;  %v4312_v18 = vsel %vm906_vm9, %v14544_v44, %v14545_v54  ;;  %v14553_v39 = vld [vmem:[#allocation52_spill] sm:$0xff]  ;;  %v14554_v42 = vld [vmem:[#allocation107_spill] sm:$0xff] }
 0x8dc   : > { %4146 = vrot.lane.b32.xlu2 %v10849_v28, %s14036_s27  ;;  %v4324_v52 = vmul.f32 %v11157_v20, %v4304_v9  ;;  %14551 = vst [vmem:[#allocation69_spill] sm:$0xff] %v11197_v34  ;;  %v4821_v19 = vmul.f32 %v14547_v57, %v4253_v3  ;;  %v4780_v43 = vadd.f32 %v4764_v41, %v4716_v50  ;;  %v14556_v4 = vld [vmem:[#allocation140_spill] sm:$0xff]  ;;  %v14557_v3 = vld [vmem:[#allocation59_spill] sm:$0xff] }
 0x8dd   : > { %v4828_v9 = vmul.f32 %v14552_v36, %v4260_v31  ;;  %v4829_v59 = vmul.f32 %v14552_v36, %v4261_v11  ;;  %v4885_v35 = vmul.f32 %v14548_v30, %v4317_v15  ;;  %v4900_v10 = vadd.f32 %v4884_v61, %v4836_v27  ;;  %v14558_v31 = vld [vmem:[#allocation82_spill] sm:$0xff]  ;;  %v14559_v61 = vld [vmem:[#allocation157_spill] sm:$0xff] }
 0x8de   : > { %v11193_v7 = vpop.permute.xlu2 %4096  ;;  %v3917_v44 = vsel %vm810_vm4, %v14554_v42, %v14553_v39  ;;  %v3925_v54 = vsel %vm810_vm4, %v14553_v39, %v14554_v42  ;;  %v4325_v11 = vmul.f32 %v11186_v55, %v4312_v18  ;;  %v4892_v50 = vmul.f32 %v14556_v4, %v4324_v52  ;;  %v14562_v18 = vld [vmem:[#allocation177_spill] sm:$0xff]  ;;  %v14563_v36 = vld [vmem:[#allocation170_spill] sm:$0xff] }
 0x8df   : > { %14550 = vst [vmem:[#allocation55_spill] sm:$0xff] %v11193_v7  ;;  %4234 = vrot.lane.b32.xlu0 %v10865_v2, %s14039_s8  ;;  %4218 = vrot.lane.b32.xlu1 %v10871_v22, %s14039_s8  ;;  %v3853_v48 = vsel %vm794_vm0, %v14558_v31, %v14557_v3  ;;  %v3861_v57 = vsel %vm794_vm0, %v14557_v3, %v14558_v31 }
 0x8e0   : > { %v4781_v15 = vadd.f32 %v4765_v51, %v4717_v16  ;;  %v4837_v30 = vadd.f32 %v4821_v19, %v4773_v58  ;;  %v11235_v41 = vmul.f32 %v14559_v61, %v10690_v32  ;;  %v11239_v52 = vmul.f32 %v14559_v61, %v10729_v21  ;;  %v14564_v58 = vld [vmem:[#allocation96_spill] sm:$0xff]  ;;  %v14571_v61 = vld [vmem:[#allocation74_spill] sm:$0xff] }
 0x8e1   : > { %v11219_v14 = vpop.permute.xlu0 %4104  ;;  %v11231_v47 = vpop.permute.xlu1 %4032  ;;  %v4844_v27 = vadd.f32 %v4828_v9, %v4780_v43  ;;  %v3989_v39 = vsel %vm826_vm3, %v14563_v36, %v14562_v18  ;;  %v3934_v42 = vmul.f32 %v3925_v54, %v14357_v17  ;;  %v3935_v3 = vmul.f32 %v3917_v44, %v14358_v23 }
 0x8e2   : > { %14555 = vst [vmem:[#allocation71_spill] sm:$0xff] %v11219_v14  ;;  %v4845_v51 = vadd.f32 %v4829_v59, %v4781_v15  ;;  %v11249_v32 = vadd.f32 %v4885_v35, %v4837_v30  ;;  %v3870_v16 = vmul.f32 %v3861_v57, %v14353_v60  ;;  %v3871_v21 = vmul.f32 %v3853_v48, %v14354_v63  ;;  %v14566_v59 = vld [vmem:[#allocation72_spill] sm:$0xff]  ;;  %v14567_v35 = vld [vmem:[#allocation111_spill] sm:$0xff]  ;;  %v14569_v57 = vld [vmem:[#allocation58_spill] sm:$0xff] }
 0x8e3   : > { %14560 = vst [vmem:[#allocation120_spill] sm:$0xff] %v11235_v41  ;;  %v11254_v19 = vadd.f32 %v14564_v58, %v4900_v10  ;;  %v4893_v43 = vmul.f32 %v14556_v4, %v4325_v11  ;;  %v11257_v9 = vadd.f32 %v4892_v50, %v4844_v27  ;;  %v3981_v44 = vsel %vm826_vm3, %v14562_v18, %v14563_v36  ;;  %v14568_v10 = vld [vmem:[#allocation176_spill] sm:$0xff]  ;;  %v14572_v27 = vld [vmem:[#allocation179_spill] sm:$0xff] }
 0x8e4   : > { %14561 = vst [vmem:[#allocation67_spill] sm:$0xff] %v11239_v52  ;;  %4170 = vrot.lane.b32.xlu2 %v10865_v2, %s14036_s27  ;;  %v3929_v31 = vsel %vm810_vm4, %v14567_v35, %v14566_v59  ;;  %v3998_v48 = vmul.f32 %v3989_v39, %v14359_v56  ;;  %v3857_v11 = vsel %vm794_vm0, %v14569_v57, %v14568_v10  ;;  %v14570_v50 = vld [vmem:[#allocation124_spill] sm:$0xff] }
 0x8e5   : > { %v3865_v4 = vsel %vm794_vm0, %v14568_v10, %v14569_v57  ;;  %v4438_v15 = vmul.f32 %v14570_v50, %v3934_v42  ;;  %v4439_v30 = vmul.f32 %v14570_v50, %v3935_v3  ;;  %v4045_v18 = vsel %vm842_vm5, %v14572_v27, %v14571_v61  ;;  %v14573_v42 = vld [vmem:[#allocation114_spill] sm:$0xff] }
 0x8e6   : > { %v11263_v54 = vpop.permute.xlu2 %4152  ;;  %v4053_v36 = vsel %vm842_vm5, %v14571_v61, %v14572_v27  ;;  %v3921_v39 = vsel %vm810_vm4, %v14566_v59, %v14567_v35  ;;  %v4390_v3 = vmul.f32 %v14573_v42, %v3870_v16  ;;  %v4391_v10 = vmul.f32 %v14573_v42, %v3871_v21  ;;  %v14575_v27 = vld [vmem:[#allocation12_spill] sm:$0xff] }
 0x8e7   : > { %14565 = vst [vmem:[#allocation112_spill] sm:$0xff] %v11263_v54  ;;  %4290 = vrot.lane.b32.xlu0 %v10885_v29, %s14040_s0  ;;  %4274 = vrot.lane.b32.xlu1 %v10849_v28, %s14040_s0  ;;  %v3999_v57 = vmul.f32 %v3981_v44, %v14360_v62  ;;  %v3878_v52 = vmul.f32 %v3865_v4, %v14353_v60  ;;  %v14576_v54 = vld [vmem:[#allocation90_spill] sm:$0xff]  ;;  %v14578_v42 = vld [vmem:[#allocation132_spill] sm:$0xff]  ;;  %vm4972_vm14 = vcmp.gt.f32.partialorder %v11254_v19, 0.0 }
 0x8e8   : > { %v3879_v61 = vmul.f32 %v3857_v11, %v14354_v63  ;;  %v3985_v28 = vsel %vm826_vm3, %v14576_v54, %v14575_v27  ;;  %v3993_v16 = vsel %vm826_vm3, %v14575_v27, %v14576_v54  ;;  %v4909_v21 = vadd.f32 %v4893_v43, %v4845_v51  ;;  %v5028_v54 = vld [vmem:[%s14579_s3] sm:$0xff] }
 0x8e9   : > { %v11299_v50 = vpop.permute.xlu0 %4160  ;;  %v11311_v59 = vpop.permute.xlu1 %4088  ;;  %v3942_v44 = vmul.f32 %v3929_v31, %v14357_v17  ;;  %v4062_v35 = vmul.f32 %v4053_v36, %v14366_v5  ;;  %v4063_v4 = vmul.f32 %v4045_v18, %v14367_v25  ;;  %v3943_v11 = vmul.f32 %v3921_v39, %v14358_v23  ;;  %v14580_v18 = vld [vmem:[#allocation22_spill] sm:$0xff] }
 0x8ea   : > { %14574 = vst [vmem:[#allocation79_spill] sm:$0xff] %v11299_v50  ;;  %v4502_v41 = vmul.f32 %v14578_v42, %v3998_v48  ;;  %v4454_v14 = vadd.f32 %v4438_v15, %v4390_v3  ;;  %v4455_v34 = vadd.f32 %v4439_v30, %v4391_v10  ;;  %v4503_v51 = vmul.f32 %v14578_v42, %v3999_v57  ;;  %v5030_v15 = vld [vmem:[%s14579_s3 + $0x10] sm:$0xff]  ;;  %v14581_v30 = vld [vmem:[#allocation128_spill] sm:$0xff]  ;;  %v14582_v3 = vld [vmem:[#allocation18_spill] sm:$0xff] }
 0x8eb   : > { %14577 = vst [vmem:[#allocation76_spill] sm:$0xff] %v11311_v59  ;;  %v4006_v43 = vmul.f32 %v3993_v16, %v14359_v56  ;;  %v4007_v31 = vmul.f32 %v3985_v28, %v14360_v62  ;;  %v4057_v48 = vsel %vm842_vm5, %v10843_v38, %v14580_v18  ;;  %v4398_v36 = vmul.f32 %v14581_v30, %v3878_v52  ;;  %v14583_v10 = vld [vmem:[#allocation89_spill] sm:$0xff] }
 0x8ec   : > { %4226 = vrot.lane.b32.xlu2 %v10885_v29, %s14039_s8  ;;  %v4399_v39 = vmul.f32 %v14581_v30, %v3879_v61  ;;  %v4113_v57 = vsel %vm858_vm6, %v14583_v10, %v14582_v3  ;;  %v4049_v28 = vsel %vm842_vm5, %v14580_v18, %v10843_v38  ;;  %v14585_v16 = vld [vmem:[#allocation137_spill] sm:$0xff]  ;;  %v4121_v52 = vsel %vm858_vm6, %v14582_v3, %v14583_v10  ;;  %v14587_v18 = vld [vmem:[#allocation146_spill] sm:$0xff] }
 0x8ed   : > { %v4446_v42 = vmul.f32 %v14585_v16, %v3942_v44  ;;  %v14586_v61 = vld [vmem:[#allocation141_spill] sm:$0xff]  ;;  %v4447_v59 = vmul.f32 %v14585_v16, %v3943_v11  ;;  %v4518_v50 = vadd.f32 %v4502_v41, %v4454_v14  ;;  %v4519_v7 = vadd.f32 %v4503_v51, %v4455_v34  ;;  %v14588_v51 = vld [vmem:[#allocation172_spill] sm:$0xff] }
 0x8ee   : > { %v11343_v27 = vpop.permute.xlu2 %4208  ;;  %v4566_v30 = vmul.f32 %v14586_v61, %v4062_v35  ;;  %v4567_v29 = vmul.f32 %v14586_v61, %v4063_v4  ;;  %v4070_v38 = vmul.f32 %v4057_v48, %v14366_v5  ;;  %v4511_v44 = vmul.f32 %v14587_v18, %v4007_v31  ;;  %v14590_v48 = vld [vmem:[#allocation178_spill] sm:$0xff]  ;;  %v14595_v61 = vld [vmem:[#allocation63_spill] sm:$0xff] }
 0x8ef   : > { %14584 = vst [vmem:[#allocation51_spill] sm:$0xff] %v11343_v27  ;;  %5464 = vperm.xlu0 %7018, %v5028_v54   ;;  %5474 = vperm.xlu1 %7020, %v5030_v15   ;;  %v4510_v27 = vmul.f32 %v14587_v18, %v4006_v43  ;;  %v4134_v62 = vmul.f32 %v4113_v57, %v14098_v0  ;;  %v14591_v15 = vld [vmem:[#allocation154_spill] sm:$0xff]  ;;  %v14593_v57 = vld [vmem:[#allocation145_spill] sm:$0xff] }
 0x8f0   : > { %v4071_v3 = vmul.f32 %v4049_v28, %v14367_v25  ;;  %v11362_v35 = vadd.f32 %v14564_v58, %v11249_v32  ;;  %v4462_v4 = vadd.f32 %v4446_v42, %v4398_v36  ;;  %v4463_v14 = vadd.f32 %v4447_v59, %v4399_v39  ;;  %v14589_v32 = vld [vmem:[#allocation186_spill] sm:$0xff]  ;;  %v5033_v36 = vld [vmem:[%s14579_s3 + $0x28] sm:$0xff] }
 0x8f1   : > { %v11358_v10 = vpop.permute.xlu0 %4216  ;;  %v4135_v34 = vmul.f32 %v4121_v52, %v14526_v37  ;;  %v11365_v41 = vpop.permute.xlu1 %4144  ;;  %v4582_v11 = vadd.f32 %v4566_v30, %v4518_v50  ;;  %v4583_v54 = vadd.f32 %v4567_v29, %v4519_v7  ;;  %v4109_v43 = vsel %vm858_vm6, %v14588_v51, %v10861_v12  ;;  %v14592_v7 = vld [vmem:[#allocation155_spill] sm:$0xff] }
 0x8f2   : > { %v4117_v31 = vsel %vm858_vm6, %v10861_v12, %v14588_v51  ;;  %v4964_v58 = vadd.f32 %v14589_v32, %v11257_v9  ;;  %v4965_v59 = vadd.f32 %v14589_v32, %v4909_v21  ;;  %v4173_v29 = vsel %vm874_vm7, %v14591_v15, %v14590_v48  ;;  %v14594_v52 = vld [vmem:[#allocation175_spill] sm:$0xff] }
 0x8f3   : > { %v4574_v50 = vmul.f32 %v14592_v7, %v4070_v38  ;;  %v4526_v12 = vadd.f32 %v4510_v27, %v4462_v4  ;;  %v4527_v39 = vadd.f32 %v4511_v44, %v4463_v14  ;;  %v4702_v9 = vmul.f32 %v14593_v57, %v4134_v62 }
 0x8f4   : > { %4282 = vrot.lane.b32.xlu2 %v10871_v22, %s14040_s0  ;;  %v4575_v21 = vmul.f32 %v14592_v7, %v4071_v3  ;;  %v4703_v28 = vmul.f32 %v14593_v57, %v4135_v34  ;;  %v4126_v16 = vmul.f32 %v4109_v43, %v14098_v0  ;;  %v4127_v42 = vmul.f32 %v4117_v31, %v14526_v37  ;;  %v14596_v43 = vld [vmem:[#allocation68_spill] sm:$0xff] }
 0x8f5   : > { %v4177_v30 = vsel %vm874_vm7, %v14595_v61, %v14594_v52  ;;  %v4181_v62 = vsel %vm874_vm7, %v14590_v48, %v14591_v15  ;;  %v4190_v27 = vmul.f32 %v4173_v29, %v14527_v26  ;;  %v4646_v18 = vadd.f32 %v11088_v1, %v4582_v11  ;;  %v14597_v31 = vld [vmem:[#allocation168_spill] sm:$0xff]  ;;  %v14598_v48 = vld [vmem:[#allocation161_spill] sm:$0xff] }
 0x8f6   : > { %v11397_v38 = vpop.permute.xlu2 %4232  ;;  %v4647_v44 = vadd.f32 %v11096_v6, %v4583_v54  ;;  %v4590_v3 = vadd.f32 %v4574_v50, %v4526_v12  ;;  %v4185_v4 = vsel %vm874_vm7, %v14594_v52, %v14595_v61  ;;  %vm4980_vm1 = vcmp.gt.f32.partialorder %v4964_v58, 0.0  ;;  %v5029_v11 = vld [vmem:[%s14579_s3 + $0x8] sm:$0xff]  ;;  %v14600_v12 = vld [vmem:[#allocation133_spill] sm:$0xff] }
 0x8f7   : > { %5489 = vperm.xlu0 %7018, %v5033_v36   ;;  %4298 = vrot.lane.b32.xlu1 %v10865_v2, %s14040_s0  ;;  %v4996_v14 = vmul.f32 0.2, %v4964_v58  ;;  %v4591_v34 = vadd.f32 %v4575_v21, %v4527_v39  ;;  %v4198_v51 = vmul.f32 %v4177_v30, %v14527_v26  ;;  %v4241_v1 = vsel %vm890_vm8, %v14597_v31, %v14596_v43  ;;  %v14599_v36 = vld [vmem:[#allocation105_spill] sm:$0xff] }
 0x8f8   : > { %v4997_v54 = vmul.f32 0.2, %v4965_v59  ;;  %v4191_v32 = vmul.f32 %v4181_v62, %v14537_v33  ;;  %v4694_v15 = vmul.f32 %v14598_v48, %v4126_v16  ;;  %v4695_v29 = vmul.f32 %v14598_v48, %v4127_v42  ;;  %v14601_v16 = vld [vmem:[#allocation147_spill] sm:$0xff] }
 0x8f9   : > { %v11417_v6 = vpop.permute.xlu0 %4272  ;;  %v11425_v7 = vpop.permute.xlu1 %4168  ;;  %vm4981_vm10 = vcmp.gt.f32.partialorder %v4965_v59, 0.0  ;;  %v4199_v50 = vmul.f32 %v4185_v4, %v14537_v33  ;;  %v4237_v39 = vsel %vm890_vm8, %v14600_v12, %v14599_v36  ;;  %v4245_v57 = vsel %vm890_vm8, %v14599_v36, %v14600_v12  ;;  %v14603_v4 = vld [vmem:[#allocation136_spill] sm:$0xff]  ;;  %v14604_v36 = vld [vmem:[#allocation101_spill] sm:$0xff] }
 0x8fa   : > { %v4249_v21 = vsel %vm890_vm8, %v14596_v43, %v14597_v31  ;;  %v4758_v42 = vmul.f32 %v14601_v16, %v4190_v27  ;;  %v4654_v52 = vadd.f32 %v11080_v49, %v4590_v3  ;;  %v4262_v61 = vmul.f32 %v4241_v1, %v14540_v45  ;;  %v14605_v12 = vld [vmem:[#allocation56_spill] sm:$0xff]  ;;  %v5032_v27 = vld [vmem:[%s14579_s3 + $0x20] sm:$0xff] }
 0x8fb   : > { %v11444_v30 = vsel %vm4980_vm1, %v4964_v58, %v4996_v14  ;;  %v4655_v62 = vadd.f32 %v11084_v13, %v4591_v34  ;;  %v4766_v48 = vmul.f32 %v14603_v4, %v4198_v51  ;;  %v4305_v2 = vsel %vm906_vm9, %v14605_v12, %v14604_v36 }
 0x8fc   : > { %5469 = vperm.xlu2 %7019, %v5029_v11   ;;  %14602 = vst [vmem:[#allocation122_spill] sm:$0xff] %v11444_v30  ;;  %v11455_v49 = vsel %vm4981_vm10, %v4965_v59, %v4997_v54  ;;  %v4313_v58 = vsel %vm906_vm9, %v14604_v36, %v14605_v12  ;;  %v4254_v13 = vmul.f32 %v4237_v39, %v14540_v45  ;;  %v14607_v11 = vld [vmem:[#allocation182_spill] sm:$0xff]  ;;  %vm4973_vm2 = vcmp.gt.f32.partialorder %v11362_v35, 0.0 }
 0x8fd   : > { %14606 = vst [vmem:[#allocation106_spill] sm:$0xff] %v11455_v49  ;;  %v4255_v3 = vmul.f32 %v4245_v57, %v14546_v40  ;;  %v4263_v14 = vmul.f32 %v4249_v21, %v14546_v40  ;;  %v4759_v51 = vmul.f32 %v14601_v16, %v4191_v32  ;;  %v4710_v43 = vadd.f32 %v4694_v15, %v4646_v18  ;;  %v14608_v32 = vld [vmem:[#allocation57_spill] sm:$0xff]  ;;  %v5031_v15 = vld [vmem:[%s14579_s3 + $0x18] sm:$0xff] }
 0x8fe   : > { %v11464_v34 = vpop.permute.xlu2 %4288  ;;  %v4711_v31 = vadd.f32 %v4695_v29, %v4647_v44  ;;  %v4767_v59 = vmul.f32 %v14603_v4, %v4199_v50  ;;  %v4718_v1 = vadd.f32 %v4702_v9, %v4654_v52  ;;  %v4830_v54 = vmul.f32 %v14607_v11, %v4262_v61  ;;  %v14609_v18 = vld [vmem:[#allocation65_spill] sm:$0xff]  ;;  %v14610_v50 = vld [vmem:[#allocation42_spill] sm:$0xff] }
 0x8ff   : > { %5484 = vperm.xlu1 %7020, %v5032_v27   ;;  %v5068_v36 = vmul.f32 %v11444_v30, %v11444_v30  ;;  %v5069_v39 = vmul.f32 %v11455_v49, %v11455_v49  ;;  %v4719_v57 = vadd.f32 %v4703_v28, %v4655_v62  ;;  %v4326_v21 = vmul.f32 %v11157_v20, %v4305_v2 }
 0x900   : > { %v4327_v12 = vmul.f32 %v11186_v55, %v4313_v58  ;;  %v3866_v44 = vsel %vm794_vm0, %v14609_v18, %v14608_v32  ;;  %v4782_v29 = vadd.f32 %v4766_v48, %v4718_v1  ;;  %v4822_v16 = vmul.f32 %v14610_v50, %v4254_v13  ;;  %v14611_v1 = vld [vmem:[#allocation77_spill] sm:$0xff] }
 0x901   : > { %v11479_v9 = vpop.permute.xlu0 %4296  ;;  %v4823_v28 = vmul.f32 %v14610_v50, %v4255_v3  ;;  %v4831_v2 = vmul.f32 %v14607_v11, %v4263_v14  ;;  %v11487_v52 = vpop.permute.xlu1 %4224  ;;  %v4783_v61 = vadd.f32 %v4767_v59, %v4719_v57  ;;  %v4774_v62 = vadd.f32 %v4758_v42, %v4710_v43  ;;  %v14612_v3 = vld [vmem:[#allocation97_spill] sm:$0xff]  ;;  %v14613_v59 = vld [vmem:[#allocation184_spill] sm:$0xff]  ;;  %v5035_v43 = vld [vmem:[%s14579_s3 + $0x38] sm:$0xff] }
 0x902   : > { %v4775_v4 = vadd.f32 %v4759_v51, %v4711_v31  ;;  %v11490_v27 = vmul.f32 0.2, %v11254_v19  ;;  %v4846_v58 = vadd.f32 %v4830_v54, %v4782_v29  ;;  %v3858_v48 = vsel %vm794_vm0, %v14608_v32, %v14609_v18  ;;  %v14618_v29 = vld [vmem:[#allocation36_spill] sm:$0xff] }
 0x903   : > { %v3880_v13 = vmul.f32 %v3866_v44, %v14353_v60  ;;  %v4301_v14 = vsel %vm906_vm9, %v14612_v3, %v14611_v1  ;;  %v4894_v42 = vmul.f32 %v14613_v59, %v4326_v21  ;;  %v11503_v51 = vmul.f32 %v14613_v59, %v4327_v12  ;;  %v14617_v44 = vld [vmem:[#allocation40_spill] sm:$0xff] }
 0x904   : > { %5479 = vperm.xlu2 %7019, %v5031_v15   ;;  %v11508_v31 = vadd.f32 %v5069_v39, %v5068_v36  ;;  %v11511_v11 = vmul.f32 0.2, %v11362_v35  ;;  %v4838_v54 = vadd.f32 %v4822_v16, %v4774_v62  ;;  %v11513_v57 = vadd.f32 %v4823_v28, %v4775_v4  ;;  %v14616_v39 = vld [vmem:[#allocation110_spill] sm:$0xff]  ;;  %v14619_v28 = vld [vmem:[#allocation121_spill] sm:$0xff]  ;;  %v14621_v62 = vld [vmem:[#allocation39_spill] sm:$0xff] }
 0x905   : > { %v11515_v32 = vadd.f32 %v4831_v2, %v4783_v61  ;;  %v4309_v21 = vsel %vm906_vm9, %v14611_v1, %v14612_v3  ;;  %v3881_v18 = vmul.f32 %v3858_v48, %v14354_v63  ;;  %v4318_v36 = vmul.f32 %v11157_v20, %v4301_v14  ;;  %v14620_v61 = vld [vmem:[#allocation75_spill] sm:$0xff]  ;;  %v14622_v3 = vld [vmem:[#allocation61_spill] sm:$0xff] }
 0x906   : > { %14614 = vst [vmem:[#allocation131_spill] sm:$0xff] %v11511_v11  ;;  %v11521_v12 = vpop.permute.xlu2 %3842  ;;  %v3862_v15 = vsel %vm794_vm0, %v14617_v44, %v14616_v39  ;;  %v3930_v50 = vsel %vm810_vm4, %v14618_v29, %v11027_v8  ;;  %v11533_v16 = vadd.f32 %v4894_v42, %v4846_v58  ;;  %v4400_v2 = vmul.f32 %v14619_v28, %v3880_v13  ;;  %v5034_v42 = vld [vmem:[%s14579_s3 + $0x30] sm:$0xff]  ;;  %s14782_s3 = smov 110  }
 0x907   : > { %14615 = vst [vmem:[#allocation115_spill] sm:$0xff] %v11521_v12  ;;  %v3926_v4 = vsel %vm810_vm4, %v14621_v62, %v14620_v61  ;;  %v3854_v48 = vsel %vm794_vm0, %v14616_v39, %v14617_v44  ;;  %5499 = vperm.xlu1 %7020, %v5035_v43   ;;  %v4319_v1 = vmul.f32 %v11186_v55, %v4309_v21  ;;  %v14624_v39 = vld [vmem:[#allocation109_spill] sm:$0xff]  ;;  %v14626_v12 = vld [vmem:[#allocation119_spill] sm:$0xff] }
 0x908   : > { %v3918_v58 = vsel %vm810_vm4, %v14620_v61, %v14621_v62  ;;  %v3922_v13 = vsel %vm810_vm4, %v11027_v8, %v14618_v29  ;;  %v3994_v14 = vsel %vm826_vm3, %v11169_v24, %v14622_v3  ;;  %v3872_v43 = vmul.f32 %v3862_v15, %v14353_v60  ;;  %v14625_v61 = vld [vmem:[#allocation38_spill] sm:$0xff] }
 0x909   : > { %v11557_v59 = vpop.permute.xlu0 %3826  ;;  %v3944_v21 = vmul.f32 %v3930_v50, %v14357_v17  ;;  %v3982_v8 = vsel %vm826_vm3, %v14624_v39, %v11019_v53  ;;  %v3990_v44 = vsel %vm826_vm3, %v11019_v53, %v14624_v39  ;;  %v11572_v29 = vpop.permute.xlu1 %4280  ;;  %v4886_v62 = vmul.f32 %v14625_v61, %v4318_v36  ;;  %v14628_v39 = vld [vmem:[#allocation125_spill] sm:$0xff] }
 0x90a   : > { %14623 = vst [vmem:[#allocation126_spill] sm:$0xff] %v11557_v59  ;;  %v3936_v22 = vmul.f32 %v3926_v4, %v14357_v17  ;;  %v3873_v15 = vmul.f32 %v3854_v48, %v14354_v63  ;;  %v3986_v50 = vsel %vm826_vm3, %v14622_v3, %v11169_v24  ;;  %v3945_v60 = vmul.f32 %v3922_v13, %v14358_v23  ;;  %v14627_v13 = vld [vmem:[#allocation13_spill] sm:$0xff] }
 0x90b   : > { %v4008_v59 = vmul.f32 %v3994_v14, %v14359_v56  ;;  %v4046_v53 = vsel %vm842_vm5, %v14626_v12, %v11231_v47  ;;  %v4054_v36 = vsel %vm842_vm5, %v11231_v47, %v14626_v12  ;;  %v4401_v4 = vmul.f32 %v14619_v28, %v3881_v18  ;;  %v14629_v17 = vld [vmem:[#allocation129_spill] sm:$0xff]  ;;  %v14632_v18 = vld [vmem:[#allocation78_spill] sm:$0xff] }
 0x90c   : > { %5494 = vperm.xlu2 %7019, %v5034_v42   ;;  %v3937_v48 = vmul.f32 %v3918_v58, %v14358_v23  ;;  %v4000_v24 = vmul.f32 %v3990_v44, %v14359_v56  ;;  %v4001_v3 = vmul.f32 %v3982_v8, %v14627_v13  ;;  %v4887_v14 = vmul.f32 %v14625_v61, %v4319_v1  ;;  %v14631_v12 = vld [vmem:[#allocation117_spill] sm:$0xff]  ;;  %v14633_v8 = vld [vmem:[#allocation127_spill] sm:$0xff] }
 0x90d   : > { %v4392_v63 = vmul.f32 %v14628_v39, %v3872_v43  ;;  %v4448_v49 = vmul.f32 %v14629_v17, %v3944_v21  ;;  %v4009_v30 = vmul.f32 %v3986_v50, %v14627_v13  ;;  %v4393_v47 = vmul.f32 %v14628_v39, %v3873_v15  ;;  %v14634_v44 = vld [vmem:[#allocation43_spill] sm:$0xff] }
 0x90e   : > { %v11599_v11 = vpop.permute.xlu2 %3898  ;;  %v4058_v28 = vsel %vm842_vm5, %v14632_v18, %v14631_v12  ;;  %v4064_v58 = vmul.f32 %v4054_v36, %v14366_v5  ;;  %v4065_v42 = vmul.f32 %v4046_v53, %v14367_v25  ;;  %v4902_v1 = vadd.f32 %v4886_v62, %v4838_v54  ;;  %v14636_v53 = vld [vmem:[#allocation55_spill] sm:$0xff] }
 0x90f   : > { %14630 = vst [vmem:[#allocation139_spill] sm:$0xff] %v11599_v11  ;;  %v4440_v43 = vmul.f32 %v14633_v8, %v3936_v22  ;;  %v4449_v21 = vmul.f32 %v14629_v17, %v3945_v60  ;;  %v4512_v61 = vmul.f32 %v14634_v44, %v4008_v59  ;;  %v4441_v50 = vmul.f32 %v14633_v8, %v3937_v48  ;;  %v14635_v11 = vld [vmem:[#allocation138_spill] sm:$0xff]  ;;  %v14637_v48 = vld [vmem:[#allocation123_spill] sm:$0xff] }
 0x910   : > { %v4504_v15 = vmul.f32 %v14635_v11, %v4000_v24  ;;  %v4505_v39 = vmul.f32 %v14635_v11, %v4001_v3  ;;  %v4050_v36 = vsel %vm842_vm5, %v14631_v12, %v14632_v18  ;;  %v4464_v62 = vadd.f32 %v4448_v49, %v4400_v2  ;;  %v14638_v24 = vld [vmem:[#allocation149_spill] sm:$0xff] }
 0x911   : > { %v11618_v13 = vpop.permute.xlu0 %3850  ;;  %v4456_v54 = vadd.f32 %v4440_v43, %v4392_v63  ;;  %v4072_v22 = vmul.f32 %v4058_v28, %v14366_v5  ;;  %v4513_v60 = vmul.f32 %v14634_v44, %v4009_v30  ;;  %v11622_v17 = vpop.permute.xlu1 %3834  ;;  %v4457_v59 = vadd.f32 %v4441_v50, %v4393_v47  ;;  %v14639_v43 = vld [vmem:[#allocation185_spill] sm:$0xff] }
 0x912   : > { %v4110_v11 = vsel %vm858_vm6, %v14637_v48, %v14636_v53  ;;  %v4568_v3 = vmul.f32 %v14638_v24, %v4064_v58  ;;  %v4569_v12 = vmul.f32 %v14638_v24, %v4065_v42  ;;  %v4903_v18 = vadd.f32 %v4887_v14, %v11513_v57  ;;  %v14640_v42 = vld [vmem:[#allocation148_spill] sm:$0xff] }
 0x913   : > { %v4465_v63 = vadd.f32 %v4449_v21, %v4401_v4  ;;  %v4073_v49 = vmul.f32 %v4050_v36, %v14367_v25  ;;  %v4528_v2 = vadd.f32 %v4512_v61, %v4464_v62  ;;  %v4911_v30 = vadd.f32 %v11503_v51, %v11515_v32  ;;  %v14641_v61 = vld [vmem:[#allocation79_spill] sm:$0xff] }
 0x914   : > { %v4520_v28 = vadd.f32 %v4504_v15, %v4456_v54  ;;  %v4521_v47 = vadd.f32 %v4505_v39, %v4457_v59  ;;  %v4118_v8 = vsel %vm858_vm6, %v14636_v53, %v14637_v48  ;;  %v11639_v58 = vadd.f32 %v14639_v43, %v4902_v1  ;;  %v14642_v54 = vld [vmem:[#allocation51_spill] sm:$0xff] }
 0x915   : > { %v4576_v44 = vmul.f32 %v14640_v42, %v4072_v22  ;;  %v4529_v57 = vadd.f32 %v4513_v60, %v4465_v63  ;;  %v4128_v4 = vmul.f32 %v4110_v11, %v14098_v0  ;;  %v4174_v51 = vsel %vm874_vm7, %v11365_v41, %v14641_v61  ;;  %v14643_v60 = vld [vmem:[#allocation45_spill] sm:$0xff]  ;;  %v14644_v11 = vld [vmem:[#allocation166_spill] sm:$0xff]  ;;  %v14645_v63 = vld [vmem:[#allocation80_spill] sm:$0xff] }
 0x916   : > { %v4584_v14 = vadd.f32 %v4568_v3, %v4520_v28  ;;  %v4585_v21 = vadd.f32 %v4569_v12, %v4521_v47  ;;  %v4182_v32 = vsel %vm874_vm7, %v14641_v61, %v11365_v41  ;;  %v11652_v1 = vadd.f32 %v14639_v43, %v4903_v18  ;;  %v11656_v36 = vpop.permute.xlu2 %3954  ;;  %v14647_v28 = vld [vmem:[#allocation71_spill] sm:$0xff]  ;;  %v14648_v47 = vld [vmem:[#allocation76_spill] sm:$0xff] }
 0x917   : > { %v4577_v50 = vmul.f32 %v14640_v42, %v4073_v49  ;;  %v4592_v15 = vadd.f32 %v4576_v44, %v4528_v2  ;;  %v4129_v39 = vmul.f32 %v4118_v8, %v14526_v37  ;;  %v4238_v62 = vsel %vm890_vm8, %v14642_v54, %v11487_v52  ;;  %v14646_v2 = vld [vmem:[#allocation69_spill] sm:$0xff]  ;;  %v14649_v43 = vld [vmem:[#allocation120_spill] sm:$0xff] }
 0x918   : > { %v4246_v41 = vsel %vm890_vm8, %v11487_v52, %v14642_v54  ;;  %v4966_v59 = vadd.f32 %v14643_v60, %v11533_v16  ;;  %v4967_v53 = vadd.f32 %v14643_v60, %v4911_v30  ;;  %v4696_v24 = vmul.f32 %v14644_v11, %v4128_v4 }
 0x919   : > { %v11666_v22 = vpop.permute.xlu0 %3906  ;;  %v4593_v48 = vadd.f32 %v4577_v50, %v4529_v57  ;;  %v4192_v3 = vmul.f32 %v4174_v51, %v14527_v26  ;;  %v4193_v12 = vmul.f32 %v4182_v32, %v14537_v33  ;;  %v11674_v18 = vpop.permute.xlu1 %3890  ;;  %v4648_v49 = vadd.f32 %v14645_v63, %v4584_v14  ;;  %v14650_v51 = vld [vmem:[#allocation83_spill] sm:$0xff] }
 0x91a   : > { %v4649_v52 = vadd.f32 %v14646_v2, %v4585_v21  ;;  %v4114_v16 = vsel %vm858_vm6, %v14648_v47, %v14647_v28  ;;  %v4122_v30 = vsel %vm858_vm6, %v14647_v28, %v14648_v47  ;;  %v4697_v8 = vmul.f32 %v14644_v11, %v4129_v39 }
 0x91b   : > { %v4656_v42 = vadd.f32 %v14649_v43, %v4592_v15  ;;  %v4256_v44 = vmul.f32 %v4238_v62, %v14540_v45  ;;  %v4257_v57 = vmul.f32 %v4246_v41, %v14546_v40  ;;  %vm4982_vm12 = vcmp.gt.f32.partialorder %v4966_v59, 0.0  ;;  %v14651_v41 = vld [vmem:[#allocation112_spill] sm:$0xff] }
 0x91c   : > { %vm4983_vm13 = vcmp.gt.f32.partialorder %v4967_v53, 0.0  ;;  %v4998_v4 = vmul.f32 0.2, %v4966_v59  ;;  %v4999_v14 = vmul.f32 0.2, %v4967_v53  ;;  %v4136_v21 = vmul.f32 %v4114_v16, %v14098_v0 }
 0x91d   : > { %v4137_v61 = vmul.f32 %v4122_v30, %v14526_v37  ;;  %v4760_v32 = vmul.f32 %v14650_v51, %v4192_v3  ;;  %v4761_v50 = vmul.f32 %v14650_v51, %v4193_v12  ;;  %v4712_v54 = vadd.f32 %v4696_v24, %v4648_v49  ;;  %v14652_v24 = vld [vmem:[#allocation93_spill] sm:$0xff] }
 0x91e   : > { %v4713_v39 = vadd.f32 %v4697_v8, %v4649_v52  ;;  %v4302_v15 = vsel %vm906_vm9, %v11417_v6, %v11464_v34  ;;  %v4310_v62 = vsel %vm906_vm9, %v11464_v34, %v11417_v6  ;;  %v4178_v60 = vsel %vm874_vm7, %v14651_v41, %v11425_v7  ;;  %v11727_v52 = vpop.permute.xlu2 %3978  ;;  %v14653_v30 = vld [vmem:[#allocation85_spill] sm:$0xff] }
 0x91f   : > { %v4186_v11 = vsel %vm874_vm7, %v11425_v7, %v14651_v41  ;;  %v4824_v3 = vmul.f32 %v14652_v24, %v4256_v44  ;;  %v4825_v12 = vmul.f32 %v14652_v24, %v4257_v57  ;;  %v11716_v6 = vsel %vm4982_vm12, %v4966_v59, %v4998_v4  ;;  %v14654_v4 = vld [vmem:[#allocation67_spill] sm:$0xff] }
 0x920   : > { %v11719_v34 = vsel %vm4983_vm13, %v4967_v53, %v4999_v14  ;;  %vm4974_vm15 = vcmp.gt.f32.partialorder %v11639_v58, 0.0  ;;  %vm4975_vm1 = vcmp.gt.f32.partialorder %v11652_v1, 0.0  ;;  %v4776_v7 = vadd.f32 %v4760_v32, %v4712_v54 }
 0x921   : > { %v11712_v63 = vpop.permute.xlu0 %3962  ;;  %5089 = vadd.xlane.f32.xlu0 %v11508_v31  ;;  %v4777_v49 = vadd.f32 %v4761_v50, %v4713_v39  ;;  %v4320_v2 = vmul.f32 %v11157_v20, %v4302_v15  ;;  %v4321_v31 = vmul.f32 %v11186_v55, %v4310_v62  ;;  %v11729_v59 = vpop.permute.xlu1 %3914  ;;  %v4200_v53 = vmul.f32 %v4178_v60, %v14527_v26  ;;  %v14656_v15 = vld [vmem:[#allocation81_spill] sm:$0xff] }
 0x922   : > { %v4201_v28 = vmul.f32 %v4186_v11, %v14537_v33  ;;  %v4990_v47 = vmul.f32 0.2, %v11639_v58  ;;  %v4991_v16 = vmul.f32 0.2, %v11652_v1  ;;  %v4704_v8 = vmul.f32 %v14653_v30, %v4136_v21  ;;  %v14655_v21 = vld [vmem:[#allocation100_spill] sm:$0xff] }
 0x923   : > { %v4705_v43 = vmul.f32 %v14653_v30, %v4137_v61  ;;  %v4840_v44 = vadd.f32 %v4824_v3, %v4776_v7  ;;  %v4841_v57 = vadd.f32 %v4825_v12, %v4777_v49  ;;  %v4657_v14 = vadd.f32 %v14654_v4, %v4593_v48 }
 0x924   : > { %v4242_v51 = vsel %vm890_vm8, %v11358_v10, %v11397_v38  ;;  %v4250_v32 = vsel %vm890_vm8, %v11397_v38, %v11358_v10  ;;  %v5051_v50 = vadd.f32 %v11719_v34, %v11716_v6  ;;  %v4888_v54 = vmul.f32 %v14655_v21, %v4320_v2 }
 0x925   : > { %v4889_v61 = vmul.f32 %v14655_v21, %v4321_v31  ;;  %v4306_v48 = vsel %vm906_vm9, %v11572_v29, %v11479_v9  ;;  %v4314_v39 = vsel %vm906_vm9, %v11479_v9, %v11572_v29  ;;  %v4768_v62 = vmul.f32 %v14656_v15, %v4200_v53 }
 0x926   : > { %v4769_v10 = vmul.f32 %v14656_v15, %v4201_v28  ;;  %v11763_v38 = vsel %vm4974_vm15, %v11639_v58, %v4990_v47  ;;  %v11768_v41 = vsel %vm4975_vm1, %v11652_v1, %v4991_v16  ;;  %v4720_v60 = vadd.f32 %v4704_v8, %v4656_v42  ;;  %v11782_v53 = vpop.permute.xlu2 %4034  ;;  %v14658_v47 = vld [vmem:[#allocation54_spill] sm:$0xff]  ;;  %v14659_v8 = vld [vmem:[#allocation99_spill] sm:$0xff] }
 0x927   : > { %v4721_v11 = vadd.f32 %v4705_v43, %v4657_v14  ;;  %v4904_v24 = vadd.f32 %v4888_v54, %v4840_v44  ;;  %v4905_v3 = vadd.f32 %v4889_v61, %v4841_v57  ;;  %v4264_v9 = vmul.f32 %v4242_v51, %v14540_v45  ;;  %v14660_v57 = vld [vmem:[#allocation183_spill] sm:$0xff]  ;;  %v14662_v15 = vld [vmem:[#allocation106_spill] sm:$0xff] }
 0x928   : > { %v4265_v29 = vmul.f32 %v4250_v32, %v14546_v40  ;;  %v4328_v12 = vmul.f32 %v11157_v20, %v4306_v48  ;;  %v4329_v7 = vmul.f32 %v11186_v55, %v4314_v39  ;;  %v4784_v2 = vadd.f32 %v4768_v62, %v4720_v60  ;;  %v14657_v55 = vld [vmem:[#allocation131_spill] sm:$0xff]  ;;  %v14661_v39 = vld [vmem:[#allocation122_spill] sm:$0xff] }
 0x929   : > { %v11774_v49 = vpop.permute.xlu0 %4018  ;;  %5052 = vadd.xlane.f32.xlu0 %v5051_v50  ;;  %v11776_v58 = vpop.permute.xlu1 %3970  ;;  %v4785_v1 = vadd.f32 %v4769_v10, %v4721_v11  ;;  %v5062_v42 = vmul.f32 %v11763_v38, %v11763_v38  ;;  %v5063_v31 = vmul.f32 %v11768_v41, %v11768_v41  ;;  %v11788_v20 = vsel %vm4972_vm14, %v11254_v19, %v11490_v27 }
 0x92a   : > { %v11794_v28 = vsel %vm4973_vm2, %v11362_v35, %v14657_v55  ;;  %v4960_v16 = vadd.f32 %v14658_v47, %v4904_v24  ;;  %v4961_v30 = vadd.f32 %v14658_v47, %v4905_v3  ;;  %v4832_v43 = vmul.f32 %v14659_v8, %v4264_v9  ;;  %v14663_v3 = vld [vmem:[#allocation95_spill] sm:$0xff] }
 0x92b   : > { %v4833_v44 = vmul.f32 %v14659_v8, %v4265_v29  ;;  %v4896_v4 = vmul.f32 %v14660_v57, %v4328_v12  ;;  %v4897_v14 = vmul.f32 %v14660_v57, %v4329_v7  ;;  %v5079_v51 = vadd.f32 %v5063_v31, %v5062_v42 }
 0x92c   : > { %v4848_v19 = vadd.f32 %v4832_v43, %v4784_v2  ;;  %v5036_v32 = vadd.f32 %v11794_v28, %v11788_v20  ;;  %v4992_v35 = vmul.f32 0.2, %v4960_v16  ;;  %v4993_v50 = vmul.f32 0.2, %v4961_v30 }
 0x92d   : > { %v4849_v27 = vadd.f32 %v4833_v44, %v4785_v1  ;;  %vm4976_vm10 = vcmp.gt.f32.partialorder %v4960_v16, 0.0  ;;  %vm4977_vm12 = vcmp.gt.f32.partialorder %v4961_v30, 0.0  ;;  %v5048_v62 = vadd.f32 %v14662_v15, %v14661_v39 }
 0x92e   : > { %v4912_v21 = vadd.f32 %v4896_v4, %v4848_v19  ;;  %v5060_v10 = vmul.f32 %v11788_v20, %v11788_v20  ;;  %v5061_v60 = vmul.f32 %v11794_v28, %v11794_v28  ;;  %v11814_v11 = vsel %vm4976_vm10, %v4960_v16, %v4992_v35  ;;  %v11820_v12 = vpop.permute.xlu2 %4090 }
 0x92f   : > { %v4913_v54 = vadd.f32 %v4897_v14, %v4849_v27  ;;  %v11816_v24 = vsel %vm4977_vm12, %v4961_v30, %v4993_v50  ;;  %v5039_v47 = vadd.f32 %v11768_v41, %v11763_v38  ;;  %v5070_v8 = vmul.f32 %v11716_v6, %v11716_v6  ;;  %v14664_v27 = vld [vmem:[#allocation115_spill] sm:$0xff] }
 0x930   : > { %v4968_v9 = vadd.f32 %v14663_v3, %v4912_v21  ;;  %v5042_v7 = vadd.f32 %v11816_v24, %v11814_v11  ;;  %v5076_v2 = vadd.f32 %v5061_v60, %v5060_v10  ;;  %v5071_v43 = vmul.f32 %v11719_v34, %v11719_v34 }
 0x931   : > { %v11804_v61 = vpop.permute.xlu0 %4042  ;;  %5080 = vadd.xlane.f32.xlu0 %v5079_v51  ;;  %v11806_v48 = vpop.permute.xlu1 %4026  ;;  %5037 = vadd.xlane.f32.xlu1 %v5036_v32  ;;  %v4969_v29 = vadd.f32 %v14663_v3, %v4913_v54  ;;  %v3919_v44 = vsel %vm810_vm4, %v11674_v18, %v11666_v22  ;;  %v3927_v57 = vsel %vm810_vm4, %v11666_v22, %v11674_v18  ;;  %v14665_v51 = vld [vmem:[#allocation126_spill] sm:$0xff]  ;;  %vm5108_vm12 = vcmask 523264  }
 0x932   : > { %v5000_v42 = vmul.f32 0.2, %v4968_v9  ;;  %vm4984_vm13 = vcmp.gt.f32.partialorder %v4968_v9, 0.0  ;;  %v3855_v32 = vsel %vm794_vm0, %v14665_v51, %v14664_v27  ;;  %v3863_v35 = vsel %vm794_vm0, %v14664_v27, %v14665_v51  ;;  %v14666_v18 = vld [vmem:[#allocation10_spill] sm:$0xff] }
 0x933   : > { %v5001_v31 = vmul.f32 0.2, %v4969_v29  ;;  %vm4985_vm14 = vcmp.gt.f32.partialorder %v4969_v29, 0.0  ;;  %v5091_v22 = vadd.f32 %v5071_v43, %v5070_v8  ;;  %v3938_v21 = vmul.f32 %v3927_v57, %v14666_v18  ;;  %v14670_v8 = vld [vmem:[#allocation134_spill] sm:$0xff] }
 0x934   : > { %v11826_v16 = vsel %vm4984_vm13, %v4968_v9, %v5000_v42  ;;  %v3939_v54 = vmul.f32 %v3919_v44, %v14358_v23  ;;  %v3991_v10 = vsel %vm826_vm3, %v11776_v58, %v11656_v36  ;;  %v14667_v9 = vld [vmem:[#allocation6_spill] sm:$0xff] }
 0x935   : > { %5049 = vadd.xlane.f32.xlu2 %v5048_v62  ;;  %v11828_v30 = vsel %vm4985_vm14, %v4969_v29, %v5001_v31  ;;  %v3983_v62 = vsel %vm826_vm3, %v11656_v36, %v11776_v58  ;;  %v5072_v60 = vmul.f32 %v11826_v16, %v11826_v16  ;;  %v3874_v29 = vmul.f32 %v3863_v35, %v14667_v9  ;;  %v14669_v31 = vld [vmem:[#allocation13_spill] sm:$0xff] }
 0x936   : > { %v4147_v4 = vpop.permute.xlu2 %4146  ;;  %v5054_v14 = vadd.f32 %v11828_v30, %v11826_v16  ;;  %v5073_v3 = vmul.f32 %v11828_v30, %v11828_v30  ;;  %v4002_v42 = vmul.f32 %v3991_v10, %v14359_v56  ;;  %v4442_v43 = vmul.f32 %v14670_v8, %v3938_v21  ;;  %v14672_v21 = vld [vmem:[#allocation143_spill] sm:$0xff] }
 0x937   : > { %v4443_v44 = vmul.f32 %v14670_v8, %v3939_v54  ;;  %v5064_v36 = vmul.f32 %v11814_v11, %v11814_v11  ;;  %v5065_v58 = vmul.f32 %v11816_v24, %v11816_v24  ;;  %v4055_v35 = vsel %vm842_vm5, %v11782_v53, %v11774_v49  ;;  %v14673_v8 = vld [vmem:[#allocation139_spill] sm:$0xff] }
 0x938   : > { %v5094_v57 = vadd.f32 %v5073_v3, %v5072_v60  ;;  %v4506_v54 = vmul.f32 %v14672_v21, %v4002_v42 }
 0x939   : > { %v4099_v1 = vpop.permute.xlu0 %4098  ;;  %5043 = vadd.xlane.f32.xlu0 %v5042_v7  ;;  %v4083_v55 = vpop.permute.xlu1 %4082  ;;  %5077 = vadd.xlane.f32.xlu1 %v5076_v2  ;;  %v14668_v7 = vld [vmem:[#allocation7_spill] sm:$0xff] }
 0x93a   : > { %v3875_v2 = vmul.f32 %v3855_v32, %v14668_v7  ;;  %v4047_v32 = vsel %vm842_vm5, %v11774_v49, %v11782_v53  ;;  %v3931_v49 = vsel %vm810_vm4, %v11729_v59, %v14673_v8  ;;  %v4066_v53 = vmul.f32 %v4055_v35, %v14366_v5 }
 0x93b   : > { %v4067_v42 = vmul.f32 %v4047_v32, %v14367_v25 }
 0x93d   : > { %5040 = vadd.xlane.f32.xlu2 %v5039_v47  ;;  %v4003_v47 = vmul.f32 %v3983_v62, %v14669_v31 }
 0x93e   : > { %v11892_v10 = vpop.permute.xlu2 %4170 }
 0x93f   : > { %v4507_v62 = vmul.f32 %v14672_v21, %v4003_v47  ;;  %v4111_v47 = vsel %vm858_vm6, %v4083_v55, %v4099_v1 }
 0x940   : > { %v4130_v21 = vmul.f32 %v4111_v47, %v14098_v0  ;;  %v3987_v47 = vsel %vm826_vm3, %v11712_v63, %v11727_v52 }
 0x941   : > { %v11844_v19 = vpop.permute.xlu0 %4154  ;;  %v11854_v50 = vpop.permute.xlu1 %4106  ;;  %5055 = vadd.xlane.f32.xlu1 %v5054_v14  ;;  %v14671_v14 = vld [vmem:[#allocation118_spill] sm:$0xff] }
 0x942   : > { %v4394_v27 = vmul.f32 %v14671_v14, %v3874_v29  ;;  %v4395_v51 = vmul.f32 %v14671_v14, %v3875_v2  ;;  %v5082_v2 = vadd.f32 %v5065_v58, %v5064_v36  ;;  %v3923_v14 = vsel %vm810_vm4, %v14673_v8, %v11729_v59 }
 0x943   : > { %v3867_v59 = vsel %vm794_vm0, %v11618_v13, %v11622_v17 }
 0x944   : > { %v4458_v3 = vadd.f32 %v4442_v43, %v4394_v27  ;;  %v4459_v29 = vadd.f32 %v4443_v44, %v4395_v51  ;;  %v4119_v43 = vsel %vm858_vm6, %v4099_v1, %v4083_v55  ;;  %v3859_v44 = vsel %vm794_vm0, %v11622_v17, %v11618_v13  ;;  %v14674_v51 = vld [vmem:[#allocation153_spill] sm:$0xff]  ;;  %v14675_v17 = vld [vmem:[#allocation104_spill] sm:$0xff] }
 0x945   : > { %5092 = vadd.xlane.f32.xlu2 %v5091_v22  ;;  %v3947_v27 = vmul.f32 %v3923_v14, %v14358_v23  ;;  %v4570_v32 = vmul.f32 %v14674_v51, %v4066_v53  ;;  %v4571_v35 = vmul.f32 %v14674_v51, %v4067_v42  ;;  %v4131_v13 = vmul.f32 %v4119_v43, %v14526_v37 }
 0x946   : > { %v4522_v36 = vadd.f32 %v4506_v54, %v4458_v3  ;;  %v4523_v58 = vadd.f32 %v4507_v62, %v4459_v29  ;;  %v14676_v54 = vld [vmem:[#allocation162_spill] sm:$0xff]  ;;  %v14677_v3 = vld [vmem:[#allocation156_spill] sm:$0xff]  ;;  %v3882_v53 = vmul.f32 %v3867_v59, %v14667_v9  ;;  %v3883_v42 = vmul.f32 %v3859_v44, %v14668_v7 }
 0x947   : > { %v4635_v62 = vmul.f32 %v14676_v54, %v14675_v17  ;;  %v4634_v29 = vmul.f32 %v14676_v54, %v14677_v3  ;;  %v3995_v43 = vsel %vm826_vm3, %v11727_v52, %v11712_v63  ;;  %v4051_v44 = vsel %vm842_vm5, %v11806_v48, %v11804_v61  ;;  %v14681_v54 = vld [vmem:[#allocation88_spill] sm:$0xff] }
 0x948   : > { %v4586_v8 = vadd.f32 %v4570_v32, %v4522_v36  ;;  %v4587_v14 = vadd.f32 %v4571_v35, %v4523_v58  ;;  %v14678_v36 = vld [vmem:[#allocation130_spill] sm:$0xff]  ;;  %v4227_v32 = vpop.permute.xlu2 %4226  ;;  %v4059_v35 = vsel %vm842_vm5, %v11804_v61, %v11806_v48  ;;  %v4402_v3 = vmul.f32 %v14681_v54, %v3882_v53 }
 0x949   : > { %v4211_v22 = vpop.permute.xlu0 %4210  ;;  %v4163_v60 = vpop.permute.xlu1 %4162  ;;  %5095 = vadd.xlane.f32.xlu1 %v5094_v57  ;;  %v3946_v57 = vmul.f32 %v3931_v49, %v14666_v18  ;;  %v4010_v23 = vmul.f32 %v3995_v43, %v14359_v56 }
 0x94a   : > { %v4175_v1 = vsel %vm874_vm7, %v4147_v4, %v4163_v60  ;;  %v4183_v55 = vsel %vm874_vm7, %v4163_v60, %v4147_v4  ;;  %v4239_v63 = vsel %vm890_vm8, %v4211_v22, %v4227_v32  ;;  %v4247_v52 = vsel %vm890_vm8, %v4227_v32, %v4211_v22  ;;  %v7083_v32 = vld [vmem:[%s13975_s4 + $0x10] ss:$0 sm:$0xff] }
 0x94b   : > { %v4194_v4 = vmul.f32 %v4175_v1, %v14527_v26  ;;  %v4195_v60 = vmul.f32 %v4183_v55, %v14537_v33  ;;  %v4450_v58 = vmul.f32 %v14678_v36, %v3946_v57  ;;  %v4451_v1 = vmul.f32 %v14678_v36, %v3947_v27  ;;  %v14679_v55 = vld [vmem:[#allocation167_spill] sm:$0xff] }
 0x94c   : > { %v4698_v51 = vmul.f32 %v14679_v55, %v4130_v21  ;;  %v4699_v59 = vmul.f32 %v14679_v55, %v4131_v13  ;;  %v4650_v57 = vadd.f32 %v4634_v29, %v4586_v8  ;;  %v4651_v27 = vadd.f32 %v4635_v62, %v4587_v14  ;;  %v14680_v21 = vld [vmem:[#allocation169_spill] sm:$0xff] }
 0x94d   : > { %5083 = vadd.xlane.f32.xlu2 %v5082_v2  ;;  %v4762_v13 = vmul.f32 %v14680_v21, %v4194_v4  ;;  %v4763_v17 = vmul.f32 %v14680_v21, %v4195_v60  ;;  %v4403_v36 = vmul.f32 %v14681_v54, %v3883_v42  ;;  %v4258_v61 = vmul.f32 %v4239_v63, %v14540_v45  ;;  %v14685_v54 = vld [vmem:[#allocation116_spill] sm:$0xff] }
 0x94e   : > { %v4714_v55 = vadd.f32 %v4698_v51, %v4650_v57  ;;  %v4715_v7 = vadd.f32 %v4699_v59, %v4651_v27  ;;  %v4259_v48 = vmul.f32 %v4247_v52, %v14546_v40  ;;  %v4011_v22 = vmul.f32 %v3987_v47, %v14669_v31  ;;  %v14684_v57 = vld [vmem:[#allocation152_spill] sm:$0xff] }
 0x94f   : > { %v4074_v62 = vmul.f32 %v4059_v35, %v14366_v5  ;;  %v4075_v29 = vmul.f32 %v4051_v44, %v14367_v25  ;;  %v4466_v14 = vadd.f32 %v4450_v58, %v4402_v3  ;;  %v4467_v4 = vadd.f32 %v4451_v1, %v4403_v36  ;;  %v14682_v1 = vld [vmem:[#allocation87_spill] sm:$0xff]  ;;  %v7084_v35 = vld [vmem:[%s13975_s4 + $0x18] ss:$0 sm:$0xff] }
 0x950   : > { %v4778_v60 = vadd.f32 %v4762_v13, %v4714_v55  ;;  %v4779_v53 = vadd.f32 %v4763_v17, %v4715_v7  ;;  %v4115_v51 = vsel %vm858_vm6, %v11820_v12, %v11854_v50  ;;  %v4123_v47 = vsel %vm858_vm6, %v11854_v50, %v11820_v12  ;;  %v14683_v50 = vld [vmem:[#allocation142_spill] sm:$0xff] }
 0x951   : > { %v11930_v2 = vpop.permute.xlu0 %4234  ;;  %v11934_v49 = vpop.permute.xlu1 %4218  ;;  %v4826_v59 = vmul.f32 %v14682_v1, %v4258_v61  ;;  %v4827_v7 = vmul.f32 %v14682_v1, %v4259_v48  ;;  %v4514_v63 = vmul.f32 %v14683_v50, %v4010_v23  ;;  %v4515_v52 = vmul.f32 %v14683_v50, %v4011_v22 }
 0x952   : > { %v4578_v27 = vmul.f32 %v14684_v57, %v4074_v62  ;;  %v4579_v21 = vmul.f32 %v14684_v57, %v4075_v29  ;;  %v4138_v48 = vmul.f32 %v4115_v51, %v14098_v0  ;;  %v14687_v62 = vld [vmem:[#allocation163_spill] sm:$0xff]  ;;  %v14688_v29 = vld [vmem:[#allocation98_spill] sm:$0xff]  ;;  %v4243_v50 = vsel %vm890_vm8, %v11934_v49, %v11930_v2 }
 0x953   : > { %v4842_v13 = vadd.f32 %v4826_v59, %v4778_v60  ;;  %v4843_v17 = vadd.f32 %v4827_v7, %v4779_v53  ;;  %v4530_v55 = vadd.f32 %v4514_v63, %v4466_v14  ;;  %v4531_v61 = vadd.f32 %v4515_v52, %v4467_v4  ;;  %v14689_v53 = vld [vmem:[#allocation49_spill] sm:$0xff]  ;;  %v14690_v7 = vld [vmem:[#allocation62_spill] sm:$0xff] }
 0x954   : > { %v4643_v60 = vmul.f32 %v14687_v62, %v14688_v29  ;;  %v4179_v14 = vsel %vm874_vm7, %v11844_v19, %v11892_v10  ;;  %v4187_v4 = vsel %vm874_vm7, %v11892_v10, %v11844_v19  ;;  %v4251_v19 = vsel %vm890_vm8, %v11930_v2, %v11934_v49 }
 0x955   : > { %v4595_v22 = vadd.f32 %v4579_v21, %v4531_v61  ;;  %v4203_v21 = vmul.f32 %v4187_v4, %v14537_v33 }
 0x957   : > { %v4659_v57 = vadd.f32 %v4643_v60, %v4595_v22 }
 0x959   : > { %v4291_v8 = vpop.permute.xlu0 %4290  ;;  %v4275_v42 = vpop.permute.xlu1 %4274 }
 0x95a   : > { %v4303_v43 = vsel %vm906_vm9, %v4275_v42, %v4291_v8  ;;  %v4311_v58 = vsel %vm906_vm9, %v4291_v8, %v4275_v42  ;;  %v4139_v8 = vmul.f32 %v4123_v47, %v14526_v37 }
 0x95b   : > { %v4322_v44 = vmul.f32 %v7083_v32, %v4303_v43  ;;  %v4323_v12 = vmul.f32 %v7084_v35, %v4311_v58  ;;  %v4594_v43 = vadd.f32 %v4578_v27, %v4530_v55  ;;  %v14686_v58 = vld [vmem:[#allocation180_spill] sm:$0xff]  ;;  %v4202_v27 = vmul.f32 %v4179_v14, %v14527_v26  ;;  %v14691_v55 = vld [vmem:[#allocation171_spill] sm:$0xff] }
 0x95c   : > { %v4642_v1 = vmul.f32 %v14687_v62, %v14686_v58 }
 0x95d   : > { %v4890_v3 = vmul.f32 %v14685_v54, %v4322_v44  ;;  %v4891_v36 = vmul.f32 %v14685_v54, %v4323_v12  ;;  %v4706_v44 = vmul.f32 %v14690_v7, %v4138_v48  ;;  %v4707_v12 = vmul.f32 %v14690_v7, %v4139_v8  ;;  %v4283_v8 = vpop.permute.xlu2 %4282  ;;  %v14693_v7 = vld [vmem:[#allocation181_spill] sm:$0xff] }
 0x95e   : > { %v4658_v52 = vadd.f32 %v4642_v1, %v4594_v43  ;;  %v4770_v61 = vmul.f32 %v14691_v55, %v4202_v27  ;;  %v4771_v48 = vmul.f32 %v14691_v55, %v4203_v21 }
 0x95f   : > { %v4906_v42 = vadd.f32 %v4890_v3, %v4842_v13  ;;  %v4907_v23 = vadd.f32 %v4891_v36, %v4843_v17  ;;  %v4266_v13 = vmul.f32 %v4243_v50, %v14540_v45  ;;  %v4267_v17 = vmul.f32 %v4251_v19, %v14546_v40 }
 0x960   : > { %v4722_v49 = vadd.f32 %v4706_v44, %v4658_v52  ;;  %v4723_v36 = vadd.f32 %v4707_v12, %v4659_v57 }
 0x961   : > { %v4962_v51 = vadd.f32 %v14689_v53, %v4906_v42  ;;  %v4963_v47 = vadd.f32 %v14689_v53, %v4907_v23  ;;  %v12014_v59 = vpop.permute.xlu1 %5474  ;;  %v14692_v42 = vld [vmem:[#allocation174_spill] sm:$0xff] }
 0x962   : > { %v4834_v23 = vmul.f32 %v14692_v42, %v4266_v13  ;;  %v4835_v43 = vmul.f32 %v14692_v42, %v4267_v17  ;;  %v4786_v60 = vadd.f32 %v4770_v61, %v4722_v49  ;;  %v4787_v14 = vadd.f32 %v4771_v48, %v4723_v36  ;;  %v12066_v61 = vpop.permute.xlu0 %5464 }
 0x963   : > { %vm4978_vm2 = vcmp.gt.f32.partialorder %v4962_v51, 0.0  ;;  %vm4979_vm15 = vcmp.gt.f32.partialorder %v4963_v47, 0.0  ;;  %v4994_v10 = vmul.f32 0.2, %v4962_v51  ;;  %v4995_v63 = vmul.f32 0.2, %v4963_v47 }
 0x965   : > { %v12030_v54 = vsel %vm4978_vm2, %v4962_v51, %v4994_v10  ;;  %v12032_v3 = vsel %vm4979_vm15, %v4963_v47, %v4995_v63  ;;  %v4850_v51 = vadd.f32 %v4834_v23, %v4786_v60  ;;  %v4851_v47 = vadd.f32 %v4835_v43, %v4787_v14  ;;  %v14694_v63 = vld [vmem:[#allocation86_spill] sm:$0xff]  ;;  %v12062_v36 = vpop.permute.xlu2 %5469 }
 0x966   : > { %v5045_v2 = vadd.f32 %v12032_v3, %v12030_v54  ;;  %v5066_v1 = vmul.f32 %v12030_v54, %v12030_v54  ;;  %v5067_v29 = vmul.f32 %v12032_v3, %v12032_v3 }
 0x968   : > { %5046 = vadd.xlane.f32.xlu1 %v5045_v2  ;;  %v5085_v50 = vadd.f32 %v5067_v29, %v5066_v1 }
 0x969   : > { %v4299_v22 = vpop.permute.xlu1 %4298 }
 0x96a   : > { %v4307_v58 = vsel %vm906_vm9, %v4283_v8, %v4299_v22  ;;  %v4315_v62 = vsel %vm906_vm9, %v4299_v22, %v4283_v8  ;;  %v12072_v42 = vpop.permute.xlu0 %5489 }
 0x96b   : > { %v4330_v4 = vmul.f32 %v7083_v32, %v4307_v58  ;;  %v4331_v53 = vmul.f32 %v7084_v35, %v4315_v62 }
 0x96d   : > { %v4898_v44 = vmul.f32 %v14693_v7, %v4330_v4  ;;  %v4899_v12 = vmul.f32 %v14693_v7, %v4331_v53  ;;  %v12068_v48 = vpop.permute.xlu2 %5479 }
 0x96f   : > { %v4914_v19 = vadd.f32 %v4898_v44, %v4850_v51  ;;  %v4915_v10 = vadd.f32 %v4899_v12, %v4851_v47 }
 0x970   : > { %5086 = vadd.xlane.f32.xlu1 %v5085_v50 }
 0x971   : > { %v4970_v52 = vadd.f32 %v14694_v63, %v4914_v19  ;;  %v4971_v57 = vadd.f32 %v14694_v63, %v4915_v10  ;;  %v12064_v55 = vpop.permute.xlu1 %5484 }
 0x973   : > { %vm4986_vm1 = vcmp.gt.f32.partialorder %v4970_v52, 0.0  ;;  %vm4987_vm10 = vcmp.gt.f32.partialorder %v4971_v57, 0.0  ;;  %v5002_v27 = vmul.f32 0.2, %v4970_v52  ;;  %v5003_v21 = vmul.f32 0.2, %v4971_v57 }
 0x975   : > { %v12052_v32 = vsel %vm4986_vm1, %v4970_v52, %v5002_v27  ;;  %v12054_v35 = vsel %vm4987_vm10, %v4971_v57, %v5003_v21  ;;  %v12074_v23 = vpop.permute.xlu2 %5494 }
 0x976   : > { %v5057_v13 = vadd.f32 %v12054_v35, %v12052_v32  ;;  %v5074_v17 = vmul.f32 %v12052_v32, %v12052_v32  ;;  %v5075_v2 = vmul.f32 %v12054_v35, %v12054_v35 }
 0x978   : > { %5058 = vadd.xlane.f32.xlu2 %v5057_v13  ;;  %v5097_v49 = vadd.f32 %v5075_v2, %v5074_v17  ;;  %v773_v13 = vld [vmem:[%s14695_s2] sm:$0xff]  ;;  %v774_v2 = vld [vmem:[%s14695_s2 + $0x8] sm:$0xff] }
 0x979   : > { %v12070_v8 = vpop.permute.xlu1 %5499 }
 0x97a   : > { %5098 = vadd.xlane.f32.xlu0 %v5097_v49  ;;  %v775_v49 = vld [vmem:[%s14695_s2 + $0x10] sm:$0xff] }
 0x994   : > { %v5090_v22 = vpop.xlane.xlu0 %5089 }
 0x99c   : > { %v5053_v1 = vpop.xlane.xlu0 %5052 }
 0x9a4   : > { %v5038_v43 = vpop.xlane.xlu1 %5037  ;;  %v5081_v14 = vpop.xlane.xlu0 %5080 }
 0x9a8   : > { %v5050_v58 = vpop.xlane.xlu2 %5049 }
 0x9a9   : > { %v5104_v52 = vsel %vm2989_vm11, %v5050_v58, %v5090_v22  ;;  %v776_v22 = vld [vmem:[%s14695_s2 + $0x18] sm:$0xff]  ;;  %v778_v58 = vld [vmem:[%s14695_s2 + $0x28] sm:$0xff] }
 0x9ac   : > { %v5078_v62 = vpop.xlane.xlu1 %5077  ;;  %v5044_v51 = vpop.xlane.xlu0 %5043 }
 0x9ad   : > { %v5100_v17 = vsel %vm2989_vm11, %v5038_v43, %v5078_v62  ;;  %v777_v43 = vld [vmem:[%s14695_s2 + $0x20] sm:$0xff]  ;;  %v779_v62 = vld [vmem:[%s14695_s2 + $0x30] sm:$0xff] }
 0x9b0   : > { %v5041_v29 = vpop.xlane.xlu2 %5040 }
 0x9b1   : > { %v5101_v21 = vsel %vm2989_vm11, %v5041_v29, %v5081_v14 }
 0x9b4   : > { %v5056_v60 = vpop.xlane.xlu1 %5055 }
 0x9b8   : > { %v5093_v4 = vpop.xlane.xlu2 %5092 }
 0x9b9   : > { %v5105_v10 = vsel %vm2989_vm11, %v5053_v1, %v5093_v4  ;;  %v780_v1 = vld [vmem:[%s14695_s2 + $0x38] sm:$0xff] }
 0x9bc   : > { %v5096_v53 = vpop.xlane.xlu1 %5095 }
 0x9bd   : > { %v5106_v19 = vsel %vm2989_vm11, %v5056_v60, %v5096_v53 }
 0x9c0   : > { %v5084_v47 = vpop.xlane.xlu2 %5083 }
 0x9c1   : > { %v5102_v27 = vsel %vm2989_vm11, %v5044_v51, %v5084_v47 }
 0x9db   : > { %v5047_v7 = vpop.xlane.xlu1 %5046 }
 0x9e3   : > { %v5087_v63 = vpop.xlane.xlu1 %5086 }
 0x9e4   : > { %v5103_v57 = vsel %vm2989_vm11, %v5047_v7, %v5087_v63 }
 0x9eb   : > { %v5059_v44 = vpop.xlane.xlu2 %5058 }
 0x9ed   : > { %v5099_v12 = vpop.xlane.xlu0 %5098 }
 0x9ee   : > { %v5107_v50 = vsel %vm2989_vm11, %v5059_v44, %v5099_v12 }
 0x9ef   : > { %5141 = vmatpush.msrb.mxu0 %v5107_v50 }
 0x9f1   : > { %5142 = vmatpush.msrb.mxu0 %v5106_v19 }
 0x9f3   : > { %5143 = vmatpush.msrb.mxu0 %v5105_v10 }
 0x9f5   : > { %5144 = vmatpush.msrb.mxu0 %v5104_v52  ;;  %v14696_v52 = vmov 1  }
 0x9f7   : > { %5145 = vmatpush.msrb.mxu0 %v5103_v57 }
 0x9f9   : > { %5146 = vmatpush.msrb.mxu0 %v5102_v27 }
 0x9fb   : > { %5147 = vmatpush.msrb.mxu0 %v5101_v21 }
 0x9fd   : > { %5148 = vmatpush.msrb.mxu0 %v5100_v17 }
 0x9fe   : > { %6864 = vmatmul.msk.f32.vlgmr.msrb.gmra.mxu0 %vm5108_vm12, %v773_v13 }
 0xa06   : > { %6865 = vmatmul.msk.f32.gmra.mxu0 %vm5108_vm12, %v774_v2 }
 0xa0e   : > { %6866 = vmatmul.msk.f32.gmra.mxu0 %vm5108_vm12, %v775_v49 }
 0xa16   : > { %6867 = vmatmul.msk.f32.gmra.mxu0 %vm5108_vm12, %v776_v22 }
 0xa1e   : > { %6868 = vmatmul.msk.f32.gmra.mxu0 %vm5108_vm12, %v777_v43 }
 0xa26   : > { %6869 = vmatmul.msk.f32.gmra.mxu0 %vm5108_vm12, %v778_v58 }
 0xa2e   : > { %6870 = vmatmul.msk.f32.gmra.mxu0 %vm5108_vm12, %v779_v62 }
 0xa36   : > { %6871 = vmatmul.msk.f32.gmra.mxu0 %vm5108_vm12, %v780_v1 }
 0xa7b   : > { %v5150_v29 = vpop.f32.mrf.mxu0 }
 0xa7c   : > { %5352 = vperm.xlu2 %7019, %v5150_v29   ;;  %v5174_v60 = vmul.f32 %v5150_v29, %v5150_v29 }
 0xa83   : > { %v5153_v14 = vpop.f32.mrf.mxu0 }
 0xa84   : > { %v5175_v4 = vmul.f32 %v5153_v14, %v5153_v14  ;;  %5190 = vrot.lane.b32.xlu2 %v5174_v60, %s14033_s6  ;;  %5357 = vperm.xlu1 %7020, %v5153_v14  }
 0xa86   : > { %5192 = vrot.lane.b32.xlu0 %v5175_v4, %s14033_s6 }
 0xa8b   : > { %v5156_v53 = vpop.f32.mrf.mxu0 }
 0xa8c   : > { %v5176_v51 = vmul.f32 %v5156_v53, %v5156_v53 }
 0xa8e   : > { %5362 = vperm.xlu0 %7018, %v5156_v53   ;;  %5194 = vrot.lane.b32.xlu1 %v5176_v51, %s14033_s6  ;;  %v14697_v51 = vld [vmem:[#allocation92_spill] sm:$0xff] }
 0xa93   : > { %v12119_v47 = vpop.f32.mrf.mxu0 }
 0xa94   : > { %v5177_v7 = vmul.f32 %v12119_v47, %v12119_v47  ;;  %5367 = vperm.xlu2 %7019, %v12119_v47  }
 0xa96   : > { %5196 = vrot.lane.b32.xlu0 %v5177_v7, %s14033_s6 }
 0xa9b   : > { %v5162_v44 = vpop.f32.mrf.mxu0 }
 0xa9c   : > { %v5178_v12 = vmul.f32 %v5162_v44, %v5162_v44  ;;  %5372 = vperm.xlu1 %7020, %v5162_v44  }
 0xa9e   : > { %5198 = vrot.lane.b32.xlu2 %v5178_v12, %s14033_s6 }
 0xaa3   : > { %v12126_v50 = vpop.f32.mrf.mxu0 }
 0xaa4   : > { %v5179_v19 = vmul.f32 %v12126_v50, %v12126_v50  ;;  %5377 = vperm.xlu0 %7018, %v12126_v50  }
 0xaa6   : > { %5200 = vrot.lane.b32.xlu1 %v5179_v19, %s14033_s6 }
 0xaab   : > { %v12132_v10 = vpop.f32.mrf.mxu0 }
 0xaac   : > { %v5180_v63 = vmul.f32 %v12132_v10, %v12132_v10  ;;  %5382 = vperm.xlu2 %7019, %v12132_v10   ;;  %7021 = vset.pattern.permute.xlu0 %v14696_v52 }
 0xaae   : > { %5202 = vrot.lane.b32.xlu0 %v5180_v63, %s14033_s6 }
 0xab3   : > { %v12139_v57 = vpop.f32.mrf.mxu0 }
 0xab4   : > { %v5181_v27 = vmul.f32 %v12139_v57, %v12139_v57  ;;  %5387 = vperm.xlu1 %7020, %v12139_v57   ;;  %7022 = vset.pattern.permute.xlu2 %v14696_v52 }
 0xab6   : > { %5204 = vrot.lane.b32.xlu2 %v5181_v27, %s14033_s6 }
 0xabc   : > { %7023 = vset.pattern.permute.xlu1 %v14696_v52 }
 0xad6   : > { %v12147_v21 = vpop.permute.xlu2 %5352 }
 0xade   : > { %v5191_v13 = vpop.permute.xlu2 %5190 }
 0xadf   : > { %v5214_v17 = vsub.f32 %v5150_v29, %v5191_v13 }
 0xae1   : > { %v5222_v2 = vadd.f32 1e-05, %v5214_v17 }
 0xae3   : > { %7044 = vrsqrt.f32 %v5222_v2  ;;  %vm5236_vm13 = vweird.f32 %v5222_v2 }
 0xae9   : > { %v7045_v49 = vpop.eup %7044 }
 0xaea   : > { %v5231_v22 = vmul.f32 %v7045_v49, %v5222_v2  ;;  %vm5237_vm11 = vweird.f32 %v7045_v49 }
 0xaeb   : > { %vm5238_vm14 = vmor %vm5236_vm13, %vm5237_vm11 }
 0xaec   : > { %v5232_v43 = vmul.f32 %v7045_v49, %v5231_v22 }
 0xaee   : > { %v5233_v58 = vmul.f32 0.5, %v5232_v43  ;;  %v12149_v1 = vpop.permute.xlu2 %5367 }
 0xaf0   : > { %v5234_v62 = vsub.f32 1.5, %v5233_v58 }
 0xaf2   : > { %v5235_v60 = vmul.f32 %v7045_v49, %v5234_v62 }
 0xaf4   : > { %v5239_v4 = vsel %vm5238_vm14, %v7045_v49, %v5235_v60 }
 0xaf5   : > { %v5342_v7 = vmul.f32 %v14697_v51, %v5239_v4 }
 0xaf6   : > { %v12152_v12 = vpop.permute.xlu1 %5357 }
 0xaf7   : > { %5408 = vperm.xlu0 %7021, %v5342_v7  }
 0xaf8   : > { %v5193_v29 = vpop.permute.xlu0 %5192  ;;  %v5199_v19 = vpop.permute.xlu2 %5198 }
 0xaf9   : > { %v5215_v63 = vsub.f32 %v5153_v14, %v5193_v29  ;;  %v5218_v52 = vsub.f32 %v5162_v44, %v5199_v19 }
 0xafb   : > { %v5223_v27 = vadd.f32 1e-05, %v5215_v63  ;;  %v5226_v13 = vadd.f32 1e-05, %v5218_v52 }
 0xafd   : > { %7046 = vrsqrt.f32 %v5223_v27  ;;  %vm5246_vm15 = vweird.f32 %v5223_v27 }
 0xafe   : > { %7048 = vrsqrt.f32 %v5226_v13 }
 0xb00   : > { %v12154_v17 = vpop.permute.xlu0 %5362  ;;  %v5195_v22 = vpop.permute.xlu1 %5194 }
 0xb01   : > { %v5216_v43 = vsub.f32 %v5156_v53, %v5195_v22 }
 0xb03   : > { %v7047_v2 = vpop.eup %7046  ;;  %v5224_v58 = vadd.f32 1e-05, %v5216_v43 }
 0xb04   : > { %v5241_v49 = vmul.f32 %v7047_v2, %v5223_v27  ;;  %v7049_v62 = vpop.eup %7048  ;;  %vm5247_vm2 = vweird.f32 %v7047_v2 }
 0xb05   : > { %7050 = vrsqrt.f32 %v5224_v58  ;;  %v5271_v51 = vmul.f32 %v7049_v62, %v5226_v13  ;;  %vm5248_vm1 = vmor %vm5246_vm15, %vm5247_vm2  ;;  %vm5256_vm11 = vweird.f32 %v5224_v58  ;;  %vm5277_vm14 = vweird.f32 %v7049_v62 }
 0xb06   : > { %v5242_v60 = vmul.f32 %v7047_v2, %v5241_v49  ;;  %v12156_v7 = vpop.permute.xlu2 %5382  ;;  %v14698_v49 = vld [vmem:[#allocation84_spill] sm:$0xff]  ;;  %vm5276_vm2 = vweird.f32 %v5226_v13 }
 0xb07   : > { %v5272_v53 = vmul.f32 %v7049_v62, %v5271_v51 }
 0xb08   : > { %v5243_v4 = vmul.f32 0.5, %v5242_v60  ;;  %v5197_v14 = vpop.permute.xlu0 %5196 }
 0xb09   : > { %v5217_v44 = vsub.f32 %v12119_v47, %v5197_v14  ;;  %v5273_v40 = vmul.f32 0.5, %v5272_v53 }
 0xb0a   : > { %v5244_v29 = vsub.f32 1.5, %v5243_v4 }
 0xb0b   : > { %v7051_v19 = vpop.eup %7050  ;;  %v5225_v63 = vadd.f32 1e-05, %v5217_v44  ;;  %v5274_v51 = vsub.f32 1.5, %v5273_v40 }
 0xb0c   : > { %v5245_v52 = vmul.f32 %v7047_v2, %v5244_v29  ;;  %v5251_v22 = vmul.f32 %v7051_v19, %v5224_v58  ;;  %vm5257_vm10 = vweird.f32 %v7051_v19 }
 0xb0d   : > { %7052 = vrsqrt.f32 %v5225_v63  ;;  %vm5258_vm13 = vmor %vm5256_vm11, %vm5257_vm10  ;;  %vm5266_vm10 = vweird.f32 %v5225_v63 }
 0xb0e   : > { %v5252_v43 = vmul.f32 %v7051_v19, %v5251_v22  ;;  %v5249_v33 = vsel %vm5248_vm1, %v7047_v2, %v5245_v52  ;;  %v12160_v25 = vpop.permute.xlu1 %5372  ;;  %v14699_v52 = vld [vmem:[#allocation113_spill] sm:$0xff]  ;;  %v5275_v22 = vmul.f32 %v7049_v62, %v5274_v51  ;;  %vm5278_vm1 = vmor %vm5276_vm2, %vm5277_vm14 }
 0xb0f   : > { %v5343_v60 = vmul.f32 %v14698_v49, %v5249_v33 }
 0xb10   : > { %v5253_v31 = vmul.f32 0.5, %v5252_v43  ;;  %v5205_v26 = vpop.permute.xlu2 %5204 }
 0xb11   : > { %v5221_v47 = vsub.f32 %v12139_v57, %v5205_v26  ;;  %5413 = vperm.xlu2 %7022, %v5343_v60  }
 0xb12   : > { %v5254_v4 = vsub.f32 1.5, %v5253_v31 }
 0xb13   : > { %v7053_v14 = vpop.eup %7052  ;;  %v5229_v27 = vadd.f32 1e-05, %v5221_v47  ;;  %v5279_v47 = vsel %vm5278_vm1, %v7049_v62, %v5275_v22 }
 0xb14   : > { %v5255_v44 = vmul.f32 %v7051_v19, %v5254_v4  ;;  %v5261_v29 = vmul.f32 %v7053_v14, %v5225_v63  ;;  %vm5267_vm15 = vweird.f32 %v7053_v14 }
 0xb15   : > { %7054 = vrsqrt.f32 %v5229_v27  ;;  %vm5268_vm11 = vmor %vm5266_vm10, %vm5267_vm15  ;;  %vm5306_vm14 = vweird.f32 %v5229_v27 }
 0xb16   : > { %v5262_v2 = vmul.f32 %v7053_v14, %v5261_v29  ;;  %v5259_v33 = vsel %vm5258_vm13, %v7051_v19, %v5255_v44  ;;  %v12164_v49 = vpop.permute.xlu0 %5377  ;;  %v14700_v44 = vld [vmem:[#allocation46_spill] sm:$0xff] }
 0xb17   : > { %v5344_v53 = vmul.f32 %v14699_v52, %v5259_v33  ;;  %v5346_v29 = vmul.f32 %v14700_v44, %v5279_v47 }
 0xb18   : > { %v5263_v43 = vmul.f32 0.5, %v5262_v2  ;;  %v5201_v26 = vpop.permute.xlu1 %5200  ;;  %v14701_v2 = vld [vmem:[#allocation53_spill] sm:$0xff] }
 0xb19   : > { %v5219_v31 = vsub.f32 %v12126_v50, %v5201_v26  ;;  %5418 = vperm.xlu1 %7023, %v5344_v53  }
 0xb1a   : > { %v5264_v40 = vsub.f32 1.5, %v5263_v43 }
 0xb1b   : > { %v7055_v57 = vpop.eup %7054  ;;  %v5227_v58 = vadd.f32 1e-05, %v5219_v31  ;;  %v14702_v31 = vld [vmem:[#allocation60_spill] sm:$0xff] }
 0xb1c   : > { %v5265_v60 = vmul.f32 %v7053_v14, %v5264_v40  ;;  %v5301_v19 = vmul.f32 %v7055_v57, %v5229_v27  ;;  %vm5307_vm13 = vweird.f32 %v7055_v57 }
 0xb1d   : > { %7056 = vrsqrt.f32 %v5227_v58  ;;  %vm5308_vm2 = vmor %vm5306_vm14, %vm5307_vm13  ;;  %vm5286_vm1 = vweird.f32 %v5227_v58 }
 0xb1e   : > { %v5302_v4 = vmul.f32 %v7055_v57, %v5301_v19  ;;  %v5269_v51 = vsel %vm5268_vm11, %v7053_v14, %v5265_v60 }
 0xb1f   : > { %v5345_v33 = vmul.f32 %v14701_v2, %v5269_v51 }
 0xb20   : > { %v5303_v50 = vmul.f32 0.5, %v5302_v4  ;;  %v5203_v52 = vpop.permute.xlu0 %5202 }
 0xb21   : > { %v5220_v13 = vsub.f32 %v12132_v10, %v5203_v52  ;;  %5428 = vperm.xlu1 %7023, %v5346_v29   ;;  %5423 = vperm.xlu2 %7022, %v5345_v33   ;;  %v14703_v29 = vld [vmem:[#allocation160_spill] sm:$0xff] }
 0xb22   : > { %v5304_v53 = vsub.f32 1.5, %v5303_v50  ;;  %v14704_v52 = vld [vmem:[#allocation44_spill] sm:$0xff] }
 0xb23   : > { %v7057_v43 = vpop.eup %7056  ;;  %v5228_v63 = vadd.f32 1e-05, %v5220_v13 }
 0xb24   : > { %v5305_v26 = vmul.f32 %v7055_v57, %v5304_v53  ;;  %v5281_v62 = vmul.f32 %v7057_v43, %v5227_v58  ;;  %vm5287_vm15 = vweird.f32 %v7057_v43  ;;  %v14705_v53 = vmov 0  }
 0xb25   : > { %7058 = vrsqrt.f32 %v5228_v63  ;;  %vm5288_vm10 = vmor %vm5286_vm1, %vm5287_vm15  ;;  %vm5296_vm13 = vweird.f32 %v5228_v63  ;;  %v5390_v58 = vsub.f32 %v11788_v20, %v12147_v21 }
 0xb26   : > { %v5282_v14 = vmul.f32 %v7057_v43, %v5281_v62  ;;  %v5309_v22 = vsel %vm5308_vm2, %v7055_v57, %v5305_v26 }
 0xb27   : > { %v5349_v40 = vmul.f32 %v14702_v31, %v5309_v22  ;;  %v5392_v31 = vsub.f32 %v11763_v38, %v12152_v12  ;;  %v12225_v38 = vpop.permute.xlu1 %5387 }
 0xb28   : > { %v5283_v60 = vmul.f32 0.5, %v5282_v14 }
 0xb29   : > { %5443 = vperm.xlu1 %7023, %v5349_v40  }
 0xb2a   : > { %v5284_v19 = vsub.f32 1.5, %v5283_v60 }
 0xb2b   : > { %v7059_v10 = vpop.eup %7058 }
 0xb2c   : > { %v5285_v47 = vmul.f32 %v7057_v43, %v5284_v19  ;;  %v5291_v4 = vmul.f32 %v7059_v10, %v5228_v63  ;;  %vm5297_vm11 = vweird.f32 %v7059_v10 }
 0xb2d   : > { %vm5298_vm14 = vmor %vm5296_vm13, %vm5297_vm11 }
 0xb2e   : > { %v5292_v51 = vmul.f32 %v7059_v10, %v5291_v4  ;;  %v5289_v44 = vsel %vm5288_vm10, %v7057_v43, %v5285_v47  ;;  %v5391_v43 = vsub.f32 %v11794_v28, %v12147_v21  ;;  %v5393_v28 = vsub.f32 %v11768_v41, %v12152_v12 }
 0xb2f   : > { %v5347_v27 = vmul.f32 %v14703_v29, %v5289_v44  ;;  %v5394_v12 = vsub.f32 %v11814_v11, %v12154_v17  ;;  %v5396_v29 = vsub.f32 %v12030_v54, %v12149_v1 }
 0xb30   : > { %v5293_v2 = vmul.f32 0.5, %v5292_v51 }
 0xb31   : > { %5433 = vperm.xlu0 %7021, %v5347_v27  }
 0xb32   : > { %v5294_v33 = vsub.f32 1.5, %v5293_v2 }
 0xb34   : > { %v5295_v57 = vmul.f32 %v7059_v10, %v5294_v33 }
 0xb36   : > { %v5299_v50 = vsel %vm5298_vm14, %v7059_v10, %v5295_v57  ;;  %v5395_v10 = vsub.f32 %v11816_v24, %v12154_v17  ;;  %v5397_v17 = vsub.f32 %v12032_v3, %v12149_v1 }
 0xb37   : > { %v5348_v13 = vmul.f32 %v14704_v52, %v5299_v50 }
 0xb39   : > { %5438 = vperm.xlu2 %7022, %v5348_v13   ;;  %7025 = vset.pattern.permute.xlu0 %v14705_v53 }
 0xb41   : > { %7024 = vset.pattern.permute.xlu2 %v14705_v53 }
 0xb69   : > { %v5409_v26 = vpop.permute.xlu0 %5408 }
 0xb6a   : > { %v5446_v62 = vmul.f32 %v5409_v26, %v5390_v58  ;;  %v5447_v14 = vmul.f32 %v5409_v26, %v5391_v43 }
 0xb6b   : > { %v5414_v20 = vpop.permute.xlu2 %5413 }
 0xb6c   : > { %v12180_v63 = vadd.f32 %v12066_v61, %v5446_v62  ;;  %v12183_v22 = vadd.f32 %v12066_v61, %v5447_v14  ;;  %v5449_v61 = vmul.f32 %v5414_v20, %v5393_v28  ;;  %v5448_v41 = vmul.f32 %v5414_v20, %v5392_v31 }
 0xb6e   : > { %14706 = vst [vmem:[#allocation48_spill] sm:$0xff] %v12180_v63  ;;  %5518 = vrot.lane.b32.xlu0 %v12180_v63, %s14044_s7  ;;  %5582 = vrot.lane.b32.xlu2 %v12180_v63, %s14027_s1  ;;  %v12206_v21 = vadd.f32 %v12062_v36, %v5449_v61  ;;  %v12217_v40 = vadd.f32 %v12062_v36, %v5448_v41 }
 0xb6f   : > { %14707 = vst [vmem:[#allocation135_spill] sm:$0xff] %v12183_v22  ;;  %5534 = vrot.lane.b32.xlu1 %v12183_v22, %s14044_s7  ;;  %v5399_v61 = vsub.f32 %v14662_v15, %v12160_v25 }
 0xb70   : > { %14708 = vst [vmem:[#allocation144_spill] sm:$0xff] %v12206_v21 }
 0xb71   : > { %14709 = vst [vmem:[#allocation158_spill] sm:$0xff] %v12217_v40 }
 0xb76   : > { %5598 = vrot.lane.b32.xlu0 %v12183_v22, %s14027_s1  ;;  %5662 = vrot.lane.b32.xlu2 %v12183_v22, %s14030_s30 }
 0xb77   : > { %5646 = vrot.lane.b32.xlu1 %v12180_v63, %s14030_s30 }
 0xb7b   : > { %v5424_v24 = vpop.permute.xlu2 %5423 }
 0xb7c   : > { %v5453_v51 = vmul.f32 %v5424_v24, %v5397_v17  ;;  %v5452_v2 = vmul.f32 %v5424_v24, %v5396_v29  ;;  %v5398_v17 = vsub.f32 %v14661_v39, %v12160_v25 }
 0xb7e   : > { %5774 = vrot.lane.b32.xlu0 %v12180_v63, %s14034_s26  ;;  %5710 = vrot.lane.b32.xlu2 %v12180_v63, %s14033_s6  ;;  %v12284_v44 = vadd.f32 %v12068_v48, %v5453_v51  ;;  %v12295_v33 = vadd.f32 %v12068_v48, %v5452_v2 }
 0xb7f   : > { %5726 = vrot.lane.b32.xlu1 %v12183_v22, %s14033_s6 }
 0xb80   : > { %14712 = vst [vmem:[#allocation164_spill] sm:$0xff] %v12284_v44 }
 0xb81   : > { %14713 = vst [vmem:[#allocation151_spill] sm:$0xff] %v12295_v33 }
 0xb86   : > { %5790 = vrot.lane.b32.xlu2 %v12183_v22, %s14034_s26  ;;  %5536 = vrot.lane.b32.xlu0 %v12206_v21, %s14044_s7 }
 0xb87   : > { %5918 = vrot.lane.b32.xlu1 %v12183_v22, %s14039_s8 }
 0xb8b   : > { %v5419_v36 = vpop.permute.xlu1 %5418 }
 0xb8c   : > { %v5450_v60 = vmul.f32 %v5419_v36, %v5394_v12  ;;  %v5451_v11 = vmul.f32 %v5419_v36, %v5395_v10 }
 0xb8e   : > { %5902 = vrot.lane.b32.xlu2 %v12180_v63, %s14039_s8  ;;  %5648 = vrot.lane.b32.xlu0 %v12217_v40, %s14030_s30  ;;  %v12242_v19 = vadd.f32 %v12014_v59, %v5450_v60  ;;  %v12253_v47 = vadd.f32 %v12014_v59, %v5451_v11 }
 0xb8f   : > { %5584 = vrot.lane.b32.xlu1 %v12217_v40, %s14027_s1 }
 0xb90   : > { %14710 = vst [vmem:[#allocation150_spill] sm:$0xff] %v12242_v19 }
 0xb91   : > { %14711 = vst [vmem:[#allocation187_spill] sm:$0xff] %v12253_v47 }
 0xb93   : > { %v12273_v59 = vpop.permute.xlu2 %5438  ;;  %v5429_v27 = vpop.permute.xlu1 %5428 }
 0xb94   : > { %v5455_v31 = vmul.f32 %v5429_v27, %v5399_v61 }
 0xb96   : > { %5728 = vrot.lane.b32.xlu0 %v12206_v21, %s14033_s6  ;;  %5520 = vrot.lane.b32.xlu2 %v12217_v40, %s14044_s7  ;;  %v12368_v24 = vadd.f32 %v12064_v55, %v5455_v31 }
 0xb97   : > { %5712 = vrot.lane.b32.xlu1 %v12217_v40, %s14033_s6 }
 0xb98   : > { %14719 = vst [vmem:[#allocation50_spill] sm:$0xff] %v12368_v24 }
 0xb9b   : > { %v12305_v57 = vpop.permute.xlu1 %5443 }
 0xb9e   : > { %5776 = vrot.lane.b32.xlu0 %v12217_v40, %s14034_s26  ;;  %5600 = vrot.lane.b32.xlu2 %v12206_v21, %s14027_s1 }
 0xb9f   : > { %5664 = vrot.lane.b32.xlu1 %v12206_v21, %s14030_s30 }
 0xba3   : > { %v12303_v54 = vpop.permute.xlu0 %5433 }
 0xba6   : > { %5904 = vrot.lane.b32.xlu0 %v12217_v40, %s14039_s8  ;;  %5792 = vrot.lane.b32.xlu2 %v12206_v21, %s14034_s26 }
 0xba7   : > { %5522 = vrot.lane.b32.xlu1 %v12242_v19, %s14044_s7 }
 0xbae   : > { %5968 = vrot.lane.b32.xlu0 %v12217_v40, %s14040_s0  ;;  %5920 = vrot.lane.b32.xlu2 %v12206_v21, %s14039_s8 }
 0xbaf   : > { %5602 = vrot.lane.b32.xlu1 %v12253_v47, %s14027_s1 }
 0xbb6   : > { %5586 = vrot.lane.b32.xlu0 %v12242_v19, %s14027_s1  ;;  %5984 = vrot.lane.b32.xlu2 %v12206_v21, %s14040_s0 }
 0xbb7   : > { %5666 = vrot.lane.b32.xlu1 %v12253_v47, %s14030_s30 }
 0xbbe   : > { %5714 = vrot.lane.b32.xlu0 %v12242_v19, %s14033_s6  ;;  %5538 = vrot.lane.b32.xlu2 %v12253_v47, %s14044_s7 }
 0xbbf   : > { %5906 = vrot.lane.b32.xlu1 %v12242_v19, %s14039_s8 }
 0xbc6   : > { %5778 = vrot.lane.b32.xlu0 %v12242_v19, %s14034_s26  ;;  %5650 = vrot.lane.b32.xlu2 %v12242_v19, %s14030_s30 }
 0xbc7   : > { %5970 = vrot.lane.b32.xlu1 %v12242_v19, %s14040_s0 }
 0xbc8   : > { %v5583_v4 = vpop.permute.xlu2 %5582 }
 0xbce   : > { %5922 = vrot.lane.b32.xlu0 %v12253_v47, %s14039_s8  ;;  %5730 = vrot.lane.b32.xlu2 %v12253_v47, %s14033_s6 }
 0xbcf   : > { %5540 = vrot.lane.b32.xlu1 %v12284_v44, %s14044_s7 }
 0xbd0   : > { %v5663_v3 = vpop.permute.xlu2 %5662 }
 0xbd6   : > { %5986 = vrot.lane.b32.xlu0 %v12253_v47, %s14040_s0  ;;  %5794 = vrot.lane.b32.xlu2 %v12253_v47, %s14034_s26 }
 0xbd7   : > { %5652 = vrot.lane.b32.xlu1 %v12295_v33, %s14030_s30 }
 0xbd8   : > { %v5711_v1 = vpop.permute.xlu2 %5710 }
 0xbde   : > { %5524 = vrot.lane.b32.xlu0 %v12295_v33, %s14044_s7  ;;  %5588 = vrot.lane.b32.xlu2 %v12295_v33, %s14027_s1 }
 0xbdf   : > { %5732 = vrot.lane.b32.xlu1 %v12284_v44, %s14033_s6 }
 0xbe0   : > { %v5519_v48 = vpop.permute.xlu0 %5518  ;;  %v5791_v50 = vpop.permute.xlu2 %5790 }
 0xbe1   : > { %v5535_v52 = vpop.permute.xlu1 %5534 }
 0xbe2   : > { %v12315_v13 = vsel %vm794_vm0, %v5519_v48, %v5535_v52  ;;  %v12319_v53 = vsel %vm794_vm0, %v5535_v52, %v5519_v48 }
 0xbe3   : > { %14714 = vst [vmem:[#allocation23_spill] sm:$0xff] %v12315_v13 }
 0xbe6   : > { %5604 = vrot.lane.b32.xlu0 %v12284_v44, %s14027_s1  ;;  %5716 = vrot.lane.b32.xlu2 %v12295_v33, %s14033_s6 }
 0xbe7   : > { %5668 = vrot.lane.b32.xlu1 %v12284_v44, %s14030_s30 }
 0xbe8   : > { %v5599_v58 = vpop.permute.xlu0 %5598  ;;  %v5903_v43 = vpop.permute.xlu2 %5902 }
 0xbe9   : > { %v12329_v26 = vsel %vm810_vm4, %v5583_v4, %v5599_v58  ;;  %v12333_v62 = vsel %vm810_vm4, %v5599_v58, %v5583_v4  ;;  %v5647_v14 = vpop.permute.xlu1 %5646  ;;  %v5454_v4 = vmul.f32 %v5429_v27, %v5398_v17 }
 0xbea   : > { %14715 = vst [vmem:[#allocation165_spill] sm:$0xff] %v12329_v26  ;;  %v12337_v20 = vsel %vm826_vm3, %v5647_v14, %v5663_v3  ;;  %v12341_v28 = vsel %vm826_vm3, %v5663_v3, %v5647_v14 }
 0xbeb   : > { %14716 = vst [vmem:[#allocation159_spill] sm:$0xff] %v12337_v20  ;;  %v12395_v27 = vadd.f32 %v12064_v55, %v5454_v4 }
 0xbec   : > { %14717 = vst [vmem:[#allocation108_spill] sm:$0xff] %v12341_v28 }
 0xbed   : > { %14723 = vst [vmem:[#allocation5_spill] sm:$0xff] %v12395_v27 }
 0xbee   : > { %5780 = vrot.lane.b32.xlu0 %v12295_v33, %s14034_s26  ;;  %5796 = vrot.lane.b32.xlu2 %v12284_v44, %s14034_s26 }
 0xbef   : > { %5924 = vrot.lane.b32.xlu1 %v12284_v44, %s14039_s8 }
 0xbf0   : > { %v5775_v41 = vpop.permute.xlu0 %5774  ;;  %v5521_v60 = vpop.permute.xlu2 %5520 }
 0xbf1   : > { %v12353_v36 = vsel %vm858_vm6, %v5775_v41, %v5791_v50  ;;  %v12357_v12 = vsel %vm858_vm6, %v5791_v50, %v5775_v41  ;;  %v5727_v15 = vpop.permute.xlu1 %5726 }
 0xbf2   : > { %v12361_v10 = vsel %vm842_vm5, %v5711_v1, %v5727_v15  ;;  %v12365_v11 = vsel %vm842_vm5, %v5727_v15, %v5711_v1  ;;  %v5400_v15 = vsub.f32 %v11716_v6, %v12164_v49 }
 0xbf3   : > { %14718 = vst [vmem:[#allocation47_spill] sm:$0xff] %v12361_v10 }
 0xbf4   : > { %v5456_v17 = vmul.f32 %v12303_v54, %v5400_v15 }
 0xbf6   : > { %5542 = vrot.lane.b32.xlu0 %v12368_v24, %s14044_s7  ;;  %5908 = vrot.lane.b32.xlu2 %v12295_v33, %s14039_s8 }
 0xbf7   : > { %5988 = vrot.lane.b32.xlu1 %v12284_v44, %s14040_s0 }
 0xbf8   : > { %v5537_v51 = vpop.permute.xlu0 %5536  ;;  %v5601_v25 = vpop.permute.xlu2 %5600 }
 0xbf9   : > { %v5919_v29 = vpop.permute.xlu1 %5918  ;;  %v12380_v3 = vsel %vm794_vm0, %v5521_v60, %v5537_v51  ;;  %v12384_v2 = vsel %vm794_vm0, %v5537_v51, %v5521_v60 }
 0xbfa   : > { %14720 = vst [vmem:[#allocation102_spill] sm:$0xff] %v12380_v3  ;;  %v12388_v39 = vsel %vm890_vm8, %v5903_v43, %v5919_v29  ;;  %v12392_v1 = vsel %vm890_vm8, %v5919_v29, %v5903_v43  ;;  %v5402_v3 = vsub.f32 %v11826_v16, %v12156_v7 }
 0xbfb   : > { %14721 = vst [vmem:[#allocation73_spill] sm:$0xff] %v12388_v39 }
 0xbfc   : > { %14722 = vst [vmem:[#allocation37_spill] sm:$0xff] %v12392_v1 }
 0xbfe   : > { %5654 = vrot.lane.b32.xlu0 %v12395_v27, %s14030_s30  ;;  %5972 = vrot.lane.b32.xlu2 %v12295_v33, %s14040_s0 }
 0xbff   : > { %5590 = vrot.lane.b32.xlu1 %v12395_v27, %s14027_s1 }
 0xc00   : > { %v5649_v48 = vpop.permute.xlu0 %5648  ;;  %v5793_v52 = vpop.permute.xlu2 %5792 }
 0xc01   : > { %v5585_v50 = vpop.permute.xlu1 %5584 }
 0xc02   : > { %v12405_v58 = vsel %vm810_vm4, %v5585_v50, %v5601_v25  ;;  %v12409_v55 = vsel %vm810_vm4, %v5601_v25, %v5585_v50 }
 0xc03   : > { %14724 = vst [vmem:[#allocation66_spill] sm:$0xff] %v12405_v58 }
 0xc06   : > { %5734 = vrot.lane.b32.xlu0 %v12368_v24, %s14033_s6  ;;  %5526 = vrot.lane.b32.xlu2 %v12395_v27, %s14044_s7 }
 0xc07   : > { %5718 = vrot.lane.b32.xlu1 %v12395_v27, %s14033_s6 }
 0xc08   : > { %v5729_v43 = vpop.permute.xlu0 %5728  ;;  %v5921_v61 = vpop.permute.xlu2 %5920 }
 0xc09   : > { %v5713_v14 = vpop.permute.xlu1 %5712 }
 0xc0a   : > { %v12419_v31 = vsel %vm842_vm5, %v5713_v14, %v5729_v43  ;;  %v12423_v41 = vsel %vm842_vm5, %v5729_v43, %v5713_v14  ;;  %v12451_v43 = vadd.f32 %v12072_v42, %v5456_v17 }
 0xc0b   : > { %14725 = vst [vmem:[#allocation64_spill] sm:$0xff] %v12419_v31 }
 0xc0c   : > { %14728 = vst [vmem:[#allocation41_spill] sm:$0xff] %v12451_v43 }
 0xc0e   : > { %5782 = vrot.lane.b32.xlu0 %v12395_v27, %s14034_s26  ;;  %5606 = vrot.lane.b32.xlu2 %v12368_v24, %s14027_s1 }
 0xc0f   : > { %5670 = vrot.lane.b32.xlu1 %v12368_v24, %s14030_s30 }
 0xc10   : > { %v5777_v60 = vpop.permute.xlu0 %5776  ;;  %v5985_v25 = vpop.permute.xlu2 %5984 }
 0xc11   : > { %v12436_v4 = vsel %vm858_vm6, %v5777_v60, %v5793_v52  ;;  %v12440_v51 = vsel %vm858_vm6, %v5793_v52, %v5777_v60  ;;  %v5665_v29 = vpop.permute.xlu1 %5664  ;;  %v5401_v52 = vsub.f32 %v11719_v34, %v12164_v49 }
 0xc12   : > { %v12444_v6 = vsel %vm826_vm3, %v5649_v48, %v5665_v29  ;;  %v12448_v50 = vsel %vm826_vm3, %v5665_v29, %v5649_v48 }
 0xc13   : > { %14726 = vst [vmem:[#allocation70_spill] sm:$0xff] %v12444_v6  ;;  %v5457_v15 = vmul.f32 %v12303_v54, %v5401_v52 }
 0xc14   : > { %14727 = vst [vmem:[#allocation103_spill] sm:$0xff] %v12448_v50 }
 0xc15   : > { %v12479_v54 = vadd.f32 %v12072_v42, %v5457_v15 }
 0xc16   : > { %5910 = vrot.lane.b32.xlu0 %v12395_v27, %s14039_s8  ;;  %5798 = vrot.lane.b32.xlu2 %v12368_v24, %s14034_s26 }
 0xc17   : > { %5528 = vrot.lane.b32.xlu1 %v12451_v43, %s14044_s7  ;;  %14732 = vst [vmem:[#allocation52_spill] sm:$0xff] %v12479_v54 }
 0xc18   : > { %v5905_v14 = vpop.permute.xlu0 %5904  ;;  %v5539_v29 = vpop.permute.xlu2 %5538 }
 0xc19   : > { %v12464_v48 = vsel %vm890_vm8, %v5905_v14, %v5921_v61  ;;  %v12468_v60 = vsel %vm890_vm8, %v5921_v61, %v5905_v14  ;;  %v5523_v17 = vpop.permute.xlu1 %5522 }
 0xc1a   : > { %14729 = vst [vmem:[#allocation91_spill] sm:$0xff] %v12464_v48  ;;  %v12472_v34 = vsel %vm794_vm0, %v5523_v17, %v5539_v29  ;;  %v12476_v49 = vsel %vm794_vm0, %v5539_v29, %v5523_v17 }
 0xc1b   : > { %14730 = vst [vmem:[#allocation94_spill] sm:$0xff] %v12468_v60 }
 0xc1c   : > { %14731 = vst [vmem:[#allocation173_spill] sm:$0xff] %v12472_v34 }
 0xc1e   : > { %5974 = vrot.lane.b32.xlu0 %v12395_v27, %s14040_s0  ;;  %5926 = vrot.lane.b32.xlu2 %v12368_v24, %s14039_s8 }
 0xc1f   : > { %5608 = vrot.lane.b32.xlu1 %v12479_v54, %s14027_s1 }
 0xc20   : > { %v5969_v61 = vpop.permute.xlu0 %5968  ;;  %v5651_v15 = vpop.permute.xlu2 %5650 }
 0xc21   : > { %v12489_v52 = vsel %vm906_vm9, %v5969_v61, %v5985_v25  ;;  %v12493_v14 = vsel %vm906_vm9, %v5985_v25, %v5969_v61  ;;  %v5603_v42 = vpop.permute.xlu1 %5602 }
 0xc22   : > { %14733 = vst [vmem:[#allocation107_spill] sm:$0xff] %v12489_v52 }
 0xc23   : > { %14734 = vst [vmem:[#allocation140_spill] sm:$0xff] %v12493_v14  ;;  %v5403_v14 = vsub.f32 %v11828_v30, %v12156_v7 }
 0xc25   : > { %v5459_v10 = vmul.f32 %v12273_v59, %v5403_v14 }
 0xc26   : > { %5592 = vrot.lane.b32.xlu0 %v12451_v43, %s14027_s1  ;;  %5990 = vrot.lane.b32.xlu2 %v12368_v24, %s14040_s0 }
 0xc27   : > { %5672 = vrot.lane.b32.xlu1 %v12479_v54, %s14030_s30  ;;  %v12549_v30 = vadd.f32 %v12074_v23, %v5459_v10 }
 0xc28   : > { %v5587_v17 = vpop.permute.xlu0 %5586  ;;  %v5731_v1 = vpop.permute.xlu2 %5730 }
 0xc29   : > { %v12503_v29 = vsel %vm810_vm4, %v5587_v17, %v5603_v42  ;;  %v12507_v25 = vsel %vm810_vm4, %v5603_v42, %v5587_v17  ;;  %v5667_v61 = vpop.permute.xlu1 %5666  ;;  %14738 = vst [vmem:[#allocation177_spill] sm:$0xff] %v12549_v30 }
 0xc2a   : > { %14735 = vst [vmem:[#allocation59_spill] sm:$0xff] %v12503_v29  ;;  %v12511_v60 = vsel %vm826_vm3, %v5651_v15, %v5667_v61  ;;  %v12515_v20 = vsel %vm826_vm3, %v5667_v61, %v5651_v15 }
 0xc2b   : > { %14736 = vst [vmem:[#allocation82_spill] sm:$0xff] %v12511_v60 }
 0xc2e   : > { %5720 = vrot.lane.b32.xlu0 %v12451_v43, %s14033_s6  ;;  %5544 = vrot.lane.b32.xlu2 %v12479_v54, %s14044_s7 }
 0xc2f   : > { %5912 = vrot.lane.b32.xlu1 %v12451_v43, %s14039_s8 }
 0xc30   : > { %v5715_v42 = vpop.permute.xlu0 %5714  ;;  %v5795_v61 = vpop.permute.xlu2 %5794 }
 0xc31   : > { %v12525_v17 = vsel %vm842_vm5, %v5715_v42, %v5731_v1  ;;  %v12529_v6 = vsel %vm842_vm5, %v5731_v1, %v5715_v42  ;;  %v5907_v15 = vpop.permute.xlu1 %5906 }
 0xc32   : > { %14737 = vst [vmem:[#allocation157_spill] sm:$0xff] %v12525_v17 }
 0xc36   : > { %5784 = vrot.lane.b32.xlu0 %v12451_v43, %s14034_s26  ;;  %5656 = vrot.lane.b32.xlu2 %v12451_v43, %s14030_s30 }
 0xc37   : > { %5976 = vrot.lane.b32.xlu1 %v12451_v43, %s14040_s0 }
 0xc38   : > { %v5779_v60 = vpop.permute.xlu0 %5778  ;;  %v5589_v31 = vpop.permute.xlu2 %5588 }
 0xc39   : > { %v12542_v1 = vsel %vm858_vm6, %v5779_v60, %v5795_v61  ;;  %v12546_v42 = vsel %vm858_vm6, %v5795_v61, %v5779_v60  ;;  %v5971_v13 = vpop.permute.xlu1 %5970  ;;  %v5458_v60 = vmul.f32 %v12273_v59, %v5402_v3 }
 0xc3b   : > { %v12569_v16 = vadd.f32 %v12074_v23, %v5458_v60 }
 0xc3d   : > { %14741 = vst [vmem:[#allocation72_spill] sm:$0xff] %v12569_v16 }
 0xc3e   : > { %5928 = vrot.lane.b32.xlu0 %v12479_v54, %s14039_s8  ;;  %5736 = vrot.lane.b32.xlu2 %v12479_v54, %s14033_s6 }
 0xc3f   : > { %5546 = vrot.lane.b32.xlu1 %v12549_v30, %s14044_s7 }
 0xc40   : > { %v5923_v14 = vpop.permute.xlu0 %5922  ;;  %v5717_v34 = vpop.permute.xlu2 %5716 }
 0xc41   : > { %v12562_v61 = vsel %vm890_vm8, %v5907_v15, %v5923_v14  ;;  %v12566_v10 = vsel %vm890_vm8, %v5923_v14, %v5907_v15  ;;  %v5541_v17 = vpop.permute.xlu1 %5540 }
 0xc42   : > { %14739 = vst [vmem:[#allocation170_spill] sm:$0xff] %v12562_v61 }
 0xc43   : > { %14740 = vst [vmem:[#allocation96_spill] sm:$0xff] %v12566_v10 }
 0xc46   : > { %5992 = vrot.lane.b32.xlu0 %v12479_v54, %s14040_s0  ;;  %5800 = vrot.lane.b32.xlu2 %v12479_v54, %s14034_s26 }
 0xc47   : > { %5658 = vrot.lane.b32.xlu1 %v12569_v16, %s14030_s30 }
 0xc48   : > { %v5987_v7 = vpop.permute.xlu0 %5986  ;;  %v5797_v15 = vpop.permute.xlu2 %5796 }
 0xc49   : > { %v12579_v59 = vsel %vm906_vm9, %v5971_v13, %v5987_v7  ;;  %v12583_v3 = vsel %vm906_vm9, %v5987_v7, %v5971_v13  ;;  %v5653_v23 = vpop.permute.xlu1 %5652 }
 0xc4a   : > { %14742 = vst [vmem:[#allocation111_spill] sm:$0xff] %v12579_v59  ;;  %v5405_v59 = vsub.f32 %v12054_v35, %v12225_v38 }
 0xc4b   : > { %14743 = vst [vmem:[#allocation176_spill] sm:$0xff] %v12583_v3 }
 0xc4e   : > { %5530 = vrot.lane.b32.xlu0 %v12569_v16, %s14044_s7  ;;  %5594 = vrot.lane.b32.xlu2 %v12569_v16, %s14027_s1 }
 0xc4f   : > { %5738 = vrot.lane.b32.xlu1 %v12549_v30, %s14033_s6 }
 0xc50   : > { %v5525_v14 = vpop.permute.xlu0 %5524  ;;  %v5909_v7 = vpop.permute.xlu2 %5908 }
 0xc51   : > { %v5733_v60 = vpop.permute.xlu1 %5732  ;;  %v12593_v10 = vsel %vm794_vm0, %v5525_v14, %v5541_v17  ;;  %v12597_v13 = vsel %vm794_vm0, %v5541_v17, %v5525_v14 }
 0xc52   : > { %14744 = vst [vmem:[#allocation58_spill] sm:$0xff] %v12593_v10  ;;  %v12601_v3 = vsel %vm842_vm5, %v5717_v34, %v5733_v60  ;;  %v12605_v52 = vsel %vm842_vm5, %v5733_v60, %v5717_v34 }
 0xc53   : > { %14745 = vst [vmem:[#allocation124_spill] sm:$0xff] %v12601_v3 }
 0xc56   : > { %5610 = vrot.lane.b32.xlu0 %v12549_v30, %s14027_s1  ;;  %5722 = vrot.lane.b32.xlu2 %v12569_v16, %s14033_s6 }
 0xc57   : > { %5674 = vrot.lane.b32.xlu1 %v12549_v30, %s14030_s30 }
 0xc58   : > { %v5605_v17 = vpop.permute.xlu0 %5604  ;;  %v5973_v34 = vpop.permute.xlu2 %5972 }
 0xc59   : > { %v5669_v14 = vpop.permute.xlu1 %5668  ;;  %v12615_v10 = vsel %vm810_vm4, %v5589_v31, %v5605_v17  ;;  %v12619_v3 = vsel %vm810_vm4, %v5605_v17, %v5589_v31  ;;  %v5461_v31 = vmul.f32 %v12305_v57, %v5405_v59 }
 0xc5a   : > { %14746 = vst [vmem:[#allocation74_spill] sm:$0xff] %v12615_v10  ;;  %v12623_v60 = vsel %vm826_vm3, %v5653_v23, %v5669_v14  ;;  %v12627_v26 = vsel %vm826_vm3, %v5669_v14, %v5653_v23  ;;  %v5404_v10 = vsub.f32 %v12052_v32, %v12225_v38 }
 0xc5b   : > { %14747 = vst [vmem:[#allocation179_spill] sm:$0xff] %v12623_v60  ;;  %v12655_v59 = vadd.f32 %v12070_v8, %v5461_v31 }
 0xc5d   : > { %14750 = vst [vmem:[#allocation90_spill] sm:$0xff] %v12655_v59 }
 0xc5e   : > { %5786 = vrot.lane.b32.xlu0 %v12569_v16, %s14034_s26  ;;  %5802 = vrot.lane.b32.xlu2 %v12549_v30, %s14034_s26 }
 0xc5f   : > { %5930 = vrot.lane.b32.xlu1 %v12549_v30, %s14039_s8 }
 0xc60   : > { %v5781_v17 = vpop.permute.xlu0 %5780  ;;  %v5527_v14 = vpop.permute.xlu2 %5526 }
 0xc61   : > { %v5925_v60 = vpop.permute.xlu1 %5924  ;;  %v12640_v23 = vsel %vm858_vm6, %v5781_v17, %v5797_v15  ;;  %v12644_v35 = vsel %vm858_vm6, %v5797_v15, %v5781_v17  ;;  %v5460_v15 = vmul.f32 %v12305_v57, %v5404_v10 }
 0xc62   : > { %v12648_v58 = vsel %vm890_vm8, %v5909_v7, %v5925_v60  ;;  %v12652_v29 = vsel %vm890_vm8, %v5925_v60, %v5909_v7 }
 0xc63   : > { %14748 = vst [vmem:[#allocation114_spill] sm:$0xff] %v12648_v58  ;;  %v12683_v57 = vadd.f32 %v12070_v8, %v5460_v15 }
 0xc64   : > { %14749 = vst [vmem:[#allocation12_spill] sm:$0xff] %v12652_v29 }
 0xc66   : > { %5548 = vrot.lane.b32.xlu0 %v12655_v59, %s14044_s7  ;;  %5914 = vrot.lane.b32.xlu2 %v12569_v16, %s14039_s8 }
 0xc67   : > { %5994 = vrot.lane.b32.xlu1 %v12549_v30, %s14040_s0 }
 0xc68   : > { %v5543_v17 = vpop.permute.xlu0 %5542  ;;  %v5607_v38 = vpop.permute.xlu2 %5606 }
 0xc69   : > { %v5989_v7 = vpop.permute.xlu1 %5988  ;;  %v12668_v60 = vsel %vm794_vm0, %v5527_v14, %v5543_v17  ;;  %v12672_v32 = vsel %vm794_vm0, %v5543_v17, %v5527_v14 }
 0xc6a   : > { %14751 = vst [vmem:[#allocation132_spill] sm:$0xff] %v12668_v60  ;;  %v12676_v31 = vsel %vm906_vm9, %v5973_v34, %v5989_v7  ;;  %v12680_v29 = vsel %vm906_vm9, %v5989_v7, %v5973_v34 }
 0xc6b   : > { %14752 = vst [vmem:[#allocation22_spill] sm:$0xff] %v12676_v31 }
 0xc6c   : > { %14753 = vst [vmem:[#allocation128_spill] sm:$0xff] %v12680_v29 }
 0xc6e   : > { %5660 = vrot.lane.b32.xlu0 %v12683_v57, %s14030_s30  ;;  %5978 = vrot.lane.b32.xlu2 %v12569_v16, %s14040_s0 }
 0xc6f   : > { %5596 = vrot.lane.b32.xlu1 %v12683_v57, %s14027_s1 }
 0xc70   : > { %v5655_v10 = vpop.permute.xlu0 %5654  ;;  %v5799_v17 = vpop.permute.xlu2 %5798 }
 0xc71   : > { %v5591_v14 = vpop.permute.xlu1 %5590 }
 0xc72   : > { %v12693_v60 = vsel %vm810_vm4, %v5591_v14, %v5607_v38  ;;  %v12697_v8 = vsel %vm810_vm4, %v5607_v38, %v5591_v14 }
 0xc73   : > { %14754 = vst [vmem:[#allocation18_spill] sm:$0xff] %v12693_v60 }
 0xc76   : > { %5740 = vrot.lane.b32.xlu0 %v12655_v59, %s14033_s6  ;;  %5532 = vrot.lane.b32.xlu2 %v12683_v57, %s14044_s7 }
 0xc77   : > { %5724 = vrot.lane.b32.xlu1 %v12683_v57, %s14033_s6  ;;  %s14776_s6 = smov 116  }
 0xc78   : > { %v5735_v34 = vpop.permute.xlu0 %5734  ;;  %v5927_v7 = vpop.permute.xlu2 %5926 }
 0xc79   : > { %v5719_v15 = vpop.permute.xlu1 %5718 }
 0xc7a   : > { %v12707_v29 = vsel %vm842_vm5, %v5719_v15, %v5735_v34  ;;  %v12711_v38 = vsel %vm842_vm5, %v5735_v34, %v5719_v15 }
 0xc7b   : > { %14755 = vst [vmem:[#allocation89_spill] sm:$0xff] %v12707_v29 }
 0xc7e   : > { %5788 = vrot.lane.b32.xlu0 %v12683_v57, %s14034_s26  ;;  %5612 = vrot.lane.b32.xlu2 %v12655_v59, %s14027_s1  ;;  %s14771_s1 = smov 125  }
 0xc7f   : > { %5982 = vrot.lane.b32.xlu1 %v12183_v22, %s14040_s0 }
 0xc80   : > { %v5783_v14 = vpop.permute.xlu0 %5782  ;;  %v5991_v34 = vpop.permute.xlu2 %5990 }
 0xc81   : > { %v5671_v31 = vpop.permute.xlu1 %5670  ;;  %v12721_v39 = vsel %vm858_vm6, %v5783_v14, %v5799_v17  ;;  %v12725_v29 = vsel %vm858_vm6, %v5799_v17, %v5783_v14 }
 0xc82   : > { %v12729_v15 = vsel %vm826_vm3, %v5655_v10, %v5671_v31  ;;  %v12733_v60 = vsel %vm826_vm3, %v5671_v31, %v5655_v10 }
 0xc83   : > { %14756 = vst [vmem:[#allocation137_spill] sm:$0xff] %v12729_v15 }
 0xc86   : > { %5850 = vrot.lane.b32.xlu0 %v12569_v16, %s14036_s27  ;;  %5804 = vrot.lane.b32.xlu2 %v12655_v59, %s14034_s26  ;;  %s14777_s26 = smov 119  }
 0xc87   : > { %5676 = vrot.lane.b32.xlu1 %v12655_v59, %s14030_s30  ;;  %s14775_s30 = smov 122  }
 0xc88   : > { %v5911_v17 = vpop.permute.xlu0 %5910  ;;  %v5545_v31 = vpop.permute.xlu2 %5544 }
 0xc89   : > { %v5529_v14 = vpop.permute.xlu1 %5528  ;;  %v12743_v48 = vsel %vm890_vm8, %v5911_v17, %v5927_v7  ;;  %v12747_v15 = vsel %vm890_vm8, %v5927_v7, %v5911_v17 }
 0xc8a   : > { %14757 = vst [vmem:[#allocation141_spill] sm:$0xff] %v12743_v48  ;;  %v12751_v10 = vsel %vm794_vm0, %v5529_v14, %v5545_v31  ;;  %v12755_v61 = vsel %vm794_vm0, %v5545_v31, %v5529_v14 }
 0xc8b   : > { %14758 = vst [vmem:[#allocation146_spill] sm:$0xff] %v12747_v15 }
 0xc8c   : > { %14759 = vst [vmem:[#allocation172_spill] sm:$0xff] %v12751_v10 }
 0xc8e   : > { %5864 = vrot.lane.b32.xlu0 %v12479_v54, %s14036_s27  ;;  %5966 = vrot.lane.b32.xlu2 %v12180_v63, %s14040_s0 }
 0xc8f   : > { %5848 = vrot.lane.b32.xlu1 %v12451_v43, %s14036_s27 }
 0xc90   : > { %v5975_v7 = vpop.permute.xlu0 %5974  ;;  %v5657_v14 = vpop.permute.xlu2 %5656 }
 0xc91   : > { %v5609_v17 = vpop.permute.xlu1 %5608  ;;  %v12765_v15 = vsel %vm906_vm9, %v5975_v7, %v5991_v34  ;;  %v12769_v10 = vsel %vm906_vm9, %v5991_v34, %v5975_v7 }
 0xc92   : > { %14760 = vst [vmem:[#allocation186_spill] sm:$0xff] %v12765_v15 }
 0xc93   : > { %14761 = vst [vmem:[#allocation178_spill] sm:$0xff] %v12769_v10 }
 0xc96   : > { %5932 = vrot.lane.b32.xlu0 %v12655_v59, %s14039_s8  ;;  %5866 = vrot.lane.b32.xlu2 %v12549_v30, %s14036_s27 }
 0xc97   : > { %5916 = vrot.lane.b32.xlu1 %v12683_v57, %s14039_s8  ;;  %s14781_s8 = smov 107  }
 0xc98   : > { %v5593_v31 = vpop.permute.xlu0 %5592  ;;  %v5737_v7 = vpop.permute.xlu2 %5736 }
 0xc99   : > { %v5673_v58 = vpop.permute.xlu1 %5672  ;;  %v12779_v48 = vsel %vm810_vm4, %v5593_v31, %v5609_v17  ;;  %v12783_v34 = vsel %vm810_vm4, %v5609_v17, %v5593_v31 }
 0xc9a   : > { %14762 = vst [vmem:[#allocation154_spill] sm:$0xff] %v12779_v48  ;;  %v12787_v10 = vsel %vm826_vm3, %v5657_v14, %v5673_v58  ;;  %v12791_v15 = vsel %vm826_vm3, %v5673_v58, %v5657_v14 }
 0xc9b   : > { %14763 = vst [vmem:[#allocation155_spill] sm:$0xff] %v12787_v10 }
 0xc9e   : > { %5980 = vrot.lane.b32.xlu0 %v12683_v57, %s14040_s0  ;;  %5996 = vrot.lane.b32.xlu2 %v12655_v59, %s14040_s0  ;;  %s14769_s0 = sld [smem:[#allocation201_spill]] }
 0xc9f   : > { %5862 = vrot.lane.b32.xlu1 %v12368_v24, %s14036_s27 }
 0xca0   : > { %v5721_v17 = vpop.permute.xlu0 %5720  ;;  %v5801_v58 = vpop.permute.xlu2 %5800 }
 0xca1   : > { %v5913_v31 = vpop.permute.xlu1 %5912  ;;  %v12801_v48 = vsel %vm842_vm5, %v5721_v17, %v5737_v7  ;;  %v12805_v10 = vsel %vm842_vm5, %v5737_v7, %v5721_v17 }
 0xca2   : > { %14764 = vst [vmem:[#allocation145_spill] sm:$0xff] %v12801_v48 }
 0xca6   : > { %5844 = vrot.lane.b32.xlu0 %v12295_v33, %s14036_s27  ;;  %5846 = vrot.lane.b32.xlu2 %v12395_v27, %s14036_s27 }
 0xca7   : > { %5852 = vrot.lane.b32.xlu1 %v12683_v57, %s14036_s27 }
 0xca8   : > { %v5785_v14 = vpop.permute.xlu0 %5784  ;;  %v5595_v17 = vpop.permute.xlu2 %5594 }
 0xca9   : > { %v5977_v24 = vpop.permute.xlu1 %5976  ;;  %v12815_v45 = vsel %vm858_vm6, %v5785_v14, %v5801_v58  ;;  %v12819_v7 = vsel %vm858_vm6, %v5801_v58, %v5785_v14 }
 0xcae   : > { %5868 = vrot.lane.b32.xlu0 %v12655_v59, %s14036_s27  ;;  %5860 = vrot.lane.b32.xlu2 %v12284_v44, %s14036_s27 }
 0xcaf   : > { %5842 = vrot.lane.b32.xlu1 %v12242_v19, %s14036_s27 }
 0xcb0   : > { %v5929_v48 = vpop.permute.xlu0 %5928  ;;  %v5723_v14 = vpop.permute.xlu2 %5722 }
 0xcb1   : > { %v12829_v33 = vsel %vm890_vm8, %v5913_v31, %v5929_v48  ;;  %v12833_v27 = vsel %vm890_vm8, %v5929_v48, %v5913_v31  ;;  %v12835_v58 = vpop.permute.xlu1 %5546 }
 0xcb2   : > { %14765 = vst [vmem:[#allocation175_spill] sm:$0xff] %v12829_v33 }
 0xcb3   : > { %14766 = vst [vmem:[#allocation63_spill] sm:$0xff] %v12833_v27 }
 0xcb6   : > { %5858 = vrot.lane.b32.xlu0 %v12253_v47, %s14036_s27  ;;  %5840 = vrot.lane.b32.xlu2 %v12217_v40, %s14036_s27 }
 0xcb7   : > { %5856 = vrot.lane.b32.xlu1 %v12206_v21, %s14036_s27  ;;  %v12858_v21 = vld [vmem:[%s14769_s0] sm:$0x7] }
 0xcb8   : > { %v5993_v19 = vpop.permute.xlu0 %5992  ;;  %v12853_v27 = vpop.permute.xlu2 %5802  ;;  %14770 = vst [vmem:[#allocation161_spill] sm:$0xff] %v12858_v21 }
 0xcb9   : > { %v12845_v33 = vsel %vm906_vm9, %v5977_v24, %v5993_v19  ;;  %v12849_v48 = vsel %vm906_vm9, %v5993_v19, %v5977_v24  ;;  %v12851_v31 = vpop.permute.xlu1 %5658 }
 0xcba   : > { %14767 = vst [vmem:[#allocation68_spill] sm:$0xff] %v12845_v33 }
 0xcbb   : > { %14768 = vst [vmem:[#allocation168_spill] sm:$0xff] %v12849_v48 }
 0xcbe   : > { %5838 = vrot.lane.b32.xlu0 %v12180_v63, %s14036_s27  ;;  %5854 = vrot.lane.b32.xlu2 %v12183_v22, %s14036_s27 }
 0xcbf   : > { %6260 = vrot.lane.b32.xlu1 %v12858_v21, %s14771_s1 }
 0xcc0   : > { %v12866_v19 = vpop.permute.xlu0 %5530  ;;  %v12878_v63 = vpop.permute.xlu2 %5914 }
 0xcc1   : > { %v5739_v24 = vpop.permute.xlu1 %5738  ;;  %v12872_v48 = vsel %vm794_vm0, %v12866_v19, %v12835_v58  ;;  %14774 = vst [vmem:[#allocation147_spill] sm:$0xff] %v12878_v63 }
 0xcc2   : > { %14772 = vst [vmem:[#allocation105_spill] sm:$0xff] %v12872_v48  ;;  %v12876_v33 = vsel %vm842_vm5, %v5723_v14, %v5739_v24 }
 0xcc3   : > { %14773 = vst [vmem:[#allocation133_spill] sm:$0xff] %v12876_v33 }
 0xcc6   : > { %6346 = vrot.lane.b32.xlu0 %v12858_v21, %s14775_s30  ;;  %6392 = vrot.lane.b32.xlu2 %v12858_v21, %s14777_s26 }
 0xcc7   : > { %6438 = vrot.lane.b32.xlu1 %v12858_v21, %s14776_s6 }
 0xcc8   : > { %v5611_v22 = vpop.permute.xlu0 %5610  ;;  %v12898_v47 = vpop.permute.xlu2 %5978 }
 0xcc9   : > { %v12886_v40 = vpop.permute.xlu1 %5674  ;;  %v12890_v48 = vsel %vm810_vm4, %v5595_v17, %v5611_v22  ;;  %14780 = vst [vmem:[#allocation56_spill] sm:$0xff] %v12898_v47 }
 0xcca   : > { %14778 = vst [vmem:[#allocation136_spill] sm:$0xff] %v12890_v48  ;;  %v12896_v33 = vsel %vm826_vm3, %v12851_v31, %v12886_v40 }
 0xccb   : > { %14779 = vst [vmem:[#allocation101_spill] sm:$0xff] %v12896_v33 }
 0xcce   : > { %6491 = vrot.lane.b32.xlu0 %v12858_v21, %s14036_s27  ;;  %6537 = vrot.lane.b32.xlu2 %v12858_v21, %s14782_s3  ;;  %s14928_s3 = sld [smem:[#allocation3_spill]] }
 0xccf   : > { %6583 = vrot.lane.b32.xlu1 %v12858_v21, %s14781_s8  ;;  %s14857_s8 = sld [smem:[#allocation202_spill]] }
 0xcd0   : > { %v5787_v44 = vpop.permute.xlu0 %5786  ;;  %v5533_v33 = vpop.permute.xlu2 %5532 }
 0xcd1   : > { %v12906_v54 = vpop.permute.xlu1 %5930 }
 0xcd2   : > { %14783 = vst [vmem:[#allocation182_spill] sm:$0xff] %v12906_v54  ;;  %v12912_v48 = vsel %vm890_vm8, %v12906_v54, %v12878_v63 }
 0xcd3   : > { %14784 = vst [vmem:[#allocation57_spill] sm:$0xff] %v12912_v48 }
 0xcd6   : > { %6629 = vrot.lane.b32.xlu0 %v12858_v21, %s14785_s5  ;;  %v5628_v21 = vsel %vm810_vm4, %v5611_v22, %v5595_v17  ;;  %v5756_v17 = vsel %vm842_vm5, %v5739_v24, %v5723_v14  ;;  %s14929_s5 = sshll.u32 %s14928_s3, 3 }
 0xcd7   : > { %v5642_v59 = vmul.f32 %v5628_v21, %v14666_v18  ;;  %s764_s24 = scalar_lea.vmem %s14930_s20, %s14929_s5 }
 0xcd8   : > { %v5549_v28 = vpop.permute.xlu0 %5548  ;;  %v12928_v16 = vpop.permute.xlu2 %5612 }
 0xcd9   : > { %v12916_v43 = vpop.permute.xlu1 %5994  ;;  %v12920_v30 = vsel %vm794_vm0, %v5533_v33, %v5549_v28  ;;  %v5565_v14 = vsel %vm794_vm0, %v5549_v28, %v5533_v33  ;;  %v5564_v33 = vsel %vm794_vm0, %v12835_v58, %v12866_v19  ;;  %v5762_v58 = vmul.f32 %v12529_v6, %v14366_v5 }
 0xcda   : > { %14786 = vst [vmem:[#allocation65_spill] sm:$0xff] %v12916_v43  ;;  %v12926_v50 = vsel %vm906_vm9, %v12916_v43, %v12898_v47  ;;  %v5638_v43 = vmul.f32 %v12697_v8, %v14666_v18  ;;  %v5632_v8 = vmul.f32 %v12409_v55, %v14666_v18  ;;  %v5820_v55 = vsel %vm858_vm6, %v12853_v27, %v5787_v44 }
 0xcdb   : > { %14787 = vst [vmem:[#allocation42_spill] sm:$0xff] %v12920_v30  ;;  %v5578_v19 = vmul.f32 %v5564_v33, %v14667_v9  ;;  %v5830_v6 = vmul.f32 %v12721_v39, %v14098_v0  ;;  %v5831_v39 = vmul.f32 %v12725_v29, %v14526_v37  ;;  %v5826_v29 = vmul.f32 %v12542_v1, %v14098_v0  ;;  %v14798_v33 = vld [vmem:[#allocation147_spill] sm:$0xff] }
 0xcdc   : > { %14788 = vst [vmem:[#allocation77_spill] sm:$0xff] %v12926_v50  ;;  %v5640_v50 = vmul.f32 %v12783_v34, %v14666_v18  ;;  %v5768_v34 = vmul.f32 %v12805_v10, %v14366_v5  ;;  %v5568_v1 = vmul.f32 %v12384_v2, %v14667_v9  ;;  %v5702_v2 = vmul.f32 %v12733_v60, %v14359_v56 }
 0xcdd   : > { %vm14822_vm0 = vcmask 1042432  }
 0xcde   : > { %vm14887_vm2 = vmmov %vm14822_vm0 }
 0xcdf   : > { %vm14892_vm15 = vmmov %vm14822_vm0 }
 0xce0   : > { %v12930_v48 = vpop.permute.xlu0 %5660  ;;  %vm14895_vm10 = vmmov %vm14822_vm0 }
 0xce1   : > { %v12932_v63 = vpop.permute.xlu1 %5596  ;;  %vm14899_vm14 = vmmov %vm14822_vm0 }
 0xce2   : > { %14789 = vst [vmem:[#allocation97_spill] sm:$0xff] %v12932_v63  ;;  %v5629_v30 = vsel %vm810_vm4, %v12928_v16, %v12932_v63  ;;  %v5805_v63 = vpop.permute.xlu2 %5804 }
 0xce3   : > { %v5644_v54 = vmul.f32 %v5629_v30, %v14666_v18 }
 0xce5   : > { %6058 = vmatpush.msrb.mxu1 %v5644_v54  ;;  %v5636_v54 = vmul.f32 %v12619_v3, %v14666_v18  ;;  %v5630_v3 = vmul.f32 %v12333_v62, %v14666_v18 }
 0xce7   : > { %6059 = vmatpush.msrb.mxu1 %v5642_v59  ;;  %v5634_v59 = vmul.f32 %v12507_v25, %v14666_v18  ;;  %v5812_v25 = vsel %vm858_vm6, %v5787_v44, %v12853_v27  ;;  %v5764_v44 = vmul.f32 %v12605_v52, %v14366_v5  ;;  %v5580_v27 = vmul.f32 %v5565_v14, %v14667_v9 }
 0xce8   : > { %v12944_v47 = vpop.permute.xlu0 %5740  ;;  %v5832_v52 = vmul.f32 %v12815_v45, %v14098_v0  ;;  %v5758_v45 = vmul.f32 %v12365_v11, %v14366_v5  ;;  %v5572_v11 = vmul.f32 %v12597_v13, %v14667_v9  ;;  %v5824_v13 = vmul.f32 %v12436_v4, %v14098_v0 }
 0xce9   : > { %v12948_v22 = vpop.permute.xlu1 %5724  ;;  %6060 = vmatpush.msrb.mxu1 %v5640_v50  ;;  %v5770_v50 = vmul.f32 %v5756_v17, %v14366_v5  ;;  %v5835_v17 = vmul.f32 %v5820_v55, %v14526_v37  ;;  %v5825_v4 = vmul.f32 %v12440_v51, %v14526_v37  ;;  %v14792_v51 = vld [vmem:[#allocation72_spill] sm:$0xff] }
 0xcea   : > { %v5757_v21 = vsel %vm842_vm5, %v12944_v47, %v12948_v22 }
 0xceb   : > { %v5772_v30 = vmul.f32 %v5757_v21, %v14366_v5  ;;  %6061 = vmatpush.msrb.mxu1 %v5638_v43  ;;  %v5766_v43 = vmul.f32 %v12711_v38, %v14366_v5  ;;  %v12995_v21 = vpop.permute.xlu2 %5966 }
 0xced   : > { %6062 = vmatpush.msrb.mxu1 %v5636_v54  ;;  %6078 = vmatpush.msrb.mxu2 %v5772_v30  ;;  %v5833_v54 = vmul.f32 %v12819_v7, %v14526_v37  ;;  %v5760_v30 = vmul.f32 %v12423_v41, %v14366_v5  ;;  %v5574_v7 = vmul.f32 %v12672_v32, %v14667_v9 }
 0xcee   : > { %v5828_v41 = vmul.f32 %v12640_v23, %v14098_v0  ;;  %v5829_v23 = vmul.f32 %v12644_v35, %v14526_v37  ;;  %v5822_v35 = vmul.f32 %v12353_v36, %v14098_v0 }
 0xcef   : > { %6063 = vmatpush.msrb.mxu1 %v5634_v59  ;;  %6079 = vmatpush.msrb.mxu2 %v5770_v50  ;;  %v5576_v59 = vmul.f32 %v12755_v61, %v14667_v9  ;;  %v5692_v61 = vsel %vm826_vm3, %v12886_v40, %v12851_v31  ;;  %v5570_v40 = vmul.f32 %v12476_v49, %v14667_v9 }
 0xcf0   : > { %v5789_v24 = vpop.permute.xlu0 %5788  ;;  %v5706_v31 = vmul.f32 %v5692_v61, %v14359_v56  ;;  %v5704_v49 = vmul.f32 %v12791_v15, %v14359_v56 }
 0xcf1   : > { %v12978_v10 = vpop.permute.xlu1 %5982  ;;  %v5813_v18 = vsel %vm858_vm6, %v5789_v24, %v5805_v63  ;;  %v5821_v62 = vsel %vm858_vm6, %v5805_v63, %v5789_v24  ;;  %6064 = vmatpush.msrb.mxu1 %v5632_v8  ;;  %6080 = vmatpush.msrb.mxu2 %v5768_v34  ;;  %v5834_v63 = vmul.f32 %v5812_v25, %v14098_v0  ;;  %v14795_v24 = vld [vmem:[#allocation41_spill] sm:$0xff] }
 0xcf2   : > { %v5836_v28 = vmul.f32 %v5813_v18, %v14098_v0  ;;  %v5837_v38 = vmul.f32 %v5821_v62, %v14526_v37  ;;  %v5827_v34 = vmul.f32 %v12546_v42, %v14526_v37  ;;  %v5823_v0 = vmul.f32 %v12357_v12, %v14526_v37  ;;  %v6030_v37 = vld [vmem:[%s14790_s19] sm:$0x77]  ;;  %v14791_v12 = vld [vmem:[#allocation90_spill] sm:$0xff] }
 0xcf3   : > { %6065 = vmatpush.msrb.mxu1 %v5630_v3  ;;  %6081 = vmatpush.msrb.mxu2 %v5766_v43  ;;  %v13044_v3 = vpop.permute.xlu2 %5866  ;;  %v5566_v43 = vmul.f32 %v12319_v53, %v14667_v9  ;;  %v5700_v9 = vmul.f32 %v12627_v26, %v14359_v56  ;;  %v5698_v53 = vmul.f32 %v12515_v20, %v14359_v56  ;;  %v14793_v26 = vld [vmem:[#allocation103_spill] sm:$0xff]  ;;  %v14796_v20 = vld [vmem:[#allocation108_spill] sm:$0xff]  ;;  %v14797_v62 = vld [vmem:[#allocation182_spill] sm:$0xff] }
 0xcf4   : > { %6098 = vmatpush.msrb.mxu3 %v5836_v28  ;;  %6198 = vmatpush.msra.mxu0 %v5837_v38  ;;  %6042 = vst [vmem:[#allocation1] ss:$2 sm:$0xff] %v6030_v37  ;;  %v5696_v60 = vmul.f32 %v14793_v26, %v14359_v56  ;;  %v5694_v55 = vmul.f32 %v14796_v20, %v14359_v56  ;;  %v14819_v26 = vld [vmem:[#allocation135_spill] sm:$0xff]  ;;  %v14821_v20 = vld [vmem:[#allocation16_spill] sm:$0xff] }
 0xcf5   : > { %6066 = vmatpush.msrb.mxu1 %v5580_v27  ;;  %6082 = vmatpush.msrb.mxu2 %v5764_v44  ;;  %v5940_v28 = vsel %vm890_vm8, %v14798_v33, %v14797_v62  ;;  %v14799_v44 = vld [vmem:[#allocation52_spill] sm:$0xff]  ;;  %v14800_v27 = vld [vmem:[#allocation5_spill] sm:$0xff] }
 0xcf6   : > { %6099 = vmatpush.msrb.mxu3 %v5834_v63  ;;  %6199 = vmatpush.msra.mxu0 %v5835_v17  ;;  %v14801_v63 = vld [vmem:[#allocation30_spill] sm:$0xff] }
 0xcf7   : > { %6067 = vmatpush.msrb.mxu1 %v5578_v19  ;;  %6083 = vmatpush.msrb.mxu2 %v5762_v58  ;;  %v14802_v58 = vld [vmem:[#allocation50_spill] sm:$0xff]  ;;  %v14803_v19 = vld [vmem:[#allocation151_spill] sm:$0xff] }
 0xcf8   : > { %v13010_v50 = vpop.permute.xlu0 %5850  ;;  %6100 = vmatpush.msrb.mxu3 %v5832_v52  ;;  %6200 = vmatpush.msra.mxu0 %v5833_v54  ;;  %v5962_v54 = vmul.f32 %v5940_v28, %v14801_v63  ;;  %v14824_v28 = vld [vmem:[#allocation91_spill] sm:$0xff] }
 0xcf9   : > { %v13016_v8 = vpop.permute.xlu1 %5676  ;;  %6068 = vmatpush.msrb.mxu1 %v5576_v59  ;;  %6084 = vmatpush.msrb.mxu2 %v5760_v30  ;;  %v14804_v59 = vld [vmem:[#allocation164_spill] sm:$0xff] }
 0xcfa   : > { %v5693_v5 = vsel %vm826_vm3, %v13016_v8, %v12930_v48  ;;  %6101 = vmatpush.msrb.mxu3 %v5830_v6  ;;  %6201 = vmatpush.msra.mxu0 %v5831_v39  ;;  %v14805_v6 = vld [vmem:[#allocation150_spill] sm:$0xff]  ;;  %v14808_v39 = vld [vmem:[#allocation97_spill] sm:$0xff] }
 0xcfb   : > { %v5708_v32 = vmul.f32 %v5693_v5, %v14359_v56  ;;  %6069 = vmatpush.msrb.mxu1 %v5574_v7  ;;  %6085 = vmatpush.msrb.mxu2 %v5758_v45  ;;  %v13082_v15 = vpop.permute.xlu2 %5996  ;;  %v6031_v56 = vld [vmem:[%s14790_s19 + $0x8] sm:$0x77]  ;;  %v13112_v30 = vld.sshfl [vmem:[#allocation1] sm:$0xff pattern:$0x75316420]  ;;  %v5621_v61 = vsel %vm810_vm4, %v14808_v39, %v12928_v16  ;;  %vm14830_vm4 = vmmov %vm14822_vm0 }
 0xcfc   : > { %6102 = vmatpush.msrb.mxu3 %v5828_v41  ;;  %6202 = vmatpush.msra.mxu0 %v5829_v23  ;;  %v13108_v52 = vld.sshfl [vmem:[#allocation1 + $0x8] sm:$0xff pattern:$0x75316420]  ;;  %6044 = vst [vmem:[#allocation1 + $0x10] ss:$2 sm:$0xff] %v6031_v56  ;;  %v14807_v7 = vld [vmem:[#allocation175_spill] sm:$0xff] }
 0xcfd   : > { %6070 = vmatpush.msrb.mxu1 %v5572_v11  ;;  %6086 = vmatpush.msrb.mxu2 %v5708_v32  ;;  %v14806_v45 = vld [vmem:[#allocation4_spill] sm:$0xff]  ;;  %v5960_v41 = vmul.f32 %v14807_v7, %v14801_v63  ;;  %v14809_v5 = vld [vmem:[#allocation187_spill] sm:$0xff]  ;;  %v14810_v32 = vld [vmem:[#allocation158_spill] sm:$0xff] }
 0xcfe   : > { %6103 = vmatpush.msrb.mxu3 %v5826_v29  ;;  %6203 = vmatpush.msra.mxu0 %v5827_v34  ;;  %6440 = vst [vmem:[#allocation1] ss:$2 sm:$0xff] %v14806_v45  ;;  %v14811_v29 = vld [vmem:[#allocation141_spill] sm:$0xff]  ;;  %v14829_v7 = vld [vmem:[#allocation186_spill] sm:$0xff] }
 0xcff   : > { %6071 = vmatpush.msrb.mxu1 %v5570_v40  ;;  %6087 = vmatpush.msrb.mxu2 %v5706_v31  ;;  %v5958_v23 = vmul.f32 %v14811_v29, %v14801_v63 }
 0xd00   : > { %v13054_v42 = vpop.permute.xlu0 %5864  ;;  %6104 = vmatpush.msrb.mxu3 %v5824_v13  ;;  %6204 = vmatpush.msra.mxu0 %v5825_v4  ;;  %v14812_v13 = vld [vmem:[#allocation11_spill] sm:$0xff]  ;;  %v6032_v4 = vld [vmem:[%s14790_s19 + $0x10] sm:$0x7] }
 0xd01   : > { %v13060_v25 = vpop.permute.xlu1 %5848  ;;  %6072 = vmatpush.msrb.mxu1 %v5568_v1  ;;  %6088 = vmatpush.msrb.mxu2 %v5704_v49  ;;  %v5645_v16 = vmul.f32 %v5621_v61, %v14812_v13  ;;  %v7085_v1 = vld [vmem:[%s13975_s4 + $0x10] ss:$0 sm:$0xff]  ;;  %6046 = vst [vmem:[#allocation1 + $0x20] ss:$2 sm:$0xff] %v6032_v4  ;;  %v14831_v61 = vld [vmem:[#allocation59_spill] sm:$0xff] }
 0xd02   : > { %v13068_v36 = vsel %vm874_vm7, %v13054_v42, %v13060_v25  ;;  %6105 = vmatpush.msrb.mxu3 %v5822_v35  ;;  %6205 = vmatpush.msra.mxu0 %v5823_v0  ;;  %v14813_v35 = vld [vmem:[#allocation144_spill] sm:$0xff]  ;;  %v14815_v0 = vld [vmem:[#allocation65_spill] sm:$0xff] }
 0xd03   : > { %6073 = vmatpush.msrb.mxu1 %v5566_v43  ;;  %6089 = vmatpush.msrb.mxu2 %v5702_v2  ;;  %v13136_v34 = vpop.permute.xlu2 %5846  ;;  %v14814_v43 = vld [vmem:[#allocation114_spill] sm:$0xff]  ;;  %v14835_v4 = vld [vmem:[#allocation165_spill] sm:$0xff] }
 0xd04   : > { %6106 = vmatpush.msrb.mxu3 %v12683_v57  ;;  %6206 = vmatpush.msra.mxu0 %v14791_v12  ;;  %v14794_v57 = vld [vmem:[#allocation177_spill] sm:$0xff]  ;;  %v5956_v2 = vmul.f32 %v14814_v43, %v14801_v63  ;;  %v14818_v12 = vld [vmem:[#allocation136_spill] sm:$0xff]  ;;  %v5631_v43 = vmul.f32 %v14835_v4, %v14812_v13 }
 0xd05   : > { %6090 = vmatpush.msrb.mxu2 %v5700_v9  ;;  %v14816_v9 = vld [vmem:[#allocation56_spill] sm:$0xff]  ;;  %v6441_v39 = vld.sshfl [vmem:[#allocation1] sm:$0xff pattern:$0x75316420]  ;;  %6074 = vmatmul.f32.vlgmr.msrb.gmra.mxu1 %v13112_v30  ;;  %v14849_v4 = vld [vmem:[#allocation173_spill] sm:$0xff] }
 0xd06   : > { %6107 = vmatpush.msrb.mxu3 %v14792_v51  ;;  %6207 = vmatpush.msra.mxu0 %v14794_v57  ;;  %v6004_v37 = vsel %vm906_vm9, %v14816_v9, %v14815_v0  ;;  %v5643_v51 = vmul.f32 %v14818_v12, %v14812_v13  ;;  %v14820_v57 = vld [vmem:[#allocation170_spill] sm:$0xff]  ;;  %v5749_v9 = vsel %vm842_vm5, %v12948_v22, %v12944_v47  ;;  %vm14872_vm5 = vmmov %vm14822_vm0 }
 0xd07   : > { %6091 = vmatpush.msrb.mxu2 %v5698_v53  ;;  %v14817_v53 = vld [vmem:[#allocation48_spill] sm:$0xff]  ;;  %v6026_v33 = vmul.f32 %v7085_v1, %v6004_v37  ;;  %v14838_v12 = vld [vmem:[#allocation42_spill] sm:$0xff]  ;;  %v5876_v47 = vsel %vm874_vm7, %v13010_v50, %v13044_v3 }
 0xd08   : > { %v13085_v14 = vpop.permute.xlu0 %5932  ;;  %6108 = vmatpush.msrb.mxu3 %v14795_v24  ;;  %6208 = vmatpush.msra.mxu0 %v14799_v44  ;;  %v5954_v24 = vmul.f32 %v14820_v57, %v14801_v63  ;;  %v14825_v44 = vld [vmem:[#allocation18_spill] sm:$0xff] }
 0xd09   : > { %v13090_v18 = vpop.permute.xlu1 %5916  ;;  %6092 = vmatpush.msrb.mxu2 %v5696_v60  ;;  %v6049_v60 = vld.sshfl [vmem:[#allocation1 + $0x10] sm:$0xff pattern:$0x75316420]  ;;  %v14839_v22 = vld [vmem:[#allocation26_spill] sm:$0xff] }
 0xd0a   : > { %v5941_v38 = vsel %vm890_vm8, %v13090_v18, %v13085_v14  ;;  %6109 = vmatpush.msrb.mxu3 %v14800_v27  ;;  %6209 = vmatpush.msra.mxu0 %v14802_v58  ;;  %v5639_v27 = vmul.f32 %v14825_v44, %v14812_v13  ;;  %v5898_v44 = vmul.f32 %v5876_v47, %v14839_v22  ;;  %v14852_v47 = vld [vmem:[#allocation64_spill] sm:$0xff] }
 0xd0b   : > { %v5964_v17 = vmul.f32 %v5941_v38, %v14801_v63  ;;  %6093 = vmatpush.msrb.mxu2 %v5694_v55  ;;  %v14823_v55 = vld [vmem:[#allocation154_spill] sm:$0xff]  ;;  %v5952_v38 = vmul.f32 %v14824_v28, %v14801_v63  ;;  %v13179_v29 = vpop.permute.xlu2 %5860  ;;  %v14842_v28 = vld [vmem:[#allocation133_spill] sm:$0xff] }
 0xd0c   : > { %6110 = vmatpush.msrb.mxu3 %v14803_v19  ;;  %6094 = vmatmul.f32.vlgmr.msrb.gmra.mxu2 %v13108_v52  ;;  %v5641_v62 = vmul.f32 %v14823_v55, %v14812_v13  ;;  %v14827_v19 = vld [vmem:[#allocation73_spill] sm:$0xff]  ;;  %v13212_v55 = vld.sshfl [vmem:[#allocation1 + $0x20] sm:$0xff pattern:$0x75316420] }
 0xd0d   : > { %6118 = vmatpush.msra.mxu1 %v5964_v17  ;;  %6210 = vmatpush.msra.mxu0 %v14804_v59  ;;  %v14826_v17 = vld [vmem:[#allocation68_spill] sm:$0xff] }
 0xd0e   : > { %6111 = vmatpush.msrb.mxu3 %v14805_v6  ;;  %v6024_v56 = vmul.f32 %v7085_v1, %v14826_v17  ;;  %v14828_v6 = vld [vmem:[#allocation74_spill] sm:$0xff] }
 0xd0f   : > { %6119 = vmatpush.msra.mxu1 %v5962_v54  ;;  %6211 = vmatpush.msra.mxu0 %v14809_v5  ;;  %v5950_v54 = vmul.f32 %v14827_v19, %v14801_v63  ;;  %v5637_v45 = vmul.f32 %v14828_v6, %v14812_v13  ;;  %v5635_v5 = vmul.f32 %v14831_v61, %v14812_v13  ;;  %v14845_v6 = vld [vmem:[#allocation132_spill] sm:$0xff] }
 0xd10   : > { %v13124_v11 = vpop.permute.xlu0 %5980  ;;  %6112 = vmatpush.msrb.mxu3 %v14810_v32  ;;  %v14832_v32 = vld [vmem:[#allocation22_spill] sm:$0xff] }
 0xd11   : > { %v13129_v40 = vpop.permute.xlu1 %5862  ;;  %v6005_v31 = vsel %vm906_vm9, %v13124_v11, %v13082_v15  ;;  %6120 = vmatpush.msra.mxu1 %v5960_v41  ;;  %6212 = vmatpush.msra.mxu0 %v14813_v35  ;;  %v6022_v41 = vmul.f32 %v7085_v1, %v14829_v7  ;;  %v6020_v63 = vmul.f32 %v7085_v1, %v14832_v32 }
 0xd12   : > { %v6028_v49 = vmul.f32 %v7085_v1, %v6005_v31  ;;  %6113 = vmatpush.msrb.mxu3 %v14817_v53  ;;  %v5998_v35 = vsel %vm906_vm9, %v12995_v21, %v12978_v10  ;;  %v14837_v53 = vld [vmem:[#allocation7_spill] sm:$0xff] }
 0xd13   : > { %6121 = vmatpush.msra.mxu1 %v5958_v23  ;;  %6213 = vmatpush.msra.mxu0 %v14819_v26  ;;  %v14833_v23 = vld [vmem:[#allocation66_spill] sm:$0xff]  ;;  %v13229_v19 = vpop.permute.xlu2 %5840 }
 0xd14   : > { %6158 = vmatpush.msra.mxu3 %v5645_v16  ;;  %6146 = vmatpush.msra.mxu2 %v6028_v49  ;;  %v5633_v31 = vmul.f32 %v14833_v23, %v14812_v13  ;;  %v14834_v16 = vld [vmem:[#allocation111_spill] sm:$0xff] }
 0xd15   : > { %6882 = vmatpush.msk.msrb.mxu0 %vm14822_vm0, %v14821_v20  ;;  %6122 = vmatpush.msra.mxu1 %v5956_v2  ;;  %v6018_v49 = vmul.f32 %v7085_v1, %v14834_v16  ;;  %v14836_v2 = vld [vmem:[#allocation107_spill] sm:$0xff]  ;;  %v14848_v16 = vld [vmem:[#allocation124_spill] sm:$0xff] }
 0xd16   : > { %6159 = vmatpush.msra.mxu3 %v5643_v51  ;;  %6147 = vmatpush.msra.mxu2 %v6026_v33  ;;  %v6016_v0 = vmul.f32 %v7085_v1, %v14836_v2  ;;  %v5581_v51 = vmul.f32 %v14838_v12, %v14837_v53 }
 0xd17   : > { %6123 = vmatpush.msra.mxu1 %v5954_v24  ;;  %6114 = vmatmul.f32.vlgmr.msrb.gmra.mxu3 %v6049_v60  ;;  %v14840_v24 = vld [vmem:[#allocation19_spill] sm:$0xff] }
 0xd18   : > { %6160 = vmatpush.msra.mxu3 %v5641_v62  ;;  %v13166_v58 = vpop.permute.xlu0 %5844  ;;  %6214 = vmatmul.f32.vlgmr.msra.gmra.mxu0 %v6049_v60  ;;  %v6014_v60 = vmul.f32 %v7085_v1, %v5998_v35  ;;  %v5773_v20 = vmul.f32 %v5749_v9, %v14840_v24  ;;  %v14841_v62 = vld [vmem:[#allocation105_spill] sm:$0xff]  ;;  %v5875_v1 = vsel %vm874_vm7, %v13060_v25, %v13054_v42 }
 0xd19   : > { %v13170_v59 = vpop.permute.xlu1 %5852  ;;  %6124 = vmatpush.msra.mxu1 %v5952_v38  ;;  %6148 = vmatpush.msra.mxu2 %v6024_v56  ;;  %v5579_v33 = vmul.f32 %v14841_v62, %v14837_v53  ;;  %v5771_v38 = vmul.f32 %v14842_v28, %v14840_v24  ;;  %v5874_v56 = vsel %vm874_vm7, %v13136_v34, %v13129_v40  ;;  %v14844_v42 = vld [vmem:[#allocation145_spill] sm:$0xff]  ;;  %v14853_v62 = vld [vmem:[#allocation23_spill] sm:$0xff] }
 0xd1a   : > { %6161 = vmatpush.msra.mxu3 %v5639_v27  ;;  %6890 = vmatpush.msk.msra.mxu0 %vm14830_vm4, %v6441_v39  ;;  %v14843_v27 = vld [vmem:[#allocation172_spill] sm:$0xff]  ;;  %v5769_v25 = vmul.f32 %v14844_v42, %v14840_v24  ;;  %v5873_v7 = vsel %vm874_vm7, %v13166_v58, %v13179_v29  ;;  %v14846_v39 = vld [vmem:[#allocation89_spill] sm:$0xff]  ;;  %vm14903_vm4 = vmmov %vm14887_vm2 }
 0xd1b   : > { %6125 = vmatpush.msra.mxu1 %v5950_v54  ;;  %6149 = vmatpush.msra.mxu2 %v6022_v41  ;;  %v5577_v17 = vmul.f32 %v14843_v27, %v14837_v53  ;;  %v5896_v54 = vmul.f32 %v5875_v1, %v14839_v22  ;;  %v5767_v61 = vmul.f32 %v14846_v39, %v14840_v24  ;;  %v13282_v28 = vpop.permute.xlu2 %5854 }
 0xd1c   : > { %6162 = vmatpush.msra.mxu3 %v5637_v45  ;;  %v5575_v45 = vmul.f32 %v14845_v6, %v14837_v53  ;;  %v5892_v35 = vmul.f32 %v5873_v7, %v14839_v22  ;;  %v5685_v1 = vsel %vm826_vm3, %v12930_v48, %v13016_v8  ;;  %v5949_v48 = vsel %vm890_vm8, %v13085_v14, %v13090_v18  ;;  %v14858_v14 = vld [vmem:[#allocation101_spill] sm:$0xff]  ;;  %v14860_v7 = vld [vmem:[#allocation168_spill] sm:$0xff]  ;;  %vm14882_vm8 = vmmov %vm14822_vm0 }
 0xd1d   : > { %6150 = vmatpush.msra.mxu2 %v6020_v63  ;;  %v14847_v63 = vld [vmem:[#allocation58_spill] sm:$0xff]  ;;  %vm14867_vm3 = vcmask 23552  }
 0xd1e   : > { %6163 = vmatpush.msra.mxu3 %v5635_v5  ;;  %v5894_v5 = vmul.f32 %v5874_v56, %v14839_v22  ;;  %v5573_v23 = vmul.f32 %v14847_v63, %v14837_v53  ;;  %v14856_v56 = vld [vmem:[#allocation13_spill] sm:$0xff]  ;;  %vm14880_vm6 = vmmov %vm14867_vm3 }
 0xd1f   : > { %6151 = vmatpush.msra.mxu2 %v6018_v49  ;;  %v5765_v49 = vmul.f32 %v14848_v16, %v14840_v24  ;;  %v5709_v42 = vmul.f32 %v5685_v1, %v14856_v56  ;;  %v5707_v18 = vmul.f32 %v14858_v14, %v14856_v56  ;;  %v14862_v63 = vld [vmem:[#allocation57_spill] sm:$0xff]  ;;  %vm14893_vm1 = vmmov %vm14867_vm3 }
 0xd20   : > { %6164 = vmatpush.msra.mxu3 %v5633_v31  ;;  %v13196_v37 = vpop.permute.xlu0 %5868  ;;  %vm14896_vm11 = vmmov %vm14893_vm1 }
 0xd21   : > { %v13200_v26 = vpop.permute.xlu1 %5842  ;;  %v5877_v13 = vsel %vm874_vm7, %v13170_v59, %v13196_v37  ;;  %6152 = vmatpush.msra.mxu2 %v6016_v0  ;;  %v14850_v0 = vld [vmem:[#allocation157_spill] sm:$0xff]  ;;  %vm14897_vm13 = vmmov %vm14893_vm1 }
 0xd22   : > { %v5900_v57 = vmul.f32 %v5877_v13, %v14839_v22  ;;  %6165 = vmatpush.msra.mxu3 %v5631_v43  ;;  %v5571_v43 = vmul.f32 %v14849_v4, %v14837_v53  ;;  %v5763_v9 = vmul.f32 %v14850_v0, %v14840_v24  ;;  %v14865_v4 = vld [vmem:[#allocation63_spill] sm:$0xff] }
 0xd23   : > { %6153 = vmatpush.msra.mxu2 %v6014_v60  ;;  %v6013_v60 = vsel %vm906_vm9, %v13082_v15, %v13124_v11  ;;  %v14854_v11 = vld [vmem:[#allocation47_spill] sm:$0xff] }
 0xd24   : > { %6166 = vmatpush.msra.mxu3 %v5581_v51  ;;  %6126 = vmatpush.msra.mxu1 %v5900_v57  ;;  %v14851_v51 = vld [vmem:[#allocation102_spill] sm:$0xff]  ;;  %v5761_v57 = vmul.f32 %v14852_v47, %v14840_v24 }
 0xd25   : > { %6178 = vmatpush.msrb.mxu2 %v5773_v20  ;;  %v5569_v13 = vmul.f32 %v14851_v51, %v14837_v53  ;;  %v14869_v51 = vld [vmem:[#allocation146_spill] sm:$0xff] }
 0xd26   : > { %6167 = vmatpush.msra.mxu3 %v5579_v33  ;;  %6872 = vmatmul.msk.f32.vlgmr.msra.gmra.mxu2 %vm5108_vm12, %v13212_v55  ;;  %v5567_v33 = vmul.f32 %v14853_v62, %v14837_v53 }
 0xd27   : > { %6179 = vmatpush.msrb.mxu2 %v5771_v38  ;;  %6127 = vmatpush.msra.mxu1 %v5898_v44  ;;  %v5759_v38 = vmul.f32 %v14854_v11, %v14840_v24  ;;  %v7086_v44 = vld [vmem:[%s13975_s4 + $0x18] ss:$0 sm:$0xff]  ;;  %v14855_v24 = vld [vmem:[#allocation77_spill] sm:$0xff]  ;;  %v6006_v11 = vsel %vm906_vm9, %v12978_v10, %v12995_v21  ;;  %vm14885_vm9 = vmmov %vm14822_vm0 }
 0xd28   : > { %6168 = vmatpush.msra.mxu3 %v5577_v17  ;;  %v13242_v41 = vpop.permute.xlu0 %5858  ;;  %v6029_v27 = vmul.f32 %v7086_v44, %v6013_v60  ;;  %v6027_v17 = vmul.f32 %v7086_v44, %v14855_v24  ;;  %v6025_v39 = vmul.f32 %v7086_v44, %v14860_v7  ;;  %v14870_v60 = vld [vmem:[#allocation176_spill] sm:$0xff]  ;;  %v14879_v21 = vld [vmem:[#allocation94_spill] sm:$0xff] }
 0xd29   : > { %6180 = vmatpush.msrb.mxu2 %v5769_v25  ;;  %v13247_v32 = vpop.permute.xlu1 %5856  ;;  %6128 = vmatpush.msra.mxu1 %v5896_v54  ;;  %v5872_v31 = vsel %vm874_vm7, %v13200_v26, %v13242_v41  ;;  %v13302_v25 = vld.sshfl [vmem:[#allocation1 + $0x18] sm:$0xff pattern:$0x75316420]  ;;  %v6033_v54 = vld [vmem:[%s14857_s8] sm:$0x7]  ;;  %v6019_v47 = vmul.f32 %v7086_v44, %v14870_v60 }
 0xd2a   : > { %6169 = vmatpush.msra.mxu3 %v5575_v45  ;;  %v5871_v2 = vsel %vm874_vm7, %v13229_v19, %v13247_v32  ;;  %v5890_v12 = vmul.f32 %v5872_v31, %v14839_v22  ;;  %6036 = vperm.xlu2 %7024, %v6033_v54   ;;  %v14878_v54 = vld [vmem:[#allocation159_spill] sm:$0xff] }
 0xd2b   : > { %6181 = vmatpush.msrb.mxu2 %v5767_v61  ;;  %6129 = vmatpush.msra.mxu1 %v5894_v5  ;;  %v5888_v20 = vmul.f32 %v5871_v2, %v14839_v22  ;;  %v14861_v61 = vld [vmem:[#allocation155_spill] sm:$0xff]  ;;  %v14866_v2 = vld [vmem:[#allocation128_spill] sm:$0xff]  ;;  %v5695_v10 = vmul.f32 %v14878_v54, %v14856_v56 }
 0xd2c   : > { %6170 = vmatpush.msra.mxu3 %v5573_v23  ;;  %v5705_v5 = vmul.f32 %v14861_v61, %v14856_v56  ;;  %v14863_v23 = vld [vmem:[#allocation178_spill] sm:$0xff]  ;;  %v6021_v0 = vmul.f32 %v7086_v44, %v14866_v2  ;;  %v14890_v61 = vld [vmem:[#allocation27_spill] sm:$0xff]  ;;  %v14917_v2 = vld [vmem:[#allocation29_spill] sm:$0xff] }
 0xd2d   : > { %6182 = vmatpush.msrb.mxu2 %v5765_v49  ;;  %6130 = vmatpush.msra.mxu1 %v5892_v35  ;;  %v6023_v31 = vmul.f32 %v7086_v44, %v14863_v23  ;;  %v14864_v49 = vld [vmem:[#allocation137_spill] sm:$0xff] }
 0xd2e   : > { %6171 = vmatpush.msra.mxu3 %v5571_v43  ;;  %v5703_v35 = vmul.f32 %v14864_v49, %v14856_v56  ;;  %v14894_v49 = vld [vmem:[#allocation21_spill] sm:$0xff] }
 0xd2f   : > { %6183 = vmatpush.msrb.mxu2 %v5763_v9  ;;  %6131 = vmatpush.msra.mxu1 %v5890_v12  ;;  %v14868_v9 = vld [vmem:[#allocation179_spill] sm:$0xff] }
 0xd30   : > { %6172 = vmatpush.msra.mxu3 %v5569_v13  ;;  %v13284_v15 = vpop.permute.xlu0 %5838  ;;  %v5701_v12 = vmul.f32 %v14868_v9, %v14856_v56 }
 0xd31   : > { %6184 = vmatpush.msrb.mxu2 %v5761_v57  ;;  %v5870_v53 = vsel %vm874_vm7, %v13284_v15, %v13282_v28  ;;  %6132 = vmatpush.msra.mxu1 %v5888_v20  ;;  %v13311_v45 = vpop.permute.xlu1 %6260  ;;  %v14871_v57 = vld [vmem:[#allocation28_spill] sm:$0xff]  ;;  %v14873_v20 = vld [vmem:[#allocation82_spill] sm:$0xff] }
 0xd32   : > { %v5886_v8 = vmul.f32 %v5870_v53, %v14839_v22  ;;  %6173 = vmatpush.msra.mxu3 %v5567_v33  ;;  %v14859_v22 = vld [vmem:[#allocation31_spill] sm:$0xff]  ;;  %v5699_v62 = vmul.f32 %v14873_v20, %v14856_v56  ;;  %v14874_v33 = vld [vmem:[#allocation12_spill] sm:$0xff]  ;;  %v14876_v53 = vld [vmem:[#allocation70_spill] sm:$0xff] }
 0xd33   : > { %6185 = vmatpush.msrb.mxu2 %v5759_v38  ;;  %6174 = vmatmul.f32.vlgmr.msra.gmra.mxu3 %v13112_v30  ;;  %v5965_v6 = vmul.f32 %v5949_v48, %v14859_v22  ;;  %v5963_v30 = vmul.f32 %v14862_v63, %v14859_v22  ;;  %v5961_v43 = vmul.f32 %v14865_v4, %v14859_v22  ;;  %v14875_v38 = vld [vmem:[#allocation140_spill] sm:$0xff] }
 0xd34   : > { %6246 = vmatpush.msrb.mxu3 %v6029_v27  ;;  %6133 = vmatpush.msra.mxu1 %v5886_v8  ;;  %v5959_v13 = vmul.f32 %v14869_v51, %v14859_v22  ;;  %v5957_v1 = vmul.f32 %v14874_v33, %v14859_v22  ;;  %v6017_v27 = vmul.f32 %v7086_v44, %v14875_v38  ;;  %v14877_v8 = vld [vmem:[#allocation96_spill] sm:$0xff] }
 0xd35   : > { %6186 = vmatpush.msrb.mxu2 %v5709_v42  ;;  %6134 = vmatmul.f32.vlgmr.msra.gmra.mxu1 %v13302_v25  ;;  %v5697_v48 = vmul.f32 %v14876_v53, %v14856_v56  ;;  %v5955_v24 = vmul.f32 %v14877_v8, %v14859_v22  ;;  %v6015_v42 = vmul.f32 %v7086_v44, %v6006_v11  ;;  %v14881_v56 = vld [vmem:[#allocation34_spill] sm:$0xff] }
 0xd36   : > { %6247 = vmatpush.msrb.mxu3 %v6027_v17  ;;  %6218 = vmatpush.msrb.mxu1 %v5965_v6  ;;  %v5953_v14 = vmul.f32 %v14879_v21, %v14859_v22  ;;  %v5885_v44 = vsel %vm874_vm7, %v13196_v37, %v13170_v59  ;;  %v14883_v6 = vld [vmem:[#allocation37_spill] sm:$0xff]  ;;  %v5884_v59 = vsel %vm874_vm7, %v13044_v3, %v13010_v50  ;;  %v14886_v37 = vld [vmem:[#allocation14_spill] sm:$0xff] }
 0xd37   : > { %6187 = vmatpush.msrb.mxu2 %v5707_v18  ;;  %v6393_v18 = vpop.permute.xlu2 %6392  ;;  %v5951_v7 = vmul.f32 %v14883_v6, %v14859_v22  ;;  %v14891_v22 = vld [vmem:[#allocation8_spill] sm:$0xff]  ;;  %v5899_v63 = vmul.f32 %v5884_v59, %v14890_v61  ;;  %v5882_v50 = vsel %vm874_vm7, %v13129_v40, %v13136_v34  ;;  %v5897_v3 = vmul.f32 %v13068_v36, %v14890_v61 }
 0xd38   : > { %6248 = vmatpush.msrb.mxu3 %v6025_v39  ;;  %v13320_v16 = vpop.permute.xlu0 %6346  ;;  %6219 = vmatpush.msrb.mxu1 %v5963_v30  ;;  %v14884_v39 = vld [vmem:[#allocation15_spill] sm:$0xff]  ;;  %v5881_v30 = vsel %vm874_vm7, %v13179_v29, %v13166_v58  ;;  %v5880_v36 = vsel %vm874_vm7, %v13242_v41, %v13200_v26  ;;  %v14898_v34 = vld [vmem:[#allocation20_spill] sm:$0xff]  ;;  %v5879_v58 = vsel %vm874_vm7, %v13247_v32, %v13229_v19  ;;  %v14908_v32 = vld [vmem:[#allocation17_spill] sm:$0xff] }
 0xd39   : > { %6188 = vmatpush.msrb.mxu2 %v5705_v5  ;;  %6883 = vmatmul.msk.f32.vlgmr.msrb.gmra.mxu0 %vm14867_vm3, %v13320_v16  ;;  %v13349_v17 = vpop.permute.xlu1 %6438  ;;  %v5901_v5 = vmul.f32 %v5885_v44, %v14890_v61  ;;  %v5893_v40 = vmul.f32 %v5881_v30, %v14890_v61  ;;  %v5891_v29 = vmul.f32 %v5880_v36, %v14890_v61  ;;  %v6442_v19 = vld.sshfl [vmem:[#allocation1 + $0x8] sm:$0xff pattern:$0x75316420] }
 0xd3a   : > { %6249 = vmatpush.msrb.mxu3 %v6023_v31  ;;  %6220 = vmatpush.msrb.mxu1 %v5961_v43  ;;  %v5895_v31 = vmul.f32 %v5882_v50, %v14890_v61  ;;  %v5878_v26 = vsel %vm874_vm7, %v13282_v28, %v13284_v15  ;;  %v5889_v41 = vmul.f32 %v5879_v58, %v14890_v61  ;;  %v14902_v43 = vld [vmem:[#allocation25_spill] sm:$0xff]  ;;  %vm14907_vm7 = vmmov %vm14887_vm2  ;;  %v14914_v15 = vld [vmem:[#allocation32_spill] sm:$0xff] }
 0xd3b   : > { %6189 = vmatpush.msrb.mxu2 %v5703_v35  ;;  %6898 = vmatpush.msk.msrb.mxu0 %vm14872_vm5, %v14871_v57  ;;  %v14900_v35 = vld [vmem:[#allocation161_spill] sm:$0xff]  ;;  %v5887_v4 = vmul.f32 %v5878_v26, %v14890_v61 }
 0xd3c   : > { %6250 = vmatpush.msrb.mxu3 %v6021_v0  ;;  %6221 = vmatpush.msrb.mxu1 %v5959_v13  ;;  %v14912_v28 = vld [vmem:[#allocation33_spill] sm:$0xff] }
 0xd3d   : > { %6190 = vmatpush.msrb.mxu2 %v5701_v12 }
 0xd3e   : > { %6251 = vmatpush.msrb.mxu3 %v6019_v47  ;;  %6222 = vmatpush.msrb.mxu1 %v5957_v1 }
 0xd3f   : > { %6191 = vmatpush.msrb.mxu2 %v5699_v62  ;;  %v6538_v23 = vpop.permute.xlu2 %6537 }
 0xd40   : > { %6252 = vmatpush.msrb.mxu3 %v6017_v27  ;;  %6223 = vmatpush.msrb.mxu1 %v5955_v24 }
 0xd41   : > { %6192 = vmatpush.msrb.mxu2 %v5697_v48  ;;  %6891 = vmatmul.msk.f32.vlgmr.msra.gmra.mxu0 %vm14880_vm6, %v13349_v17  ;;  %vm14909_vm6 = vmmov %vm14887_vm2  ;;  %v6584_v0 = vpop.permute.xlu1 %6583 }
 0xd42   : > { %6253 = vmatpush.msrb.mxu3 %v6015_v42  ;;  %6224 = vmatpush.msrb.mxu1 %v5953_v14 }
 0xd43   : > { %6193 = vmatpush.msrb.mxu2 %v5695_v10  ;;  %6873 = vmatmul.msk.f32.vlgmr.msrb.gmra.mxu3 %vm5108_vm12, %v13212_v55  ;;  %v14888_v55 = vld [vmem:[#allocation9_spill] sm:$0xff]  ;;  %vm14889_vm12 = vmmov %vm14822_vm0 }
 0xd44   : > { %6906 = vmatpush.msk.msra.mxu0 %vm14882_vm8, %v14881_v56  ;;  %6876 = vmatpush.msk.msra.mxu3 %vm14885_vm9, %v14884_v39  ;;  %vm14901_vm0 = vmmov %vm14893_vm1 }
 0xd45   : > { %6194 = vmatmul.f32.vlgmr.msrb.gmra.mxu2 %v13108_v52  ;;  %6225 = vmatpush.msrb.mxu1 %v5951_v7  ;;  %v6492_v52 = vpop.permute.xlu0 %6491  ;;  %vm14904_vm3 = vmmov %vm14901_vm0 }
 0xd46   : > { %6874 = vmatpush.msk.msra.mxu2 %vm14887_vm2, %v14886_v37  ;;  %6880 = vmatpush.msk.msrb.mxu3 %vm14889_vm12, %v14888_v55  ;;  %vm14905_vm5 = vmmov %vm14901_vm0 }
 0xd47   : > { %6226 = vmatpush.msrb.mxu1 %v5901_v5  ;;  %vm14910_vm8 = vmmov %vm14887_vm2 }
 0xd48   : > { %6878 = vmatpush.msk.msrb.mxu2 %vm14892_vm15, %v14891_v22  ;;  %vm14911_vm9 = vmmov %vm14901_vm0 }
 0xd49   : > { %6227 = vmatpush.msrb.mxu1 %v5899_v63  ;;  %6899 = vmatmul.msk.f32.vlgmr.msrb.gmra.mxu0 %vm14897_vm13, %v6538_v23  ;;  %vm14913_vm12 = vmmov %vm14901_vm0 }
 0xd4a   : > { %vm14915_vm15 = vmmov %vm14887_vm2 }
 0xd4b   : > { %6877 = vmatmul.msk.f32.vlgmr.msra.gmra.mxu3 %vm14893_vm1, %v13311_v45  ;;  %6228 = vmatpush.msrb.mxu1 %v5897_v3  ;;  %vm14916_vm1 = vmmov %vm14901_vm0 }
 0xd4c   : > { %6888 = vmatpush.msk.msra.mxu3 %vm14895_vm10, %v14894_v49  ;;  %vm14918_vm10 = vmmov %vm14887_vm2 }
 0xd4d   : > { %6875 = vmatmul.msk.f32.vlgmr.msra.gmra.mxu2 %vm14896_vm11, %v13311_v45  ;;  %6229 = vmatpush.msrb.mxu1 %v5895_v31  ;;  %v6630_v45 = vpop.permute.xlu0 %6629  ;;  %vm14919_vm11 = vmmov %vm14901_vm0 }
 0xd4e   : > { %6886 = vmatpush.msk.msra.mxu2 %vm14899_vm14, %v14898_v34  ;;  %vm14920_vm13 = vmmov %vm14901_vm0 }
 0xd4f   : > { %6230 = vmatpush.msrb.mxu1 %v5893_v40  ;;  %vm14921_vm14 = vmmov %vm14901_vm0 }
 0xd51   : > { %6231 = vmatpush.msrb.mxu1 %v5891_v29  ;;  %6907 = vmatmul.msk.f32.vlgmr.msra.gmra.mxu0 %vm14905_vm5, %v6630_v45  ;;  %vm14926_vm5 = vmmov %vm14916_vm1 }
 0xd53   : > { %6881 = vmatmul.msk.f32.vlgmr.msrb.gmra.mxu3 %vm14901_vm0, %v14900_v35  ;;  %6232 = vmatpush.msrb.mxu1 %v5889_v41  ;;  %vm14923_vm0 = vmmov %vm14887_vm2 }
 0xd54   : > { %6896 = vmatpush.msk.msrb.mxu3 %vm14903_vm4, %v14902_v43  ;;  %vm14924_vm4 = vmmov %vm14916_vm1 }
 0xd55   : > { %6879 = vmatmul.msk.f32.vlgmr.msrb.gmra.mxu2 %vm14904_vm3, %v14900_v35  ;;  %6233 = vmatpush.msrb.mxu1 %v5887_v4  ;;  %vm14925_vm3 = vmmov %vm14916_vm1 }
 0xd56   : > { %6894 = vmatpush.msk.msrb.mxu2 %vm14907_vm7, %v14906_v46  ;;  %6234 = vmatmul.f32.vlgmr.msrb.gmra.mxu1 %v13302_v25  ;;  %v14922_v25 = vld [vmem:[#allocation35_spill] sm:$0xff]  ;;  %vm14927_vm7 = vmmov %vm14916_vm1 }
 0xd57   : > { %6884 = vmatpush.msk.msra.mxu1 %vm14909_vm6, %v14908_v32  ;;  %vm6682_vm6 = vcmask 1043456  }
 0xd59   : > { %6892 = vmatpush.msk.msrb.mxu1 %vm14910_vm8, %v6442_v19 }
 0xd5b   : > { %6889 = vmatmul.msk.f32.vlgmr.msra.gmra.mxu3 %vm14911_vm9, %v6393_v18 }
 0xd5c   : > { %6904 = vmatpush.msk.msra.mxu3 %vm14887_vm2, %v14912_v28 }
 0xd5d   : > { %6887 = vmatmul.msk.f32.vlgmr.msra.gmra.mxu2 %vm14913_vm12, %v6393_v18 }
 0xd5e   : > { %6902 = vmatpush.msk.msra.mxu2 %vm14915_vm15, %v14914_v15  ;;  %6885 = vmatmul.msk.f32.vlgmr.msra.gmra.mxu1 %vm14916_vm1, %v13320_v16 }
 0xd5f   : > { %6900 = vmatpush.msk.msra.mxu1 %vm14918_vm10, %v14917_v2 }
 0xd63   : > { %6897 = vmatmul.msk.f32.vlgmr.msrb.gmra.mxu3 %vm14919_vm11, %v6492_v52 }
 0xd65   : > { %6895 = vmatmul.msk.f32.vlgmr.msrb.gmra.mxu2 %vm14920_vm13, %v6492_v52 }
 0xd66   : > { %6893 = vmatmul.msk.f32.vlgmr.msrb.gmra.mxu1 %vm14921_vm14, %v13349_v17 }
 0xd67   : > { %6908 = vmatpush.msk.msrb.mxu1 %vm14923_vm0, %v14922_v25 }
 0xd6b   : > { %6905 = vmatmul.msk.f32.vlgmr.msra.gmra.mxu3 %vm14924_vm4, %v6584_v0 }
 0xd6d   : > { %6903 = vmatmul.msk.f32.vlgmr.msra.gmra.mxu2 %vm14925_vm3, %v6584_v0 }
 0xd6e   : > { %6901 = vmatmul.msk.f32.vlgmr.msra.gmra.mxu1 %vm14926_vm5, %v6538_v23 }
 0xd76   : > { %6909 = vmatmul.msk.f32.vlgmr.msrb.gmra.mxu1 %vm14927_vm7, %v6630_v45 }
 0xd82   : > { %v6075_v13 = vpop.f32.mrf.mxu1 }
 0xd84   : > { %v6037_v21 = vpop.permute.xlu2 %6036 }
 0xd85   : > { %v6076_v6 = vadd.f32 %v6075_v13, %v6037_v21 }
 0xd8f   : > { %v6095_v9 = vpop.f32.mrf.mxu2 }
 0xd90   : > { %v6096_v61 = vadd.f32 %v6095_v9, %v6076_v6 }
 0xd95   : > { %v6215_v57 = vpop.f32.mrf.mxu0 }
 0xd9a   : > { %v6115_v16 = vpop.f32.mrf.mxu3 }
 0xd9b   : > { %v6116_v3 = vadd.f32 %v6115_v16, %v6096_v61 }
 0xda9   : > { %v6155_v51 = vpop.f32.mrf.mxu2 }
 0xdb2   : > { %v6135_v20 = vpop.f32.mrf.mxu1 }
 0xdb3   : > { %v6136_v40 = vadd.f32 %v6135_v20, %v6116_v3 }
 0xdb5   : > { %v6156_v45 = vadd.f32 %v6155_v51, %v6136_v40 }
 0xdb6   : > { %v6175_v12 = vpop.f32.mrf.mxu3  ;;  %v6367_v1 = vpop.f32.mrf.mxu0 }
 0xdb7   : > { %v6176_v59 = vadd.f32 %v6175_v12, %v6037_v21 }
 0xdbe   : > { %v6466_v53 = vpop.f32.mrf.mxu0 }
 0xdc6   : > { %v6255_v60 = vpop.f32.mrf.mxu3  ;;  %v6558_v56 = vpop.f32.mrf.mxu0 }
 0xdc8   : > { %v6195_v47 = vpop.f32.mrf.mxu2 }
 0xdc9   : > { %v6196_v5 = vadd.f32 %v6195_v47, %v6176_v59 }
 0xdcb   : > { %v6216_v52 = vadd.f32 %v6215_v57, %v6196_v5 }
 0xdce   : > { %v6301_v62 = vpop.f32.mrf.mxu3  ;;  %v6650_v31 = vpop.f32.mrf.mxu0 }
 0xdd0   : > { %v6281_v33 = vpop.f32.mrf.mxu2 }
 0xdd3   : > { %v6235_v11 = vpop.f32.mrf.mxu1 }
 0xdd4   : > { %v6236_v34 = vadd.f32 %v6235_v11, %v6216_v52 }
 0xdd6   : > { %v6343_v38 = vpop.f32.mrf.mxu3  ;;  %v6256_v35 = vadd.f32 %v6255_v60, %v6236_v34 }
 0xdd7   : > { %v6344_v42 = vadd.f32 %v6343_v38, %v6301_v62 }
 0xdd8   : > { %v6323_v27 = vpop.f32.mrf.mxu2 }
 0xdd9   : > { %v6324_v24 = vadd.f32 %v6323_v27, %v6281_v33 }
 0xddb   : > { %v6387_v48 = vpop.f32.mrf.mxu1  ;;  %v6390_v54 = vadd.f32 %v6367_v1, %v6324_v24 }
 0xddc   : > { %v6391_v10 = vadd.f32 %v6387_v48, %v6344_v42 }
 0xdde   : > { %v6433_v8 = vpop.f32.mrf.mxu3 }
 0xddf   : > { %v6437_v7 = vadd.f32 %v6433_v8, %v6391_v10 }
 0xde0   : > { %v6413_v17 = vpop.f32.mrf.mxu2 }
 0xde1   : > { %v6436_v44 = vadd.f32 %v6413_v17, %v6390_v54 }
 0xde3   : > { %v6486_v14 = vpop.f32.mrf.mxu1  ;;  %v6489_v37 = vadd.f32 %v6466_v53, %v6436_v44 }
 0xde4   : > { %v6490_v55 = vadd.f32 %v6486_v14, %v6437_v7 }
 0xde6   : > { %v6532_v18 = vpop.f32.mrf.mxu3 }
 0xde7   : > { %v6536_v50 = vadd.f32 %v6532_v18, %v6490_v55 }
 0xde8   : > { %v6512_v39 = vpop.f32.mrf.mxu2 }
 0xde9   : > { %v6535_v22 = vadd.f32 %v6512_v39, %v6489_v37 }
 0xdeb   : > { %v6578_v63 = vpop.f32.mrf.mxu1  ;;  %v6581_v30 = vadd.f32 %v6558_v56, %v6535_v22 }
 0xdec   : > { %v6582_v23 = vadd.f32 %v6578_v63, %v6536_v50 }
 0xdee   : > { %v6624_v49 = vpop.f32.mrf.mxu3 }
 0xdef   : > { %v6628_v29 = vadd.f32 %v6624_v49, %v6582_v23 }
 0xdf0   : > { %v6604_v36 = vpop.f32.mrf.mxu2 }
 0xdf1   : > { %v6627_v58 = vadd.f32 %v6604_v36, %v6581_v30 }
 0xdf3   : > { %v6673_v26 = vadd.f32 %v6650_v31, %v6627_v58  ;;  %v6670_v41 = vpop.f32.mrf.mxu1 }
 0xdf4   : > { %v6674_v4 = vadd.f32 %v6670_v41, %v6628_v29 }
 0xdf5   : > { %v6675_v43 = vadd.f32 %v6673_v26, %v6156_v45 }
 0xdf6   : > { %v6676_v46 = vadd.f32 %v6674_v4, %v6256_v35 }
 0xdf8   : > { %7060 = vtanh.f32 %v6676_v46 }
 0xdf9   : > { %7062 = vtanh.f32 %v6675_v43 }
 0xdfe   : > { %v7061_v19 = vpop.eup %7060 }
 0xdff   : > { %v6681_v32 = vrot.slane %v7061_v19, 4  ;;  %v7063_v28 = vpop.eup %7062 }
 0xe01   : > { %v6683_v15 = vsel %vm6682_vm6, %v7063_v28, %v6681_v32 }
 0xe02   : > { %6685 = vst [vmem:[%s764_s24] sm:$0x77] %v6683_v15 }
 0xe03 PF: > { %s14931_s29 = sld [smem:[#allocation2_spill]] }
 0xe09   : > { %s35_s29 = sadd.s32 1, %s14931_s29  }
 0xe0a   : > { %p32_p4 = scmp.ge.s32.totalorder %s35_s29, 4  }
 0xe0c   :  { %34 = sbr.rel (!%p32_p4) target bundleno = 18 (0x12), region = 152 }

</bundles_post_ra>
